<compile_context>
chip_gen: v7x
topology: tpu7x:2x2x1
jax: 0.10.0
libtpu: 0.0.40
codegen_flags: <defaults>
</compile_context>

<pallas_src>
import jax
import jax.numpy as jnp
from jax.experimental import pallas as pl
from jax.experimental.pallas import tpu as pltpu


def _vmem():
    return pl.BlockSpec(memory_space=pltpu.MemorySpace.VMEM)


# --------------------------------------------------------------------------
# Pallas kernels (whole-array blocks resident in VMEM)
# --------------------------------------------------------------------------
def _conv_bn_relu_kernel(p_ref, w_ref, s_ref, b_ref, o_ref):
    # matmul (bf16 in, f32 acc) + BN + ReLU epilogue
    y = jnp.dot(p_ref[...], w_ref[...], preferred_element_type=jnp.float32)
    o_ref[...] = jnp.maximum(y * s_ref[...] + b_ref[...], 0.0)


def _maxpool_kernel(p_ref, o_ref):
    # p_ref: (M, 9, C) -> max over taps (axis=-2), C stays on lanes
    o_ref[...] = jnp.max(p_ref[...], axis=1)


def _dpb_pre_kernel(x_ref, sa_ref, ba_ref, wa_ref, sb_ref, bb_ref, h_ref):
    # BN_a + ReLU -> 1x1 a-conv -> BN_b + ReLU (prologue of the 3x3), bf16 out
    ta = jnp.maximum(x_ref[...] * sa_ref[...] + ba_ref[...], 0.0).astype(jnp.bfloat16)
    ya = jnp.dot(ta, wa_ref[...], preferred_element_type=jnp.float32)
    h_ref[...] = jnp.maximum(ya * sb_ref[...] + bb_ref[...], 0.0).astype(jnp.bfloat16)


def _dpb_pre_proj_kernel(x_ref, xs_ref, sa_ref, ba_ref, wa_ref, sb_ref, bb_ref,
                         sw_ref, bw_ref, ww1_ref, ww2_ref,
                         h_ref, xs1_ref, xs2_ref):
    # a-path (as above) + projection w-path on the (possibly subsampled) input,
    # with the w 1x1 conv pre-split into (x_s1, x_s2) weights.
    ta = jnp.maximum(x_ref[...] * sa_ref[...] + ba_ref[...], 0.0).astype(jnp.bfloat16)
    ya = jnp.dot(ta, wa_ref[...], preferred_element_type=jnp.float32)
    h_ref[...] = jnp.maximum(ya * sb_ref[...] + bb_ref[...], 0.0).astype(jnp.bfloat16)

    tw = jnp.maximum(xs_ref[...] * sw_ref[...] + bw_ref[...], 0.0).astype(jnp.bfloat16)
    xs1_ref[...] = jnp.dot(tw, ww1_ref[...], preferred_element_type=jnp.float32)
    xs2_ref[...] = jnp.dot(tw, ww2_ref[...], preferred_element_type=jnp.float32)


def _dpb_post_kernel(p_ref, wb_ref, sc_ref, bc_ref, wc1_ref, wc2_ref, xs1_ref,
                     resid_ref, out2_ref):
    # grouped 3x3 via block-structured weight -> BN_c + ReLU -> split 1x1 c-conv
    # -> residual add; both groups and both output halves in one call.
    y3 = jnp.dot(p_ref[...], wb_ref[...], preferred_element_type=jnp.float32)
    tc = jnp.maximum(y3 * sc_ref[...] + bc_ref[...], 0.0).astype(jnp.bfloat16)
    resid_ref[...] = xs1_ref[...] + jnp.dot(tc, wc1_ref[...],
                                            preferred_element_type=jnp.float32)
    out2_ref[...] = jnp.dot(tc, wc2_ref[...], preferred_element_type=jnp.float32)


def _head_kernel(x_ref, s_ref, b_ref, w_ref, bias_ref, o_ref):
    # final CatBnAct + global average pool (over HW, C on lanes) + classifier
    a = jnp.maximum(x_ref[...] * s_ref[...] + b_ref[...], 0.0)     # (N, HW, C)
    pooled = jnp.mean(a, axis=1)                                   # (N, C)
    o_ref[...] = (jnp.dot(pooled.astype(jnp.bfloat16), w_ref[...],
                          preferred_element_type=jnp.float32) + bias_ref[...])


# --------------------------------------------------------------------------
# Plain-JAX glue
# --------------------------------------------------------------------------
def im2col(x, ksize, stride, padding, pad_value=0.0):
    """x: (N, H, W, C) -> (N, Ho, Wo, ksize*ksize, C) patches, tap-major."""
    n, h, w, c = x.shape
    ho = (h + 2 * padding - ksize) // stride + 1
    wo = (w + 2 * padding - ksize) // stride + 1
    xp = jnp.pad(x, ((0, 0), (padding, padding), (padding, padding), (0, 0)),
                 constant_values=pad_value)
    taps = []
    for di in range(ksize):
        for dj in range(ksize):
            taps.append(xp[:, di:di + stride * (ho - 1) + 1:stride,
                           dj:dj + stride * (wo - 1) + 1:stride, :])
    return jnp.stack(taps, axis=3), ho, wo


def input_block(x, p):
    """InputBlock: conv(k,s=2,pad) + BN + ReLU fused; maxpool(3,s=2,p=1) fused."""
    ks, pad = p['ksize'], p['pad']
    n, _, _, cin = x.shape
    patches, ho, wo = im2col(x.astype(jnp.bfloat16), ks, 2, pad, 0.0)
    m = n * ho * wo
    cout = p['conv_w'].shape[1]
    y = pl.pallas_call(
        _conv_bn_relu_kernel,
        out_shape=jax.ShapeDtypeStruct((m, cout), jnp.float32),
        in_specs=[_vmem()] * 4,
        out_specs=_vmem(),
    )(patches.reshape(m, ks * ks * cin), p['conv_w'], p['bn_scale'], p['bn_bias'])
    y = y.reshape(n, ho, wo, cout)

    pp, ho2, wo2 = im2col(y, 3, 2, 1, -jnp.inf)          # (N, Ho2, Wo2, 9, C)
    m2 = n * ho2 * wo2
    y = pl.pallas_call(
        _maxpool_kernel,
        out_shape=jax.ShapeDtypeStruct((m2, cout), jnp.float32),
        in_specs=[_vmem()],
        out_specs=_vmem(),
    )(pp.reshape(m2, 9, cout))
    return y.reshape(n, ho2, wo2, cout)


def dual_path_block(x, p, block_type, groups, num_1x1_c, inc):
    # `groups` is already folded into the block-structured p['b_conv'] weight.
    del groups
    x_in = jnp.concatenate(x, axis=-1) if isinstance(x, tuple) else x
    n, hh, ww, c = x_in.shape
    key_stride = 2 if block_type == 'down' else 1
    has_proj = block_type in ('proj', 'down')
    x2d = x_in.reshape(n * hh * ww, c)
    r = p['a_conv'].shape[1]

    if has_proj:
        xs_src = x_in[:, ::2, ::2, :] if key_stride == 2 else x_in
        _, hs, ws, _ = xs_src.shape
        ms = n * hs * ws
        h_pre, x_s1, x_s2 = pl.pallas_call(
            _dpb_pre_proj_kernel,
            out_shape=(jax.ShapeDtypeStruct((n * hh * ww, r), jnp.bfloat16),
                       jax.ShapeDtypeStruct((ms, num_1x1_c), jnp.float32),
                       jax.ShapeDtypeStruct((ms, 2 * inc), jnp.float32)),
            in_specs=[_vmem()] * 11,
            out_specs=(_vmem(), _vmem(), _vmem()),
        )(x2d, xs_src.reshape(ms, c),
          p['a_bn_scale'], p['a_bn_bias'], p['a_conv'],
          p['b_bn_scale'], p['b_bn_bias'],
          p['w_bn_scale'], p['w_bn_bias'], p['w_conv1'], p['w_conv2'])
    else:
        h_pre = pl.pallas_call(
            _dpb_pre_kernel,
            out_shape=jax.ShapeDtypeStruct((n * hh * ww, r), jnp.bfloat16),
            in_specs=[_vmem()] * 6,
            out_specs=_vmem(),
        )(x2d, p['a_bn_scale'], p['a_bn_bias'], p['a_conv'],
          p['b_bn_scale'], p['b_bn_bias'])
        x_s1 = x[0].reshape(n * hh * ww, -1)
        x_s2 = x[1].reshape(n * hh * ww, -1)

    # BN_b + ReLU already applied (before zero-pad), patches in bf16.
    patches, ho, wo = im2col(h_pre.reshape(n, hh, ww, r), 3, key_stride, 1, 0.0)
    m2 = n * ho * wo
    resid, out2 = pl.pallas_call(
        _dpb_post_kernel,
        out_shape=(jax.ShapeDtypeStruct((m2, num_1x1_c), jnp.float32),
                   jax.ShapeDtypeStruct((m2, inc), jnp.float32)),
        in_specs=[_vmem()] * 7,
        out_specs=(_vmem(), _vmem()),
    )(patches.reshape(m2, 9 * r), p['b_conv'],
      p['c_bn_scale'], p['c_bn_bias'], p['c_conv1'], p['c_conv2'], x_s1)

    resid = resid.reshape(n, ho, wo, num_1x1_c)
    dense = jnp.concatenate([x_s2, out2], axis=-1).reshape(n, ho, wo, -1)
    return (resid, dense)


# --------------------------------------------------------------------------
# Deterministic parameter construction (mirrors DPN.__init__; b=False path)
# --------------------------------------------------------------------------
def _init_bn(key, c, eps=1e-3):
    k1, k2, k3, k4 = jax.random.split(key, 4)
    gamma = jax.random.uniform(k1, (c,), minval=0.5, maxval=1.5)
    beta = jax.random.uniform(k2, (c,), minval=-0.1, maxval=0.1)
    mean = jax.random.uniform(k3, (c,), minval=-0.1, maxval=0.1)
    var = jax.random.uniform(k4, (c,), minval=0.5, maxval=1.5)
    scale = gamma / jnp.sqrt(var + eps)
    bias = beta - mean * scale
    # pre-shaped (1, C) so kernels broadcast without per-call reshapes
    return (scale.reshape(1, c).astype(jnp.float32),
            bias.reshape(1, c).astype(jnp.float32))


def _init_conv(key, cin, cout, ksize):
    # weight layout (kh, kw, cin, cout) matching tap-major im2col ordering
    return (jax.random.normal(key, (ksize, ksize, cin, cout), dtype=jnp.float32)
            * 0.05)


def make_dpn(key, small=True, num_init_features=16, k_r=8, groups=2, b=False,
             k_sec=(1, 1, 1, 1), inc_sec=(4, 4, 4, 4), num_classes=10):
    assert not b  # TODO(synk): b=True branch (CatBnAct + split 1x1 convs) not built
    keys = iter(jax.random.split(key, 512))
    blocks = []
    bw_factor = 1 if small else 4

    ks, pad = (3, 1) if small else (7, 3)
    bn_s, bn_b = _init_bn(next(keys), num_init_features)
    blocks.append(('input', dict(
        conv_w=_init_conv(next(keys), 3, num_init_features, ks)
        .reshape(ks * ks * 3, num_init_features).astype(jnp.bfloat16),
        bn_scale=bn_s, bn_bias=bn_b, ksize=ks, pad=pad)))

    def make_dpb(in_chs, r, bw, inc, block_type):
        p = {}
        if block_type in ('proj', 'down'):
            p['w_bn_scale'], p['w_bn_bias'] = _init_bn(next(keys), in_chs)
            wfull = _init_conv(next(keys), in_chs, bw + 2 * inc, 1).reshape(in_chs, -1)
            p['w_conv1'] = wfull[:, :bw].astype(jnp.bfloat16)     # -> x_s1
            p['w_conv2'] = wfull[:, bw:].astype(jnp.bfloat16)     # -> x_s2
        p['a_bn_scale'], p['a_bn_bias'] = _init_bn(next(keys), in_chs)
        p['a_conv'] = (_init_conv(next(keys), in_chs, r, 1)
                       .reshape(in_chs, r).astype(jnp.bfloat16))
        p['b_bn_scale'], p['b_bn_bias'] = _init_bn(next(keys), r)
        cpg = r // groups
        wg = jax.random.normal(next(keys), (groups, 3, 3, cpg, cpg),
                               dtype=jnp.float32) * 0.05
        # fold the grouped 3x3 conv into one block-structured (9*r, r) matrix
        wf = jnp.zeros((3, 3, r, r), dtype=jnp.float32)
        for g in range(groups):
            wf = wf.at[:, :, g * cpg:(g + 1) * cpg, g * cpg:(g + 1) * cpg].set(wg[g])
        p['b_conv'] = wf.reshape(9 * r, r).astype(jnp.bfloat16)
        p['c_bn_scale'], p['c_bn_bias'] = _init_bn(next(keys), r)
        cfull = _init_conv(next(keys), r, bw + inc, 1).reshape(r, -1)
        p['c_conv1'] = cfull[:, :bw].astype(jnp.bfloat16)         # -> out1 (resid)
        p['c_conv2'] = cfull[:, bw:].astype(jnp.bfloat16)         # -> out2 (dense)
        cfg = dict(block_type=block_type, groups=groups, num_1x1_c=bw, inc=inc)
        return ('dpb', p, cfg)

    in_chs = num_init_features
    for stage, (bw_mult, inc) in enumerate(zip((64, 128, 256, 512), inc_sec)):
        bw = bw_mult * bw_factor
        r = (k_r * bw) // (64 * bw_factor)
        first = 'proj' if stage == 0 else 'down'
        blocks.append(make_dpb(in_chs, r, bw, inc, first))
        in_chs = bw + 3 * inc
        for _ in range(2, k_sec[stage] + 1):
            blocks.append(make_dpb(in_chs, r, bw, inc, 'normal'))
            in_chs += inc

    bn_s, bn_b = _init_bn(next(keys), in_chs)
    blocks.append(('bnact', dict(scale=bn_s.reshape(1, 1, in_chs),
                                 bias=bn_b.reshape(1, 1, in_chs))))
    classifier = dict(
        w=_init_conv(next(keys), in_chs, num_classes, 1)
        .reshape(in_chs, num_classes).astype(jnp.bfloat16),
        b=(jax.random.normal(next(keys), (num_classes,), dtype=jnp.float32) * 0.05)
        .reshape(1, num_classes))
    return blocks, classifier


# --------------------------------------------------------------------------
# Forward pass (eval mode, test_time_pool=False)
# --------------------------------------------------------------------------
def dpn_forward(x_nchw, blocks, classifier):
    x = jnp.transpose(x_nchw.astype(jnp.float32), (0, 2, 3, 1))   # NCHW -> NHWC
    for item in blocks:
        kind = item[0]
        if kind == 'input':
            x = input_block(x, item[1])
        elif kind == 'dpb':
            _, p, cfg = item
            x = dual_path_block(x, p, **cfg)
        else:  # fused CatBnAct + global avg pool + classifier
            if isinstance(x, tuple):
                x = jnp.concatenate(x, axis=-1)
            n, hh, ww, c = x.shape
            num_classes = classifier['w'].shape[1]
            x = pl.pallas_call(
                _head_kernel,
                out_shape=jax.ShapeDtypeStruct((n, num_classes), jnp.float32),
                in_specs=[_vmem()] * 5,
                out_specs=_vmem(),
            )(x.reshape(n, hh * ww, c), item[1]['scale'], item[1]['bias'],
              classifier['w'], classifier['b'])
    return x                                                       # (N, num_classes)


if __name__ == "__main__":
    key = jax.random.PRNGKey(0)
    k_params, k_x = jax.random.split(key)
    blocks, classifier = make_dpn(k_params)
    x = jax.random.normal(k_x, (2, 3, 32, 32), dtype=jnp.float32)

    fwd = jax.jit(lambda inp: dpn_forward(inp, blocks, classifier))
    out = jax.block_until_ready(fwd(x))
    assert out.shape == (2, 10), out.shape
    assert bool(jnp.all(jnp.isfinite(out)))
    print("KERNEL_OK")
</pallas_src>

<mosaic_0001>
module attributes {stable_mosaic.version = 11 : i64} {
  func.func @_conv_bn_relu_kernel(%arg0: memref<512x27xbf16, #tpu.memory_space<vmem>>, %arg1: memref<27x16xbf16, #tpu.memory_space<vmem>>, %arg2: memref<1x16xf32, #tpu.memory_space<vmem>>, %arg3: memref<1x16xf32, #tpu.memory_space<vmem>>, %arg4: memref<512x16xf32, #tpu.memory_space<vmem>>) attributes {dimension_semantics = [], scalar_prefetch = 0 : i64, scratch_operands = 0 : i64, tpu.core_type = #tpu.core_type<tc>} {
    %c0 = arith.constant 0 : index
    %c0_0 = arith.constant 0 : index
    %0 = vector.load %arg0[%c0, %c0_0] : memref<512x27xbf16, #tpu.memory_space<vmem>>, vector<512x27xbf16>
    %c0_1 = arith.constant 0 : index
    %c0_2 = arith.constant 0 : index
    %1 = vector.load %arg1[%c0_1, %c0_2] : memref<27x16xbf16, #tpu.memory_space<vmem>>, vector<27x16xbf16>
    %cst = arith.constant dense<0.000000e+00> : vector<512x16xf32>
    %2 = tpu.matmul %0, %1, %cst {dimension_numbers = #tpu.dot_dimension_numbers<[1], [0], [0], [1], [0, 0, 1, 1], [], []>} : vector<512x27xbf16>, vector<27x16xbf16>, vector<512x16xf32> -> vector<512x16xf32>
    %c0_3 = arith.constant 0 : index
    %c0_4 = arith.constant 0 : index
    %3 = vector.load %arg2[%c0_3, %c0_4] : memref<1x16xf32, #tpu.memory_space<vmem>>, vector<1x16xf32>
    %4 = vector.broadcast %3 : vector<1x16xf32> to vector<512x16xf32>
    %5 = arith.mulf %2, %4 : vector<512x16xf32>
    %c0_5 = arith.constant 0 : index
    %c0_6 = arith.constant 0 : index
    %6 = vector.load %arg3[%c0_5, %c0_6] : memref<1x16xf32, #tpu.memory_space<vmem>>, vector<1x16xf32>
    %7 = vector.broadcast %6 : vector<1x16xf32> to vector<512x16xf32>
    %8 = arith.addf %5, %7 : vector<512x16xf32>
    %cst_7 = arith.constant 0.000000e+00 : f32
    %9 = vector.broadcast %cst_7 : f32 to vector<512x16xf32>
    %10 = arith.maximumf %8, %9 : vector<512x16xf32>
    %c0_8 = arith.constant 0 : index
    %c0_9 = arith.constant 0 : index
    %11 = vector.load %arg4[%c0_8, %c0_9] : memref<512x16xf32, #tpu.memory_space<vmem>>, vector<512x16xf32>
    tpu.vector_store %arg4[%c0_8, %c0_9], %10 {strides = array<i32>} : memref<512x16xf32, #tpu.memory_space<vmem>>, vector<512x16xf32>,
    return
  }
}

module attributes {stable_mosaic.version = 11 : i64} {
  func.func @_maxpool_kernel(%arg0: memref<128x9x16xf32, #tpu.memory_space<vmem>>, %arg1: memref<128x16xf32, #tpu.memory_space<vmem>>) attributes {dimension_semantics = [], scalar_prefetch = 0 : i64, scratch_operands = 0 : i64, tpu.core_type = #tpu.core_type<tc>} {
    %c0 = arith.constant 0 : index
    %c0_0 = arith.constant 0 : index
    %c0_1 = arith.constant 0 : index
    %0 = vector.load %arg0[%c0, %c0_0, %c0_1] : memref<128x9x16xf32, #tpu.memory_space<vmem>>, vector<128x9x16xf32>
    %cst = arith.constant dense<0xFF800000> : vector<128x16xf32>
    %1 = vector.multi_reduction <maximumf>, %0, %cst [1] : vector<128x9x16xf32> to vector<128x16xf32>
    %c0_2 = arith.constant 0 : index
    %c0_3 = arith.constant 0 : index
    %2 = vector.load %arg1[%c0_2, %c0_3] : memref<128x16xf32, #tpu.memory_space<vmem>>, vector<128x16xf32>
    tpu.vector_store %arg1[%c0_2, %c0_3], %1 {strides = array<i32>} : memref<128x16xf32, #tpu.memory_space<vmem>>, vector<128x16xf32>,
    return
  }
}

module attributes {stable_mosaic.version = 11 : i64} {
  func.func @_dpb_pre_proj_kernel(%arg0: memref<128x16xf32, #tpu.memory_space<vmem>>, %arg1: memref<128x16xf32, #tpu.memory_space<vmem>>, %arg2: memref<1x16xf32, #tpu.memory_space<vmem>>, %arg3: memref<1x16xf32, #tpu.memory_space<vmem>>, %arg4: memref<16x8xbf16, #tpu.memory_space<vmem>>, %arg5: memref<1x8xf32, #tpu.memory_space<vmem>>, %arg6: memref<1x8xf32, #tpu.memory_space<vmem>>, %arg7: memref<1x16xf32, #tpu.memory_space<vmem>>, %arg8: memref<1x16xf32, #tpu.memory_space<vmem>>, %arg9: memref<16x64xbf16, #tpu.memory_space<vmem>>, %arg10: memref<16x8xbf16, #tpu.memory_space<vmem>>, %arg11: memref<128x8xbf16, #tpu.memory_space<vmem>>, %arg12: memref<128x64xf32, #tpu.memory_space<vmem>>, %arg13: memref<128x8xf32, #tpu.memory_space<vmem>>) attributes {dimension_semantics = [], scalar_prefetch = 0 : i64, scratch_operands = 0 : i64, tpu.core_type = #tpu.core_type<tc>} {
    %c0 = arith.constant 0 : index
    %c0_0 = arith.constant 0 : index
    %0 = vector.load %arg0[%c0, %c0_0] : memref<128x16xf32, #tpu.memory_space<vmem>>, vector<128x16xf32>
    %c0_1 = arith.constant 0 : index
    %c0_2 = arith.constant 0 : index
    %1 = vector.load %arg2[%c0_1, %c0_2] : memref<1x16xf32, #tpu.memory_space<vmem>>, vector<1x16xf32>
    %2 = vector.broadcast %1 : vector<1x16xf32> to vector<128x16xf32>
    %3 = arith.mulf %0, %2 : vector<128x16xf32>
    %c0_3 = arith.constant 0 : index
    %c0_4 = arith.constant 0 : index
    %4 = vector.load %arg3[%c0_3, %c0_4] : memref<1x16xf32, #tpu.memory_space<vmem>>, vector<1x16xf32>
    %5 = vector.broadcast %4 : vector<1x16xf32> to vector<128x16xf32>
    %6 = arith.addf %3, %5 : vector<128x16xf32>
    %cst = arith.constant 0.000000e+00 : f32
    %7 = vector.broadcast %cst : f32 to vector<128x16xf32>
    %8 = arith.maximumf %6, %7 : vector<128x16xf32>
    %9 = arith.truncf %8 : vector<128x16xf32> to vector<128x16xbf16>
    %c0_5 = arith.constant 0 : index
    %c0_6 = arith.constant 0 : index
    %10 = vector.load %arg4[%c0_5, %c0_6] : memref<16x8xbf16, #tpu.memory_space<vmem>>, vector<16x8xbf16>
    %cst_7 = arith.constant dense<0.000000e+00> : vector<128x8xf32>
    %11 = tpu.matmul %9, %10, %cst_7 {dimension_numbers = #tpu.dot_dimension_numbers<[1], [0], [0], [1], [0, 0, 1, 1], [], []>} : vector<128x16xbf16>, vector<16x8xbf16>, vector<128x8xf32> -> vector<128x8xf32>
    %c0_8 = arith.constant 0 : index
    %c0_9 = arith.constant 0 : index
    %12 = vector.load %arg5[%c0_8, %c0_9] : memref<1x8xf32, #tpu.memory_space<vmem>>, vector<1x8xf32>
    %13 = vector.broadcast %12 : vector<1x8xf32> to vector<128x8xf32>
    %14 = arith.mulf %11, %13 : vector<128x8xf32>
    %c0_10 = arith.constant 0 : index
    %c0_11 = arith.constant 0 : index
    %15 = vector.load %arg6[%c0_10, %c0_11] : memref<1x8xf32, #tpu.memory_space<vmem>>, vector<1x8xf32>
    %16 = vector.broadcast %15 : vector<1x8xf32> to vector<128x8xf32>
    %17 = arith.addf %14, %16 : vector<128x8xf32>
    %cst_12 = arith.constant 0.000000e+00 : f32
    %18 = vector.broadcast %cst_12 : f32 to vector<128x8xf32>
    %19 = arith.maximumf %17, %18 : vector<128x8xf32>
    %20 = arith.truncf %19 : vector<128x8xf32> to vector<128x8xbf16>
    %c0_13 = arith.constant 0 : index
    %c0_14 = arith.constant 0 : index
    %21 = vector.load %arg11[%c0_13, %c0_14] : memref<128x8xbf16, #tpu.memory_space<vmem>>, vector<128x8xbf16>
    tpu.vector_store %arg11[%c0_13, %c0_14], %20 {strides = array<i32>} : memref<128x8xbf16, #tpu.memory_space<vmem>>, vector<128x8xbf16>,
    %c0_15 = arith.constant 0 : index
    %c0_16 = arith.constant 0 : index
    %22 = vector.load %arg1[%c0_15, %c0_16] : memref<128x16xf32, #tpu.memory_space<vmem>>, vector<128x16xf32>
    %c0_17 = arith.constant 0 : index
    %c0_18 = arith.constant 0 : index
    %23 = vector.load %arg7[%c0_17, %c0_18] : memref<1x16xf32, #tpu.memory_space<vmem>>, vector<1x16xf32>
    %24 = vector.broadcast %23 : vector<1x16xf32> to vector<128x16xf32>
    %25 = arith.mulf %22, %24 : vector<128x16xf32>
    %c0_19 = arith.constant 0 : index
    %c0_20 = arith.constant 0 : index
    %26 = vector.load %arg8[%c0_19, %c0_20] : memref<1x16xf32, #tpu.memory_space<vmem>>, vector<1x16xf32>
    %27 = vector.broadcast %26 : vector<1x16xf32> to vector<128x16xf32>
    %28 = arith.addf %25, %27 : vector<128x16xf32>
    %cst_21 = arith.constant 0.000000e+00 : f32
    %29 = vector.broadcast %cst_21 : f32 to vector<128x16xf32>
    %30 = arith.maximumf %28, %29 : vector<128x16xf32>
    %31 = arith.truncf %30 : vector<128x16xf32> to vector<128x16xbf16>
    %c0_22 = arith.constant 0 : index
    %c0_23 = arith.constant 0 : index
    %32 = vector.load %arg9[%c0_22, %c0_23] : memref<16x64xbf16, #tpu.memory_space<vmem>>, vector<16x64xbf16>
    %cst_24 = arith.constant dense<0.000000e+00> : vector<128x64xf32>
    %33 = tpu.matmul %31, %32, %cst_24 {dimension_numbers = #tpu.dot_dimension_numbers<[1], [0], [0], [1], [0, 0, 1, 1], [], []>} : vector<128x16xbf16>, vector<16x64xbf16>, vector<128x64xf32> -> vector<128x64xf32>
    %c0_25 = arith.constant 0 : index
    %c0_26 = arith.constant 0 : index
    %34 = vector.load %arg12[%c0_25, %c0_26] : memref<128x64xf32, #tpu.memory_space<vmem>>, vector<128x64xf32>
    tpu.vector_store %arg12[%c0_25, %c0_26], %33 {strides = array<i32>} : memref<128x64xf32, #tpu.memory_space<vmem>>, vector<128x64xf32>,
    %c0_27 = arith.constant 0 : index
    %c0_28 = arith.constant 0 : index
    %35 = vector.load %arg10[%c0_27, %c0_28] : memref<16x8xbf16, #tpu.memory_space<vmem>>, vector<16x8xbf16>
    %cst_29 = arith.constant dense<0.000000e+00> : vector<128x8xf32>
    %36 = tpu.matmul %31, %35, %cst_29 {dimension_numbers = #tpu.dot_dimension_numbers<[1], [0], [0], [1], [0, 0, 1, 1], [], []>} : vector<128x16xbf16>, vector<16x8xbf16>, vector<128x8xf32> -> vector<128x8xf32>
    %c0_30 = arith.constant 0 : index
    %c0_31 = arith.constant 0 : index
    %37 = vector.load %arg13[%c0_30, %c0_31] : memref<128x8xf32, #tpu.memory_space<vmem>>, vector<128x8xf32>
    tpu.vector_store %arg13[%c0_30, %c0_31], %36 {strides = array<i32>} : memref<128x8xf32, #tpu.memory_space<vmem>>, vector<128x8xf32>,
    return
  }
}

module attributes {stable_mosaic.version = 11 : i64} {
  func.func @_dpb_post_kernel(%arg0: memref<128x72xbf16, #tpu.memory_space<vmem>>, %arg1: memref<72x8xbf16, #tpu.memory_space<vmem>>, %arg2: memref<1x8xf32, #tpu.memory_space<vmem>>, %arg3: memref<1x8xf32, #tpu.memory_space<vmem>>, %arg4: memref<8x64xbf16, #tpu.memory_space<vmem>>, %arg5: memref<8x4xbf16, #tpu.memory_space<vmem>>, %arg6: memref<128x64xf32, #tpu.memory_space<vmem>>, %arg7: memref<128x64xf32, #tpu.memory_space<vmem>>, %arg8: memref<128x4xf32, #tpu.memory_space<vmem>>) attributes {dimension_semantics = [], scalar_prefetch = 0 : i64, scratch_operands = 0 : i64, tpu.core_type = #tpu.core_type<tc>} {
    %c0 = arith.constant 0 : index
    %c0_0 = arith.constant 0 : index
    %0 = vector.load %arg0[%c0, %c0_0] : memref<128x72xbf16, #tpu.memory_space<vmem>>, vector<128x72xbf16>
    %c0_1 = arith.constant 0 : index
    %c0_2 = arith.constant 0 : index
    %1 = vector.load %arg1[%c0_1, %c0_2] : memref<72x8xbf16, #tpu.memory_space<vmem>>, vector<72x8xbf16>
    %cst = arith.constant dense<0.000000e+00> : vector<128x8xf32>
    %2 = tpu.matmul %0, %1, %cst {dimension_numbers = #tpu.dot_dimension_numbers<[1], [0], [0], [1], [0, 0, 1, 1], [], []>} : vector<128x72xbf16>, vector<72x8xbf16>, vector<128x8xf32> -> vector<128x8xf32>
    %c0_3 = arith.constant 0 : index
    %c0_4 = arith.constant 0 : index
    %3 = vector.load %arg2[%c0_3, %c0_4] : memref<1x8xf32, #tpu.memory_space<vmem>>, vector<1x8xf32>
    %4 = vector.broadcast %3 : vector<1x8xf32> to vector<128x8xf32>
    %5 = arith.mulf %2, %4 : vector<128x8xf32>
    %c0_5 = arith.constant 0 : index
    %c0_6 = arith.constant 0 : index
    %6 = vector.load %arg3[%c0_5, %c0_6] : memref<1x8xf32, #tpu.memory_space<vmem>>, vector<1x8xf32>
    %7 = vector.broadcast %6 : vector<1x8xf32> to vector<128x8xf32>
    %8 = arith.addf %5, %7 : vector<128x8xf32>
    %cst_7 = arith.constant 0.000000e+00 : f32
    %9 = vector.broadcast %cst_7 : f32 to vector<128x8xf32>
    %10 = arith.maximumf %8, %9 : vector<128x8xf32>
    %11 = arith.truncf %10 : vector<128x8xf32> to vector<128x8xbf16>
    %c0_8 = arith.constant 0 : index
    %c0_9 = arith.constant 0 : index
    %12 = vector.load %arg6[%c0_8, %c0_9] : memref<128x64xf32, #tpu.memory_space<vmem>>, vector<128x64xf32>
    %c0_10 = arith.constant 0 : index
    %c0_11 = arith.constant 0 : index
    %13 = vector.load %arg4[%c0_10, %c0_11] : memref<8x64xbf16, #tpu.memory_space<vmem>>, vector<8x64xbf16>
    %cst_12 = arith.constant dense<0.000000e+00> : vector<128x64xf32>
    %14 = tpu.matmul %11, %13, %cst_12 {dimension_numbers = #tpu.dot_dimension_numbers<[1], [0], [0], [1], [0, 0, 1, 1], [], []>} : vector<128x8xbf16>, vector<8x64xbf16>, vector<128x64xf32> -> vector<128x64xf32>
    %15 = arith.addf %12, %14 : vector<128x64xf32>
    %c0_13 = arith.constant 0 : index
    %c0_14 = arith.constant 0 : index
    %16 = vector.load %arg7[%c0_13, %c0_14] : memref<128x64xf32, #tpu.memory_space<vmem>>, vector<128x64xf32>
    tpu.vector_store %arg7[%c0_13, %c0_14], %15 {strides = array<i32>} : memref<128x64xf32, #tpu.memory_space<vmem>>, vector<128x64xf32>,
    %c0_15 = arith.constant 0 : index
    %c0_16 = arith.constant 0 : index
    %17 = vector.load %arg5[%c0_15, %c0_16] : memref<8x4xbf16, #tpu.memory_space<vmem>>, vector<8x4xbf16>
    %cst_17 = arith.constant dense<0.000000e+00> : vector<128x4xf32>
    %18 = tpu.matmul %11, %17, %cst_17 {dimension_numbers = #tpu.dot_dimension_numbers<[1], [0], [0], [1], [0, 0, 1, 1], [], []>} : vector<128x8xbf16>, vector<8x4xbf16>, vector<128x4xf32> -> vector<128x4xf32>
    %c0_18 = arith.constant 0 : index
    %c0_19 = arith.constant 0 : index
    %19 = vector.load %arg8[%c0_18, %c0_19] : memref<128x4xf32, #tpu.memory_space<vmem>>, vector<128x4xf32>
    tpu.vector_store %arg8[%c0_18, %c0_19], %18 {strides = array<i32>} : memref<128x4xf32, #tpu.memory_space<vmem>>, vector<128x4xf32>,
    return
  }
}

module attributes {stable_mosaic.version = 11 : i64} {
  func.func @_dpb_pre_proj_kernel(%arg0: memref<128x76xf32, #tpu.memory_space<vmem>>, %arg1: memref<32x76xf32, #tpu.memory_space<vmem>>, %arg2: memref<1x76xf32, #tpu.memory_space<vmem>>, %arg3: memref<1x76xf32, #tpu.memory_space<vmem>>, %arg4: memref<76x16xbf16, #tpu.memory_space<vmem>>, %arg5: memref<1x16xf32, #tpu.memory_space<vmem>>, %arg6: memref<1x16xf32, #tpu.memory_space<vmem>>, %arg7: memref<1x76xf32, #tpu.memory_space<vmem>>, %arg8: memref<1x76xf32, #tpu.memory_space<vmem>>, %arg9: memref<76x128xbf16, #tpu.memory_space<vmem>>, %arg10: memref<76x8xbf16, #tpu.memory_space<vmem>>, %arg11: memref<128x16xbf16, #tpu.memory_space<vmem>>, %arg12: memref<32x128xf32, #tpu.memory_space<vmem>>, %arg13: memref<32x8xf32, #tpu.memory_space<vmem>>) attributes {dimension_semantics = [], scalar_prefetch = 0 : i64, scratch_operands = 0 : i64, tpu.core_type = #tpu.core_type<tc>} {
    %c0 = arith.constant 0 : index
    %c0_0 = arith.constant 0 : index
    %0 = vector.load %arg0[%c0, %c0_0] : memref<128x76xf32, #tpu.memory_space<vmem>>, vector<128x76xf32>
    %c0_1 = arith.constant 0 : index
    %c0_2 = arith.constant 0 : index
    %1 = vector.load %arg2[%c0_1, %c0_2] : memref<1x76xf32, #tpu.memory_space<vmem>>, vector<1x76xf32>
    %2 = vector.broadcast %1 : vector<1x76xf32> to vector<128x76xf32>
    %3 = arith.mulf %0, %2 : vector<128x76xf32>
    %c0_3 = arith.constant 0 : index
    %c0_4 = arith.constant 0 : index
    %4 = vector.load %arg3[%c0_3, %c0_4] : memref<1x76xf32, #tpu.memory_space<vmem>>, vector<1x76xf32>
    %5 = vector.broadcast %4 : vector<1x76xf32> to vector<128x76xf32>
    %6 = arith.addf %3, %5 : vector<128x76xf32>
    %cst = arith.constant 0.000000e+00 : f32
    %7 = vector.broadcast %cst : f32 to vector<128x76xf32>
    %8 = arith.maximumf %6, %7 : vector<128x76xf32>
    %9 = arith.truncf %8 : vector<128x76xf32> to vector<128x76xbf16>
    %c0_5 = arith.constant 0 : index
    %c0_6 = arith.constant 0 : index
    %10 = vector.load %arg4[%c0_5, %c0_6] : memref<76x16xbf16, #tpu.memory_space<vmem>>, vector<76x16xbf16>
    %cst_7 = arith.constant dense<0.000000e+00> : vector<128x16xf32>
    %11 = tpu.matmul %9, %10, %cst_7 {dimension_numbers = #tpu.dot_dimension_numbers<[1], [0], [0], [1], [0, 0, 1, 1], [], []>} : vector<128x76xbf16>, vector<76x16xbf16>, vector<128x16xf32> -> vector<128x16xf32>
    %c0_8 = arith.constant 0 : index
    %c0_9 = arith.constant 0 : index
    %12 = vector.load %arg5[%c0_8, %c0_9] : memref<1x16xf32, #tpu.memory_space<vmem>>, vector<1x16xf32>
    %13 = vector.broadcast %12 : vector<1x16xf32> to vector<128x16xf32>
    %14 = arith.mulf %11, %13 : vector<128x16xf32>
    %c0_10 = arith.constant 0 : index
    %c0_11 = arith.constant 0 : index
    %15 = vector.load %arg6[%c0_10, %c0_11] : memref<1x16xf32, #tpu.memory_space<vmem>>, vector<1x16xf32>
    %16 = vector.broadcast %15 : vector<1x16xf32> to vector<128x16xf32>
    %17 = arith.addf %14, %16 : vector<128x16xf32>
    %cst_12 = arith.constant 0.000000e+00 : f32
    %18 = vector.broadcast %cst_12 : f32 to vector<128x16xf32>
    %19 = arith.maximumf %17, %18 : vector<128x16xf32>
    %20 = arith.truncf %19 : vector<128x16xf32> to vector<128x16xbf16>
    %c0_13 = arith.constant 0 : index
    %c0_14 = arith.constant 0 : index
    %21 = vector.load %arg11[%c0_13, %c0_14] : memref<128x16xbf16, #tpu.memory_space<vmem>>, vector<128x16xbf16>
    tpu.vector_store %arg11[%c0_13, %c0_14], %20 {strides = array<i32>} : memref<128x16xbf16, #tpu.memory_space<vmem>>, vector<128x16xbf16>,
    %c0_15 = arith.constant 0 : index
    %c0_16 = arith.constant 0 : index
    %22 = vector.load %arg1[%c0_15, %c0_16] : memref<32x76xf32, #tpu.memory_space<vmem>>, vector<32x76xf32>
    %c0_17 = arith.constant 0 : index
    %c0_18 = arith.constant 0 : index
    %23 = vector.load %arg7[%c0_17, %c0_18] : memref<1x76xf32, #tpu.memory_space<vmem>>, vector<1x76xf32>
    %24 = vector.broadcast %23 : vector<1x76xf32> to vector<32x76xf32>
    %25 = arith.mulf %22, %24 : vector<32x76xf32>
    %c0_19 = arith.constant 0 : index
    %c0_20 = arith.constant 0 : index
    %26 = vector.load %arg8[%c0_19, %c0_20] : memref<1x76xf32, #tpu.memory_space<vmem>>, vector<1x76xf32>
    %27 = vector.broadcast %26 : vector<1x76xf32> to vector<32x76xf32>
    %28 = arith.addf %25, %27 : vector<32x76xf32>
    %cst_21 = arith.constant 0.000000e+00 : f32
    %29 = vector.broadcast %cst_21 : f32 to vector<32x76xf32>
    %30 = arith.maximumf %28, %29 : vector<32x76xf32>
    %31 = arith.truncf %30 : vector<32x76xf32> to vector<32x76xbf16>
    %c0_22 = arith.constant 0 : index
    %c0_23 = arith.constant 0 : index
    %32 = vector.load %arg9[%c0_22, %c0_23] : memref<76x128xbf16, #tpu.memory_space<vmem>>, vector<76x128xbf16>
    %cst_24 = arith.constant dense<0.000000e+00> : vector<32x128xf32>
    %33 = tpu.matmul %31, %32, %cst_24 {dimension_numbers = #tpu.dot_dimension_numbers<[1], [0], [0], [1], [0, 0, 1, 1], [], []>} : vector<32x76xbf16>, vector<76x128xbf16>, vector<32x128xf32> -> vector<32x128xf32>
    %c0_25 = arith.constant 0 : index
    %c0_26 = arith.constant 0 : index
    %34 = vector.load %arg12[%c0_25, %c0_26] : memref<32x128xf32, #tpu.memory_space<vmem>>, vector<32x128xf32>
    tpu.vector_store %arg12[%c0_25, %c0_26], %33 {strides = array<i32>} : memref<32x128xf32, #tpu.memory_space<vmem>>, vector<32x128xf32>,
    %c0_27 = arith.constant 0 : index
    %c0_28 = arith.constant 0 : index
    %35 = vector.load %arg10[%c0_27, %c0_28] : memref<76x8xbf16, #tpu.memory_space<vmem>>, vector<76x8xbf16>
    %cst_29 = arith.constant dense<0.000000e+00> : vector<32x8xf32>
    %36 = tpu.matmul %31, %35, %cst_29 {dimension_numbers = #tpu.dot_dimension_numbers<[1], [0], [0], [1], [0, 0, 1, 1], [], []>} : vector<32x76xbf16>, vector<76x8xbf16>, vector<32x8xf32> -> vector<32x8xf32>
    %c0_30 = arith.constant 0 : index
    %c0_31 = arith.constant 0 : index
    %37 = vector.load %arg13[%c0_30, %c0_31] : memref<32x8xf32, #tpu.memory_space<vmem>>, vector<32x8xf32>
    tpu.vector_store %arg13[%c0_30, %c0_31], %36 {strides = array<i32>} : memref<32x8xf32, #tpu.memory_space<vmem>>, vector<32x8xf32>,
    return
  }
}

module attributes {stable_mosaic.version = 11 : i64} {
  func.func @_dpb_post_kernel(%arg0: memref<32x144xbf16, #tpu.memory_space<vmem>>, %arg1: memref<144x16xbf16, #tpu.memory_space<vmem>>, %arg2: memref<1x16xf32, #tpu.memory_space<vmem>>, %arg3: memref<1x16xf32, #tpu.memory_space<vmem>>, %arg4: memref<16x128xbf16, #tpu.memory_space<vmem>>, %arg5: memref<16x4xbf16, #tpu.memory_space<vmem>>, %arg6: memref<32x128xf32, #tpu.memory_space<vmem>>, %arg7: memref<32x128xf32, #tpu.memory_space<vmem>>, %arg8: memref<32x4xf32, #tpu.memory_space<vmem>>) attributes {dimension_semantics = [], scalar_prefetch = 0 : i64, scratch_operands = 0 : i64, tpu.core_type = #tpu.core_type<tc>} {
    %c0 = arith.constant 0 : index
    %c0_0 = arith.constant 0 : index
    %0 = vector.load %arg0[%c0, %c0_0] : memref<32x144xbf16, #tpu.memory_space<vmem>>, vector<32x144xbf16>
    %c0_1 = arith.constant 0 : index
    %c0_2 = arith.constant 0 : index
    %1 = vector.load %arg1[%c0_1, %c0_2] : memref<144x16xbf16, #tpu.memory_space<vmem>>, vector<144x16xbf16>
    %cst = arith.constant dense<0.000000e+00> : vector<32x16xf32>
    %2 = tpu.matmul %0, %1, %cst {dimension_numbers = #tpu.dot_dimension_numbers<[1], [0], [0], [1], [0, 0, 1, 1], [], []>} : vector<32x144xbf16>, vector<144x16xbf16>, vector<32x16xf32> -> vector<32x16xf32>
    %c0_3 = arith.constant 0 : index
    %c0_4 = arith.constant 0 : index
    %3 = vector.load %arg2[%c0_3, %c0_4] : memref<1x16xf32, #tpu.memory_space<vmem>>, vector<1x16xf32>
    %4 = vector.broadcast %3 : vector<1x16xf32> to vector<32x16xf32>
    %5 = arith.mulf %2, %4 : vector<32x16xf32>
    %c0_5 = arith.constant 0 : index
    %c0_6 = arith.constant 0 : index
    %6 = vector.load %arg3[%c0_5, %c0_6] : memref<1x16xf32, #tpu.memory_space<vmem>>, vector<1x16xf32>
    %7 = vector.broadcast %6 : vector<1x16xf32> to vector<32x16xf32>
    %8 = arith.addf %5, %7 : vector<32x16xf32>
    %cst_7 = arith.constant 0.000000e+00 : f32
    %9 = vector.broadcast %cst_7 : f32 to vector<32x16xf32>
    %10 = arith.maximumf %8, %9 : vector<32x16xf32>
    %11 = arith.truncf %10 : vector<32x16xf32> to vector<32x16xbf16>
    %c0_8 = arith.constant 0 : index
    %c0_9 = arith.constant 0 : index
    %12 = vector.load %arg6[%c0_8, %c0_9] : memref<32x128xf32, #tpu.memory_space<vmem>>, vector<32x128xf32>
    %c0_10 = arith.constant 0 : index
    %c0_11 = arith.constant 0 : index
    %13 = vector.load %arg4[%c0_10, %c0_11] : memref<16x128xbf16, #tpu.memory_space<vmem>>, vector<16x128xbf16>
    %cst_12 = arith.constant dense<0.000000e+00> : vector<32x128xf32>
    %14 = tpu.matmul %11, %13, %cst_12 {dimension_numbers = #tpu.dot_dimension_numbers<[1], [0], [0], [1], [0, 0, 1, 1], [], []>} : vector<32x16xbf16>, vector<16x128xbf16>, vector<32x128xf32> -> vector<32x128xf32>
    %15 = arith.addf %12, %14 : vector<32x128xf32>
    %c0_13 = arith.constant 0 : index
    %c0_14 = arith.constant 0 : index
    %16 = vector.load %arg7[%c0_13, %c0_14] : memref<32x128xf32, #tpu.memory_space<vmem>>, vector<32x128xf32>
    tpu.vector_store %arg7[%c0_13, %c0_14], %15 {strides = array<i32>} : memref<32x128xf32, #tpu.memory_space<vmem>>, vector<32x128xf32>,
    %c0_15 = arith.constant 0 : index
    %c0_16 = arith.constant 0 : index
    %17 = vector.load %arg5[%c0_15, %c0_16] : memref<16x4xbf16, #tpu.memory_space<vmem>>, vector<16x4xbf16>
    %cst_17 = arith.constant dense<0.000000e+00> : vector<32x4xf32>
    %18 = tpu.matmul %11, %17, %cst_17 {dimension_numbers = #tpu.dot_dimension_numbers<[1], [0], [0], [1], [0, 0, 1, 1], [], []>} : vector<32x16xbf16>, vector<16x4xbf16>, vector<32x4xf32> -> vector<32x4xf32>
    %c0_18 = arith.constant 0 : index
    %c0_19 = arith.constant 0 : index
    %19 = vector.load %arg8[%c0_18, %c0_19] : memref<32x4xf32, #tpu.memory_space<vmem>>, vector<32x4xf32>
    tpu.vector_store %arg8[%c0_18, %c0_19], %18 {strides = array<i32>} : memref<32x4xf32, #tpu.memory_space<vmem>>, vector<32x4xf32>,
    return
  }
}

module attributes {stable_mosaic.version = 11 : i64} {
  func.func @_dpb_pre_proj_kernel(%arg0: memref<32x140xf32, #tpu.memory_space<vmem>>, %arg1: memref<8x140xf32, #tpu.memory_space<vmem>>, %arg2: memref<1x140xf32, #tpu.memory_space<vmem>>, %arg3: memref<1x140xf32, #tpu.memory_space<vmem>>, %arg4: memref<140x32xbf16, #tpu.memory_space<vmem>>, %arg5: memref<1x32xf32, #tpu.memory_space<vmem>>, %arg6: memref<1x32xf32, #tpu.memory_space<vmem>>, %arg7: memref<1x140xf32, #tpu.memory_space<vmem>>, %arg8: memref<1x140xf32, #tpu.memory_space<vmem>>, %arg9: memref<140x256xbf16, #tpu.memory_space<vmem>>, %arg10: memref<140x8xbf16, #tpu.memory_space<vmem>>, %arg11: memref<32x32xbf16, #tpu.memory_space<vmem>>, %arg12: memref<8x256xf32, #tpu.memory_space<vmem>>, %arg13: memref<8x8xf32, #tpu.memory_space<vmem>>) attributes {dimension_semantics = [], scalar_prefetch = 0 : i64, scratch_operands = 0 : i64, tpu.core_type = #tpu.core_type<tc>} {
    %c0 = arith.constant 0 : index
    %c0_0 = arith.constant 0 : index
    %0 = vector.load %arg0[%c0, %c0_0] : memref<32x140xf32, #tpu.memory_space<vmem>>, vector<32x140xf32>
    %c0_1 = arith.constant 0 : index
    %c0_2 = arith.constant 0 : index
    %1 = vector.load %arg2[%c0_1, %c0_2] : memref<1x140xf32, #tpu.memory_space<vmem>>, vector<1x140xf32>
    %2 = vector.broadcast %1 : vector<1x140xf32> to vector<32x140xf32>
    %3 = arith.mulf %0, %2 : vector<32x140xf32>
    %c0_3 = arith.constant 0 : index
    %c0_4 = arith.constant 0 : index
    %4 = vector.load %arg3[%c0_3, %c0_4] : memref<1x140xf32, #tpu.memory_space<vmem>>, vector<1x140xf32>
    %5 = vector.broadcast %4 : vector<1x140xf32> to vector<32x140xf32>
    %6 = arith.addf %3, %5 : vector<32x140xf32>
    %cst = arith.constant 0.000000e+00 : f32
    %7 = vector.broadcast %cst : f32 to vector<32x140xf32>
    %8 = arith.maximumf %6, %7 : vector<32x140xf32>
    %9 = arith.truncf %8 : vector<32x140xf32> to vector<32x140xbf16>
    %c0_5 = arith.constant 0 : index
    %c0_6 = arith.constant 0 : index
    %10 = vector.load %arg4[%c0_5, %c0_6] : memref<140x32xbf16, #tpu.memory_space<vmem>>, vector<140x32xbf16>
    %cst_7 = arith.constant dense<0.000000e+00> : vector<32x32xf32>
    %11 = tpu.matmul %9, %10, %cst_7 {dimension_numbers = #tpu.dot_dimension_numbers<[1], [0], [0], [1], [0, 0, 1, 1], [], []>} : vector<32x140xbf16>, vector<140x32xbf16>, vector<32x32xf32> -> vector<32x32xf32>
    %c0_8 = arith.constant 0 : index
    %c0_9 = arith.constant 0 : index
    %12 = vector.load %arg5[%c0_8, %c0_9] : memref<1x32xf32, #tpu.memory_space<vmem>>, vector<1x32xf32>
    %13 = vector.broadcast %12 : vector<1x32xf32> to vector<32x32xf32>
    %14 = arith.mulf %11, %13 : vector<32x32xf32>
    %c0_10 = arith.constant 0 : index
    %c0_11 = arith.constant 0 : index
    %15 = vector.load %arg6[%c0_10, %c0_11] : memref<1x32xf32, #tpu.memory_space<vmem>>, vector<1x32xf32>
    %16 = vector.broadcast %15 : vector<1x32xf32> to vector<32x32xf32>
    %17 = arith.addf %14, %16 : vector<32x32xf32>
    %cst_12 = arith.constant 0.000000e+00 : f32
    %18 = vector.broadcast %cst_12 : f32 to vector<32x32xf32>
    %19 = arith.maximumf %17, %18 : vector<32x32xf32>
    %20 = arith.truncf %19 : vector<32x32xf32> to vector<32x32xbf16>
    %c0_13 = arith.constant 0 : index
    %c0_14 = arith.constant 0 : index
    %21 = vector.load %arg11[%c0_13, %c0_14] : memref<32x32xbf16, #tpu.memory_space<vmem>>, vector<32x32xbf16>
    tpu.vector_store %arg11[%c0_13, %c0_14], %20 {strides = array<i32>} : memref<32x32xbf16, #tpu.memory_space<vmem>>, vector<32x32xbf16>,
    %c0_15 = arith.constant 0 : index
    %c0_16 = arith.constant 0 : index
    %22 = vector.load %arg1[%c0_15, %c0_16] : memref<8x140xf32, #tpu.memory_space<vmem>>, vector<8x140xf32>
    %c0_17 = arith.constant 0 : index
    %c0_18 = arith.constant 0 : index
    %23 = vector.load %arg7[%c0_17, %c0_18] : memref<1x140xf32, #tpu.memory_space<vmem>>, vector<1x140xf32>
    %24 = vector.broadcast %23 : vector<1x140xf32> to vector<8x140xf32>
    %25 = arith.mulf %22, %24 : vector<8x140xf32>
    %c0_19 = arith.constant 0 : index
    %c0_20 = arith.constant 0 : index
    %26 = vector.load %arg8[%c0_19, %c0_20] : memref<1x140xf32, #tpu.memory_space<vmem>>, vector<1x140xf32>
    %27 = vector.broadcast %26 : vector<1x140xf32> to vector<8x140xf32>
    %28 = arith.addf %25, %27 : vector<8x140xf32>
    %cst_21 = arith.constant 0.000000e+00 : f32
    %29 = vector.broadcast %cst_21 : f32 to vector<8x140xf32>
    %30 = arith.maximumf %28, %29 : vector<8x140xf32>
    %31 = arith.truncf %30 : vector<8x140xf32> to vector<8x140xbf16>
    %c0_22 = arith.constant 0 : index
    %c0_23 = arith.constant 0 : index
    %32 = vector.load %arg9[%c0_22, %c0_23] : memref<140x256xbf16, #tpu.memory_space<vmem>>, vector<140x256xbf16>
    %cst_24 = arith.constant dense<0.000000e+00> : vector<8x256xf32>
    %33 = tpu.matmul %31, %32, %cst_24 {dimension_numbers = #tpu.dot_dimension_numbers<[1], [0], [0], [1], [0, 0, 1, 1], [], []>} : vector<8x140xbf16>, vector<140x256xbf16>, vector<8x256xf32> -> vector<8x256xf32>
    %c0_25 = arith.constant 0 : index
    %c0_26 = arith.constant 0 : index
    %34 = vector.load %arg12[%c0_25, %c0_26] : memref<8x256xf32, #tpu.memory_space<vmem>>, vector<8x256xf32>
    tpu.vector_store %arg12[%c0_25, %c0_26], %33 {strides = array<i32>} : memref<8x256xf32, #tpu.memory_space<vmem>>, vector<8x256xf32>,
    %c0_27 = arith.constant 0 : index
    %c0_28 = arith.constant 0 : index
    %35 = vector.load %arg10[%c0_27, %c0_28] : memref<140x8xbf16, #tpu.memory_space<vmem>>, vector<140x8xbf16>
    %cst_29 = arith.constant dense<0.000000e+00> : vector<8x8xf32>
    %36 = tpu.matmul %31, %35, %cst_29 {dimension_numbers = #tpu.dot_dimension_numbers<[1], [0], [0], [1], [0, 0, 1, 1], [], []>} : vector<8x140xbf16>, vector<140x8xbf16>, vector<8x8xf32> -> vector<8x8xf32>
    %c0_30 = arith.constant 0 : index
    %c0_31 = arith.constant 0 : index
    %37 = vector.load %arg13[%c0_30, %c0_31] : memref<8x8xf32, #tpu.memory_space<vmem>>, vector<8x8xf32>
    tpu.vector_store %arg13[%c0_30, %c0_31], %36 {strides = array<i32>} : memref<8x8xf32, #tpu.memory_space<vmem>>, vector<8x8xf32>,
    return
  }
}

module attributes {stable_mosaic.version = 11 : i64} {
  func.func @_dpb_post_kernel(%arg0: memref<8x288xbf16, #tpu.memory_space<vmem>>, %arg1: memref<288x32xbf16, #tpu.memory_space<vmem>>, %arg2: memref<1x32xf32, #tpu.memory_space<vmem>>, %arg3: memref<1x32xf32, #tpu.memory_space<vmem>>, %arg4: memref<32x256xbf16, #tpu.memory_space<vmem>>, %arg5: memref<32x4xbf16, #tpu.memory_space<vmem>>, %arg6: memref<8x256xf32, #tpu.memory_space<vmem>>, %arg7: memref<8x256xf32, #tpu.memory_space<vmem>>, %arg8: memref<8x4xf32, #tpu.memory_space<vmem>>) attributes {dimension_semantics = [], scalar_prefetch = 0 : i64, scratch_operands = 0 : i64, tpu.core_type = #tpu.core_type<tc>} {
    %c0 = arith.constant 0 : index
    %c0_0 = arith.constant 0 : index
    %0 = vector.load %arg0[%c0, %c0_0] : memref<8x288xbf16, #tpu.memory_space<vmem>>, vector<8x288xbf16>
    %c0_1 = arith.constant 0 : index
    %c0_2 = arith.constant 0 : index
    %1 = vector.load %arg1[%c0_1, %c0_2] : memref<288x32xbf16, #tpu.memory_space<vmem>>, vector<288x32xbf16>
    %cst = arith.constant dense<0.000000e+00> : vector<8x32xf32>
    %2 = tpu.matmul %0, %1, %cst {dimension_numbers = #tpu.dot_dimension_numbers<[1], [0], [0], [1], [0, 0, 1, 1], [], []>} : vector<8x288xbf16>, vector<288x32xbf16>, vector<8x32xf32> -> vector<8x32xf32>
    %c0_3 = arith.constant 0 : index
    %c0_4 = arith.constant 0 : index
    %3 = vector.load %arg2[%c0_3, %c0_4] : memref<1x32xf32, #tpu.memory_space<vmem>>, vector<1x32xf32>
    %4 = vector.broadcast %3 : vector<1x32xf32> to vector<8x32xf32>
    %5 = arith.mulf %2, %4 : vector<8x32xf32>
    %c0_5 = arith.constant 0 : index
    %c0_6 = arith.constant 0 : index
    %6 = vector.load %arg3[%c0_5, %c0_6] : memref<1x32xf32, #tpu.memory_space<vmem>>, vector<1x32xf32>
    %7 = vector.broadcast %6 : vector<1x32xf32> to vector<8x32xf32>
    %8 = arith.addf %5, %7 : vector<8x32xf32>
    %cst_7 = arith.constant 0.000000e+00 : f32
    %9 = vector.broadcast %cst_7 : f32 to vector<8x32xf32>
    %10 = arith.maximumf %8, %9 : vector<8x32xf32>
    %11 = arith.truncf %10 : vector<8x32xf32> to vector<8x32xbf16>
    %c0_8 = arith.constant 0 : index
    %c0_9 = arith.constant 0 : index
    %12 = vector.load %arg6[%c0_8, %c0_9] : memref<8x256xf32, #tpu.memory_space<vmem>>, vector<8x256xf32>
    %c0_10 = arith.constant 0 : index
    %c0_11 = arith.constant 0 : index
    %13 = vector.load %arg4[%c0_10, %c0_11] : memref<32x256xbf16, #tpu.memory_space<vmem>>, vector<32x256xbf16>
    %cst_12 = arith.constant dense<0.000000e+00> : vector<8x256xf32>
    %14 = tpu.matmul %11, %13, %cst_12 {dimension_numbers = #tpu.dot_dimension_numbers<[1], [0], [0], [1], [0, 0, 1, 1], [], []>} : vector<8x32xbf16>, vector<32x256xbf16>, vector<8x256xf32> -> vector<8x256xf32>
    %15 = arith.addf %12, %14 : vector<8x256xf32>
    %c0_13 = arith.constant 0 : index
    %c0_14 = arith.constant 0 : index
    %16 = vector.load %arg7[%c0_13, %c0_14] : memref<8x256xf32, #tpu.memory_space<vmem>>, vector<8x256xf32>
    tpu.vector_store %arg7[%c0_13, %c0_14], %15 {strides = array<i32>} : memref<8x256xf32, #tpu.memory_space<vmem>>, vector<8x256xf32>,
    %c0_15 = arith.constant 0 : index
    %c0_16 = arith.constant 0 : index
    %17 = vector.load %arg5[%c0_15, %c0_16] : memref<32x4xbf16, #tpu.memory_space<vmem>>, vector<32x4xbf16>
    %cst_17 = arith.constant dense<0.000000e+00> : vector<8x4xf32>
    %18 = tpu.matmul %11, %17, %cst_17 {dimension_numbers = #tpu.dot_dimension_numbers<[1], [0], [0], [1], [0, 0, 1, 1], [], []>} : vector<8x32xbf16>, vector<32x4xbf16>, vector<8x4xf32> -> vector<8x4xf32>
    %c0_18 = arith.constant 0 : index
    %c0_19 = arith.constant 0 : index
    %19 = vector.load %arg8[%c0_18, %c0_19] : memref<8x4xf32, #tpu.memory_space<vmem>>, vector<8x4xf32>
    tpu.vector_store %arg8[%c0_18, %c0_19], %18 {strides = array<i32>} : memref<8x4xf32, #tpu.memory_space<vmem>>, vector<8x4xf32>,
    return
  }
}

module attributes {stable_mosaic.version = 11 : i64} {
  func.func @_dpb_pre_proj_kernel(%arg0: memref<8x268xf32, #tpu.memory_space<vmem>>, %arg1: memref<2x268xf32, #tpu.memory_space<vmem>>, %arg2: memref<1x268xf32, #tpu.memory_space<vmem>>, %arg3: memref<1x268xf32, #tpu.memory_space<vmem>>, %arg4: memref<268x64xbf16, #tpu.memory_space<vmem>>, %arg5: memref<1x64xf32, #tpu.memory_space<vmem>>, %arg6: memref<1x64xf32, #tpu.memory_space<vmem>>, %arg7: memref<1x268xf32, #tpu.memory_space<vmem>>, %arg8: memref<1x268xf32, #tpu.memory_space<vmem>>, %arg9: memref<268x512xbf16, #tpu.memory_space<vmem>>, %arg10: memref<268x8xbf16, #tpu.memory_space<vmem>>, %arg11: memref<8x64xbf16, #tpu.memory_space<vmem>>, %arg12: memref<2x512xf32, #tpu.memory_space<vmem>>, %arg13: memref<2x8xf32, #tpu.memory_space<vmem>>) attributes {dimension_semantics = [], scalar_prefetch = 0 : i64, scratch_operands = 0 : i64, tpu.core_type = #tpu.core_type<tc>} {
    %c0 = arith.constant 0 : index
    %c0_0 = arith.constant 0 : index
    %0 = vector.load %arg0[%c0, %c0_0] : memref<8x268xf32, #tpu.memory_space<vmem>>, vector<8x268xf32>
    %c0_1 = arith.constant 0 : index
    %c0_2 = arith.constant 0 : index
    %1 = vector.load %arg2[%c0_1, %c0_2] : memref<1x268xf32, #tpu.memory_space<vmem>>, vector<1x268xf32>
    %2 = vector.broadcast %1 : vector<1x268xf32> to vector<8x268xf32>
    %3 = arith.mulf %0, %2 : vector<8x268xf32>
    %c0_3 = arith.constant 0 : index
    %c0_4 = arith.constant 0 : index
    %4 = vector.load %arg3[%c0_3, %c0_4] : memref<1x268xf32, #tpu.memory_space<vmem>>, vector<1x268xf32>
    %5 = vector.broadcast %4 : vector<1x268xf32> to vector<8x268xf32>
    %6 = arith.addf %3, %5 : vector<8x268xf32>
    %cst = arith.constant 0.000000e+00 : f32
    %7 = vector.broadcast %cst : f32 to vector<8x268xf32>
    %8 = arith.maximumf %6, %7 : vector<8x268xf32>
    %9 = arith.truncf %8 : vector<8x268xf32> to vector<8x268xbf16>
    %c0_5 = arith.constant 0 : index
    %c0_6 = arith.constant 0 : index
    %10 = vector.load %arg4[%c0_5, %c0_6] : memref<268x64xbf16, #tpu.memory_space<vmem>>, vector<268x64xbf16>
    %cst_7 = arith.constant dense<0.000000e+00> : vector<8x64xf32>
    %11 = tpu.matmul %9, %10, %cst_7 {dimension_numbers = #tpu.dot_dimension_numbers<[1], [0], [0], [1], [0, 0, 1, 1], [], []>} : vector<8x268xbf16>, vector<268x64xbf16>, vector<8x64xf32> -> vector<8x64xf32>
    %c0_8 = arith.constant 0 : index
    %c0_9 = arith.constant 0 : index
    %12 = vector.load %arg5[%c0_8, %c0_9] : memref<1x64xf32, #tpu.memory_space<vmem>>, vector<1x64xf32>
    %13 = vector.broadcast %12 : vector<1x64xf32> to vector<8x64xf32>
    %14 = arith.mulf %11, %13 : vector<8x64xf32>
    %c0_10 = arith.constant 0 : index
    %c0_11 = arith.constant 0 : index
    %15 = vector.load %arg6[%c0_10, %c0_11] : memref<1x64xf32, #tpu.memory_space<vmem>>, vector<1x64xf32>
    %16 = vector.broadcast %15 : vector<1x64xf32> to vector<8x64xf32>
    %17 = arith.addf %14, %16 : vector<8x64xf32>
    %cst_12 = arith.constant 0.000000e+00 : f32
    %18 = vector.broadcast %cst_12 : f32 to vector<8x64xf32>
    %19 = arith.maximumf %17, %18 : vector<8x64xf32>
    %20 = arith.truncf %19 : vector<8x64xf32> to vector<8x64xbf16>
    %c0_13 = arith.constant 0 : index
    %c0_14 = arith.constant 0 : index
    %21 = vector.load %arg11[%c0_13, %c0_14] : memref<8x64xbf16, #tpu.memory_space<vmem>>, vector<8x64xbf16>
    tpu.vector_store %arg11[%c0_13, %c0_14], %20 {strides = array<i32>} : memref<8x64xbf16, #tpu.memory_space<vmem>>, vector<8x64xbf16>,
    %c0_15 = arith.constant 0 : index
    %c0_16 = arith.constant 0 : index
    %22 = vector.load %arg1[%c0_15, %c0_16] : memref<2x268xf32, #tpu.memory_space<vmem>>, vector<2x268xf32>
    %c0_17 = arith.constant 0 : index
    %c0_18 = arith.constant 0 : index
    %23 = vector.load %arg7[%c0_17, %c0_18] : memref<1x268xf32, #tpu.memory_space<vmem>>, vector<1x268xf32>
    %24 = vector.broadcast %23 : vector<1x268xf32> to vector<2x268xf32>
    %25 = arith.mulf %22, %24 : vector<2x268xf32>
    %c0_19 = arith.constant 0 : index
    %c0_20 = arith.constant 0 : index
    %26 = vector.load %arg8[%c0_19, %c0_20] : memref<1x268xf32, #tpu.memory_space<vmem>>, vector<1x268xf32>
    %27 = vector.broadcast %26 : vector<1x268xf32> to vector<2x268xf32>
    %28 = arith.addf %25, %27 : vector<2x268xf32>
    %cst_21 = arith.constant 0.000000e+00 : f32
    %29 = vector.broadcast %cst_21 : f32 to vector<2x268xf32>
    %30 = arith.maximumf %28, %29 : vector<2x268xf32>
    %31 = arith.truncf %30 : vector<2x268xf32> to vector<2x268xbf16>
    %c0_22 = arith.constant 0 : index
    %c0_23 = arith.constant 0 : index
    %32 = vector.load %arg9[%c0_22, %c0_23] : memref<268x512xbf16, #tpu.memory_space<vmem>>, vector<268x512xbf16>
    %cst_24 = arith.constant dense<0.000000e+00> : vector<2x512xf32>
    %33 = tpu.matmul %31, %32, %cst_24 {dimension_numbers = #tpu.dot_dimension_numbers<[1], [0], [0], [1], [0, 0, 1, 1], [], []>} : vector<2x268xbf16>, vector<268x512xbf16>, vector<2x512xf32> -> vector<2x512xf32>
    %c0_25 = arith.constant 0 : index
    %c0_26 = arith.constant 0 : index
    %34 = vector.load %arg12[%c0_25, %c0_26] : memref<2x512xf32, #tpu.memory_space<vmem>>, vector<2x512xf32>
    tpu.vector_store %arg12[%c0_25, %c0_26], %33 {strides = array<i32>} : memref<2x512xf32, #tpu.memory_space<vmem>>, vector<2x512xf32>,
    %c0_27 = arith.constant 0 : index
    %c0_28 = arith.constant 0 : index
    %35 = vector.load %arg10[%c0_27, %c0_28] : memref<268x8xbf16, #tpu.memory_space<vmem>>, vector<268x8xbf16>
    %cst_29 = arith.constant dense<0.000000e+00> : vector<2x8xf32>
    %36 = tpu.matmul %31, %35, %cst_29 {dimension_numbers = #tpu.dot_dimension_numbers<[1], [0], [0], [1], [0, 0, 1, 1], [], []>} : vector<2x268xbf16>, vector<268x8xbf16>, vector<2x8xf32> -> vector<2x8xf32>
    %c0_30 = arith.constant 0 : index
    %c0_31 = arith.constant 0 : index
    %37 = vector.load %arg13[%c0_30, %c0_31] : memref<2x8xf32, #tpu.memory_space<vmem>>, vector<2x8xf32>
    tpu.vector_store %arg13[%c0_30, %c0_31], %36 {strides = array<i32>} : memref<2x8xf32, #tpu.memory_space<vmem>>, vector<2x8xf32>,
    return
  }
}

module attributes {stable_mosaic.version = 11 : i64} {
  func.func @_dpb_post_kernel(%arg0: memref<2x576xbf16, #tpu.memory_space<vmem>>, %arg1: memref<576x64xbf16, #tpu.memory_space<vmem>>, %arg2: memref<1x64xf32, #tpu.memory_space<vmem>>, %arg3: memref<1x64xf32, #tpu.memory_space<vmem>>, %arg4: memref<64x512xbf16, #tpu.memory_space<vmem>>, %arg5: memref<64x4xbf16, #tpu.memory_space<vmem>>, %arg6: memref<2x512xf32, #tpu.memory_space<vmem>>, %arg7: memref<2x512xf32, #tpu.memory_space<vmem>>, %arg8: memref<2x4xf32, #tpu.memory_space<vmem>>) attributes {dimension_semantics = [], scalar_prefetch = 0 : i64, scratch_operands = 0 : i64, tpu.core_type = #tpu.core_type<tc>} {
    %c0 = arith.constant 0 : index
    %c0_0 = arith.constant 0 : index
    %0 = vector.load %arg0[%c0, %c0_0] : memref<2x576xbf16, #tpu.memory_space<vmem>>, vector<2x576xbf16>
    %c0_1 = arith.constant 0 : index
    %c0_2 = arith.constant 0 : index
    %1 = vector.load %arg1[%c0_1, %c0_2] : memref<576x64xbf16, #tpu.memory_space<vmem>>, vector<576x64xbf16>
    %cst = arith.constant dense<0.000000e+00> : vector<2x64xf32>
    %2 = tpu.matmul %0, %1, %cst {dimension_numbers = #tpu.dot_dimension_numbers<[1], [0], [0], [1], [0, 0, 1, 1], [], []>} : vector<2x576xbf16>, vector<576x64xbf16>, vector<2x64xf32> -> vector<2x64xf32>
    %c0_3 = arith.constant 0 : index
    %c0_4 = arith.constant 0 : index
    %3 = vector.load %arg2[%c0_3, %c0_4] : memref<1x64xf32, #tpu.memory_space<vmem>>, vector<1x64xf32>
    %4 = vector.broadcast %3 : vector<1x64xf32> to vector<2x64xf32>
    %5 = arith.mulf %2, %4 : vector<2x64xf32>
    %c0_5 = arith.constant 0 : index
    %c0_6 = arith.constant 0 : index
    %6 = vector.load %arg3[%c0_5, %c0_6] : memref<1x64xf32, #tpu.memory_space<vmem>>, vector<1x64xf32>
    %7 = vector.broadcast %6 : vector<1x64xf32> to vector<2x64xf32>
    %8 = arith.addf %5, %7 : vector<2x64xf32>
    %cst_7 = arith.constant 0.000000e+00 : f32
    %9 = vector.broadcast %cst_7 : f32 to vector<2x64xf32>
    %10 = arith.maximumf %8, %9 : vector<2x64xf32>
    %11 = arith.truncf %10 : vector<2x64xf32> to vector<2x64xbf16>
    %c0_8 = arith.constant 0 : index
    %c0_9 = arith.constant 0 : index
    %12 = vector.load %arg6[%c0_8, %c0_9] : memref<2x512xf32, #tpu.memory_space<vmem>>, vector<2x512xf32>
    %c0_10 = arith.constant 0 : index
    %c0_11 = arith.constant 0 : index
    %13 = vector.load %arg4[%c0_10, %c0_11] : memref<64x512xbf16, #tpu.memory_space<vmem>>, vector<64x512xbf16>
    %cst_12 = arith.constant dense<0.000000e+00> : vector<2x512xf32>
    %14 = tpu.matmul %11, %13, %cst_12 {dimension_numbers = #tpu.dot_dimension_numbers<[1], [0], [0], [1], [0, 0, 1, 1], [], []>} : vector<2x64xbf16>, vector<64x512xbf16>, vector<2x512xf32> -> vector<2x512xf32>
    %15 = arith.addf %12, %14 : vector<2x512xf32>
    %c0_13 = arith.constant 0 : index
    %c0_14 = arith.constant 0 : index
    %16 = vector.load %arg7[%c0_13, %c0_14] : memref<2x512xf32, #tpu.memory_space<vmem>>, vector<2x512xf32>
    tpu.vector_store %arg7[%c0_13, %c0_14], %15 {strides = array<i32>} : memref<2x512xf32, #tpu.memory_space<vmem>>, vector<2x512xf32>,
    %c0_15 = arith.constant 0 : index
    %c0_16 = arith.constant 0 : index
    %17 = vector.load %arg5[%c0_15, %c0_16] : memref<64x4xbf16, #tpu.memory_space<vmem>>, vector<64x4xbf16>
    %cst_17 = arith.constant dense<0.000000e+00> : vector<2x4xf32>
    %18 = tpu.matmul %11, %17, %cst_17 {dimension_numbers = #tpu.dot_dimension_numbers<[1], [0], [0], [1], [0, 0, 1, 1], [], []>} : vector<2x64xbf16>, vector<64x4xbf16>, vector<2x4xf32> -> vector<2x4xf32>
    %c0_18 = arith.constant 0 : index
    %c0_19 = arith.constant 0 : index
    %19 = vector.load %arg8[%c0_18, %c0_19] : memref<2x4xf32, #tpu.memory_space<vmem>>, vector<2x4xf32>
    tpu.vector_store %arg8[%c0_18, %c0_19], %18 {strides = array<i32>} : memref<2x4xf32, #tpu.memory_space<vmem>>, vector<2x4xf32>,
    return
  }
}

module attributes {stable_mosaic.version = 11 : i64} {
  func.func @_head_kernel(%arg0: memref<2x1x524xf32, #tpu.memory_space<vmem>>, %arg1: memref<1x1x524xf32, #tpu.memory_space<vmem>>, %arg2: memref<1x1x524xf32, #tpu.memory_space<vmem>>, %arg3: memref<524x10xbf16, #tpu.memory_space<vmem>>, %arg4: memref<1x10xf32, #tpu.memory_space<vmem>>, %arg5: memref<2x10xf32, #tpu.memory_space<vmem>>) attributes {dimension_semantics = [], scalar_prefetch = 0 : i64, scratch_operands = 0 : i64, tpu.core_type = #tpu.core_type<tc>} {
    %c0 = arith.constant 0 : index
    %c0_0 = arith.constant 0 : index
    %c0_1 = arith.constant 0 : index
    %0 = vector.load %arg0[%c0, %c0_0, %c0_1] : memref<2x1x524xf32, #tpu.memory_space<vmem>>, vector<2x1x524xf32>
    %c0_2 = arith.constant 0 : index
    %c0_3 = arith.constant 0 : index
    %c0_4 = arith.constant 0 : index
    %1 = vector.load %arg1[%c0_2, %c0_3, %c0_4] : memref<1x1x524xf32, #tpu.memory_space<vmem>>, vector<1x1x524xf32>
    %2 = vector.broadcast %1 : vector<1x1x524xf32> to vector<2x1x524xf32>
    %3 = arith.mulf %0, %2 : vector<2x1x524xf32>
    %c0_5 = arith.constant 0 : index
    %c0_6 = arith.constant 0 : index
    %c0_7 = arith.constant 0 : index
    %4 = vector.load %arg2[%c0_5, %c0_6, %c0_7] : memref<1x1x524xf32, #tpu.memory_space<vmem>>, vector<1x1x524xf32>
    %5 = vector.broadcast %4 : vector<1x1x524xf32> to vector<2x1x524xf32>
    %6 = arith.addf %3, %5 : vector<2x1x524xf32>
    %cst = arith.constant 0.000000e+00 : f32
    %7 = vector.broadcast %cst : f32 to vector<2x1x524xf32>
    %8 = arith.maximumf %6, %7 : vector<2x1x524xf32>
    %cst_8 = arith.constant dense<0.000000e+00> : vector<2x524xf32>
    %9 = vector.multi_reduction <add>, %8, %cst_8 [1] : vector<2x1x524xf32> to vector<2x524xf32>
    %cst_9 = arith.constant 1.000000e+00 : f32
    %10 = vector.broadcast %cst_9 : f32 to vector<2x524xf32>
    %11 = arith.divf %9, %10 : vector<2x524xf32>
    %12 = arith.truncf %11 : vector<2x524xf32> to vector<2x524xbf16>
    %c0_10 = arith.constant 0 : index
    %c0_11 = arith.constant 0 : index
    %13 = vector.load %arg3[%c0_10, %c0_11] : memref<524x10xbf16, #tpu.memory_space<vmem>>, vector<524x10xbf16>
    %cst_12 = arith.constant dense<0.000000e+00> : vector<2x10xf32>
    %14 = tpu.matmul %12, %13, %cst_12 {dimension_numbers = #tpu.dot_dimension_numbers<[1], [0], [0], [1], [0, 0, 1, 1], [], []>} : vector<2x524xbf16>, vector<524x10xbf16>, vector<2x10xf32> -> vector<2x10xf32>
    %c0_13 = arith.constant 0 : index
    %c0_14 = arith.constant 0 : index
    %15 = vector.load %arg4[%c0_13, %c0_14] : memref<1x10xf32, #tpu.memory_space<vmem>>, vector<1x10xf32>
    %16 = vector.broadcast %15 : vector<1x10xf32> to vector<2x10xf32>
    %17 = arith.addf %14, %16 : vector<2x10xf32>
    %c0_15 = arith.constant 0 : index
    %c0_16 = arith.constant 0 : index
    %18 = vector.load %arg5[%c0_15, %c0_16] : memref<2x10xf32, #tpu.memory_space<vmem>>, vector<2x10xf32>
    tpu.vector_store %arg5[%c0_15, %c0_16], %17 {strides = array<i32>} : memref<2x10xf32, #tpu.memory_space<vmem>>, vector<2x10xf32>,
    return
  }
}

</mosaic_0001>

<bundles_post_ra>
// kernel: _lambda_.11
= control target key start
LH: loop header
LB: loop body
LE: loop exit
PB: predicated region body
PF: predicated region fallthrough
CT: control target
= control target key end

     0   :  { %vm354_vm0 = vcmask 1044480   ;;  %vm355_vm1 = vcmask 1045504   ;;  %vm257_vm2 = vcmask 220160   ;;  %v1134_v1 = vmov 65535   ;;  %s1688_s1 = inlined_call_operand.vmem [shape: bf16[27,16], index: 1, kind: input, shape index: {}]   ;;  %s1689_s0 = inlined_call_operand.vmem [shape: bf16[512,27], index: 0, kind: input, shape index: {}]   ;;  %s1690_s2 = inlined_call_operand.vmem [shape: f32[1,16], index: 2, kind: input, shape index: {}]   ;;  %s1691_s3 = inlined_call_operand.vmem [shape: f32[1,16], index: 3, kind: input, shape index: {}]   ;;  %s1692_s4 = inlined_call_operand.vmem [shape: f32[512,16], index: 4, kind: output, shape index: {}]  }
   0x1   :  { %v1100_v0 = vld [vmem:[%s1688_s1] sm:$0xff]   ;;  %v356_v2 = vsel %vm354_vm0, 4294967295, %v1134_v1  ;;  %v1101_v3 = vld [vmem:[%s1688_s1 + $0x8] sm:$0x3f]   ;;  %v1106_v10 = vld [vmem:[%s1689_s0 + $0x10] sm:$0xff]   ;;  %vm856_vm3 = vcmask 130048  }
   0x2   :  { %1027 = vmatprep.subr.bf16.mxu0 %v1100_v0  ;;  %1095 = vmatprep.subr.bf16.mxu1 %v1100_v0  ;;  %v357_v4 = vsel %vm355_vm1, %v356_v2, 0  ;;  %v1102_v5 = vld [vmem:[%s1689_s0] sm:$0xff]   ;;  %v1104_v8 = vld [vmem:[%s1689_s0 + $0x8] sm:$0xff]   ;;  %v1107_v11 = vld [vmem:[%s1689_s0 + $0x90] sm:$0xff]  }
   0x3   :  { %1028 = vmatpush3.bf16.msra.mxu0 %v1100_v0  ;;  %1097 = vmatpush3.bf16.msra.mxu1 %v1100_v0  ;;  %v359_v6 = vand.u32 %v1101_v3, %v357_v4  ;;  %v1103_v7 = vld [vmem:[%s1689_s0 + $0x80] sm:$0xff]   ;;  %v1105_v9 = vld [vmem:[%s1689_s0 + $0x88] sm:$0xff]   ;;  %v1108_v12 = vld [vmem:[%s1689_s0 + $0x18] sm:$0xff]  }
   0x4   :  { %1031 = vmatprep.mubr.msk.bf16.mxu0 %vm257_vm2, %v1102_v5  ;;  %1063 = vmatprep.mubr.msk.bf16.mxu1 %vm257_vm2, %v1103_v7  ;;  %v1109_v13 = vld [vmem:[%s1689_s0 + $0x98] sm:$0xff]   ;;  %v1110_v14 = vld [vmem:[%s1689_s0 + $0x20] sm:$0xff]   ;;  %v1112_v16 = vld [vmem:[%s1689_s0 + $0x28] sm:$0xff]  }
   0x5   :  { %1029 = vmatprep.subr.bf16.mxu0 %v359_v6  ;;  %1096 = vmatprep.subr.bf16.mxu1 %v359_v6  ;;  %v1111_v15 = vld [vmem:[%s1689_s0 + $0xa0] sm:$0xff]   ;;  %v1113_v17 = vld [vmem:[%s1689_s0 + $0xa8] sm:$0xff]   ;;  %v1114_v18 = vld [vmem:[%s1689_s0 + $0x30] sm:$0xff]  }
   0x6   :  { %v1115_v19 = vld [vmem:[%s1689_s0 + $0xb0] sm:$0xff]   ;;  %v1116_v20 = vld [vmem:[%s1689_s0 + $0x38] sm:$0xff]   ;;  %v1118_v22 = vld [vmem:[%s1689_s0 + $0x40] sm:$0xff]  }
   0x7   :  { %1030 = vmatpush3.bf16.msra.mxu0 %v359_v6  ;;  %1098 = vmatpush3.bf16.msra.mxu1 %v359_v6  ;;  %v1117_v21 = vld [vmem:[%s1689_s0 + $0xb8] sm:$0xff]   ;;  %v1119_v23 = vld [vmem:[%s1689_s0 + $0xc0] sm:$0xff]   ;;  %v1120_v24 = vld [vmem:[%s1689_s0 + $0x48] sm:$0xff]  }
   0x8   :  { %v1121_v25 = vld [vmem:[%s1689_s0 + $0xc8] sm:$0xff]   ;;  %v1122_v26 = vld [vmem:[%s1689_s0 + $0x50] sm:$0xff]   ;;  %v1124_v28 = vld [vmem:[%s1689_s0 + $0x58] sm:$0xff]  }
   0x9   :  { %v1123_v27 = vld [vmem:[%s1689_s0 + $0xd0] sm:$0xff]   ;;  %v1125_v29 = vld [vmem:[%s1689_s0 + $0xd8] sm:$0xff]   ;;  %v1126_v30 = vld [vmem:[%s1689_s0 + $0x60] sm:$0xff]  }
   0xa   :  { %1032 = vmatmul.mubr.msk.bf16.vlgmr.msra.gmra.mrb[0].mxu0 %vm257_vm2, %v1104_v8  ;;  %1064 = vmatmul.mubr.msk.bf16.vlgmr.msra.gmra.mrb[0].mxu1 %vm257_vm2, %v1105_v9  ;;  %v1127_v31 = vld [vmem:[%s1689_s0 + $0xe0] sm:$0xff]   ;;  %v1128_v32 = vld [vmem:[%s1689_s0 + $0x68] sm:$0xff]   ;;  %v1130_v34 = vld [vmem:[%s1689_s0 + $0x70] sm:$0xff]  }
   0xb   :  { %1035 = vmatprep.mubr.msk.bf16.mxu0 %vm257_vm2, %v1106_v10  ;;  %1067 = vmatprep.mubr.msk.bf16.mxu1 %vm257_vm2, %v1107_v11  ;;  %v1129_v33 = vld [vmem:[%s1689_s0 + $0xe8] sm:$0xff]   ;;  %v1131_v35 = vld [vmem:[%s1689_s0 + $0xf0] sm:$0xff]   ;;  %v1132_v36 = vld [vmem:[%s1689_s0 + $0x78] sm:$0xff]  }
   0xc   :  { %v1133_v37 = vld [vmem:[%s1689_s0 + $0xf8] sm:$0xff]   ;;  %v1297_v38 = vld [vmem:[%s1690_s2] ss:$0 sm:$0xff] }
   0xd   :  { %v1302_v40 = vld [vmem:[%s1691_s3] ss:$0 sm:$0xff] }
  0x12   :  { %1036 = vmatmul.mubr.msk.bf16.gmra.mrb[4].mxu0 %vm257_vm2, %v1108_v12  ;;  %1068 = vmatmul.mubr.msk.bf16.gmra.mrb[4].mxu1 %vm257_vm2, %v1109_v13 }
  0x13   :  { %1039 = vmatprep.mubr.msk.bf16.mxu0 %vm257_vm2, %v1110_v14  ;;  %1071 = vmatprep.mubr.msk.bf16.mxu1 %vm257_vm2, %v1111_v15 }
  0x1a   :  { %1040 = vmatmul.mubr.msk.bf16.gmra.mrb[8].mxu0 %vm257_vm2, %v1112_v16  ;;  %1072 = vmatmul.mubr.msk.bf16.gmra.mrb[8].mxu1 %vm257_vm2, %v1113_v17 }
  0x1b   :  { %1043 = vmatprep.mubr.msk.bf16.mxu0 %vm257_vm2, %v1114_v18  ;;  %1075 = vmatprep.mubr.msk.bf16.mxu1 %vm257_vm2, %v1115_v19 }
  0x22   :  { %1044 = vmatmul.mubr.msk.bf16.gmra.mrb[12].mxu0 %vm257_vm2, %v1116_v20  ;;  %1076 = vmatmul.mubr.msk.bf16.gmra.mrb[12].mxu1 %vm257_vm2, %v1117_v21 }
  0x23   :  { %1047 = vmatprep.mubr.msk.bf16.mxu0 %vm257_vm2, %v1118_v22  ;;  %1079 = vmatprep.mubr.msk.bf16.mxu1 %vm257_vm2, %v1119_v23 }
  0x2a   :  { %1048 = vmatmul.mubr.msk.bf16.gmra.mrb[16].mxu0 %vm257_vm2, %v1120_v24  ;;  %1080 = vmatmul.mubr.msk.bf16.gmra.mrb[16].mxu1 %vm257_vm2, %v1121_v25 }
  0x2b   :  { %1051 = vmatprep.mubr.msk.bf16.mxu0 %vm257_vm2, %v1122_v26  ;;  %1083 = vmatprep.mubr.msk.bf16.mxu1 %vm257_vm2, %v1123_v27 }
  0x32   :  { %1052 = vmatmul.mubr.msk.bf16.gmra.mrb[20].mxu0 %vm257_vm2, %v1124_v28  ;;  %1084 = vmatmul.mubr.msk.bf16.gmra.mrb[20].mxu1 %vm257_vm2, %v1125_v29 }
  0x33   :  { %1055 = vmatprep.mubr.msk.bf16.mxu0 %vm257_vm2, %v1126_v30  ;;  %1087 = vmatprep.mubr.msk.bf16.mxu1 %vm257_vm2, %v1127_v31 }
  0x3a   :  { %1056 = vmatmul.mubr.msk.bf16.gmra.mrb[24].mxu0 %vm257_vm2, %v1128_v32  ;;  %1088 = vmatmul.mubr.msk.bf16.gmra.mrb[24].mxu1 %vm257_vm2, %v1129_v33 }
  0x3b   :  { %1059 = vmatprep.mubr.msk.bf16.mxu0 %vm257_vm2, %v1130_v34  ;;  %1091 = vmatprep.mubr.msk.bf16.mxu1 %vm257_vm2, %v1131_v35 }
  0x42   :  { %1060 = vmatmul.mubr.msk.bf16.gmra.mrb[28].mxu0 %vm257_vm2, %v1132_v36  ;;  %1092 = vmatmul.mubr.msk.bf16.gmra.mrb[28].mxu1 %vm257_vm2, %v1133_v37 }
  0xdd   :  { %v1033_v39 = vpop.f32.mrb[0].mxu0  ;;  %v1065_v41 = vpop.f32.mrb[0].mxu1 }
  0xde   :  { %v659_v42 = vmul.f32 %v1033_v39, %v1297_v38  ;;  %v691_v43 = vmul.f32 %v1065_v41, %v1297_v38  ;;  %v395_v44 = vpop.f32.mrb[1].mxu0  ;;  %v523_v45 = vpop.f32.mrb[1].mxu1 }
  0xdf   :  { %v657_v46 = vmul.f32 %v1297_v38, %v395_v44  ;;  %v689_v47 = vmul.f32 %v1297_v38, %v523_v45  ;;  %v1034_v48 = vpop.f32.mrb[2].mxu0  ;;  %v1066_v49 = vpop.f32.mrb[2].mxu1 }
  0xe0   :  { %v730_v50 = vadd.f32 %v1302_v40, %v659_v42  ;;  %v762_v51 = vadd.f32 %v1302_v40, %v691_v43  ;;  %v660_v52 = vmul.f32 %v1034_v48, %v1297_v38  ;;  %v692_v53 = vmul.f32 %v1066_v49, %v1297_v38  ;;  %v398_v54 = vpop.f32.mrb[3].mxu0  ;;  %v526_v55 = vpop.f32.mrb[3].mxu1 }
  0xe1   :  { %v728_v56 = vadd.f32 %v1302_v40, %v657_v46  ;;  %v760_v57 = vadd.f32 %v1302_v40, %v689_v47  ;;  %v658_v58 = vmul.f32 %v1297_v38, %v398_v54  ;;  %v690_v59 = vmul.f32 %v1297_v38, %v526_v55 }
  0xe2   :  { %v794_v60 = vmax.f32 %v730_v50, 0.0  ;;  %v826_v61 = vmax.f32 %v762_v51, 0.0  ;;  %v731_v62 = vadd.f32 %v1302_v40, %v660_v52  ;;  %v763_v63 = vadd.f32 %v1302_v40, %v692_v53 }
  0xe3   :  { %v792_v0 = vmax.f32 %v728_v56, 0.0  ;;  %v824_v1 = vmax.f32 %v760_v57, 0.0  ;;  %v729_v2 = vadd.f32 %v1302_v40, %v658_v58  ;;  %v761_v3 = vadd.f32 %v1302_v40, %v690_v59 }
  0xe4   :  { %859 = vst.msk [vmem:[%s1692_s4 + $0x10] sm:$0xff] %vm856_vm3, %v794_v60  ;;  %891 = vst.msk [vmem:[%s1692_s4 + $0x110] sm:$0xff] %vm856_vm3, %v826_v61  ;;  %v795_v4 = vmax.f32 %v731_v62, 0.0  ;;  %v827_v5 = vmax.f32 %v763_v63, 0.0 }
  0xe5   :  { %857 = vst.msk [vmem:[%s1692_s4] sm:$0xff] %vm856_vm3, %v792_v0  ;;  %889 = vst.msk [vmem:[%s1692_s4 + $0x100] sm:$0xff] %vm856_vm3, %v824_v1  ;;  %v793_v6 = vmax.f32 %v729_v2, 0.0  ;;  %v825_v7 = vmax.f32 %v761_v3, 0.0  ;;  %v1037_v8 = vpop.f32.mrb[4].mxu0  ;;  %v1069_v9 = vpop.f32.mrb[4].mxu1 }
  0xe6   :  { %860 = vst.msk [vmem:[%s1692_s4 + $0x18] sm:$0xff] %vm856_vm3, %v795_v4  ;;  %892 = vst.msk [vmem:[%s1692_s4 + $0x118] sm:$0xff] %vm856_vm3, %v827_v5  ;;  %v663_v10 = vmul.f32 %v1037_v8, %v1297_v38  ;;  %v695_v11 = vmul.f32 %v1069_v9, %v1297_v38  ;;  %v411_v12 = vpop.f32.mrb[5].mxu0  ;;  %v539_v13 = vpop.f32.mrb[5].mxu1 }
  0xe7   :  { %858 = vst.msk [vmem:[%s1692_s4 + $0x8] sm:$0xff] %vm856_vm3, %v793_v6  ;;  %890 = vst.msk [vmem:[%s1692_s4 + $0x108] sm:$0xff] %vm856_vm3, %v825_v7  ;;  %v661_v14 = vmul.f32 %v1297_v38, %v411_v12  ;;  %v693_v15 = vmul.f32 %v1297_v38, %v539_v13  ;;  %v1038_v16 = vpop.f32.mrb[6].mxu0  ;;  %v1070_v17 = vpop.f32.mrb[6].mxu1 }
  0xe8   :  { %v734_v18 = vadd.f32 %v1302_v40, %v663_v10  ;;  %v766_v19 = vadd.f32 %v1302_v40, %v695_v11  ;;  %v664_v20 = vmul.f32 %v1038_v16, %v1297_v38  ;;  %v696_v21 = vmul.f32 %v1070_v17, %v1297_v38  ;;  %v414_v22 = vpop.f32.mrb[7].mxu0  ;;  %v542_v23 = vpop.f32.mrb[7].mxu1 }
  0xe9   :  { %v732_v24 = vadd.f32 %v1302_v40, %v661_v14  ;;  %v764_v25 = vadd.f32 %v1302_v40, %v693_v15  ;;  %v662_v26 = vmul.f32 %v1297_v38, %v414_v22  ;;  %v694_v27 = vmul.f32 %v1297_v38, %v542_v23 }
  0xea   :  { %v798_v28 = vmax.f32 %v734_v18, 0.0  ;;  %v830_v29 = vmax.f32 %v766_v19, 0.0  ;;  %v735_v30 = vadd.f32 %v1302_v40, %v664_v20  ;;  %v767_v31 = vadd.f32 %v1302_v40, %v696_v21 }
  0xeb   :  { %v796_v32 = vmax.f32 %v732_v24, 0.0  ;;  %v828_v33 = vmax.f32 %v764_v25, 0.0  ;;  %v733_v34 = vadd.f32 %v1302_v40, %v662_v26  ;;  %v765_v35 = vadd.f32 %v1302_v40, %v694_v27 }
  0xec   :  { %863 = vst.msk [vmem:[%s1692_s4 + $0x30] sm:$0xff] %vm856_vm3, %v798_v28  ;;  %895 = vst.msk [vmem:[%s1692_s4 + $0x130] sm:$0xff] %vm856_vm3, %v830_v29  ;;  %v799_v36 = vmax.f32 %v735_v30, 0.0  ;;  %v831_v37 = vmax.f32 %v767_v31, 0.0 }
  0xed   :  { %861 = vst.msk [vmem:[%s1692_s4 + $0x20] sm:$0xff] %vm856_vm3, %v796_v32  ;;  %893 = vst.msk [vmem:[%s1692_s4 + $0x120] sm:$0xff] %vm856_vm3, %v828_v33  ;;  %v797_v39 = vmax.f32 %v733_v34, 0.0  ;;  %v829_v41 = vmax.f32 %v765_v35, 0.0  ;;  %v1041_v42 = vpop.f32.mrb[8].mxu0  ;;  %v1073_v43 = vpop.f32.mrb[8].mxu1 }
  0xee   :  { %864 = vst.msk [vmem:[%s1692_s4 + $0x38] sm:$0xff] %vm856_vm3, %v799_v36  ;;  %896 = vst.msk [vmem:[%s1692_s4 + $0x138] sm:$0xff] %vm856_vm3, %v831_v37  ;;  %v667_v44 = vmul.f32 %v1041_v42, %v1297_v38  ;;  %v699_v45 = vmul.f32 %v1073_v43, %v1297_v38  ;;  %v427_v46 = vpop.f32.mrb[9].mxu0  ;;  %v555_v47 = vpop.f32.mrb[9].mxu1 }
  0xef   :  { %862 = vst.msk [vmem:[%s1692_s4 + $0x28] sm:$0xff] %vm856_vm3, %v797_v39  ;;  %894 = vst.msk [vmem:[%s1692_s4 + $0x128] sm:$0xff] %vm856_vm3, %v829_v41  ;;  %v665_v48 = vmul.f32 %v1297_v38, %v427_v46  ;;  %v697_v49 = vmul.f32 %v1297_v38, %v555_v47  ;;  %v1042_v50 = vpop.f32.mrb[10].mxu0  ;;  %v1074_v51 = vpop.f32.mrb[10].mxu1 }
  0xf0   :  { %v738_v52 = vadd.f32 %v1302_v40, %v667_v44  ;;  %v770_v53 = vadd.f32 %v1302_v40, %v699_v45  ;;  %v668_v54 = vmul.f32 %v1042_v50, %v1297_v38  ;;  %v700_v55 = vmul.f32 %v1074_v51, %v1297_v38  ;;  %v430_v56 = vpop.f32.mrb[11].mxu0  ;;  %v558_v57 = vpop.f32.mrb[11].mxu1 }
  0xf1   :  { %v736_v58 = vadd.f32 %v1302_v40, %v665_v48  ;;  %v768_v59 = vadd.f32 %v1302_v40, %v697_v49  ;;  %v666_v60 = vmul.f32 %v1297_v38, %v430_v56  ;;  %v698_v61 = vmul.f32 %v1297_v38, %v558_v57 }
  0xf2   :  { %v802_v62 = vmax.f32 %v738_v52, 0.0  ;;  %v834_v63 = vmax.f32 %v770_v53, 0.0  ;;  %v739_v0 = vadd.f32 %v1302_v40, %v668_v54  ;;  %v771_v1 = vadd.f32 %v1302_v40, %v700_v55 }
  0xf3   :  { %v800_v2 = vmax.f32 %v736_v58, 0.0  ;;  %v832_v3 = vmax.f32 %v768_v59, 0.0  ;;  %v737_v4 = vadd.f32 %v1302_v40, %v666_v60  ;;  %v769_v5 = vadd.f32 %v1302_v40, %v698_v61 }
  0xf4   :  { %867 = vst.msk [vmem:[%s1692_s4 + $0x50] sm:$0xff] %vm856_vm3, %v802_v62  ;;  %899 = vst.msk [vmem:[%s1692_s4 + $0x150] sm:$0xff] %vm856_vm3, %v834_v63  ;;  %v803_v6 = vmax.f32 %v739_v0, 0.0  ;;  %v835_v7 = vmax.f32 %v771_v1, 0.0 }
  0xf5   :  { %865 = vst.msk [vmem:[%s1692_s4 + $0x40] sm:$0xff] %vm856_vm3, %v800_v2  ;;  %897 = vst.msk [vmem:[%s1692_s4 + $0x140] sm:$0xff] %vm856_vm3, %v832_v3  ;;  %v801_v8 = vmax.f32 %v737_v4, 0.0  ;;  %v833_v9 = vmax.f32 %v769_v5, 0.0  ;;  %v1045_v10 = vpop.f32.mrb[12].mxu0  ;;  %v1077_v11 = vpop.f32.mrb[12].mxu1 }
  0xf6   :  { %868 = vst.msk [vmem:[%s1692_s4 + $0x58] sm:$0xff] %vm856_vm3, %v803_v6  ;;  %900 = vst.msk [vmem:[%s1692_s4 + $0x158] sm:$0xff] %vm856_vm3, %v835_v7  ;;  %v671_v12 = vmul.f32 %v1045_v10, %v1297_v38  ;;  %v703_v13 = vmul.f32 %v1077_v11, %v1297_v38  ;;  %v443_v14 = vpop.f32.mrb[13].mxu0  ;;  %v571_v15 = vpop.f32.mrb[13].mxu1 }
  0xf7   :  { %866 = vst.msk [vmem:[%s1692_s4 + $0x48] sm:$0xff] %vm856_vm3, %v801_v8  ;;  %898 = vst.msk [vmem:[%s1692_s4 + $0x148] sm:$0xff] %vm856_vm3, %v833_v9  ;;  %v669_v16 = vmul.f32 %v1297_v38, %v443_v14  ;;  %v701_v17 = vmul.f32 %v1297_v38, %v571_v15  ;;  %v1046_v18 = vpop.f32.mrb[14].mxu0  ;;  %v1078_v19 = vpop.f32.mrb[14].mxu1 }
  0xf8   :  { %v742_v20 = vadd.f32 %v1302_v40, %v671_v12  ;;  %v774_v21 = vadd.f32 %v1302_v40, %v703_v13  ;;  %v672_v22 = vmul.f32 %v1046_v18, %v1297_v38  ;;  %v704_v23 = vmul.f32 %v1078_v19, %v1297_v38  ;;  %v446_v24 = vpop.f32.mrb[15].mxu0  ;;  %v574_v25 = vpop.f32.mrb[15].mxu1 }
  0xf9   :  { %v740_v26 = vadd.f32 %v1302_v40, %v669_v16  ;;  %v772_v27 = vadd.f32 %v1302_v40, %v701_v17  ;;  %v670_v28 = vmul.f32 %v1297_v38, %v446_v24  ;;  %v702_v29 = vmul.f32 %v1297_v38, %v574_v25 }
  0xfa   :  { %v806_v30 = vmax.f32 %v742_v20, 0.0  ;;  %v838_v31 = vmax.f32 %v774_v21, 0.0  ;;  %v743_v32 = vadd.f32 %v1302_v40, %v672_v22  ;;  %v775_v33 = vadd.f32 %v1302_v40, %v704_v23 }
  0xfb   :  { %v804_v34 = vmax.f32 %v740_v26, 0.0  ;;  %v836_v35 = vmax.f32 %v772_v27, 0.0  ;;  %v741_v36 = vadd.f32 %v1302_v40, %v670_v28  ;;  %v773_v37 = vadd.f32 %v1302_v40, %v702_v29 }
  0xfc   :  { %871 = vst.msk [vmem:[%s1692_s4 + $0x70] sm:$0xff] %vm856_vm3, %v806_v30  ;;  %903 = vst.msk [vmem:[%s1692_s4 + $0x170] sm:$0xff] %vm856_vm3, %v838_v31  ;;  %v807_v39 = vmax.f32 %v743_v32, 0.0  ;;  %v839_v41 = vmax.f32 %v775_v33, 0.0 }
  0xfd   :  { %869 = vst.msk [vmem:[%s1692_s4 + $0x60] sm:$0xff] %vm856_vm3, %v804_v34  ;;  %901 = vst.msk [vmem:[%s1692_s4 + $0x160] sm:$0xff] %vm856_vm3, %v836_v35  ;;  %v805_v42 = vmax.f32 %v741_v36, 0.0  ;;  %v837_v43 = vmax.f32 %v773_v37, 0.0  ;;  %v1049_v44 = vpop.f32.mrb[16].mxu0  ;;  %v1081_v45 = vpop.f32.mrb[16].mxu1 }
  0xfe   :  { %872 = vst.msk [vmem:[%s1692_s4 + $0x78] sm:$0xff] %vm856_vm3, %v807_v39  ;;  %904 = vst.msk [vmem:[%s1692_s4 + $0x178] sm:$0xff] %vm856_vm3, %v839_v41  ;;  %v675_v46 = vmul.f32 %v1049_v44, %v1297_v38  ;;  %v707_v47 = vmul.f32 %v1081_v45, %v1297_v38  ;;  %v459_v48 = vpop.f32.mrb[17].mxu0  ;;  %v587_v49 = vpop.f32.mrb[17].mxu1 }
  0xff   :  { %870 = vst.msk [vmem:[%s1692_s4 + $0x68] sm:$0xff] %vm856_vm3, %v805_v42  ;;  %902 = vst.msk [vmem:[%s1692_s4 + $0x168] sm:$0xff] %vm856_vm3, %v837_v43  ;;  %v673_v50 = vmul.f32 %v1297_v38, %v459_v48  ;;  %v705_v51 = vmul.f32 %v1297_v38, %v587_v49  ;;  %v1050_v52 = vpop.f32.mrb[18].mxu0  ;;  %v1082_v53 = vpop.f32.mrb[18].mxu1 }
 0x100   :  { %v746_v54 = vadd.f32 %v1302_v40, %v675_v46  ;;  %v778_v55 = vadd.f32 %v1302_v40, %v707_v47  ;;  %v676_v56 = vmul.f32 %v1050_v52, %v1297_v38  ;;  %v708_v57 = vmul.f32 %v1082_v53, %v1297_v38  ;;  %v462_v58 = vpop.f32.mrb[19].mxu0  ;;  %v590_v59 = vpop.f32.mrb[19].mxu1 }
 0x101   :  { %v744_v60 = vadd.f32 %v1302_v40, %v673_v50  ;;  %v776_v61 = vadd.f32 %v1302_v40, %v705_v51  ;;  %v674_v62 = vmul.f32 %v1297_v38, %v462_v58  ;;  %v706_v63 = vmul.f32 %v1297_v38, %v590_v59 }
 0x102   :  { %v810_v0 = vmax.f32 %v746_v54, 0.0  ;;  %v842_v1 = vmax.f32 %v778_v55, 0.0  ;;  %v747_v2 = vadd.f32 %v1302_v40, %v676_v56  ;;  %v779_v3 = vadd.f32 %v1302_v40, %v708_v57 }
 0x103   :  { %v808_v4 = vmax.f32 %v744_v60, 0.0  ;;  %v840_v5 = vmax.f32 %v776_v61, 0.0  ;;  %v745_v6 = vadd.f32 %v1302_v40, %v674_v62  ;;  %v777_v7 = vadd.f32 %v1302_v40, %v706_v63 }
 0x104   :  { %875 = vst.msk [vmem:[%s1692_s4 + $0x90] sm:$0xff] %vm856_vm3, %v810_v0  ;;  %907 = vst.msk [vmem:[%s1692_s4 + $0x190] sm:$0xff] %vm856_vm3, %v842_v1  ;;  %v811_v8 = vmax.f32 %v747_v2, 0.0  ;;  %v843_v9 = vmax.f32 %v779_v3, 0.0 }
 0x105   :  { %873 = vst.msk [vmem:[%s1692_s4 + $0x80] sm:$0xff] %vm856_vm3, %v808_v4  ;;  %905 = vst.msk [vmem:[%s1692_s4 + $0x180] sm:$0xff] %vm856_vm3, %v840_v5  ;;  %v809_v10 = vmax.f32 %v745_v6, 0.0  ;;  %v841_v11 = vmax.f32 %v777_v7, 0.0  ;;  %v1053_v12 = vpop.f32.mrb[20].mxu0  ;;  %v1085_v13 = vpop.f32.mrb[20].mxu1 }
 0x106   :  { %876 = vst.msk [vmem:[%s1692_s4 + $0x98] sm:$0xff] %vm856_vm3, %v811_v8  ;;  %908 = vst.msk [vmem:[%s1692_s4 + $0x198] sm:$0xff] %vm856_vm3, %v843_v9  ;;  %v679_v14 = vmul.f32 %v1053_v12, %v1297_v38  ;;  %v711_v15 = vmul.f32 %v1085_v13, %v1297_v38  ;;  %v475_v16 = vpop.f32.mrb[21].mxu0  ;;  %v603_v17 = vpop.f32.mrb[21].mxu1 }
 0x107   :  { %874 = vst.msk [vmem:[%s1692_s4 + $0x88] sm:$0xff] %vm856_vm3, %v809_v10  ;;  %906 = vst.msk [vmem:[%s1692_s4 + $0x188] sm:$0xff] %vm856_vm3, %v841_v11  ;;  %v677_v18 = vmul.f32 %v1297_v38, %v475_v16  ;;  %v709_v19 = vmul.f32 %v1297_v38, %v603_v17  ;;  %v1054_v20 = vpop.f32.mrb[22].mxu0  ;;  %v1086_v21 = vpop.f32.mrb[22].mxu1 }
 0x108   :  { %v750_v22 = vadd.f32 %v1302_v40, %v679_v14  ;;  %v782_v23 = vadd.f32 %v1302_v40, %v711_v15  ;;  %v680_v24 = vmul.f32 %v1054_v20, %v1297_v38  ;;  %v712_v25 = vmul.f32 %v1086_v21, %v1297_v38  ;;  %v478_v26 = vpop.f32.mrb[23].mxu0  ;;  %v606_v27 = vpop.f32.mrb[23].mxu1 }
 0x109   :  { %v748_v28 = vadd.f32 %v1302_v40, %v677_v18  ;;  %v780_v29 = vadd.f32 %v1302_v40, %v709_v19  ;;  %v678_v30 = vmul.f32 %v1297_v38, %v478_v26  ;;  %v710_v31 = vmul.f32 %v1297_v38, %v606_v27 }
 0x10a   :  { %v814_v32 = vmax.f32 %v750_v22, 0.0  ;;  %v846_v33 = vmax.f32 %v782_v23, 0.0  ;;  %v751_v34 = vadd.f32 %v1302_v40, %v680_v24  ;;  %v783_v35 = vadd.f32 %v1302_v40, %v712_v25 }
 0x10b   :  { %v812_v36 = vmax.f32 %v748_v28, 0.0  ;;  %v844_v37 = vmax.f32 %v780_v29, 0.0  ;;  %v749_v39 = vadd.f32 %v1302_v40, %v678_v30  ;;  %v781_v41 = vadd.f32 %v1302_v40, %v710_v31 }
 0x10c   :  { %879 = vst.msk [vmem:[%s1692_s4 + $0xb0] sm:$0xff] %vm856_vm3, %v814_v32  ;;  %911 = vst.msk [vmem:[%s1692_s4 + $0x1b0] sm:$0xff] %vm856_vm3, %v846_v33  ;;  %v815_v42 = vmax.f32 %v751_v34, 0.0  ;;  %v847_v43 = vmax.f32 %v783_v35, 0.0 }
 0x10d   :  { %877 = vst.msk [vmem:[%s1692_s4 + $0xa0] sm:$0xff] %vm856_vm3, %v812_v36  ;;  %909 = vst.msk [vmem:[%s1692_s4 + $0x1a0] sm:$0xff] %vm856_vm3, %v844_v37  ;;  %v813_v44 = vmax.f32 %v749_v39, 0.0  ;;  %v845_v45 = vmax.f32 %v781_v41, 0.0  ;;  %v1057_v46 = vpop.f32.mrb[24].mxu0  ;;  %v1089_v47 = vpop.f32.mrb[24].mxu1 }
 0x10e   :  { %880 = vst.msk [vmem:[%s1692_s4 + $0xb8] sm:$0xff] %vm856_vm3, %v815_v42  ;;  %912 = vst.msk [vmem:[%s1692_s4 + $0x1b8] sm:$0xff] %vm856_vm3, %v847_v43  ;;  %v683_v48 = vmul.f32 %v1057_v46, %v1297_v38  ;;  %v715_v49 = vmul.f32 %v1089_v47, %v1297_v38  ;;  %v491_v50 = vpop.f32.mrb[25].mxu0  ;;  %v619_v51 = vpop.f32.mrb[25].mxu1 }
 0x10f   :  { %878 = vst.msk [vmem:[%s1692_s4 + $0xa8] sm:$0xff] %vm856_vm3, %v813_v44  ;;  %910 = vst.msk [vmem:[%s1692_s4 + $0x1a8] sm:$0xff] %vm856_vm3, %v845_v45  ;;  %v681_v52 = vmul.f32 %v1297_v38, %v491_v50  ;;  %v713_v53 = vmul.f32 %v1297_v38, %v619_v51  ;;  %v1058_v54 = vpop.f32.mrb[26].mxu0  ;;  %v1090_v55 = vpop.f32.mrb[26].mxu1 }
 0x110   :  { %v754_v56 = vadd.f32 %v1302_v40, %v683_v48  ;;  %v786_v57 = vadd.f32 %v1302_v40, %v715_v49  ;;  %v684_v58 = vmul.f32 %v1058_v54, %v1297_v38  ;;  %v716_v59 = vmul.f32 %v1090_v55, %v1297_v38  ;;  %v494_v60 = vpop.f32.mrb[27].mxu0  ;;  %v622_v61 = vpop.f32.mrb[27].mxu1 }
 0x111   :  { %v752_v62 = vadd.f32 %v1302_v40, %v681_v52  ;;  %v784_v63 = vadd.f32 %v1302_v40, %v713_v53  ;;  %v682_v0 = vmul.f32 %v1297_v38, %v494_v60  ;;  %v714_v1 = vmul.f32 %v1297_v38, %v622_v61 }
 0x112   :  { %v818_v2 = vmax.f32 %v754_v56, 0.0  ;;  %v850_v3 = vmax.f32 %v786_v57, 0.0  ;;  %v755_v4 = vadd.f32 %v1302_v40, %v684_v58  ;;  %v787_v5 = vadd.f32 %v1302_v40, %v716_v59 }
 0x113   :  { %v816_v6 = vmax.f32 %v752_v62, 0.0  ;;  %v848_v7 = vmax.f32 %v784_v63, 0.0  ;;  %v753_v8 = vadd.f32 %v1302_v40, %v682_v0  ;;  %v785_v9 = vadd.f32 %v1302_v40, %v714_v1 }
 0x114   :  { %883 = vst.msk [vmem:[%s1692_s4 + $0xd0] sm:$0xff] %vm856_vm3, %v818_v2  ;;  %915 = vst.msk [vmem:[%s1692_s4 + $0x1d0] sm:$0xff] %vm856_vm3, %v850_v3  ;;  %v819_v10 = vmax.f32 %v755_v4, 0.0  ;;  %v851_v11 = vmax.f32 %v787_v5, 0.0 }
 0x115   :  { %881 = vst.msk [vmem:[%s1692_s4 + $0xc0] sm:$0xff] %vm856_vm3, %v816_v6  ;;  %913 = vst.msk [vmem:[%s1692_s4 + $0x1c0] sm:$0xff] %vm856_vm3, %v848_v7  ;;  %v817_v12 = vmax.f32 %v753_v8, 0.0  ;;  %v849_v13 = vmax.f32 %v785_v9, 0.0  ;;  %v1061_v14 = vpop.f32.mrb[28].mxu0  ;;  %v1093_v15 = vpop.f32.mrb[28].mxu1 }
 0x116   :  { %884 = vst.msk [vmem:[%s1692_s4 + $0xd8] sm:$0xff] %vm856_vm3, %v819_v10  ;;  %916 = vst.msk [vmem:[%s1692_s4 + $0x1d8] sm:$0xff] %vm856_vm3, %v851_v11  ;;  %v687_v16 = vmul.f32 %v1061_v14, %v1297_v38  ;;  %v719_v17 = vmul.f32 %v1093_v15, %v1297_v38  ;;  %v507_v18 = vpop.f32.mrb[29].mxu0  ;;  %v635_v19 = vpop.f32.mrb[29].mxu1 }
 0x117   :  { %882 = vst.msk [vmem:[%s1692_s4 + $0xc8] sm:$0xff] %vm856_vm3, %v817_v12  ;;  %914 = vst.msk [vmem:[%s1692_s4 + $0x1c8] sm:$0xff] %vm856_vm3, %v849_v13  ;;  %v685_v20 = vmul.f32 %v1297_v38, %v507_v18  ;;  %v717_v21 = vmul.f32 %v1297_v38, %v635_v19  ;;  %v1062_v22 = vpop.f32.mrb[30].mxu0  ;;  %v1094_v23 = vpop.f32.mrb[30].mxu1 }
 0x118   :  { %v758_v24 = vadd.f32 %v1302_v40, %v687_v16  ;;  %v790_v25 = vadd.f32 %v1302_v40, %v719_v17  ;;  %v688_v26 = vmul.f32 %v1062_v22, %v1297_v38  ;;  %v720_v27 = vmul.f32 %v1094_v23, %v1297_v38  ;;  %v510_v28 = vpop.f32.mrb[31].mxu0  ;;  %v638_v29 = vpop.f32.mrb[31].mxu1 }
 0x119   :  { %v756_v30 = vadd.f32 %v1302_v40, %v685_v20  ;;  %v788_v31 = vadd.f32 %v1302_v40, %v717_v21  ;;  %v686_v32 = vmul.f32 %v1297_v38, %v510_v28  ;;  %v718_v33 = vmul.f32 %v1297_v38, %v638_v29 }
 0x11a   :  { %v822_v34 = vmax.f32 %v758_v24, 0.0  ;;  %v854_v35 = vmax.f32 %v790_v25, 0.0  ;;  %v759_v36 = vadd.f32 %v1302_v40, %v688_v26  ;;  %v791_v37 = vadd.f32 %v1302_v40, %v720_v27 }
 0x11b   :  { %v820_v39 = vmax.f32 %v756_v30, 0.0  ;;  %v852_v41 = vmax.f32 %v788_v31, 0.0  ;;  %v757_v42 = vadd.f32 %v1302_v40, %v686_v32  ;;  %v789_v43 = vadd.f32 %v1302_v40, %v718_v33 }
 0x11c   :  { %887 = vst.msk [vmem:[%s1692_s4 + $0xf0] sm:$0xff] %vm856_vm3, %v822_v34  ;;  %919 = vst.msk [vmem:[%s1692_s4 + $0x1f0] sm:$0xff] %vm856_vm3, %v854_v35  ;;  %v823_v38 = vmax.f32 %v759_v36, 0.0  ;;  %v855_v44 = vmax.f32 %v791_v37, 0.0 }
 0x11d   :  { %885 = vst.msk [vmem:[%s1692_s4 + $0xe0] sm:$0xff] %vm856_vm3, %v820_v39  ;;  %917 = vst.msk [vmem:[%s1692_s4 + $0x1e0] sm:$0xff] %vm856_vm3, %v852_v41  ;;  %v821_v40 = vmax.f32 %v757_v42, 0.0  ;;  %v853_v45 = vmax.f32 %v789_v43, 0.0 }
 0x11e   :  { %888 = vst.msk [vmem:[%s1692_s4 + $0xf8] sm:$0xff] %vm856_vm3, %v823_v38  ;;  %920 = vst.msk [vmem:[%s1692_s4 + $0x1f8] sm:$0xff] %vm856_vm3, %v855_v44 }
 0x11f   :  { %886 = vst.msk [vmem:[%s1692_s4 + $0xe8] sm:$0xff] %vm856_vm3, %v821_v40  ;;  %918 = vst.msk [vmem:[%s1692_s4 + $0x1e8] sm:$0xff] %vm856_vm3, %v853_v45 }

// kernel: _lambda_.12
= control target key start
LH: loop header
LB: loop body
LE: loop exit
PB: predicated region body
PF: predicated region fallthrough
CT: control target
= control target key end

     0   :  { %vm264_vm0 = vcmask 130048   ;;  %vm266_vm1 = vcmask 122880   ;;  %vm1546_vm2 = vcmask 1041409   ;;  %vm1548_vm3 = vcmask 1042434   ;;  %s3295_s0 = inlined_call_operand.vmem [shape: f32[128,9,16], index: 0, kind: input, shape index: {}]   ;;  %s3296_s1 = inlined_call_operand.vmem [shape: f32[128,16], index: 1, kind: output, shape index: {}]  }
   0x1   :  { %v8_v0 = vld [vmem:[%s3295_s0] sm:$0xff]  ;;  %v9_v1 = vld [vmem:[%s3295_s0 + $0x8] sm:$0x1]  ;;  %v10_v2 = vld [vmem:[%s3295_s0 + $0x10] sm:$0xff]  ;;  %vm1550_vm4 = vcmask 1043459   ;;  %vm1552_vm5 = vcmask 1044484  }
   0x2   :  { %v11_v3 = vld [vmem:[%s3295_s0 + $0x18] sm:$0x1]  ;;  %v12_v4 = vld [vmem:[%s3295_s0 + $0x20] sm:$0xff]  ;;  %v13_v5 = vld [vmem:[%s3295_s0 + $0x28] sm:$0x1]  ;;  %v265_v6 = vsel %vm264_vm0, %v8_v0, -inf }
   0x3   :  { %v267_v7 = vsel %vm266_vm1, %v9_v1, -inf  ;;  %v14_v8 = vld [vmem:[%s3295_s0 + $0x30] sm:$0xff]  ;;  %v275_v9 = vsel %vm264_vm0, %v10_v2, -inf  ;;  %v276_v10 = vsel %vm266_vm1, %v11_v3, -inf  ;;  %v284_v11 = vsel %vm264_vm0, %v12_v4, -inf  ;;  %v16_v14 = vld [vmem:[%s3295_s0 + $0x40] sm:$0xff] }
   0x4   :  { %v285_v12 = vsel %vm266_vm1, %v13_v5, -inf  ;;  %v15_v13 = vld [vmem:[%s3295_s0 + $0x38] sm:$0x1]  ;;  %v17_v15 = vld [vmem:[%s3295_s0 + $0x48] sm:$0x1]  ;;  %v268_v16 = vmax.f32 %v265_v6, %v267_v7  ;;  %v18_v17 = vld [vmem:[%s3295_s0 + $0x50] sm:$0xff]  ;;  %v277_v19 = vmax.f32 %v275_v9, %v276_v10 }
   0x5   :  { %v19_v18 = vld [vmem:[%s3295_s0 + $0x58] sm:$0x1]  ;;  %v286_v20 = vmax.f32 %v284_v11, %v285_v12  ;;  %v293_v21 = vsel %vm264_vm0, %v14_v8, -inf  ;;  %v294_v22 = vsel %vm266_vm1, %v15_v13, -inf  ;;  %v302_v23 = vsel %vm264_vm0, %v16_v14, -inf  ;;  %v20_v28 = vld [vmem:[%s3295_s0 + $0x60] sm:$0xff] }
   0x6   :  { %v303_v24 = vsel %vm266_vm1, %v17_v15, -inf  ;;  %v269_v25 = vrot.slane %v268_v16, 4  ;;  %v311_v26 = vsel %vm264_vm0, %v18_v17, -inf  ;;  %v312_v27 = vsel %vm266_vm1, %v19_v18, -inf  ;;  %v21_v29 = vld [vmem:[%s3295_s0 + $0x68] sm:$0x1] }
   0x7   :  { %v278_v30 = vrot.slane %v277_v19, 4  ;;  %v287_v31 = vrot.slane %v286_v20, 4  ;;  %v295_v32 = vmax.f32 %v293_v21, %v294_v22  ;;  %v304_v33 = vmax.f32 %v302_v23, %v303_v24  ;;  %v22_v38 = vld [vmem:[%s3295_s0 + $0x70] sm:$0xff]  ;;  %v23_v39 = vld [vmem:[%s3295_s0 + $0x78] sm:$0x1]  ;;  %v24_v44 = vld [vmem:[%s3295_s0 + $0x80] sm:$0xff] }
   0x8   :  { %v313_v34 = vmax.f32 %v311_v26, %v312_v27  ;;  %v270_v35 = vmax.f32 %v268_v16, %v269_v25  ;;  %v320_v36 = vsel %vm264_vm0, %v20_v28, -inf  ;;  %v321_v37 = vsel %vm266_vm1, %v21_v29, -inf  ;;  %v25_v45 = vld [vmem:[%s3295_s0 + $0x88] sm:$0x1]  ;;  %v26_v46 = vld [vmem:[%s3295_s0 + $0x90] sm:$0xff]  ;;  %v28_v0 = vld [vmem:[%s3295_s0 + $0xa0] sm:$0xff] }
   0x9   :  { %v279_v40 = vmax.f32 %v277_v19, %v278_v30  ;;  %v288_v41 = vmax.f32 %v286_v20, %v287_v31  ;;  %v296_v42 = vrot.slane %v295_v32, 4  ;;  %v305_v43 = vrot.slane %v304_v33, 4  ;;  %v27_v47 = vld [vmem:[%s3295_s0 + $0x98] sm:$0x1]  ;;  %v29_v1 = vld [vmem:[%s3295_s0 + $0xa8] sm:$0x1] }
   0xa   :  { %v314_v48 = vrot.slane %v313_v34, 4  ;;  %v322_v49 = vmax.f32 %v320_v36, %v321_v37  ;;  %v271_v50 = vrot.slane %v270_v35, 2  ;;  %v329_v51 = vsel %vm264_vm0, %v22_v38, -inf  ;;  %v30_v12 = vld [vmem:[%s3295_s0 + $0xb0] sm:$0xff]  ;;  %v31_v13 = vld [vmem:[%s3295_s0 + $0xb8] sm:$0x1] }
   0xb   :  { %v330_v52 = vsel %vm266_vm1, %v23_v39, -inf  ;;  %v280_v53 = vrot.slane %v279_v40, 2  ;;  %v289_v54 = vrot.slane %v288_v41, 2  ;;  %v297_v55 = vmax.f32 %v295_v32, %v296_v42  ;;  %v32_v16 = vld [vmem:[%s3295_s0 + $0xc0] sm:$0xff]  ;;  %v33_v17 = vld [vmem:[%s3295_s0 + $0xc8] sm:$0x1] }
   0xc   :  { %v306_v56 = vmax.f32 %v304_v33, %v305_v43  ;;  %v338_v57 = vsel %vm264_vm0, %v24_v44, -inf  ;;  %v339_v58 = vsel %vm266_vm1, %v25_v45, -inf  ;;  %v347_v59 = vsel %vm264_vm0, %v26_v46, -inf  ;;  %v34_v21 = vld [vmem:[%s3295_s0 + $0xd0] sm:$0xff]  ;;  %v35_v22 = vld [vmem:[%s3295_s0 + $0xd8] sm:$0x1] }
   0xd   :  { %v348_v60 = vsel %vm266_vm1, %v27_v47, -inf  ;;  %v315_v61 = vmax.f32 %v313_v34, %v314_v48  ;;  %v323_v62 = vrot.slane %v322_v49, 4  ;;  %v331_v63 = vmax.f32 %v329_v51, %v330_v52  ;;  %v36_v39 = vld [vmem:[%s3295_s0 + $0xe0] sm:$0xff]  ;;  %v38_v46 = vld [vmem:[%s3295_s0 + $0xf0] sm:$0xff]  ;;  %v41_v48 = vld [vmem:[%s3295_s0 + $0x108] sm:$0x1] }
   0xe   :  { %v272_v2 = vmax.f32 %v270_v35, %v271_v50  ;;  %v340_v3 = vmax.f32 %v338_v57, %v339_v58  ;;  %v349_v4 = vmax.f32 %v347_v59, %v348_v60  ;;  %v281_v5 = vmax.f32 %v279_v40, %v280_v53  ;;  %v37_v40 = vld [vmem:[%s3295_s0 + $0xe8] sm:$0x1]  ;;  %v40_v47 = vld [vmem:[%s3295_s0 + $0x100] sm:$0xff]  ;;  %v42_v53 = vld [vmem:[%s3295_s0 + $0x110] sm:$0xff] }
   0xf   :  { %v290_v6 = vmax.f32 %v288_v41, %v289_v54  ;;  %v298_v7 = vrot.slane %v297_v55, 2  ;;  %v307_v8 = vrot.slane %v306_v56, 2  ;;  %v316_v9 = vrot.slane %v315_v61, 2  ;;  %v39_v41 = vld [vmem:[%s3295_s0 + $0xf8] sm:$0x1] }
  0x10   :  { %v324_v10 = vmax.f32 %v322_v49, %v323_v62  ;;  %v332_v11 = vrot.slane %v331_v63, 4  ;;  %v356_v14 = vsel %vm264_vm0, %v28_v0, -inf  ;;  %v357_v15 = vsel %vm266_vm1, %v29_v1, -inf  ;;  %v43_v58 = vld [vmem:[%s3295_s0 + $0x118] sm:$0x1] }
  0x11   :  { %v273_v18 = vrot.slane %v272_v2, 1  ;;  %v341_v19 = vrot.slane %v340_v3, 4  ;;  %v350_v20 = vrot.slane %v349_v4, 4  ;;  %v282_v23 = vrot.slane %v281_v5, 1 }
  0x12   :  { %v291_v24 = vrot.slane %v290_v6, 1  ;;  %v299_v25 = vmax.f32 %v297_v55, %v298_v7  ;;  %v308_v26 = vmax.f32 %v306_v56, %v307_v8  ;;  %v317_v27 = vmax.f32 %v315_v61, %v316_v9 }
  0x13   :  { %v325_v28 = vrot.slane %v324_v10, 2  ;;  %v333_v29 = vmax.f32 %v331_v63, %v332_v11  ;;  %v358_v30 = vmax.f32 %v356_v14, %v357_v15  ;;  %v365_v31 = vsel %vm264_vm0, %v30_v12, -inf  ;;  %v44_v11 = vld [vmem:[%s3295_s0 + $0x120] sm:$0xff]  ;;  %v45_v12 = vld [vmem:[%s3295_s0 + $0x128] sm:$0x1] }
  0x14   :  { %v366_v32 = vsel %vm266_vm1, %v31_v13, -inf  ;;  %v374_v33 = vsel %vm264_vm0, %v32_v16, -inf  ;;  %v375_v34 = vsel %vm266_vm1, %v33_v17, -inf  ;;  %v342_v35 = vmax.f32 %v340_v3, %v341_v19 }
  0x15   :  { %v351_v36 = vmax.f32 %v349_v4, %v350_v20  ;;  %v383_v37 = vsel %vm264_vm0, %v34_v21, -inf  ;;  %v384_v38 = vsel %vm266_vm1, %v35_v22, -inf  ;;  %v1832_v42 = vmax.f32 %v272_v2, %v273_v18  ;;  %v46_v21 = vld [vmem:[%s3295_s0 + $0x130] sm:$0xff] }
  0x16   :  { %v1834_v43 = vmax.f32 %v281_v5, %v282_v23  ;;  %v1836_v44 = vmax.f32 %v290_v6, %v291_v24  ;;  %v300_v45 = vrot.slane %v299_v25, 1  ;;  %v309_v49 = vrot.slane %v308_v26, 1 }
  0x17   :  { %v359_v50 = vrot.slane %v358_v30, 4  ;;  %v367_v51 = vmax.f32 %v365_v31, %v366_v32  ;;  %v376_v52 = vmax.f32 %v374_v33, %v375_v34  ;;  %v318_v54 = vrot.slane %v317_v27, 1 }
  0x18   :  { %v326_v55 = vmax.f32 %v324_v10, %v325_v28  ;;  %v334_v56 = vrot.slane %v333_v29, 2  ;;  %v385_v57 = vmax.f32 %v383_v37, %v384_v38  ;;  %v343_v59 = vrot.slane %v342_v35, 2 }
  0x19   :  { %v352_v60 = vrot.slane %v351_v36, 2  ;;  %v392_v61 = vsel %vm264_vm0, %v36_v39, -inf  ;;  %v393_v62 = vsel %vm266_vm1, %v37_v40, -inf  ;;  %v401_v63 = vsel %vm264_vm0, %v38_v46, -inf  ;;  %v49_v40 = vld [vmem:[%s3295_s0 + $0x148] sm:$0x1] }
  0x1a   :  { %v402_v0 = vsel %vm266_vm1, %v39_v41, -inf  ;;  %v410_v1 = vsel %vm264_vm0, %v40_v47, -inf  ;;  %v411_v2 = vsel %vm266_vm1, %v41_v48, -inf  ;;  %v360_v3 = vmax.f32 %v358_v30, %v359_v50 }
  0x1b   :  { %v368_v4 = vrot.slane %v367_v51, 4  ;;  %v377_v5 = vrot.slane %v376_v52, 4  ;;  %v419_v6 = vsel %vm264_vm0, %v42_v53, -inf  ;;  %v1860_v7 = vmax.f32 %v299_v25, %v300_v45 }
  0x1c   :  { %v386_v8 = vrot.slane %v385_v57, 4  ;;  %v394_v9 = vmax.f32 %v392_v61, %v393_v62  ;;  %v420_v10 = vsel %vm266_vm1, %v43_v58, -inf  ;;  %v1869_v13 = vmax.f32 %v308_v26, %v309_v49  ;;  %v51_v61 = vld [vmem:[%s3295_s0 + $0x158] sm:$0x1] }
  0x1d   :  { %v327_v14 = vrot.slane %v326_v55, 1  ;;  %v403_v15 = vmax.f32 %v401_v63, %v402_v0  ;;  %v412_v16 = vmax.f32 %v410_v1, %v411_v2  ;;  %v1871_v17 = vmax.f32 %v317_v27, %v318_v54  ;;  %v47_v27 = vld [vmem:[%s3295_s0 + $0x138] sm:$0x1] }
  0x1e   :  { %v335_v18 = vmax.f32 %v333_v29, %v334_v56  ;;  %v344_v19 = vmax.f32 %v342_v35, %v343_v59  ;;  %v421_v20 = vmax.f32 %v419_v6, %v420_v10  ;;  %v353_v22 = vmax.f32 %v351_v36, %v352_v60  ;;  %v48_v35 = vld [vmem:[%s3295_s0 + $0x140] sm:$0xff]  ;;  %v50_v60 = vld [vmem:[%s3295_s0 + $0x150] sm:$0xff] }
  0x1f   :  { %v361_v23 = vrot.slane %v360_v3, 2  ;;  %v369_v24 = vmax.f32 %v367_v51, %v368_v4  ;;  %v378_v25 = vmax.f32 %v376_v52, %v377_v5  ;;  %v387_v28 = vmax.f32 %v385_v57, %v386_v8  ;;  %v52_v6 = vld [vmem:[%s3295_s0 + $0x160] sm:$0xff] }
  0x20   :  { %v395_v30 = vrot.slane %v394_v9, 4  ;;  %v428_v26 = vsel %vm264_vm0, %v44_v11, -inf  ;;  %v429_v31 = vsel %vm266_vm1, %v45_v12, -inf  ;;  %v1881_v29 = vmax.f32 %v326_v55, %v327_v14 }
  0x21   :  { %v404_v32 = vrot.slane %v403_v15, 4  ;;  %v413_v33 = vrot.slane %v412_v16, 4  ;;  %v430_v34 = vmax.f32 %v428_v26, %v429_v31  ;;  %v336_v36 = vrot.slane %v335_v18, 1  ;;  %v55_v26 = vld [vmem:[%s3295_s0 + $0x178] sm:$0x1] }
  0x22   :  { %v345_v37 = vrot.slane %v344_v19, 1  ;;  %v422_v38 = vrot.slane %v421_v20, 4  ;;  %v437_v39 = vsel %vm264_vm0, %v46_v21, -inf  ;;  %v354_v41 = vrot.slane %v353_v22, 1 }
  0x23   :  { %v362_v45 = vmax.f32 %v360_v3, %v361_v23  ;;  %v370_v46 = vrot.slane %v369_v24, 2  ;;  %v379_v47 = vrot.slane %v378_v25, 2  ;;  %v388_v48 = vrot.slane %v387_v28, 2  ;;  %v54_v23 = vld [vmem:[%s3295_s0 + $0x170] sm:$0xff] }
  0x24   :  { %v396_v49 = vmax.f32 %v394_v9, %v395_v30  ;;  %v431_v50 = vrot.slane %v430_v34, 4  ;;  %v438_v51 = vsel %vm266_vm1, %v47_v27, -inf  ;;  %v405_v52 = vmax.f32 %v403_v15, %v404_v32 }
  0x25   :  { %v414_v53 = vmax.f32 %v412_v16, %v413_v33  ;;  %v439_v54 = vmax.f32 %v437_v39, %v438_v51  ;;  %v446_v55 = vsel %vm264_vm0, %v48_v35, -inf  ;;  %v1892_v56 = vmax.f32 %v335_v18, %v336_v36  ;;  %v53_v18 = vld [vmem:[%s3295_s0 + $0x168] sm:$0x1] }
  0x26   :  { %v1894_v57 = vmax.f32 %v344_v19, %v345_v37  ;;  %v423_v58 = vmax.f32 %v421_v20, %v422_v38  ;;  %v447_v59 = vsel %vm266_vm1, %v49_v40, -inf  ;;  %v1903_v62 = vmax.f32 %v353_v22, %v354_v41 }
  0x27   :  { %v371_v63 = vmax.f32 %v369_v24, %v370_v46  ;;  %v432_v0 = vmax.f32 %v430_v34, %v431_v50  ;;  %v448_v1 = vmax.f32 %v446_v55, %v447_v59  ;;  %v363_v2 = vrot.slane %v362_v45, 1  ;;  %v57_v50 = vld [vmem:[%s3295_s0 + $0x188] sm:$0x1] }
  0x28   :  { %v380_v3 = vmax.f32 %v378_v25, %v379_v47  ;;  %v397_v4 = vrot.slane %v396_v49, 2  ;;  %v440_v5 = vrot.slane %v439_v54, 4  ;;  %v389_v8 = vmax.f32 %v387_v28, %v388_v48 }
  0x29   :  { %v406_v9 = vrot.slane %v405_v52, 2  ;;  %v415_v10 = vrot.slane %v414_v53, 2  ;;  %v449_v11 = vrot.slane %v448_v1, 4  ;;  %v424_v12 = vrot.slane %v423_v58, 2 }
  0x2a   :  { %v441_v14 = vmax.f32 %v439_v54, %v440_v5  ;;  %v455_v15 = vsel %vm264_vm0, %v50_v60, -inf  ;;  %v456_v16 = vsel %vm266_vm1, %v51_v61, -inf  ;;  %v372_v19 = vrot.slane %v371_v63, 1  ;;  %v58_v61 = vld [vmem:[%s3295_s0 + $0x190] sm:$0xff] }
  0x2b   :  { %v433_v20 = vrot.slane %v432_v0, 2  ;;  %v450_v21 = vmax.f32 %v448_v1, %v449_v11  ;;  %v457_v22 = vmax.f32 %v455_v15, %v456_v16  ;;  %v1916_v24 = vmax.f32 %v362_v45, %v363_v2 }
  0x2c   :  { %v381_v25 = vrot.slane %v380_v3, 1  ;;  %v442_v28 = vrot.slane %v441_v14, 2  ;;  %v464_v30 = vsel %vm264_vm0, %v52_v6, -inf  ;;  %v390_v31 = vrot.slane %v389_v8, 1 }
  0x2d   :  { %v398_v27 = vmax.f32 %v396_v49, %v397_v4  ;;  %v407_v32 = vmax.f32 %v405_v52, %v406_v9  ;;  %v451_v33 = vrot.slane %v450_v21, 2  ;;  %v416_v34 = vmax.f32 %v414_v53, %v415_v10  ;;  %v56_v49 = vld [vmem:[%s3295_s0 + $0x180] sm:$0xff] }
  0x2e   :  { %v425_v35 = vmax.f32 %v423_v58, %v424_v12  ;;  %v458_v36 = vrot.slane %v457_v22, 4  ;;  %v465_v37 = vsel %vm266_vm1, %v53_v18, -inf  ;;  %v434_v38 = vmax.f32 %v432_v0, %v433_v20  ;;  %v61_v20 = vld [vmem:[%s3295_s0 + $0x1a8] sm:$0x1] }
  0x2f   :  { %v443_v39 = vmax.f32 %v441_v14, %v442_v28  ;;  %v466_v40 = vmax.f32 %v464_v30, %v465_v37  ;;  %v473_v41 = vsel %vm264_vm0, %v54_v23, -inf  ;;  %v1924_v45 = vmax.f32 %v371_v63, %v372_v19  ;;  %v60_v14 = vld [vmem:[%s3295_s0 + $0x1a0] sm:$0xff]  ;;  %v62_v28 = vld [vmem:[%s3295_s0 + $0x1b0] sm:$0xff] }
  0x30   :  { %v1926_v46 = vmax.f32 %v380_v3, %v381_v25  ;;  %v459_v47 = vmax.f32 %v457_v22, %v458_v36  ;;  %v474_v48 = vsel %vm266_vm1, %v55_v26, -inf  ;;  %v1935_v51 = vmax.f32 %v389_v8, %v390_v31  ;;  %v59_v8 = vld [vmem:[%s3295_s0 + $0x198] sm:$0x1] }
  0x31   :  { %v399_v52 = vrot.slane %v398_v27, 1  ;;  %v452_v53 = vmax.f32 %v450_v21, %v451_v33  ;;  %v475_v54 = vmax.f32 %v473_v41, %v474_v48  ;;  %v408_v55 = vrot.slane %v407_v32, 1  ;;  %v64_v33 = vld [vmem:[%s3295_s0 + $0x1c0] sm:$0xff]  ;;  %v66_v48 = vld [vmem:[%s3295_s0 + $0x1d0] sm:$0xff] }
  0x32   :  { %v417_v58 = vrot.slane %v416_v34, 1  ;;  %v460_v59 = vrot.slane %v459_v47, 2  ;;  %v467_v60 = vrot.slane %v466_v40, 4  ;;  %v426_v63 = vrot.slane %v425_v35, 1 }
  0x33   :  { %v435_v0 = vrot.slane %v434_v38, 1  ;;  %v444_v1 = vrot.slane %v443_v39, 1  ;;  %v476_v2 = vrot.slane %v475_v54, 4  ;;  %v482_v5 = vsel %vm264_vm0, %v56_v49, -inf  ;;  %v67_v49 = vld [vmem:[%s3295_s0 + $0x1d8] sm:$0x1] }
  0x34   :  { %v461_v3 = vmax.f32 %v459_v47, %v460_v59  ;;  %v468_v4 = vmax.f32 %v466_v40, %v467_v60  ;;  %v483_v6 = vsel %vm266_vm1, %v57_v50, -inf  ;;  %v1945_v9 = vmax.f32 %v398_v27, %v399_v52 }
  0x35   :  { %v453_v10 = vrot.slane %v452_v53, 1  ;;  %v477_v11 = vmax.f32 %v475_v54, %v476_v2  ;;  %v484_v12 = vmax.f32 %v482_v5, %v483_v6  ;;  %v1950_v15 = vmax.f32 %v407_v32, %v408_v55  ;;  %v63_v32 = vld [vmem:[%s3295_s0 + $0x1b8] sm:$0x1] }
  0x36   :  { %v462_v16 = vrot.slane %v461_v3, 1  ;;  %v469_v18 = vrot.slane %v468_v4, 2  ;;  %v491_v19 = vsel %vm264_vm0, %v58_v61, -inf  ;;  %v1956_v21 = vmax.f32 %v416_v34, %v417_v58  ;;  %v68_v61 = vld [vmem:[%s3295_s0 + $0x1e0] sm:$0xff] }
  0x37   :  { %v1958_v22 = vmax.f32 %v425_v35, %v426_v63  ;;  %v1960_v23 = vmax.f32 %v434_v38, %v435_v0  ;;  %v478_v25 = vrot.slane %v477_v11, 2  ;;  %v1965_v30 = vmax.f32 %v443_v39, %v444_v1  ;;  %v65_v38 = vld [vmem:[%s3295_s0 + $0x1c8] sm:$0x1] }
  0x38   :  { %v470_v26 = vmax.f32 %v468_v4, %v469_v18  ;;  %v485_v31 = vrot.slane %v484_v12, 4  ;;  %v492_v27 = vsel %vm266_vm1, %v59_v8, -inf  ;;  %v1974_v34 = vmax.f32 %v452_v53, %v453_v10  ;;  %v69_v63 = vld [vmem:[%s3295_s0 + $0x1e8] sm:$0x1]  ;;  %v70_v10 = vld [vmem:[%s3295_s0 + $0x1f0] sm:$0xff] }
  0x39   :  { %v479_v35 = vmax.f32 %v477_v11, %v478_v25  ;;  %v493_v36 = vmax.f32 %v491_v19, %v492_v27  ;;  %v500_v37 = vsel %vm264_vm0, %v60_v14, -inf  ;;  %v1980_v39 = vmax.f32 %v461_v3, %v462_v16 }
  0x3a   :  { %v471_v40 = vrot.slane %v470_v26, 1  ;;  %v486_v41 = vmax.f32 %v484_v12, %v485_v31  ;;  %v501_v47 = vsel %vm266_vm1, %v61_v20, -inf  ;;  %v509_v54 = vsel %vm264_vm0, %v62_v28, -inf  ;;  %v71_v28 = vld [vmem:[%s3295_s0 + $0x1f8] sm:$0x1] }
  0x3b   :  { %v480_v50 = vrot.slane %v479_v35, 1  ;;  %v494_v52 = vrot.slane %v493_v36, 4  ;;  %v502_v53 = vmax.f32 %v500_v37, %v501_v47  ;;  %v510_v59 = vsel %vm266_vm1, %v63_v32, -inf }
  0x3c   :  { %v1990_v55 = vmax.f32 %v470_v26, %v471_v40  ;;  %v487_v58 = vrot.slane %v486_v41, 2  ;;  %v518_v60 = vsel %vm264_vm0, %v64_v33, -inf  ;;  %v511_v3 = vmax.f32 %v509_v54, %v510_v59  ;;  %v72_v26 = vld [vmem:[%s3295_s0 + $0x200] sm:$0xff]  ;;  %v73_v40 = vld [vmem:[%s3295_s0 + $0x208] sm:$0x1] }
  0x3d   :  { %v2000_v0 = vmax.f32 %v479_v35, %v480_v50  ;;  %v495_v1 = vmax.f32 %v493_v36, %v494_v52  ;;  %v503_v2 = vrot.slane %v502_v53, 4  ;;  %v519_v5 = vsel %vm266_vm1, %v65_v38, -inf }
  0x3e   :  { %v488_v4 = vmax.f32 %v486_v41, %v487_v58  ;;  %v527_v6 = vsel %vm264_vm0, %v66_v48, -inf  ;;  %v528_v8 = vsel %vm266_vm1, %v67_v49, -inf  ;;  %v512_v14 = vrot.slane %v511_v3, 4  ;;  %v74_v58 = vld [vmem:[%s3295_s0 + $0x210] sm:$0xff] }
  0x3f   :  { %v496_v11 = vrot.slane %v495_v1, 2  ;;  %v504_v12 = vmax.f32 %v502_v53, %v503_v2  ;;  %v520_v16 = vmax.f32 %v518_v60, %v519_v5  ;;  %v529_v19 = vmax.f32 %v527_v6, %v528_v8 }
  0x40   :  { %v489_v18 = vrot.slane %v488_v4, 1  ;;  %v536_v20 = vsel %vm264_vm0, %v68_v61, -inf  ;;  %v537_v25 = vsel %vm266_vm1, %v69_v63, -inf  ;;  %v513_v32 = vmax.f32 %v511_v3, %v512_v14  ;;  %v77_v14 = vld [vmem:[%s3295_s0 + $0x228] sm:$0x1] }
  0x41   :  { %v497_v31 = vmax.f32 %v495_v1, %v496_v11  ;;  %v505_v27 = vrot.slane %v504_v12, 2  ;;  %v521_v33 = vrot.slane %v520_v16, 4  ;;  %v530_v36 = vrot.slane %v529_v19, 4  ;;  %v75_v1 = vld [vmem:[%s3295_s0 + $0x218] sm:$0x1] }
  0x42   :  { %v2016_v35 = vmax.f32 %v488_v4, %v489_v18  ;;  %v538_v37 = vmax.f32 %v536_v20, %v537_v25  ;;  %v545_v38 = vsel %vm264_vm0, %v70_v10, -inf  ;;  %v514_v48 = vrot.slane %v513_v32, 2 }
  0x43   :  { %v498_v41 = vrot.slane %v497_v31, 1  ;;  %v506_v47 = vmax.f32 %v504_v12, %v505_v27  ;;  %v522_v49 = vmax.f32 %v520_v16, %v521_v33  ;;  %v531_v50 = vmax.f32 %v529_v19, %v530_v36  ;;  %v76_v12 = vld [vmem:[%s3295_s0 + $0x220] sm:$0xff]  ;;  %v78_v27 = vld [vmem:[%s3295_s0 + $0x230] sm:$0xff] }
  0x44   :  { %v539_v52 = vrot.slane %v538_v37, 4  ;;  %v546_v53 = vsel %vm266_vm1, %v71_v28, -inf  ;;  %v554_v54 = vsel %vm264_vm0, %v72_v26, -inf  ;;  %v515_v61 = vmax.f32 %v513_v32, %v514_v48  ;;  %v79_v32 = vld [vmem:[%s3295_s0 + $0x238] sm:$0x1] }
  0x45   :  { %v2027_v59 = vmax.f32 %v497_v31, %v498_v41  ;;  %v507_v60 = vrot.slane %v506_v47, 1  ;;  %v523_v63 = vrot.slane %v522_v49, 2  ;;  %v532_v2 = vrot.slane %v531_v50, 2 }
  0x46   :  { %v540_v3 = vmax.f32 %v538_v37, %v539_v52  ;;  %v547_v4 = vmax.f32 %v545_v38, %v546_v53  ;;  %v555_v5 = vsel %vm266_vm1, %v73_v40, -inf  ;;  %v516_v8 = vrot.slane %v515_v61, 1 }
  0x47   :  { %v2033_v6 = vmax.f32 %v506_v47, %v507_v60  ;;  %v524_v10 = vmax.f32 %v522_v49, %v523_v63  ;;  %v556_v11 = vmax.f32 %v554_v54, %v555_v5  ;;  %v533_v16 = vmax.f32 %v531_v50, %v532_v2  ;;  %v80_v49 = vld [vmem:[%s3295_s0 + $0x240] sm:$0xff]  ;;  %v81_v50 = vld [vmem:[%s3295_s0 + $0x248] sm:$0x1]  ;;  %v82_v2 = vld [vmem:[%s3295_s0 + $0x250] sm:$0xff] }
  0x48   :  { %v541_v18 = vrot.slane %v540_v3, 2  ;;  %v548_v19 = vrot.slane %v547_v4, 4  ;;  %v563_v20 = vsel %vm264_vm0, %v74_v58, -inf  ;;  %v2042_v25 = vmax.f32 %v515_v61, %v516_v8 }
  0x49   :  { %v525_v28 = vrot.slane %v524_v10, 1  ;;  %v557_v26 = vrot.slane %v556_v11, 4  ;;  %v564_v31 = vsel %vm266_vm1, %v75_v1, -inf  ;;  %v534_v33 = vrot.slane %v533_v16, 1 }
  0x4a   :  { %v542_v36 = vmax.f32 %v540_v3, %v541_v18  ;;  %v549_v37 = vmax.f32 %v547_v4, %v548_v19  ;;  %v565_v38 = vmax.f32 %v563_v20, %v564_v31  ;;  %v572_v47 = vsel %vm264_vm0, %v76_v12, -inf  ;;  %v83_v3 = vld [vmem:[%s3295_s0 + $0x258] sm:$0x1]  ;;  %v84_v18 = vld [vmem:[%s3295_s0 + $0x260] sm:$0xff]  ;;  %v85_v31 = vld [vmem:[%s3295_s0 + $0x268] sm:$0x1] }
  0x4b   :  { %v2051_v40 = vmax.f32 %v524_v10, %v525_v28  ;;  %v558_v41 = vmax.f32 %v556_v11, %v557_v26  ;;  %v573_v48 = vsel %vm266_vm1, %v77_v14, -inf  ;;  %v2061_v52 = vmax.f32 %v533_v16, %v534_v33 }
  0x4c   :  { %v543_v53 = vrot.slane %v542_v36, 1  ;;  %v550_v54 = vrot.slane %v549_v37, 2  ;;  %v566_v58 = vrot.slane %v565_v38, 4  ;;  %v574_v61 = vmax.f32 %v572_v47, %v573_v48 }
  0x4d   :  { %v559_v60 = vrot.slane %v558_v41, 2  ;;  %v581_v63 = vsel %vm264_vm0, %v78_v27, -inf  ;;  %v582_v1 = vsel %vm266_vm1, %v79_v32, -inf  ;;  %v590_v14 = vsel %vm264_vm0, %v80_v49, -inf  ;;  %v87_v49 = vld [vmem:[%s3295_s0 + $0x278] sm:$0x1] }
  0x4e   :  { %v2071_v4 = vmax.f32 %v542_v36, %v543_v53  ;;  %v551_v5 = vmax.f32 %v549_v37, %v550_v54  ;;  %v567_v8 = vmax.f32 %v565_v38, %v566_v58  ;;  %v583_v10 = vmax.f32 %v581_v63, %v582_v1  ;;  %v86_v37 = vld [vmem:[%s3295_s0 + $0x270] sm:$0xff] }
  0x4f   :  { %v560_v11 = vmax.f32 %v558_v41, %v559_v60  ;;  %v575_v12 = vrot.slane %v574_v61, 4  ;;  %v591_v16 = vsel %vm266_vm1, %v81_v50, -inf  ;;  %v599_v33 = vsel %vm264_vm0, %v82_v2, -inf  ;;  %v88_v2 = vld [vmem:[%s3295_s0 + $0x280] sm:$0xff] }
  0x50   :  { %v552_v19 = vrot.slane %v551_v5, 1  ;;  %v568_v20 = vrot.slane %v567_v8, 2  ;;  %v584_v28 = vrot.slane %v583_v10, 4  ;;  %v592_v26 = vmax.f32 %v590_v14, %v591_v16 }
  0x51   :  { %v561_v27 = vrot.slane %v560_v11, 1  ;;  %v576_v32 = vmax.f32 %v574_v61, %v575_v12  ;;  %v600_v36 = vsel %vm266_vm1, %v83_v3, -inf  ;;  %v608_v58 = vsel %vm264_vm0, %v84_v18, -inf  ;;  %v89_v3 = vld [vmem:[%s3295_s0 + $0x288] sm:$0x1] }
  0x52   :  { %v2086_v38 = vmax.f32 %v551_v5, %v552_v19  ;;  %v569_v41 = vmax.f32 %v567_v8, %v568_v20  ;;  %v585_v47 = vmax.f32 %v583_v10, %v584_v28  ;;  %v593_v48 = vrot.slane %v592_v26, 4  ;;  %v90_v19 = vld [vmem:[%s3295_s0 + $0x290] sm:$0xff] }
  0x53   :  { %v2091_v50 = vmax.f32 %v560_v11, %v561_v27  ;;  %v577_v53 = vrot.slane %v576_v32, 2  ;;  %v601_v54 = vmax.f32 %v599_v33, %v600_v36  ;;  %v609_v1 = vsel %vm266_vm1, %v85_v31, -inf  ;;  %v91_v27 = vld [vmem:[%s3295_s0 + $0x298] sm:$0x1] }
  0x54   :  { %v570_v60 = vrot.slane %v569_v41, 1  ;;  %v586_v61 = vrot.slane %v585_v47, 2  ;;  %v594_v63 = vmax.f32 %v592_v26, %v593_v48  ;;  %v610_v10 = vmax.f32 %v608_v58, %v609_v1  ;;  %v94_v1 = vld [vmem:[%s3295_s0 + $0x2b0] sm:$0xff] }
  0x55   :  { %v578_v5 = vmax.f32 %v576_v32, %v577_v53  ;;  %v602_v8 = vrot.slane %v601_v54, 4  ;;  %v617_v11 = vsel %vm264_vm0, %v86_v37, -inf  ;;  %v618_v18 = vsel %vm266_vm1, %v87_v49, -inf }
  0x56   :  { %v2102_v12 = vmax.f32 %v569_v41, %v570_v60  ;;  %v587_v14 = vmax.f32 %v585_v47, %v586_v61  ;;  %v595_v16 = vrot.slane %v594_v63, 2  ;;  %v611_v26 = vrot.slane %v610_v10, 4  ;;  %v92_v41 = vld [vmem:[%s3295_s0 + $0x2a0] sm:$0xff] }
  0x57   :  { %v579_v20 = vrot.slane %v578_v5, 1  ;;  %v603_v28 = vmax.f32 %v601_v54, %v602_v8  ;;  %v619_v31 = vmax.f32 %v617_v11, %v618_v18  ;;  %v626_v36 = vsel %vm264_vm0, %v88_v2, -inf  ;;  %v93_v54 = vld [vmem:[%s3295_s0 + $0x2a8] sm:$0x1] }
  0x58   :  { %v588_v32 = vrot.slane %v587_v14, 1  ;;  %v596_v33 = vmax.f32 %v594_v63, %v595_v16  ;;  %v627_v37 = vsel %vm266_vm1, %v89_v3, -inf  ;;  %v612_v49 = vmax.f32 %v610_v10, %v611_v26  ;;  %v95_v10 = vld [vmem:[%s3295_s0 + $0x2b8] sm:$0x1] }
  0x59   :  { %v2116_v47 = vmax.f32 %v578_v5, %v579_v20  ;;  %v604_v48 = vrot.slane %v603_v28, 2  ;;  %v620_v53 = vrot.slane %v619_v31, 4  ;;  %v628_v61 = vmax.f32 %v626_v36, %v627_v37 }
  0x5a   :  { %v2121_v58 = vmax.f32 %v587_v14, %v588_v32  ;;  %v597_v60 = vrot.slane %v596_v33, 1  ;;  %v635_v63 = vsel %vm264_vm0, %v90_v19, -inf  ;;  %v613_v3 = vrot.slane %v612_v49, 2 }
  0x5b   :  { %v605_v2 = vmax.f32 %v603_v28, %v604_v48  ;;  %v621_v5 = vmax.f32 %v619_v31, %v620_v53  ;;  %v636_v8 = vsel %vm266_vm1, %v91_v27, -inf  ;;  %v629_v14 = vrot.slane %v628_v61, 4  ;;  %v96_v28 = vld [vmem:[%s3295_s0 + $0x2c0] sm:$0xff]  ;;  %v97_v31 = vld [vmem:[%s3295_s0 + $0x2c8] sm:$0x1] }
  0x5c   :  { %3297 = vst [vmem:[#allocation2_spill] sm:$0xff] %v2121_v58  ;;  %v2131_v11 = vmax.f32 %v596_v33, %v597_v60  ;;  %v637_v16 = vmax.f32 %v635_v63, %v636_v8  ;;  %v644_v18 = vsel %vm264_vm0, %v92_v41, -inf  ;;  %v614_v20 = vmax.f32 %v612_v49, %v613_v3  ;;  %v99_v60 = vld [vmem:[%s3295_s0 + $0x2d8] sm:$0x1] }
  0x5d   :  { %v606_v19 = vrot.slane %v605_v2, 1  ;;  %v622_v26 = vrot.slane %v621_v5, 2  ;;  %v645_v32 = vsel %vm266_vm1, %v93_v54, -inf  ;;  %v630_v27 = vmax.f32 %v628_v61, %v629_v14  ;;  %v98_v54 = vld [vmem:[%s3295_s0 + $0x2d0] sm:$0xff] }
  0x5e   :  { %3298 = vst [vmem:[#allocation3_spill] sm:$0xff] %v2131_v11  ;;  %v638_v33 = vrot.slane %v637_v16, 4  ;;  %v646_v36 = vmax.f32 %v644_v18, %v645_v32  ;;  %v653_v37 = vsel %vm264_vm0, %v94_v1, -inf  ;;  %v615_v41 = vrot.slane %v614_v20, 1  ;;  %v101_v18 = vld [vmem:[%s3295_s0 + $0x2e8] sm:$0x1] }
  0x5f   :  { %v2142_v48 = vmax.f32 %v605_v2, %v606_v19  ;;  %v623_v49 = vmax.f32 %v621_v5, %v622_v26  ;;  %v654_v53 = vsel %vm266_vm1, %v95_v10, -inf  ;;  %v631_v63 = vrot.slane %v630_v27, 2  ;;  %v100_v10 = vld [vmem:[%s3295_s0 + $0x2e0] sm:$0xff] }
  0x60   :  { %v639_v61 = vmax.f32 %v637_v16, %v638_v33  ;;  %v647_v3 = vrot.slane %v646_v36, 4  ;;  %v655_v8 = vmax.f32 %v653_v37, %v654_v53  ;;  %v2151_v14 = vmax.f32 %v614_v20, %v615_v41 }
  0x61   :  { %3299 = vst [vmem:[#allocation4_spill] sm:$0xff] %v2142_v48  ;;  %v624_v1 = vrot.slane %v623_v49, 1  ;;  %v662_v2 = vsel %vm264_vm0, %v96_v28, -inf  ;;  %v663_v5 = vsel %vm266_vm1, %v97_v31, -inf  ;;  %v632_v19 = vmax.f32 %v630_v27, %v631_v63  ;;  %v102_v31 = vld [vmem:[%s3295_s0 + $0x2f0] sm:$0xff] }
  0x62   :  { %3300 = vst [vmem:[#allocation5_spill] sm:$0xff] %v2151_v14  ;;  %v640_v26 = vrot.slane %v639_v61, 2  ;;  %v648_v16 = vmax.f32 %v646_v36, %v647_v3  ;;  %v656_v32 = vrot.slane %v655_v8, 4  ;;  %v664_v20 = vmax.f32 %v662_v2, %v663_v5  ;;  %v103_v27 = vld [vmem:[%s3295_s0 + $0x2f8] sm:$0x1] }
  0x63   :  { %v2161_v33 = vmax.f32 %v623_v49, %v624_v1  ;;  %v671_v37 = vsel %vm264_vm0, %v98_v54, -inf  ;;  %v672_v28 = vsel %vm266_vm1, %v99_v60, -inf  ;;  %v633_v41 = vrot.slane %v632_v19, 1 }
  0x64   :  { %v641_v53 = vmax.f32 %v639_v61, %v640_v26  ;;  %v649_v14 = vrot.slane %v648_v16, 2  ;;  %v657_v48 = vmax.f32 %v655_v8, %v656_v32  ;;  %v665_v36 = vrot.slane %v664_v20, 4  ;;  %v104_v61 = vld [vmem:[%s3295_s0 + $0x300] sm:$0xff]  ;;  %v105_v8 = vld [vmem:[%s3295_s0 + $0x308] sm:$0x1] }
  0x65   :  { %3301 = vst [vmem:[#allocation6_spill] sm:$0xff] %v2161_v33  ;;  %v673_v49 = vmax.f32 %v671_v37, %v672_v28  ;;  %v680_v63 = vsel %vm264_vm0, %v100_v10, -inf  ;;  %v681_v54 = vsel %vm266_vm1, %v101_v18, -inf  ;;  %v2173_v3 = vmax.f32 %v632_v19, %v633_v41  ;;  %v107_v28 = vld [vmem:[%s3295_s0 + $0x318] sm:$0x1] }
  0x66   :  { %v642_v60 = vrot.slane %v641_v53, 1  ;;  %v650_v1 = vmax.f32 %v648_v16, %v649_v14  ;;  %v658_v2 = vrot.slane %v657_v48, 2  ;;  %v666_v5 = vmax.f32 %v664_v20, %v665_v36  ;;  %v106_v16 = vld [vmem:[%s3295_s0 + $0x310] sm:$0xff] }
  0x67   :  { %3302 = vst [vmem:[#allocation7_spill] sm:$0xff] %v2173_v3  ;;  %v674_v26 = vrot.slane %v673_v49, 4  ;;  %v682_v32 = vmax.f32 %v680_v63, %v681_v54  ;;  %v689_v10 = vsel %vm264_vm0, %v102_v31, -inf  ;;  %v690_v14 = vsel %vm266_vm1, %v103_v27, -inf  ;;  %v108_v27 = vld [vmem:[%s3295_s0 + $0x320] sm:$0xff] }
  0x68   :  { %v2182_v37 = vmax.f32 %v641_v53, %v642_v60  ;;  %v651_v18 = vrot.slane %v650_v1, 1  ;;  %v659_v19 = vmax.f32 %v657_v48, %v658_v2  ;;  %v667_v41 = vrot.slane %v666_v5, 2  ;;  %v109_v60 = vld [vmem:[%s3295_s0 + $0x328] sm:$0x1] }
  0x69   :  { %v675_v20 = vmax.f32 %v673_v49, %v674_v26  ;;  %v683_v36 = vrot.slane %v682_v32, 4  ;;  %v691_v63 = vmax.f32 %v689_v10, %v690_v14  ;;  %v698_v53 = vsel %vm264_vm0, %v104_v61, -inf }
  0x6a   :  { %3303 = vst [vmem:[#allocation8_spill] sm:$0xff] %v2182_v37  ;;  %v2191_v54 = vmax.f32 %v650_v1, %v651_v18  ;;  %v660_v31 = vrot.slane %v659_v19, 1  ;;  %v699_v48 = vsel %vm266_vm1, %v105_v8, -inf  ;;  %v668_v2 = vmax.f32 %v666_v5, %v667_v41  ;;  %v110_v8 = vld [vmem:[%s3295_s0 + $0x330] sm:$0xff]  ;;  %v111_v5 = vld [vmem:[%s3295_s0 + $0x338] sm:$0x1] }
  0x6b   :  { %v676_v33 = vrot.slane %v675_v20, 2  ;;  %v684_v49 = vmax.f32 %v682_v32, %v683_v36  ;;  %v692_v26 = vrot.slane %v691_v63, 4  ;;  %v700_v1 = vmax.f32 %v698_v53, %v699_v48 }
  0x6c   :  { %3304 = vst [vmem:[#allocation9_spill] sm:$0xff] %v2191_v54  ;;  %v2201_v10 = vmax.f32 %v659_v19, %v660_v31  ;;  %v707_v18 = vsel %vm264_vm0, %v106_v16, -inf  ;;  %v708_v61 = vsel %vm266_vm1, %v107_v28, -inf  ;;  %v669_v14 = vrot.slane %v668_v2, 1 }
  0x6d   :  { %v677_v54 = vmax.f32 %v675_v20, %v676_v33  ;;  %v685_v11 = vrot.slane %v684_v49, 2  ;;  %v693_v37 = vmax.f32 %v691_v63, %v692_v26  ;;  %v701_v32 = vrot.slane %v700_v1, 4  ;;  %v112_v33 = vld [vmem:[%s3295_s0 + $0x340] sm:$0xff]  ;;  %v113_v20 = vld [vmem:[%s3295_s0 + $0x348] sm:$0x1] }
  0x6e   :  { %3305 = vst [vmem:[#allocation10_spill] sm:$0xff] %v2201_v10  ;;  %v709_v19 = vmax.f32 %v707_v18, %v708_v61  ;;  %v716_v41 = vsel %vm264_vm0, %v108_v27, -inf  ;;  %v717_v16 = vsel %vm266_vm1, %v109_v60, -inf  ;;  %v2213_v36 = vmax.f32 %v668_v2, %v669_v14  ;;  %v115_v61 = vld [vmem:[%s3295_s0 + $0x358] sm:$0x1] }
  0x6f   :  { %v678_v28 = vrot.slane %v677_v54, 1  ;;  %v686_v31 = vmax.f32 %v684_v49, %v685_v11  ;;  %v694_v53 = vrot.slane %v693_v37, 2  ;;  %v702_v63 = vmax.f32 %v700_v1, %v701_v32  ;;  %v114_v49 = vld [vmem:[%s3295_s0 + $0x350] sm:$0xff] }
  0x70   :  { %3306 = vst [vmem:[#allocation11_spill] sm:$0xff] %v2213_v36  ;;  %v710_v48 = vrot.slane %v709_v19, 4  ;;  %v718_v26 = vmax.f32 %v716_v41, %v717_v16  ;;  %v725_v27 = vsel %vm264_vm0, %v110_v8, -inf  ;;  %v726_v11 = vsel %vm266_vm1, %v111_v5, -inf  ;;  %v116_v5 = vld [vmem:[%s3295_s0 + $0x360] sm:$0xff] }
  0x71   :  { %v2222_v18 = vmax.f32 %v677_v54, %v678_v28  ;;  %v687_v60 = vrot.slane %v686_v31, 1  ;;  %v695_v2 = vmax.f32 %v693_v37, %v694_v53  ;;  %v703_v14 = vrot.slane %v702_v63, 2  ;;  %v117_v28 = vld [vmem:[%s3295_s0 + $0x368] sm:$0x1] }
  0x72   :  { %v711_v1 = vmax.f32 %v709_v19, %v710_v48  ;;  %v719_v32 = vrot.slane %v718_v26, 4  ;;  %v727_v41 = vmax.f32 %v725_v27, %v726_v11  ;;  %v734_v8 = vsel %vm264_vm0, %v112_v33, -inf }
  0x73   :  { %3307 = vst [vmem:[#allocation12_spill] sm:$0xff] %v2222_v18  ;;  %v2231_v16 = vmax.f32 %v686_v31, %v687_v60  ;;  %v696_v54 = vrot.slane %v695_v2, 1  ;;  %v735_v37 = vsel %vm266_vm1, %v113_v20, -inf  ;;  %v704_v53 = vmax.f32 %v702_v63, %v703_v14  ;;  %v118_v20 = vld [vmem:[%s3295_s0 + $0x370] sm:$0xff]  ;;  %v119_v63 = vld [vmem:[%s3295_s0 + $0x378] sm:$0x1] }
  0x74   :  { %v712_v18 = vrot.slane %v711_v1, 2  ;;  %v720_v19 = vmax.f32 %v718_v26, %v719_v32  ;;  %v728_v48 = vrot.slane %v727_v41, 4  ;;  %v736_v31 = vmax.f32 %v734_v8, %v735_v37 }
  0x75   :  { %3308 = vst [vmem:[#allocation13_spill] sm:$0xff] %v2231_v16  ;;  %v2241_v27 = vmax.f32 %v695_v2, %v696_v54  ;;  %v743_v60 = vsel %vm264_vm0, %v114_v49, -inf  ;;  %v744_v33 = vsel %vm266_vm1, %v115_v61, -inf  ;;  %v705_v11 = vrot.slane %v704_v53, 1 }
  0x76   :  { %v713_v16 = vmax.f32 %v711_v1, %v712_v18  ;;  %v721_v36 = vrot.slane %v720_v19, 2  ;;  %v729_v10 = vmax.f32 %v727_v41, %v728_v48  ;;  %v737_v26 = vrot.slane %v736_v31, 4  ;;  %v120_v18 = vld [vmem:[%s3295_s0 + $0x380] sm:$0xff]  ;;  %v121_v1 = vld [vmem:[%s3295_s0 + $0x388] sm:$0x1] }
  0x77   :  { %3309 = vst [vmem:[#allocation14_spill] sm:$0xff] %v2241_v27  ;;  %v745_v2 = vmax.f32 %v743_v60, %v744_v33  ;;  %v752_v14 = vsel %vm264_vm0, %v116_v5, -inf  ;;  %v753_v49 = vsel %vm266_vm1, %v117_v28, -inf  ;;  %v2253_v32 = vmax.f32 %v704_v53, %v705_v11  ;;  %v123_v33 = vld [vmem:[%s3295_s0 + $0x398] sm:$0x1] }
  0x78   :  { %v714_v61 = vrot.slane %v713_v16, 1  ;;  %v722_v54 = vmax.f32 %v720_v19, %v721_v36  ;;  %v730_v8 = vrot.slane %v729_v10, 2  ;;  %v738_v41 = vmax.f32 %v736_v31, %v737_v26  ;;  %v122_v19 = vld [vmem:[%s3295_s0 + $0x390] sm:$0xff] }
  0x79   :  { %3310 = vst [vmem:[#allocation15_spill] sm:$0xff] %v2253_v32  ;;  %v746_v37 = vrot.slane %v745_v2, 4  ;;  %v754_v48 = vmax.f32 %v752_v14, %v753_v49  ;;  %v761_v5 = vsel %vm264_vm0, %v118_v20, -inf  ;;  %v762_v36 = vsel %vm266_vm1, %v119_v63, -inf  ;;  %v124_v63 = vld [vmem:[%s3295_s0 + $0x3a0] sm:$0xff] }
  0x7a   :  { %v2262_v60 = vmax.f32 %v713_v16, %v714_v61  ;;  %v723_v28 = vrot.slane %v722_v54, 1  ;;  %v731_v53 = vmax.f32 %v729_v10, %v730_v8  ;;  %v739_v11 = vrot.slane %v738_v41, 2  ;;  %v125_v61 = vld [vmem:[%s3295_s0 + $0x3a8] sm:$0x1] }
  0x7b   :  { %v747_v31 = vmax.f32 %v745_v2, %v746_v37  ;;  %v755_v26 = vrot.slane %v754_v48, 4  ;;  %v763_v14 = vmax.f32 %v761_v5, %v762_v36  ;;  %v770_v20 = vsel %vm264_vm0, %v120_v18, -inf }
  0x7c   :  { %3311 = vst [vmem:[#allocation16_spill] sm:$0xff] %v2262_v60  ;;  %v2271_v49 = vmax.f32 %v722_v54, %v723_v28  ;;  %v732_v16 = vrot.slane %v731_v53, 1  ;;  %v771_v10 = vsel %vm266_vm1, %v121_v1, -inf  ;;  %v740_v8 = vmax.f32 %v738_v41, %v739_v11  ;;  %v126_v1 = vld [vmem:[%s3295_s0 + $0x3b0] sm:$0xff]  ;;  %v127_v41 = vld [vmem:[%s3295_s0 + $0x3b8] sm:$0x1] }
  0x7d   :  { %v748_v27 = vrot.slane %v747_v31, 2  ;;  %v756_v2 = vmax.f32 %v754_v48, %v755_v26  ;;  %v764_v37 = vrot.slane %v763_v14, 4  ;;  %v772_v54 = vmax.f32 %v770_v20, %v771_v10 }
  0x7e   :  { %3312 = vst [vmem:[#allocation17_spill] sm:$0xff] %v2271_v49  ;;  %v2281_v5 = vmax.f32 %v731_v53, %v732_v16  ;;  %v779_v28 = vsel %vm264_vm0, %v122_v19, -inf  ;;  %v780_v18 = vsel %vm266_vm1, %v123_v33, -inf  ;;  %v741_v36 = vrot.slane %v740_v8, 1 }
  0x7f   :  { %v749_v49 = vmax.f32 %v747_v31, %v748_v27  ;;  %v757_v60 = vrot.slane %v756_v2, 2  ;;  %v765_v32 = vmax.f32 %v763_v14, %v764_v37  ;;  %v773_v48 = vrot.slane %v772_v54, 4  ;;  %v128_v27 = vld [vmem:[%s3295_s0 + $0x3c0] sm:$0xff]  ;;  %v129_v31 = vld [vmem:[%s3295_s0 + $0x3c8] sm:$0x1] }
  0x80   :  { %3313 = vst [vmem:[#allocation18_spill] sm:$0xff] %v2281_v5  ;;  %v781_v53 = vmax.f32 %v779_v28, %v780_v18  ;;  %v788_v11 = vsel %vm264_vm0, %v124_v63, -inf  ;;  %v789_v19 = vsel %vm266_vm1, %v125_v61, -inf  ;;  %v2293_v26 = vmax.f32 %v740_v8, %v741_v36  ;;  %v131_v18 = vld [vmem:[%s3295_s0 + $0x3d8] sm:$0x1] }
  0x81   :  { %v750_v33 = vrot.slane %v749_v49, 1  ;;  %v758_v16 = vmax.f32 %v756_v2, %v757_v60  ;;  %v766_v20 = vrot.slane %v765_v32, 2  ;;  %v774_v14 = vmax.f32 %v772_v54, %v773_v48  ;;  %v130_v2 = vld [vmem:[%s3295_s0 + $0x3d0] sm:$0xff] }
  0x82   :  { %3314 = vst [vmem:[#allocation19_spill] sm:$0xff] %v2293_v26  ;;  %v782_v10 = vrot.slane %v781_v53, 4  ;;  %v790_v37 = vmax.f32 %v788_v11, %v789_v19  ;;  %v797_v63 = vsel %vm264_vm0, %v126_v1, -inf  ;;  %v798_v60 = vsel %vm266_vm1, %v127_v41, -inf  ;;  %v132_v41 = vld [vmem:[%s3295_s0 + $0x3e0] sm:$0xff] }
  0x83   :  { %v2302_v28 = vmax.f32 %v749_v49, %v750_v33  ;;  %v759_v61 = vrot.slane %v758_v16, 1  ;;  %v767_v8 = vmax.f32 %v765_v32, %v766_v20  ;;  %v775_v36 = vrot.slane %v774_v14, 2  ;;  %v133_v33 = vld [vmem:[%s3295_s0 + $0x3e8] sm:$0x1] }
  0x84   :  { %v783_v54 = vmax.f32 %v781_v53, %v782_v10  ;;  %v791_v48 = vrot.slane %v790_v37, 4  ;;  %v799_v11 = vmax.f32 %v797_v63, %v798_v60  ;;  %v806_v1 = vsel %vm264_vm0, %v128_v27, -inf }
  0x85   :  { %3315 = vst [vmem:[#allocation20_spill] sm:$0xff] %v2302_v28  ;;  %v2311_v19 = vmax.f32 %v758_v16, %v759_v61  ;;  %v768_v49 = vrot.slane %v767_v8, 1  ;;  %v807_v32 = vsel %vm266_vm1, %v129_v31, -inf  ;;  %v776_v20 = vmax.f32 %v774_v14, %v775_v36  ;;  %v134_v31 = vld [vmem:[%s3295_s0 + $0x3f0] sm:$0xff]  ;;  %v135_v14 = vld [vmem:[%s3295_s0 + $0x3f8] sm:$0x1] }
  0x86   :  { %v784_v28 = vrot.slane %v783_v54, 2  ;;  %v792_v53 = vmax.f32 %v790_v37, %v791_v48  ;;  %v800_v10 = vrot.slane %v799_v11, 4  ;;  %v808_v16 = vmax.f32 %v806_v1, %v807_v32 }
  0x87   :  { %3316 = vst [vmem:[#allocation21_spill] sm:$0xff] %v2311_v19  ;;  %v2321_v63 = vmax.f32 %v767_v8, %v768_v49  ;;  %v815_v61 = vsel %vm264_vm0, %v130_v2, -inf  ;;  %v816_v27 = vsel %vm266_vm1, %v131_v18, -inf  ;;  %v777_v60 = vrot.slane %v776_v20, 1 }
  0x88   :  { %v785_v19 = vmax.f32 %v783_v54, %v784_v28  ;;  %v793_v26 = vrot.slane %v792_v53, 2  ;;  %v801_v5 = vmax.f32 %v799_v11, %v800_v10  ;;  %v809_v37 = vrot.slane %v808_v16, 4  ;;  %v136_v28 = vld [vmem:[%s3295_s0 + $0x400] sm:$0xff]  ;;  %v137_v54 = vld [vmem:[%s3295_s0 + $0x408] sm:$0x1] }
  0x89   :  { %3317 = vst [vmem:[#allocation22_spill] sm:$0xff] %v2321_v63  ;;  %v817_v8 = vmax.f32 %v815_v61, %v816_v27  ;;  %v824_v36 = vsel %vm264_vm0, %v132_v41, -inf  ;;  %v825_v2 = vsel %vm266_vm1, %v133_v33, -inf  ;;  %v2333_v48 = vmax.f32 %v776_v20, %v777_v60  ;;  %v139_v27 = vld [vmem:[%s3295_s0 + $0x418] sm:$0x1] }
  0x8a   :  { %v786_v18 = vrot.slane %v785_v19, 1  ;;  %v794_v49 = vmax.f32 %v792_v53, %v793_v26  ;;  %v802_v1 = vrot.slane %v801_v5, 2  ;;  %v810_v11 = vmax.f32 %v808_v16, %v809_v37  ;;  %v138_v53 = vld [vmem:[%s3295_s0 + $0x410] sm:$0xff] }
  0x8b   :  { %3318 = vst [vmem:[#allocation23_spill] sm:$0xff] %v2333_v48  ;;  %v818_v32 = vrot.slane %v817_v8, 4  ;;  %v826_v10 = vmax.f32 %v824_v36, %v825_v2  ;;  %v833_v41 = vsel %vm264_vm0, %v134_v31, -inf  ;;  %v834_v26 = vsel %vm266_vm1, %v135_v14, -inf  ;;  %v140_v14 = vld [vmem:[%s3295_s0 + $0x420] sm:$0xff] }
  0x8c   :  { %v2342_v61 = vmax.f32 %v785_v19, %v786_v18  ;;  %v795_v33 = vrot.slane %v794_v49, 1  ;;  %v803_v20 = vmax.f32 %v801_v5, %v802_v1  ;;  %v811_v60 = vrot.slane %v810_v11, 2  ;;  %v141_v18 = vld [vmem:[%s3295_s0 + $0x428] sm:$0x1] }
  0x8d   :  { %v819_v16 = vmax.f32 %v817_v8, %v818_v32  ;;  %v827_v37 = vrot.slane %v826_v10, 4  ;;  %v835_v36 = vmax.f32 %v833_v41, %v834_v26  ;;  %v842_v31 = vsel %vm264_vm0, %v136_v28, -inf }
  0x8e   :  { %3319 = vst [vmem:[#allocation24_spill] sm:$0xff] %v2342_v61  ;;  %v2351_v2 = vmax.f32 %v794_v49, %v795_v33  ;;  %v804_v19 = vrot.slane %v803_v20, 1  ;;  %v843_v5 = vsel %vm266_vm1, %v137_v54, -inf  ;;  %v812_v1 = vmax.f32 %v810_v11, %v811_v60  ;;  %v142_v54 = vld [vmem:[%s3295_s0 + $0x430] sm:$0xff]  ;;  %v143_v11 = vld [vmem:[%s3295_s0 + $0x438] sm:$0x1] }
  0x8f   :  { %v820_v63 = vrot.slane %v819_v16, 2  ;;  %v828_v8 = vmax.f32 %v826_v10, %v827_v37  ;;  %v836_v32 = vrot.slane %v835_v36, 4  ;;  %v844_v49 = vmax.f32 %v842_v31, %v843_v5 }
  0x90   :  { %3320 = vst [vmem:[#allocation25_spill] sm:$0xff] %v2351_v2  ;;  %v2361_v41 = vmax.f32 %v803_v20, %v804_v19  ;;  %v851_v33 = vsel %vm264_vm0, %v138_v53, -inf  ;;  %v852_v28 = vsel %vm266_vm1, %v139_v27, -inf  ;;  %v813_v26 = vrot.slane %v812_v1, 1 }
  0x91   :  { %v821_v2 = vmax.f32 %v819_v16, %v820_v63  ;;  %v829_v61 = vrot.slane %v828_v8, 2  ;;  %v837_v48 = vmax.f32 %v835_v36, %v836_v32  ;;  %v845_v10 = vrot.slane %v844_v49, 4  ;;  %v144_v63 = vld [vmem:[%s3295_s0 + $0x440] sm:$0xff]  ;;  %v145_v16 = vld [vmem:[%s3295_s0 + $0x448] sm:$0x1] }
  0x92   :  { %3321 = vst [vmem:[#allocation26_spill] sm:$0xff] %v2361_v41  ;;  %v853_v20 = vmax.f32 %v851_v33, %v852_v28  ;;  %v860_v60 = vsel %vm264_vm0, %v140_v14, -inf  ;;  %v861_v53 = vsel %vm266_vm1, %v141_v18, -inf  ;;  %v2373_v37 = vmax.f32 %v812_v1, %v813_v26  ;;  %v147_v28 = vld [vmem:[%s3295_s0 + $0x458] sm:$0x1] }
  0x93   :  { %v822_v27 = vrot.slane %v821_v2, 1  ;;  %v830_v19 = vmax.f32 %v828_v8, %v829_v61  ;;  %v838_v31 = vrot.slane %v837_v48, 2  ;;  %v846_v36 = vmax.f32 %v844_v49, %v845_v10  ;;  %v146_v8 = vld [vmem:[%s3295_s0 + $0x450] sm:$0xff] }
  0x94   :  { %3322 = vst [vmem:[#allocation27_spill] sm:$0xff] %v2373_v37  ;;  %v854_v5 = vrot.slane %v853_v20, 4  ;;  %v862_v32 = vmax.f32 %v860_v60, %v861_v53  ;;  %v869_v14 = vsel %vm264_vm0, %v142_v54, -inf  ;;  %v870_v61 = vsel %vm266_vm1, %v143_v11, -inf  ;;  %v148_v11 = vld [vmem:[%s3295_s0 + $0x460] sm:$0xff] }
  0x95   :  { %v2382_v33 = vmax.f32 %v821_v2, %v822_v27  ;;  %v831_v18 = vrot.slane %v830_v19, 1  ;;  %v839_v1 = vmax.f32 %v837_v48, %v838_v31  ;;  %v847_v26 = vrot.slane %v846_v36, 2  ;;  %v149_v27 = vld [vmem:[%s3295_s0 + $0x468] sm:$0x1] }
  0x96   :  { %v855_v49 = vmax.f32 %v853_v20, %v854_v5  ;;  %v863_v10 = vrot.slane %v862_v32, 4  ;;  %v871_v60 = vmax.f32 %v869_v14, %v870_v61  ;;  %v878_v54 = vsel %vm264_vm0, %v144_v63, -inf }
  0x97   :  { %3323 = vst [vmem:[#allocation28_spill] sm:$0xff] %v2382_v33  ;;  %v2391_v53 = vmax.f32 %v830_v19, %v831_v18  ;;  %v840_v2 = vrot.slane %v839_v1, 1  ;;  %v879_v48 = vsel %vm266_vm1, %v145_v16, -inf  ;;  %v848_v31 = vmax.f32 %v846_v36, %v847_v26  ;;  %v150_v16 = vld [vmem:[%s3295_s0 + $0x470] sm:$0xff]  ;;  %v151_v36 = vld [vmem:[%s3295_s0 + $0x478] sm:$0x1] }
  0x98   :  { %v856_v33 = vrot.slane %v855_v49, 2  ;;  %v864_v20 = vmax.f32 %v862_v32, %v863_v10  ;;  %v872_v5 = vrot.slane %v871_v60, 4  ;;  %v880_v19 = vmax.f32 %v878_v54, %v879_v48 }
  0x99   :  { %3324 = vst [vmem:[#allocation29_spill] sm:$0xff] %v2391_v53  ;;  %v2401_v14 = vmax.f32 %v839_v1, %v840_v2  ;;  %v887_v18 = vsel %vm264_vm0, %v146_v8, -inf  ;;  %v888_v63 = vsel %vm266_vm1, %v147_v28, -inf  ;;  %v849_v61 = vrot.slane %v848_v31, 1 }
  0x9a   :  { %v857_v53 = vmax.f32 %v855_v49, %v856_v33  ;;  %v865_v37 = vrot.slane %v864_v20, 2  ;;  %v873_v41 = vmax.f32 %v871_v60, %v872_v5  ;;  %v881_v32 = vrot.slane %v880_v19, 4  ;;  %v152_v33 = vld [vmem:[%s3295_s0 + $0x480] sm:$0xff]  ;;  %v153_v49 = vld [vmem:[%s3295_s0 + $0x488] sm:$0x1] }
  0x9b   :  { %3325 = vst [vmem:[#allocation30_spill] sm:$0xff] %v2401_v14  ;;  %v889_v1 = vmax.f32 %v887_v18, %v888_v63  ;;  %v896_v26 = vsel %vm264_vm0, %v148_v11, -inf  ;;  %v897_v8 = vsel %vm266_vm1, %v149_v27, -inf  ;;  %v2413_v10 = vmax.f32 %v848_v31, %v849_v61  ;;  %v155_v63 = vld [vmem:[%s3295_s0 + $0x498] sm:$0x1] }
  0x9c   :  { %v858_v28 = vrot.slane %v857_v53, 1  ;;  %v866_v2 = vmax.f32 %v864_v20, %v865_v37  ;;  %v874_v54 = vrot.slane %v873_v41, 2  ;;  %v882_v60 = vmax.f32 %v880_v19, %v881_v32  ;;  %v154_v20 = vld [vmem:[%s3295_s0 + $0x490] sm:$0xff] }
  0x9d   :  { %3326 = vst [vmem:[#allocation31_spill] sm:$0xff] %v2413_v10  ;;  %v890_v48 = vrot.slane %v889_v1, 4  ;;  %v898_v5 = vmax.f32 %v896_v26, %v897_v8  ;;  %v905_v11 = vsel %vm264_vm0, %v150_v16, -inf  ;;  %v906_v37 = vsel %vm266_vm1, %v151_v36, -inf  ;;  %v156_v36 = vld [vmem:[%s3295_s0 + $0x4a0] sm:$0xff] }
  0x9e   :  { %v2422_v18 = vmax.f32 %v857_v53, %v858_v28  ;;  %v867_v27 = vrot.slane %v866_v2, 1  ;;  %v875_v31 = vmax.f32 %v873_v41, %v874_v54  ;;  %v883_v61 = vrot.slane %v882_v60, 2  ;;  %v157_v28 = vld [vmem:[%s3295_s0 + $0x4a8] sm:$0x1] }
  0x9f   :  { %v891_v19 = vmax.f32 %v889_v1, %v890_v48  ;;  %v899_v32 = vrot.slane %v898_v5, 4  ;;  %v907_v26 = vmax.f32 %v905_v11, %v906_v37  ;;  %v914_v16 = vsel %vm264_vm0, %v152_v33, -inf }
  0xa0   :  { %3327 = vst [vmem:[#allocation32_spill] sm:$0xff] %v2422_v18  ;;  %v2431_v8 = vmax.f32 %v866_v2, %v867_v27  ;;  %v876_v53 = vrot.slane %v875_v31, 1  ;;  %v915_v41 = vsel %vm266_vm1, %v153_v49, -inf  ;;  %v884_v54 = vmax.f32 %v882_v60, %v883_v61  ;;  %v158_v49 = vld [vmem:[%s3295_s0 + $0x4b0] sm:$0xff]  ;;  %v159_v60 = vld [vmem:[%s3295_s0 + $0x4b8] sm:$0x1] }
  0xa1   :  { %v892_v14 = vrot.slane %v891_v19, 2  ;;  %v900_v1 = vmax.f32 %v898_v5, %v899_v32  ;;  %v908_v48 = vrot.slane %v907_v26, 4  ;;  %v916_v2 = vmax.f32 %v914_v16, %v915_v41 }
  0xa2   :  { %3328 = vst [vmem:[#allocation33_spill] sm:$0xff] %v2431_v8  ;;  %v2441_v11 = vmax.f32 %v875_v31, %v876_v53  ;;  %v923_v27 = vsel %vm264_vm0, %v154_v20, -inf  ;;  %v924_v33 = vsel %vm266_vm1, %v155_v63, -inf  ;;  %v885_v37 = vrot.slane %v884_v54, 1 }
  0xa3   :  { %v893_v8 = vmax.f32 %v891_v19, %v892_v14  ;;  %v901_v18 = vrot.slane %v900_v1, 2  ;;  %v909_v10 = vmax.f32 %v907_v26, %v908_v48  ;;  %v917_v5 = vrot.slane %v916_v2, 4  ;;  %v160_v14 = vld [vmem:[%s3295_s0 + $0x4c0] sm:$0xff]  ;;  %v161_v19 = vld [vmem:[%s3295_s0 + $0x4c8] sm:$0x1] }
  0xa4   :  { %3329 = vst [vmem:[#allocation34_spill] sm:$0xff] %v2441_v11  ;;  %v925_v31 = vmax.f32 %v923_v27, %v924_v33  ;;  %v932_v61 = vsel %vm264_vm0, %v156_v36, -inf  ;;  %v933_v20 = vsel %vm266_vm1, %v157_v28, -inf  ;;  %v2453_v32 = vmax.f32 %v884_v54, %v885_v37  ;;  %v163_v33 = vld [vmem:[%s3295_s0 + $0x4d8] sm:$0x1] }
  0xa5   :  { %v894_v63 = vrot.slane %v893_v8, 1  ;;  %v902_v53 = vmax.f32 %v900_v1, %v901_v18  ;;  %v910_v16 = vrot.slane %v909_v10, 2  ;;  %v918_v26 = vmax.f32 %v916_v2, %v917_v5  ;;  %v162_v1 = vld [vmem:[%s3295_s0 + $0x4d0] sm:$0xff] }
  0xa6   :  { %3330 = vst [vmem:[#allocation35_spill] sm:$0xff] %v2453_v32  ;;  %v926_v41 = vrot.slane %v925_v31, 4  ;;  %v934_v48 = vmax.f32 %v932_v61, %v933_v20  ;;  %v941_v36 = vsel %vm264_vm0, %v158_v49, -inf  ;;  %v942_v18 = vsel %vm266_vm1, %v159_v60, -inf  ;;  %v164_v60 = vld [vmem:[%s3295_s0 + $0x4e0] sm:$0xff] }
  0xa7   :  { %v2462_v27 = vmax.f32 %v893_v8, %v894_v63  ;;  %v903_v28 = vrot.slane %v902_v53, 1  ;;  %v911_v54 = vmax.f32 %v909_v10, %v910_v16  ;;  %v919_v37 = vrot.slane %v918_v26, 2  ;;  %v165_v63 = vld [vmem:[%s3295_s0 + $0x4e8] sm:$0x1] }
  0xa8   :  { %v927_v2 = vmax.f32 %v925_v31, %v926_v41  ;;  %v935_v5 = vrot.slane %v934_v48, 4  ;;  %v943_v61 = vmax.f32 %v941_v36, %v942_v18  ;;  %v950_v49 = vsel %vm264_vm0, %v160_v14, -inf }
  0xa9   :  { %3331 = vst [vmem:[#allocation36_spill] sm:$0xff] %v2462_v27  ;;  %v2471_v20 = vmax.f32 %v902_v53, %v903_v28  ;;  %v912_v8 = vrot.slane %v911_v54, 1  ;;  %v951_v10 = vsel %vm266_vm1, %v161_v19, -inf  ;;  %v920_v16 = vmax.f32 %v918_v26, %v919_v37  ;;  %v166_v19 = vld [vmem:[%s3295_s0 + $0x4f0] sm:$0xff]  ;;  %v167_v26 = vld [vmem:[%s3295_s0 + $0x4f8] sm:$0x1] }
  0xaa   :  { %v928_v27 = vrot.slane %v927_v2, 2  ;;  %v936_v31 = vmax.f32 %v934_v48, %v935_v5  ;;  %v944_v41 = vrot.slane %v943_v61, 4  ;;  %v952_v53 = vmax.f32 %v950_v49, %v951_v10 }
  0xab   :  { %3332 = vst [vmem:[#allocation37_spill] sm:$0xff] %v2471_v20  ;;  %v2481_v36 = vmax.f32 %v911_v54, %v912_v8  ;;  %v959_v28 = vsel %vm264_vm0, %v162_v1, -inf  ;;  %v960_v14 = vsel %vm266_vm1, %v163_v33, -inf  ;;  %v921_v18 = vrot.slane %v920_v16, 1 }
  0xac   :  { %v929_v20 = vmax.f32 %v927_v2, %v928_v27  ;;  %v937_v32 = vrot.slane %v936_v31, 2  ;;  %v945_v11 = vmax.f32 %v943_v61, %v944_v41  ;;  %v953_v48 = vrot.slane %v952_v53, 4  ;;  %v168_v27 = vld [vmem:[%s3295_s0 + $0x500] sm:$0xff]  ;;  %v169_v2 = vld [vmem:[%s3295_s0 + $0x508] sm:$0x1] }
  0xad   :  { %3333 = vst [vmem:[#allocation38_spill] sm:$0xff] %v2481_v36  ;;  %v961_v54 = vmax.f32 %v959_v28, %v960_v14  ;;  %v968_v37 = vsel %vm264_vm0, %v164_v60, -inf  ;;  %v969_v1 = vsel %vm266_vm1, %v165_v63, -inf  ;;  %v2493_v5 = vmax.f32 %v920_v16, %v921_v18  ;;  %v171_v14 = vld [vmem:[%s3295_s0 + $0x518] sm:$0x1] }
  0xae   :  { %v930_v33 = vrot.slane %v929_v20, 1  ;;  %v938_v8 = vmax.f32 %v936_v31, %v937_v32  ;;  %v946_v49 = vrot.slane %v945_v11, 2  ;;  %v954_v61 = vmax.f32 %v952_v53, %v953_v48  ;;  %v170_v31 = vld [vmem:[%s3295_s0 + $0x510] sm:$0xff] }
  0xaf   :  { %3334 = vst [vmem:[#allocation39_spill] sm:$0xff] %v2493_v5  ;;  %v962_v10 = vrot.slane %v961_v54, 4  ;;  %v970_v41 = vmax.f32 %v968_v37, %v969_v1  ;;  %v977_v60 = vsel %vm264_vm0, %v166_v19, -inf  ;;  %v978_v32 = vsel %vm266_vm1, %v167_v26, -inf  ;;  %v172_v26 = vld [vmem:[%s3295_s0 + $0x520] sm:$0xff] }
  0xb0   :  { %v2502_v28 = vmax.f32 %v929_v20, %v930_v33  ;;  %v939_v63 = vrot.slane %v938_v8, 1  ;;  %v947_v16 = vmax.f32 %v945_v11, %v946_v49  ;;  %v955_v18 = vrot.slane %v954_v61, 2  ;;  %v173_v33 = vld [vmem:[%s3295_s0 + $0x528] sm:$0x1] }
  0xb1   :  { %v963_v53 = vmax.f32 %v961_v54, %v962_v10  ;;  %v971_v48 = vrot.slane %v970_v41, 4  ;;  %v979_v37 = vmax.f32 %v977_v60, %v978_v32  ;;  %v986_v19 = vsel %vm264_vm0, %v168_v27, -inf }
  0xb2   :  { %3335 = vst [vmem:[#allocation40_spill] sm:$0xff] %v2502_v28  ;;  %v2511_v1 = vmax.f32 %v938_v8, %v939_v63  ;;  %v948_v20 = vrot.slane %v947_v16, 1  ;;  %v987_v11 = vsel %vm266_vm1, %v169_v2, -inf  ;;  %v956_v49 = vmax.f32 %v954_v61, %v955_v18  ;;  %v174_v2 = vld [vmem:[%s3295_s0 + $0x530] sm:$0xff]  ;;  %v175_v61 = vld [vmem:[%s3295_s0 + $0x538] sm:$0x1] }
  0xb3   :  { %v964_v36 = vrot.slane %v963_v53, 2  ;;  %v972_v54 = vmax.f32 %v970_v41, %v971_v48  ;;  %v980_v10 = vrot.slane %v979_v37, 4  ;;  %v988_v8 = vmax.f32 %v986_v19, %v987_v11 }
  0xb4   :  { %3336 = vst [vmem:[#allocation41_spill] sm:$0xff] %v2511_v1  ;;  %v2521_v60 = vmax.f32 %v947_v16, %v948_v20  ;;  %v995_v63 = vsel %vm264_vm0, %v170_v31, -inf  ;;  %v996_v27 = vsel %vm266_vm1, %v171_v14, -inf  ;;  %v957_v32 = vrot.slane %v956_v49, 1 }
  0xb5   :  { %v965_v1 = vmax.f32 %v963_v53, %v964_v36  ;;  %v973_v28 = vrot.slane %v972_v54, 2  ;;  %v981_v5 = vmax.f32 %v979_v37, %v980_v10  ;;  %v989_v41 = vrot.slane %v988_v8, 4  ;;  %v176_v36 = vld [vmem:[%s3295_s0 + $0x540] sm:$0xff]  ;;  %v177_v53 = vld [vmem:[%s3295_s0 + $0x548] sm:$0x1] }
  0xb6   :  { %3337 = vst [vmem:[#allocation42_spill] sm:$0xff] %v2521_v60  ;;  %v997_v16 = vmax.f32 %v995_v63, %v996_v27  ;;  %v1004_v18 = vsel %vm264_vm0, %v172_v26, -inf  ;;  %v1005_v31 = vsel %vm266_vm1, %v173_v33, -inf  ;;  %v2533_v48 = vmax.f32 %v956_v49, %v957_v32  ;;  %v179_v27 = vld [vmem:[%s3295_s0 + $0x558] sm:$0x1] }
  0xb7   :  { %v966_v14 = vrot.slane %v965_v1, 1  ;;  %v974_v20 = vmax.f32 %v972_v54, %v973_v28  ;;  %v982_v19 = vrot.slane %v981_v5, 2  ;;  %v990_v37 = vmax.f32 %v988_v8, %v989_v41  ;;  %v178_v54 = vld [vmem:[%s3295_s0 + $0x550] sm:$0xff] }
  0xb8   :  { %3338 = vst [vmem:[#allocation43_spill] sm:$0xff] %v2533_v48  ;;  %v998_v11 = vrot.slane %v997_v16, 4  ;;  %v1006_v10 = vmax.f32 %v1004_v18, %v1005_v31  ;;  %v1013_v26 = vsel %vm264_vm0, %v174_v2, -inf  ;;  %v1014_v28 = vsel %vm266_vm1, %v175_v61, -inf  ;;  %v180_v61 = vld [vmem:[%s3295_s0 + $0x560] sm:$0xff] }
  0xb9   :  { %v2542_v63 = vmax.f32 %v965_v1, %v966_v14  ;;  %v975_v33 = vrot.slane %v974_v20, 1  ;;  %v983_v49 = vmax.f32 %v981_v5, %v982_v19  ;;  %v991_v32 = vrot.slane %v990_v37, 2  ;;  %v181_v14 = vld [vmem:[%s3295_s0 + $0x568] sm:$0x1] }
  0xba   :  { %v999_v8 = vmax.f32 %v997_v16, %v998_v11  ;;  %v1007_v41 = vrot.slane %v1006_v10, 4  ;;  %v1015_v18 = vmax.f32 %v1013_v26, %v1014_v28  ;;  %v1022_v2 = vsel %vm264_vm0, %v176_v36, -inf }
  0xbb   :  { %3339 = vst [vmem:[#allocation44_spill] sm:$0xff] %v2542_v63  ;;  %v2551_v31 = vmax.f32 %v974_v20, %v975_v33  ;;  %v984_v1 = vrot.slane %v983_v49, 1  ;;  %v1023_v5 = vsel %vm266_vm1, %v177_v53, -inf  ;;  %v992_v19 = vmax.f32 %v990_v37, %v991_v32  ;;  %v182_v53 = vld [vmem:[%s3295_s0 + $0x570] sm:$0xff]  ;;  %v183_v37 = vld [vmem:[%s3295_s0 + $0x578] sm:$0x1] }
  0xbc   :  { %v1000_v63 = vrot.slane %v999_v8, 2  ;;  %v1008_v16 = vmax.f32 %v1006_v10, %v1007_v41  ;;  %v1016_v11 = vrot.slane %v1015_v18, 4  ;;  %v1024_v20 = vmax.f32 %v1022_v2, %v1023_v5 }
  0xbd   :  { %3340 = vst [vmem:[#allocation45_spill] sm:$0xff] %v2551_v31  ;;  %v2561_v26 = vmax.f32 %v983_v49, %v984_v1  ;;  %v1031_v33 = vsel %vm264_vm0, %v178_v54, -inf  ;;  %v1032_v36 = vsel %vm266_vm1, %v179_v27, -inf  ;;  %v993_v28 = vrot.slane %v992_v19, 1 }
  0xbe   :  { %v1001_v31 = vmax.f32 %v999_v8, %v1000_v63  ;;  %v1009_v48 = vrot.slane %v1008_v16, 2  ;;  %v1017_v60 = vmax.f32 %v1015_v18, %v1016_v11  ;;  %v1025_v10 = vrot.slane %v1024_v20, 4  ;;  %v184_v63 = vld [vmem:[%s3295_s0 + $0x580] sm:$0xff]  ;;  %v185_v8 = vld [vmem:[%s3295_s0 + $0x588] sm:$0x1] }
  0xbf   :  { %3341 = vst [vmem:[#allocation46_spill] sm:$0xff] %v2561_v26  ;;  %v1033_v49 = vmax.f32 %v1031_v33, %v1032_v36  ;;  %v1040_v32 = vsel %vm264_vm0, %v180_v61, -inf  ;;  %v1041_v54 = vsel %vm266_vm1, %v181_v14, -inf  ;;  %v2573_v41 = vmax.f32 %v992_v19, %v993_v28  ;;  %v187_v36 = vld [vmem:[%s3295_s0 + $0x598] sm:$0x1] }
  0xc0   :  { %v1002_v27 = vrot.slane %v1001_v31, 1  ;;  %v1010_v1 = vmax.f32 %v1008_v16, %v1009_v48  ;;  %v1018_v2 = vrot.slane %v1017_v60, 2  ;;  %v1026_v18 = vmax.f32 %v1024_v20, %v1025_v10  ;;  %v186_v16 = vld [vmem:[%s3295_s0 + $0x590] sm:$0xff] }
  0xc1   :  { %3342 = vst [vmem:[#allocation47_spill] sm:$0xff] %v2573_v41  ;;  %v1034_v5 = vrot.slane %v1033_v49, 4  ;;  %v1042_v11 = vmax.f32 %v1040_v32, %v1041_v54  ;;  %v1049_v61 = vsel %vm264_vm0, %v182_v53, -inf  ;;  %v1050_v48 = vsel %vm266_vm1, %v183_v37, -inf  ;;  %v188_v37 = vld [vmem:[%s3295_s0 + $0x5a0] sm:$0xff] }
  0xc2   :  { %v2582_v33 = vmax.f32 %v1001_v31, %v1002_v27  ;;  %v1011_v14 = vrot.slane %v1010_v1, 1  ;;  %v1019_v19 = vmax.f32 %v1017_v60, %v1018_v2  ;;  %v1027_v28 = vrot.slane %v1026_v18, 2  ;;  %v189_v27 = vld [vmem:[%s3295_s0 + $0x5a8] sm:$0x1] }
  0xc3   :  { %v1035_v20 = vmax.f32 %v1033_v49, %v1034_v5  ;;  %v1043_v10 = vrot.slane %v1042_v11, 4  ;;  %v1051_v32 = vmax.f32 %v1049_v61, %v1050_v48  ;;  %v1058_v53 = vsel %vm264_vm0, %v184_v63, -inf }
  0xc4   :  { %3343 = vst [vmem:[#allocation48_spill] sm:$0xff] %v2582_v33  ;;  %v2591_v54 = vmax.f32 %v1010_v1, %v1011_v14  ;;  %v1020_v31 = vrot.slane %v1019_v19, 1  ;;  %v1059_v60 = vsel %vm266_vm1, %v185_v8, -inf  ;;  %v1028_v2 = vmax.f32 %v1026_v18, %v1027_v28  ;;  %v190_v8 = vld [vmem:[%s3295_s0 + $0x5b0] sm:$0xff]  ;;  %v191_v18 = vld [vmem:[%s3295_s0 + $0x5b8] sm:$0x1] }
  0xc5   :  { %v1036_v26 = vrot.slane %v1035_v20, 2  ;;  %v1044_v49 = vmax.f32 %v1042_v11, %v1043_v10  ;;  %v1052_v5 = vrot.slane %v1051_v32, 4  ;;  %v1060_v1 = vmax.f32 %v1058_v53, %v1059_v60 }
  0xc6   :  { %3344 = vst [vmem:[#allocation49_spill] sm:$0xff] %v2591_v54  ;;  %v2601_v61 = vmax.f32 %v1019_v19, %v1020_v31  ;;  %v1067_v14 = vsel %vm264_vm0, %v186_v16, -inf  ;;  %v1068_v63 = vsel %vm266_vm1, %v187_v36, -inf  ;;  %v1029_v48 = vrot.slane %v1028_v2, 1 }
  0xc7   :  { %v1037_v54 = vmax.f32 %v1035_v20, %v1036_v26  ;;  %v1045_v33 = vrot.slane %v1044_v49, 2  ;;  %v1053_v41 = vmax.f32 %v1051_v32, %v1052_v5  ;;  %v1061_v11 = vrot.slane %v1060_v1, 4  ;;  %v192_v26 = vld [vmem:[%s3295_s0 + $0x5c0] sm:$0xff]  ;;  %v193_v20 = vld [vmem:[%s3295_s0 + $0x5c8] sm:$0x1] }
  0xc8   :  { %3345 = vst [vmem:[#allocation50_spill] sm:$0xff] %v2601_v61  ;;  %v1069_v19 = vmax.f32 %v1067_v14, %v1068_v63  ;;  %v1076_v28 = vsel %vm264_vm0, %v188_v37, -inf  ;;  %v1077_v16 = vsel %vm266_vm1, %v189_v27, -inf  ;;  %v2613_v10 = vmax.f32 %v1028_v2, %v1029_v48  ;;  %v195_v63 = vld [vmem:[%s3295_s0 + $0x5d8] sm:$0x1] }
  0xc9   :  { %v1038_v36 = vrot.slane %v1037_v54, 1  ;;  %v1046_v31 = vmax.f32 %v1044_v49, %v1045_v33  ;;  %v1054_v53 = vrot.slane %v1053_v41, 2  ;;  %v1062_v32 = vmax.f32 %v1060_v1, %v1061_v11  ;;  %v194_v49 = vld [vmem:[%s3295_s0 + $0x5d0] sm:$0xff] }
  0xca   :  { %3346 = vst [vmem:[#allocation51_spill] sm:$0xff] %v2613_v10  ;;  %v1070_v60 = vrot.slane %v1069_v19, 4  ;;  %v1078_v5 = vmax.f32 %v1076_v28, %v1077_v16  ;;  %v1085_v37 = vsel %vm264_vm0, %v190_v8, -inf  ;;  %v1086_v33 = vsel %vm266_vm1, %v191_v18, -inf  ;;  %v196_v18 = vld [vmem:[%s3295_s0 + $0x5e0] sm:$0xff] }
  0xcb   :  { %v2622_v14 = vmax.f32 %v1037_v54, %v1038_v36  ;;  %v1047_v27 = vrot.slane %v1046_v31, 1  ;;  %v1055_v2 = vmax.f32 %v1053_v41, %v1054_v53  ;;  %v1063_v48 = vrot.slane %v1062_v32, 2  ;;  %v197_v36 = vld [vmem:[%s3295_s0 + $0x5e8] sm:$0x1] }
  0xcc   :  { %v1071_v1 = vmax.f32 %v1069_v19, %v1070_v60  ;;  %v1079_v11 = vrot.slane %v1078_v5, 4  ;;  %v1087_v28 = vmax.f32 %v1085_v37, %v1086_v33  ;;  %v1094_v8 = vsel %vm264_vm0, %v192_v26, -inf }
  0xcd   :  { %3347 = vst [vmem:[#allocation52_spill] sm:$0xff] %v2622_v14  ;;  %v2631_v16 = vmax.f32 %v1046_v31, %v1047_v27  ;;  %v1056_v54 = vrot.slane %v1055_v2, 1  ;;  %v1095_v41 = vsel %vm266_vm1, %v193_v20, -inf  ;;  %v1064_v53 = vmax.f32 %v1062_v32, %v1063_v48  ;;  %v198_v20 = vld [vmem:[%s3295_s0 + $0x5f0] sm:$0xff]  ;;  %v199_v32 = vld [vmem:[%s3295_s0 + $0x5f8] sm:$0x1] }
  0xce   :  { %v1072_v14 = vrot.slane %v1071_v1, 2  ;;  %v1080_v19 = vmax.f32 %v1078_v5, %v1079_v11  ;;  %v1088_v60 = vrot.slane %v1087_v28, 4  ;;  %v1096_v31 = vmax.f32 %v1094_v8, %v1095_v41 }
  0xcf   :  { %3348 = vst [vmem:[#allocation53_spill] sm:$0xff] %v2631_v16  ;;  %v2641_v37 = vmax.f32 %v1055_v2, %v1056_v54  ;;  %v1103_v27 = vsel %vm264_vm0, %v194_v49, -inf  ;;  %v1104_v26 = vsel %vm266_vm1, %v195_v63, -inf  ;;  %v1065_v33 = vrot.slane %v1064_v53, 1 }
  0xd0   :  { %v1073_v16 = vmax.f32 %v1071_v1, %v1072_v14  ;;  %v1081_v10 = vrot.slane %v1080_v19, 2  ;;  %v1089_v61 = vmax.f32 %v1087_v28, %v1088_v60  ;;  %v1097_v5 = vrot.slane %v1096_v31, 4  ;;  %v200_v14 = vld [vmem:[%s3295_s0 + $0x600] sm:$0xff]  ;;  %v201_v1 = vld [vmem:[%s3295_s0 + $0x608] sm:$0x1] }
  0xd1   :  { %3349 = vst [vmem:[#allocation54_spill] sm:$0xff] %v2641_v37  ;;  %v1105_v2 = vmax.f32 %v1103_v27, %v1104_v26  ;;  %v1112_v48 = vsel %vm264_vm0, %v196_v18, -inf  ;;  %v1113_v49 = vsel %vm266_vm1, %v197_v36, -inf  ;;  %v2653_v11 = vmax.f32 %v1064_v53, %v1065_v33  ;;  %v203_v26 = vld [vmem:[%s3295_s0 + $0x618] sm:$0x1] }
  0xd2   :  { %v1074_v63 = vrot.slane %v1073_v16, 1  ;;  %v1082_v54 = vmax.f32 %v1080_v19, %v1081_v10  ;;  %v1090_v8 = vrot.slane %v1089_v61, 2  ;;  %v1098_v28 = vmax.f32 %v1096_v31, %v1097_v5  ;;  %v202_v19 = vld [vmem:[%s3295_s0 + $0x610] sm:$0xff] }
  0xd3   :  { %3350 = vst [vmem:[#allocation55_spill] sm:$0xff] %v2653_v11  ;;  %v1106_v41 = vrot.slane %v1105_v2, 4  ;;  %v1114_v60 = vmax.f32 %v1112_v48, %v1113_v49  ;;  %v1121_v18 = vsel %vm264_vm0, %v198_v20, -inf  ;;  %v1122_v10 = vsel %vm266_vm1, %v199_v32, -inf  ;;  %v204_v32 = vld [vmem:[%s3295_s0 + $0x620] sm:$0xff] }
  0xd4   :  { %v2662_v27 = vmax.f32 %v1073_v16, %v1074_v63  ;;  %v1083_v36 = vrot.slane %v1082_v54, 1  ;;  %v1091_v53 = vmax.f32 %v1089_v61, %v1090_v8  ;;  %v1099_v33 = vrot.slane %v1098_v28, 2  ;;  %v205_v63 = vld [vmem:[%s3295_s0 + $0x628] sm:$0x1] }
  0xd5   :  { %v1107_v31 = vmax.f32 %v1105_v2, %v1106_v41  ;;  %v1115_v5 = vrot.slane %v1114_v60, 4  ;;  %v1123_v48 = vmax.f32 %v1121_v18, %v1122_v10  ;;  %v1130_v20 = vsel %vm264_vm0, %v200_v14, -inf }
  0xd6   :  { %3351 = vst [vmem:[#allocation56_spill] sm:$0xff] %v2662_v27  ;;  %v2671_v49 = vmax.f32 %v1082_v54, %v1083_v36  ;;  %v1092_v16 = vrot.slane %v1091_v53, 1  ;;  %v1131_v61 = vsel %vm266_vm1, %v201_v1, -inf  ;;  %v1100_v8 = vmax.f32 %v1098_v28, %v1099_v33  ;;  %v206_v1 = vld [vmem:[%s3295_s0 + $0x630] sm:$0xff]  ;;  %v207_v28 = vld [vmem:[%s3295_s0 + $0x638] sm:$0x1] }
  0xd7   :  { %v1108_v37 = vrot.slane %v1107_v31, 2  ;;  %v1116_v2 = vmax.f32 %v1114_v60, %v1115_v5  ;;  %v1124_v41 = vrot.slane %v1123_v48, 4  ;;  %v1132_v54 = vmax.f32 %v1130_v20, %v1131_v61 }
  0xd8   :  { %3352 = vst [vmem:[#allocation57_spill] sm:$0xff] %v2671_v49  ;;  %v2681_v18 = vmax.f32 %v1091_v53, %v1092_v16  ;;  %v1139_v36 = vsel %vm264_vm0, %v202_v19, -inf  ;;  %v1140_v14 = vsel %vm266_vm1, %v203_v26, -inf  ;;  %v1101_v10 = vrot.slane %v1100_v8, 1 }
  0xd9   :  { %v1109_v49 = vmax.f32 %v1107_v31, %v1108_v37  ;;  %v1117_v27 = vrot.slane %v1116_v2, 2  ;;  %v1125_v11 = vmax.f32 %v1123_v48, %v1124_v41  ;;  %v1133_v60 = vrot.slane %v1132_v54, 4  ;;  %v208_v37 = vld [vmem:[%s3295_s0 + $0x640] sm:$0xff]  ;;  %v209_v31 = vld [vmem:[%s3295_s0 + $0x648] sm:$0x1] }
  0xda   :  { %3353 = vst [vmem:[#allocation58_spill] sm:$0xff] %v2681_v18  ;;  %v1141_v53 = vmax.f32 %v1139_v36, %v1140_v14  ;;  %v1148_v33 = vsel %vm264_vm0, %v204_v32, -inf  ;;  %v1149_v19 = vsel %vm266_vm1, %v205_v63, -inf  ;;  %v2693_v5 = vmax.f32 %v1100_v8, %v1101_v10  ;;  %v211_v14 = vld [vmem:[%s3295_s0 + $0x658] sm:$0x1] }
  0xdb   :  { %v1110_v26 = vrot.slane %v1109_v49, 1  ;;  %v1118_v16 = vmax.f32 %v1116_v2, %v1117_v27  ;;  %v1126_v20 = vrot.slane %v1125_v11, 2  ;;  %v1134_v48 = vmax.f32 %v1132_v54, %v1133_v60  ;;  %v210_v2 = vld [vmem:[%s3295_s0 + $0x650] sm:$0xff] }
  0xdc   :  { %3354 = vst [vmem:[#allocation59_spill] sm:$0xff] %v2693_v5  ;;  %v1142_v61 = vrot.slane %v1141_v53, 4  ;;  %v1150_v41 = vmax.f32 %v1148_v33, %v1149_v19  ;;  %v1157_v32 = vsel %vm264_vm0, %v206_v1, -inf  ;;  %v1158_v27 = vsel %vm266_vm1, %v207_v28, -inf  ;;  %v212_v28 = vld [vmem:[%s3295_s0 + $0x660] sm:$0xff] }
  0xdd   :  { %v2702_v36 = vmax.f32 %v1109_v49, %v1110_v26  ;;  %v1119_v63 = vrot.slane %v1118_v16, 1  ;;  %v1127_v8 = vmax.f32 %v1125_v11, %v1126_v20  ;;  %v1135_v10 = vrot.slane %v1134_v48, 2  ;;  %v213_v26 = vld [vmem:[%s3295_s0 + $0x668] sm:$0x1] }
  0xde   :  { %v1143_v54 = vmax.f32 %v1141_v53, %v1142_v61  ;;  %v1151_v60 = vrot.slane %v1150_v41, 4  ;;  %v1159_v33 = vmax.f32 %v1157_v32, %v1158_v27  ;;  %v1166_v1 = vsel %vm264_vm0, %v208_v37, -inf }
  0xdf   :  { %3355 = vst [vmem:[#allocation60_spill] sm:$0xff] %v2702_v36  ;;  %v2711_v19 = vmax.f32 %v1118_v16, %v1119_v63  ;;  %v1128_v49 = vrot.slane %v1127_v8, 1  ;;  %v1167_v11 = vsel %vm266_vm1, %v209_v31, -inf  ;;  %v1136_v20 = vmax.f32 %v1134_v48, %v1135_v10  ;;  %v214_v31 = vld [vmem:[%s3295_s0 + $0x670] sm:$0xff]  ;;  %v215_v48 = vld [vmem:[%s3295_s0 + $0x678] sm:$0x1] }
  0xe0   :  { %v1144_v36 = vrot.slane %v1143_v54, 2  ;;  %v1152_v53 = vmax.f32 %v1150_v41, %v1151_v60  ;;  %v1160_v61 = vrot.slane %v1159_v33, 4  ;;  %v1168_v16 = vmax.f32 %v1166_v1, %v1167_v11 }
  0xe1   :  { %3356 = vst [vmem:[#allocation61_spill] sm:$0xff] %v2711_v19  ;;  %v2721_v32 = vmax.f32 %v1127_v8, %v1128_v49  ;;  %v1175_v63 = vsel %vm264_vm0, %v210_v2, -inf  ;;  %v1176_v37 = vsel %vm266_vm1, %v211_v14, -inf  ;;  %v1137_v27 = vrot.slane %v1136_v20, 1 }
  0xe2   :  { %v1145_v19 = vmax.f32 %v1143_v54, %v1144_v36  ;;  %v1153_v5 = vrot.slane %v1152_v53, 2  ;;  %v1161_v18 = vmax.f32 %v1159_v33, %v1160_v61  ;;  %v1169_v41 = vrot.slane %v1168_v16, 4  ;;  %v216_v36 = vld [vmem:[%s3295_s0 + $0x680] sm:$0xff]  ;;  %v217_v54 = vld [vmem:[%s3295_s0 + $0x688] sm:$0x1] }
  0xe3   :  { %3357 = vst [vmem:[#allocation62_spill] sm:$0xff] %v2721_v32  ;;  %v1177_v8 = vmax.f32 %v1175_v63, %v1176_v37  ;;  %v1184_v10 = vsel %vm264_vm0, %v212_v28, -inf  ;;  %v1185_v2 = vsel %vm266_vm1, %v213_v26, -inf  ;;  %v2733_v60 = vmax.f32 %v1136_v20, %v1137_v27  ;;  %v219_v37 = vld [vmem:[%s3295_s0 + $0x698] sm:$0x1] }
  0xe4   :  { %v1146_v14 = vrot.slane %v1145_v19, 1  ;;  %v1154_v49 = vmax.f32 %v1152_v53, %v1153_v5  ;;  %v1162_v1 = vrot.slane %v1161_v18, 2  ;;  %v1170_v33 = vmax.f32 %v1168_v16, %v1169_v41  ;;  %v218_v53 = vld [vmem:[%s3295_s0 + $0x690] sm:$0xff] }
  0xe5   :  { %3358 = vst [vmem:[#allocation63_spill] sm:$0xff] %v2733_v60  ;;  %v1178_v11 = vrot.slane %v1177_v8, 4  ;;  %v1186_v61 = vmax.f32 %v1184_v10, %v1185_v2  ;;  %v1193_v28 = vsel %vm264_vm0, %v214_v31, -inf  ;;  %v1194_v5 = vsel %vm266_vm1, %v215_v48, -inf  ;;  %v220_v48 = vld [vmem:[%s3295_s0 + $0x6a0] sm:$0xff] }
  0xe6   :  { %v2742_v63 = vmax.f32 %v1145_v19, %v1146_v14  ;;  %v1155_v26 = vrot.slane %v1154_v49, 1  ;;  %v1163_v20 = vmax.f32 %v1161_v18, %v1162_v1  ;;  %v1171_v27 = vrot.slane %v1170_v33, 2  ;;  %v221_v14 = vld [vmem:[%s3295_s0 + $0x6a8] sm:$0x1] }
  0xe7   :  { %v1179_v16 = vmax.f32 %v1177_v8, %v1178_v11  ;;  %v1187_v41 = vrot.slane %v1186_v61, 4  ;;  %v1195_v10 = vmax.f32 %v1193_v28, %v1194_v5  ;;  %v1202_v31 = vsel %vm264_vm0, %v216_v36, -inf }
  0xe8   :  { %3359 = vst [vmem:[#allocation64_spill] sm:$0xff] %v2742_v63  ;;  %v2751_v2 = vmax.f32 %v1154_v49, %v1155_v26  ;;  %v1164_v19 = vrot.slane %v1163_v20, 1  ;;  %v1203_v18 = vsel %vm266_vm1, %v217_v54, -inf  ;;  %v1172_v1 = vmax.f32 %v1170_v33, %v1171_v27  ;;  %v222_v54 = vld [vmem:[%s3295_s0 + $0x6b0] sm:$0xff]  ;;  %v223_v33 = vld [vmem:[%s3295_s0 + $0x6b8] sm:$0x1] }
  0xe9   :  { %v1180_v32 = vrot.slane %v1179_v16, 2  ;;  %v1188_v8 = vmax.f32 %v1186_v61, %v1187_v41  ;;  %v1196_v11 = vrot.slane %v1195_v10, 4  ;;  %v1204_v49 = vmax.f32 %v1202_v31, %v1203_v18 }
  0xea   :  { %3360 = vst [vmem:[#allocation65_spill] sm:$0xff] %v2751_v2  ;;  %v2761_v28 = vmax.f32 %v1163_v20, %v1164_v19  ;;  %v1211_v26 = vsel %vm264_vm0, %v218_v53, -inf  ;;  %v1212_v36 = vsel %vm266_vm1, %v219_v37, -inf  ;;  %v1173_v5 = vrot.slane %v1172_v1, 1 }
  0xeb   :  { %v1181_v2 = vmax.f32 %v1179_v16, %v1180_v32  ;;  %v1189_v63 = vrot.slane %v1188_v8, 2  ;;  %v1197_v60 = vmax.f32 %v1195_v10, %v1196_v11  ;;  %v1205_v61 = vrot.slane %v1204_v49, 4  ;;  %v224_v32 = vld [vmem:[%s3295_s0 + $0x6c0] sm:$0xff]  ;;  %v225_v16 = vld [vmem:[%s3295_s0 + $0x6c8] sm:$0x1] }
  0xec   :  { %3361 = vst [vmem:[#allocation66_spill] sm:$0xff] %v2761_v28  ;;  %v1213_v20 = vmax.f32 %v1211_v26, %v1212_v36  ;;  %v1220_v27 = vsel %vm264_vm0, %v220_v48, -inf  ;;  %v1221_v53 = vsel %vm266_vm1, %v221_v14, -inf  ;;  %v2773_v41 = vmax.f32 %v1172_v1, %v1173_v5  ;;  %v227_v36 = vld [vmem:[%s3295_s0 + $0x6d8] sm:$0x1] }
  0xed   :  { %v1182_v37 = vrot.slane %v1181_v2, 1  ;;  %v1190_v19 = vmax.f32 %v1188_v8, %v1189_v63  ;;  %v1198_v31 = vrot.slane %v1197_v60, 2  ;;  %v1206_v10 = vmax.f32 %v1204_v49, %v1205_v61  ;;  %v226_v8 = vld [vmem:[%s3295_s0 + $0x6d0] sm:$0xff] }
  0xee   :  { %3362 = vst [vmem:[#allocation67_spill] sm:$0xff] %v2773_v41  ;;  %v1214_v18 = vrot.slane %v1213_v20, 4  ;;  %v1222_v11 = vmax.f32 %v1220_v27, %v1221_v53  ;;  %v1229_v48 = vsel %vm264_vm0, %v222_v54, -inf  ;;  %v1230_v63 = vsel %vm266_vm1, %v223_v33, -inf  ;;  %v228_v33 = vld [vmem:[%s3295_s0 + $0x6e0] sm:$0xff] }
  0xef   :  { %v2782_v26 = vmax.f32 %v1181_v2, %v1182_v37  ;;  %v1191_v14 = vrot.slane %v1190_v19, 1  ;;  %v1199_v1 = vmax.f32 %v1197_v60, %v1198_v31  ;;  %v1207_v5 = vrot.slane %v1206_v10, 2  ;;  %v229_v37 = vld [vmem:[%s3295_s0 + $0x6e8] sm:$0x1] }
  0xf0   :  { %v1215_v49 = vmax.f32 %v1213_v20, %v1214_v18  ;;  %v1223_v61 = vrot.slane %v1222_v11, 4  ;;  %v1231_v27 = vmax.f32 %v1229_v48, %v1230_v63  ;;  %v1238_v54 = vsel %vm264_vm0, %v224_v32, -inf }
  0xf1   :  { %3363 = vst [vmem:[#allocation68_spill] sm:$0xff] %v2782_v26  ;;  %v2791_v53 = vmax.f32 %v1190_v19, %v1191_v14  ;;  %v1200_v2 = vrot.slane %v1199_v1, 1  ;;  %v1239_v60 = vsel %vm266_vm1, %v225_v16, -inf  ;;  %v1208_v31 = vmax.f32 %v1206_v10, %v1207_v5  ;;  %v230_v16 = vld [vmem:[%s3295_s0 + $0x6f0] sm:$0xff]  ;;  %v231_v10 = vld [vmem:[%s3295_s0 + $0x6f8] sm:$0x1] }
  0xf2   :  { %v1216_v26 = vrot.slane %v1215_v49, 2  ;;  %v1224_v20 = vmax.f32 %v1222_v11, %v1223_v61  ;;  %v1232_v18 = vrot.slane %v1231_v27, 4  ;;  %v1240_v19 = vmax.f32 %v1238_v54, %v1239_v60 }
  0xf3   :  { %3364 = vst [vmem:[#allocation69_spill] sm:$0xff] %v2791_v53  ;;  %v2801_v48 = vmax.f32 %v1199_v1, %v1200_v2  ;;  %v1247_v14 = vsel %vm264_vm0, %v226_v8, -inf  ;;  %v1248_v32 = vsel %vm266_vm1, %v227_v36, -inf  ;;  %v1209_v63 = vrot.slane %v1208_v31, 1 }
  0xf4   :  { %v1217_v53 = vmax.f32 %v1215_v49, %v1216_v26  ;;  %v1225_v41 = vrot.slane %v1224_v20, 2  ;;  %v1233_v28 = vmax.f32 %v1231_v27, %v1232_v18  ;;  %v1241_v11 = vrot.slane %v1240_v19, 4  ;;  %v232_v26 = vld [vmem:[%s3295_s0 + $0x700] sm:$0xff]  ;;  %v233_v49 = vld [vmem:[%s3295_s0 + $0x708] sm:$0x1] }
  0xf5   :  { %3365 = vst [vmem:[#allocation70_spill] sm:$0xff] %v2801_v48  ;;  %v1249_v1 = vmax.f32 %v1247_v14, %v1248_v32  ;;  %v1256_v5 = vsel %vm264_vm0, %v228_v33, -inf  ;;  %v1257_v8 = vsel %vm266_vm1, %v229_v37, -inf  ;;  %v2813_v61 = vmax.f32 %v1208_v31, %v1209_v63  ;;  %v235_v32 = vld [vmem:[%s3295_s0 + $0x718] sm:$0x1] }
  0xf6   :  { %v1218_v36 = vrot.slane %v1217_v53, 1  ;;  %v1226_v2 = vmax.f32 %v1224_v20, %v1225_v41  ;;  %v1234_v54 = vrot.slane %v1233_v28, 2  ;;  %v1242_v27 = vmax.f32 %v1240_v19, %v1241_v11  ;;  %v234_v20 = vld [vmem:[%s3295_s0 + $0x710] sm:$0xff] }
  0xf7   :  { %3366 = vst [vmem:[#allocation71_spill] sm:$0xff] %v2813_v61  ;;  %v1250_v60 = vrot.slane %v1249_v1, 4  ;;  %v1258_v18 = vmax.f32 %v1256_v5, %v1257_v8  ;;  %v1265_v33 = vsel %vm264_vm0, %v230_v16, -inf  ;;  %v1266_v41 = vsel %vm266_vm1, %v231_v10, -inf  ;;  %v236_v10 = vld [vmem:[%s3295_s0 + $0x720] sm:$0xff] }
  0xf8   :  { %v2822_v14 = vmax.f32 %v1217_v53, %v1218_v36  ;;  %v1227_v37 = vrot.slane %v1226_v2, 1  ;;  %v1235_v31 = vmax.f32 %v1233_v28, %v1234_v54  ;;  %v1243_v63 = vrot.slane %v1242_v27, 2  ;;  %v237_v36 = vld [vmem:[%s3295_s0 + $0x728] sm:$0x1] }
  0xf9   :  { %v1251_v19 = vmax.f32 %v1249_v1, %v1250_v60  ;;  %v1259_v11 = vrot.slane %v1258_v18, 4  ;;  %v1267_v5 = vmax.f32 %v1265_v33, %v1266_v41  ;;  %v1274_v16 = vsel %vm264_vm0, %v232_v26, -inf }
  0xfa   :  { %3367 = vst [vmem:[#allocation72_spill] sm:$0xff] %v2822_v14  ;;  %v2831_v8 = vmax.f32 %v1226_v2, %v1227_v37  ;;  %v1236_v53 = vrot.slane %v1235_v31, 1  ;;  %v1275_v28 = vsel %vm266_vm1, %v233_v49, -inf  ;;  %v1244_v54 = vmax.f32 %v1242_v27, %v1243_v63  ;;  %v238_v49 = vld [vmem:[%s3295_s0 + $0x730] sm:$0xff]  ;;  %v239_v27 = vld [vmem:[%s3295_s0 + $0x738] sm:$0x1] }
  0xfb   :  { %v1252_v48 = vrot.slane %v1251_v19, 2  ;;  %v1260_v1 = vmax.f32 %v1258_v18, %v1259_v11  ;;  %v1268_v60 = vrot.slane %v1267_v5, 4  ;;  %v1276_v2 = vmax.f32 %v1274_v16, %v1275_v28 }
  0xfc   :  { %3368 = vst [vmem:[#allocation73_spill] sm:$0xff] %v2831_v8  ;;  %v2841_v33 = vmax.f32 %v1235_v31, %v1236_v53  ;;  %v1283_v37 = vsel %vm264_vm0, %v234_v20, -inf  ;;  %v1284_v26 = vsel %vm266_vm1, %v235_v32, -inf  ;;  %v1245_v41 = vrot.slane %v1244_v54, 1 }
  0xfd   :  { %v1253_v8 = vmax.f32 %v1251_v19, %v1252_v48  ;;  %v1261_v14 = vrot.slane %v1260_v1, 2  ;;  %v1269_v61 = vmax.f32 %v1267_v5, %v1268_v60  ;;  %v1277_v18 = vrot.slane %v1276_v2, 4  ;;  %v240_v48 = vld [vmem:[%s3295_s0 + $0x740] sm:$0xff]  ;;  %v241_v19 = vld [vmem:[%s3295_s0 + $0x748] sm:$0x1] }
  0xfe   :  { %3369 = vst [vmem:[#allocation74_spill] sm:$0xff] %v2841_v33  ;;  %v1285_v31 = vmax.f32 %v1283_v37, %v1284_v26  ;;  %v1292_v63 = vsel %vm264_vm0, %v236_v10, -inf  ;;  %v1293_v20 = vsel %vm266_vm1, %v237_v36, -inf  ;;  %v2853_v11 = vmax.f32 %v1244_v54, %v1245_v41  ;;  %v243_v26 = vld [vmem:[%s3295_s0 + $0x758] sm:$0x1] }
  0xff   :  { %v1254_v32 = vrot.slane %v1253_v8, 1  ;;  %v1262_v53 = vmax.f32 %v1260_v1, %v1261_v14  ;;  %v1270_v16 = vrot.slane %v1269_v61, 2  ;;  %v1278_v5 = vmax.f32 %v1276_v2, %v1277_v18  ;;  %v242_v1 = vld [vmem:[%s3295_s0 + $0x750] sm:$0xff] }
 0x100   :  { %3370 = vst [vmem:[#allocation75_spill] sm:$0xff] %v2853_v11  ;;  %v1286_v28 = vrot.slane %v1285_v31, 4  ;;  %v1294_v60 = vmax.f32 %v1292_v63, %v1293_v20  ;;  %v1301_v10 = vsel %vm264_vm0, %v238_v49, -inf  ;;  %v1302_v14 = vsel %vm266_vm1, %v239_v27, -inf  ;;  %v244_v27 = vld [vmem:[%s3295_s0 + $0x760] sm:$0xff] }
 0x101   :  { %v2862_v37 = vmax.f32 %v1253_v8, %v1254_v32  ;;  %v1263_v36 = vrot.slane %v1262_v53, 1  ;;  %v1271_v54 = vmax.f32 %v1269_v61, %v1270_v16  ;;  %v1279_v41 = vrot.slane %v1278_v5, 2  ;;  %v245_v32 = vld [vmem:[%s3295_s0 + $0x768] sm:$0x1] }
 0x102   :  { %v1287_v2 = vmax.f32 %v1285_v31, %v1286_v28  ;;  %v1295_v18 = vrot.slane %v1294_v60, 4  ;;  %v1303_v63 = vmax.f32 %v1301_v10, %v1302_v14  ;;  %v1310_v49 = vsel %vm264_vm0, %v240_v48, -inf }
 0x103   :  { %3371 = vst [vmem:[#allocation76_spill] sm:$0xff] %v2862_v37  ;;  %v2871_v20 = vmax.f32 %v1262_v53, %v1263_v36  ;;  %v1272_v8 = vrot.slane %v1271_v54, 1  ;;  %v1311_v61 = vsel %vm266_vm1, %v241_v19, -inf  ;;  %v1280_v16 = vmax.f32 %v1278_v5, %v1279_v41  ;;  %v246_v19 = vld [vmem:[%s3295_s0 + $0x770] sm:$0xff]  ;;  %v247_v5 = vld [vmem:[%s3295_s0 + $0x778] sm:$0x1] }
 0x104   :  { %v1288_v37 = vrot.slane %v1287_v2, 2  ;;  %v1296_v31 = vmax.f32 %v1294_v60, %v1295_v18  ;;  %v1304_v28 = vrot.slane %v1303_v63, 4  ;;  %v1312_v53 = vmax.f32 %v1310_v49, %v1311_v61 }
 0x105   :  { %3372 = vst [vmem:[#allocation77_spill] sm:$0xff] %v2871_v20  ;;  %v2881_v10 = vmax.f32 %v1271_v54, %v1272_v8  ;;  %v1319_v36 = vsel %vm264_vm0, %v242_v1, -inf  ;;  %v1320_v48 = vsel %vm266_vm1, %v243_v26, -inf  ;;  %v1281_v14 = vrot.slane %v1280_v16, 1 }
 0x106   :  { %v1289_v20 = vmax.f32 %v1287_v2, %v1288_v37  ;;  %v1297_v11 = vrot.slane %v1296_v31, 2  ;;  %v1305_v33 = vmax.f32 %v1303_v63, %v1304_v28  ;;  %v1313_v60 = vrot.slane %v1312_v53, 4  ;;  %v248_v37 = vld [vmem:[%s3295_s0 + $0x780] sm:$0xff]  ;;  %v249_v2 = vld [vmem:[%s3295_s0 + $0x788] sm:$0x1] }
 0x107   :  { %3373 = vst [vmem:[#allocation78_spill] sm:$0xff] %v2881_v10  ;;  %v1321_v54 = vmax.f32 %v1319_v36, %v1320_v48  ;;  %v1328_v41 = vsel %vm264_vm0, %v244_v27, -inf  ;;  %v1329_v1 = vsel %vm266_vm1, %v245_v32, -inf  ;;  %v2893_v18 = vmax.f32 %v1280_v16, %v1281_v14  ;;  %v251_v48 = vld [vmem:[%s3295_s0 + $0x798] sm:$0x1] }
 0x108   :  { %v1290_v26 = vrot.slane %v1289_v20, 1  ;;  %v1298_v8 = vmax.f32 %v1296_v31, %v1297_v11  ;;  %v1306_v49 = vrot.slane %v1305_v33, 2  ;;  %v1314_v63 = vmax.f32 %v1312_v53, %v1313_v60  ;;  %v250_v31 = vld [vmem:[%s3295_s0 + $0x790] sm:$0xff] }
 0x109   :  { %3374 = vst [vmem:[#allocation79_spill] sm:$0xff] %v2893_v18  ;;  %v1322_v61 = vrot.slane %v1321_v54, 4  ;;  %v1330_v28 = vmax.f32 %v1328_v41, %v1329_v1  ;;  %v1337_v27 = vsel %vm264_vm0, %v246_v19, -inf  ;;  %v1338_v11 = vsel %vm266_vm1, %v247_v5, -inf  ;;  %v252_v5 = vld [vmem:[%s3295_s0 + $0x7a0] sm:$0xff] }
 0x10a   :  { %v2902_v36 = vmax.f32 %v1289_v20, %v1290_v26  ;;  %v1299_v32 = vrot.slane %v1298_v8, 1  ;;  %v1307_v16 = vmax.f32 %v1305_v33, %v1306_v49  ;;  %v1315_v14 = vrot.slane %v1314_v63, 2  ;;  %v253_v26 = vld [vmem:[%s3295_s0 + $0x7a8] sm:$0x1] }
 0x10b   :  { %v1323_v53 = vmax.f32 %v1321_v54, %v1322_v61  ;;  %v1331_v60 = vrot.slane %v1330_v28, 4  ;;  %v1339_v41 = vmax.f32 %v1337_v27, %v1338_v11  ;;  %v1346_v19 = vsel %vm264_vm0, %v248_v37, -inf }
 0x10c   :  { %3375 = vst [vmem:[#allocation80_spill] sm:$0xff] %v2902_v36  ;;  %v2911_v1 = vmax.f32 %v1298_v8, %v1299_v32  ;;  %v1308_v20 = vrot.slane %v1307_v16, 1  ;;  %v1347_v33 = vsel %vm266_vm1, %v249_v2, -inf  ;;  %v1316_v49 = vmax.f32 %v1314_v63, %v1315_v14  ;;  %v254_v2 = vld [vmem:[%s3295_s0 + $0x7b0] sm:$0xff]  ;;  %v255_v63 = vld [vmem:[%s3295_s0 + $0x7b8] sm:$0x1] }
 0x10d   :  { %v1324_v10 = vrot.slane %v1323_v53, 2  ;;  %v1332_v54 = vmax.f32 %v1330_v28, %v1331_v60  ;;  %v1340_v61 = vrot.slane %v1339_v41, 4  ;;  %v1348_v8 = vmax.f32 %v1346_v19, %v1347_v33 }
 0x10e   :  { %3376 = vst [vmem:[#allocation81_spill] sm:$0xff] %v2911_v1  ;;  %v2921_v27 = vmax.f32 %v1307_v16, %v1308_v20  ;;  %v1355_v32 = vsel %vm264_vm0, %v250_v31, -inf  ;;  %v1356_v37 = vsel %vm266_vm1, %v251_v48, -inf  ;;  %v1317_v11 = vrot.slane %v1316_v49, 1 }
 0x10f   :  { %v1325_v1 = vmax.f32 %v1323_v53, %v1324_v10  ;;  %v1333_v36 = vrot.slane %v1332_v54, 2  ;;  %v1341_v18 = vmax.f32 %v1339_v41, %v1340_v61  ;;  %v1349_v28 = vrot.slane %v1348_v8, 4  ;;  %v256_v10 = vld [vmem:[%s3295_s0 + $0x7c0] sm:$0xff]  ;;  %v257_v53 = vld [vmem:[%s3295_s0 + $0x7c8] sm:$0x1] }
 0x110   :  { %3377 = vst [vmem:[#allocation82_spill] sm:$0xff] %v2921_v27  ;;  %v1357_v16 = vmax.f32 %v1355_v32, %v1356_v37  ;;  %v1364_v14 = vsel %vm264_vm0, %v252_v5, -inf  ;;  %v1365_v31 = vsel %vm266_vm1, %v253_v26, -inf  ;;  %v2933_v60 = vmax.f32 %v1316_v49, %v1317_v11  ;;  %v259_v37 = vld [vmem:[%s3295_s0 + $0x7d8] sm:$0x1] }
 0x111   :  { %v1326_v48 = vrot.slane %v1325_v1, 1  ;;  %v1334_v20 = vmax.f32 %v1332_v54, %v1333_v36  ;;  %v1342_v19 = vrot.slane %v1341_v18, 2  ;;  %v1350_v41 = vmax.f32 %v1348_v8, %v1349_v28  ;;  %v258_v54 = vld [vmem:[%s3295_s0 + $0x7d0] sm:$0xff] }
 0x112   :  { %3378 = vst [vmem:[#allocation83_spill] sm:$0xff] %v2933_v60  ;;  %v1358_v33 = vrot.slane %v1357_v16, 4  ;;  %v1366_v61 = vmax.f32 %v1364_v14, %v1365_v31  ;;  %v1373_v5 = vsel %vm264_vm0, %v254_v2, -inf  ;;  %v1374_v36 = vsel %vm266_vm1, %v255_v63, -inf  ;;  %v260_v63 = vld [vmem:[%s3295_s0 + $0x7e0] sm:$0xff] }
 0x113   :  { %v2942_v32 = vmax.f32 %v1325_v1, %v1326_v48  ;;  %v1335_v26 = vrot.slane %v1334_v20, 1  ;;  %v1343_v49 = vmax.f32 %v1341_v18, %v1342_v19  ;;  %v1351_v11 = vrot.slane %v1350_v41, 2  ;;  %v261_v48 = vld [vmem:[%s3295_s0 + $0x7e8] sm:$0x1] }
 0x114   :  { %v1359_v8 = vmax.f32 %v1357_v16, %v1358_v33  ;;  %v1367_v28 = vrot.slane %v1366_v61, 4  ;;  %v1375_v14 = vmax.f32 %v1373_v5, %v1374_v36  ;;  %v1382_v2 = vsel %vm264_vm0, %v256_v10, -inf }
 0x115   :  { %3379 = vst [vmem:[#allocation84_spill] sm:$0xff] %v2942_v32  ;;  %v2951_v31 = vmax.f32 %v1334_v20, %v1335_v26  ;;  %v1344_v1 = vrot.slane %v1343_v49, 1  ;;  %v1383_v18 = vsel %vm266_vm1, %v257_v53, -inf  ;;  %v1352_v19 = vmax.f32 %v1350_v41, %v1351_v11  ;;  %v262_v53 = vld [vmem:[%s3295_s0 + $0x7f0] sm:$0xff]  ;;  %v263_v41 = vld [vmem:[%s3295_s0 + $0x7f8] sm:$0x1] }
 0x116   :  { %v1360_v32 = vrot.slane %v1359_v8, 2  ;;  %v1368_v16 = vmax.f32 %v1366_v61, %v1367_v28  ;;  %v1376_v33 = vrot.slane %v1375_v14, 4  ;;  %v1384_v20 = vmax.f32 %v1382_v2, %v1383_v18 }
 0x117   :  { %3380 = vst [vmem:[#allocation85_spill] sm:$0xff] %v2951_v31  ;;  %v2961_v5 = vmax.f32 %v1343_v49, %v1344_v1  ;;  %v1391_v26 = vsel %vm264_vm0, %v258_v54, -inf  ;;  %v1392_v10 = vsel %vm266_vm1, %v259_v37, -inf  ;;  %v1353_v36 = vrot.slane %v1352_v19, 1 }
 0x118   :  { %v1361_v31 = vmax.f32 %v1359_v8, %v1360_v32  ;;  %v1369_v60 = vrot.slane %v1368_v16, 2  ;;  %v1377_v27 = vmax.f32 %v1375_v14, %v1376_v33  ;;  %v1385_v61 = vrot.slane %v1384_v20, 4 }
 0x119   :  { %3381 = vst [vmem:[#allocation86_spill] sm:$0xff] %v2961_v5  ;;  %v1393_v49 = vmax.f32 %v1391_v26, %v1392_v10  ;;  %v1400_v11 = vsel %vm264_vm0, %v260_v63, -inf  ;;  %v1401_v54 = vsel %vm266_vm1, %v261_v48, -inf  ;;  %v2973_v28 = vmax.f32 %v1352_v19, %v1353_v36 }
 0x11a   :  { %v1362_v37 = vrot.slane %v1361_v31, 1  ;;  %v1370_v1 = vmax.f32 %v1368_v16, %v1369_v60  ;;  %v1378_v2 = vrot.slane %v1377_v27, 2  ;;  %v1386_v18 = vmax.f32 %v1384_v20, %v1385_v61 }
 0x11b   :  { %v1394_v5 = vrot.slane %v1393_v49, 4  ;;  %v1402_v32 = vmax.f32 %v1400_v11, %v1401_v54  ;;  %v1409_v8 = vsel %vm264_vm0, %v262_v53, -inf  ;;  %v1410_v26 = vsel %vm266_vm1, %v263_v41, -inf }
 0x11c   :  { %v2976_v14 = vmax.f32 %v1361_v31, %v1362_v37  ;;  %v1371_v33 = vrot.slane %v1370_v1, 1  ;;  %v1379_v3 = vmax.f32 %v1377_v27, %v1378_v2  ;;  %v1387_v10 = vrot.slane %v1386_v18, 2 }
 0x11d   :  { %v1395_v63 = vmax.f32 %v1393_v49, %v1394_v5  ;;  %v1403_v58 = vrot.slane %v1402_v32, 4  ;;  %v1411_v48 = vmax.f32 %v1409_v8, %v1410_v26  ;;  %v1547_v27 = vsel %vm1546_vm2, %v1834_v43, %v1832_v42 }
 0x11e   :  { %v2979_v19 = vmax.f32 %v1370_v1, %v1371_v33  ;;  %v1380_v36 = vrot.slane %v1379_v3, 1  ;;  %v1388_v60 = vmax.f32 %v1386_v18, %v1387_v10  ;;  %v1549_v11 = vsel %vm1548_vm3, %v1836_v44, %v1547_v27  ;;  %v3382_v10 = vld [vmem:[#allocation2_spill] sm:$0xff] }
 0x11f   :  { %v1396_v16 = vrot.slane %v1395_v63, 2  ;;  %v1404_v20 = vmax.f32 %v1402_v32, %v1403_v58  ;;  %v1412_v61 = vrot.slane %v1411_v48, 4  ;;  %vm1554_vm6 = vcmask 1045509  }
 0x120   :  { %v2981_v53 = vmax.f32 %v1379_v3, %v1380_v36  ;;  %v1389_v31 = vrot.slane %v1388_v60, 1  ;;  %vm1556_vm7 = vcmask 1046534   ;;  %vm1558_vm8 = vcmask 1047559  }
 0x121   :  { %v1397_v5 = vmax.f32 %v1395_v63, %v1396_v16  ;;  %v1405_v41 = vrot.slane %v1404_v20, 2  ;;  %v1413_v49 = vmax.f32 %v1411_v48, %v1412_v61  ;;  %v1551_v42 = vsel %vm1550_vm4, %v1860_v7, %v1549_v11  ;;  %v3387_v48 = vld [vmem:[#allocation15_spill] sm:$0xff]  ;;  %v3390_v16 = vld [vmem:[#allocation24_spill] sm:$0xff]  ;;  %v3394_v11 = vld [vmem:[#allocation25_spill] sm:$0xff] }
 0x122   :  { %v2988_v58 = vmax.f32 %v1388_v60, %v1389_v31  ;;  %v1560_v43 = vsel %vm1546_vm2, %v1903_v62, %v1894_v57  ;;  %v1567_v1 = vsel %vm1546_vm2, %v1958_v22, %v1956_v21  ;;  %v1574_v44 = vsel %vm1546_vm2, %v2027_v59, %v2016_v35  ;;  %v3389_v60 = vld [vmem:[#allocation23_spill] sm:$0xff]  ;;  %v3391_v61 = vld [vmem:[#allocation4_spill] sm:$0xff]  ;;  %v3392_v31 = vld [vmem:[#allocation10_spill] sm:$0xff] }
 0x123   :  { %v1398_v3 = vrot.slane %v1397_v5, 1  ;;  %v1406_v54 = vmax.f32 %v1404_v20, %v1405_v41  ;;  %v1414_v37 = vrot.slane %v1413_v49, 2  ;;  %v1553_v8 = vsel %vm1552_vm5, %v1869_v13, %v1551_v42  ;;  %v3393_v41 = vld [vmem:[#allocation17_spill] sm:$0xff]  ;;  %v3396_v42 = vld [vmem:[#allocation11_spill] sm:$0xff] }
 0x124   :  { %v1555_v7 = vsel %vm1554_vm6, %v1871_v17, %v1553_v8  ;;  %v1561_v57 = vsel %vm1548_vm3, %v1916_v24, %v1560_v43  ;;  %v1568_v62 = vsel %vm1548_vm3, %v1960_v23, %v1567_v1  ;;  %v1575_v21 = vsel %vm1548_vm3, %v2033_v6, %v1574_v44  ;;  %v3397_v1 = vld [vmem:[#allocation18_spill] sm:$0xff] }
 0x125   :  { %v3001_v2 = vmax.f32 %v1397_v5, %v1398_v3  ;;  %v1407_v18 = vrot.slane %v1406_v54, 1  ;;  %v1415_v32 = vmax.f32 %v1413_v49, %v1414_v37  ;;  %v1557_v59 = vsel %vm1556_vm7, %v1881_v29, %v1555_v7  ;;  %v3399_v8 = vld [vmem:[#allocation6_spill] sm:$0xff] }
 0x126   :  { %v1562_v13 = vsel %vm1550_vm4, %v1924_v45, %v1561_v57  ;;  %v1559_v17 = vsel %vm1558_vm8, %v1892_v56, %v1557_v59  ;;  %v1569_v23 = vsel %vm1550_vm4, %v1965_v30, %v1568_v62  ;;  %v1576_v6 = vsel %vm1550_vm4, %v2042_v25, %v1575_v21  ;;  %v3400_v57 = vld [vmem:[#allocation12_spill] sm:$0xff]  ;;  %v3401_v21 = vld [vmem:[#allocation19_spill] sm:$0xff] }
 0x127   :  { %v3013_v22 = vmax.f32 %v1406_v54, %v1407_v18  ;;  %v1416_v35 = vrot.slane %v1415_v32, 1  ;;  %v1563_v24 = vsel %vm1552_vm5, %v1926_v46, %v1562_v13  ;;  %v1570_v45 = vsel %vm1552_vm5, %v1974_v34, %v1569_v23  ;;  %1681 = vst.msk [vmem:[%s3296_s1] sm:$0xff] %vm264_vm0, %v1559_v17  ;;  %v3395_v54 = vld [vmem:[#allocation5_spill] sm:$0xff]  ;;  %v3398_v18 = vld [vmem:[#allocation26_spill] sm:$0xff]  ;;  %v3402_v59 = vld [vmem:[#allocation27_spill] sm:$0xff] }
 0x128   :  { %v1564_v29 = vsel %vm1554_vm6, %v1935_v51, %v1563_v24  ;;  %v1577_v56 = vsel %vm1552_vm5, %v2051_v40, %v1576_v6  ;;  %v1571_v30 = vsel %vm1554_vm6, %v1980_v39, %v1570_v45  ;;  %v1581_v34 = vsel %vm1546_vm2, %v2102_v12, %v2091_v50  ;;  %v3383_v12 = vld [vmem:[#allocation7_spill] sm:$0xff]  ;;  %v3403_v17 = vld [vmem:[#allocation13_spill] sm:$0xff]  ;;  %v3404_v23 = vld [vmem:[#allocation20_spill] sm:$0xff] }
 0x129   :  { %v3027_v33 = vmax.f32 %v1415_v32, %v1416_v35  ;;  %v1565_v46 = vsel %vm1556_vm7, %v1945_v9, %v1564_v29  ;;  %v1578_v51 = vsel %vm1554_vm6, %v2061_v52, %v1577_v56  ;;  %v1572_v40 = vsel %vm1556_vm7, %v1990_v55, %v1571_v30  ;;  %v3385_v55 = vld [vmem:[#allocation3_spill] sm:$0xff]  ;;  %v3405_v29 = vld [vmem:[#allocation28_spill] sm:$0xff] }
 0x12a   :  { %v1566_v25 = vsel %vm1558_vm8, %v1950_v15, %v1565_v46  ;;  %v1579_v26 = vsel %vm1556_vm7, %v2071_v4, %v1578_v51  ;;  %v1582_v9 = vsel %vm1548_vm3, %v2116_v47, %v1581_v34  ;;  %v1573_v39 = vsel %vm1558_vm8, %v2000_v0, %v1572_v40  ;;  %v3384_v15 = vld [vmem:[#allocation8_spill] sm:$0xff]  ;;  %v3386_v47 = vld [vmem:[#allocation9_spill] sm:$0xff]  ;;  %v3406_v56 = vld [vmem:[#allocation31_spill] sm:$0xff] }
 0x12b   :  { %v1580_v52 = vsel %vm1558_vm8, %v2086_v38, %v1579_v26  ;;  %v1583_v50 = vsel %vm1550_vm4, %v3382_v10, %v1582_v9  ;;  %v1588_v63 = vsel %vm1546_vm2, %v3384_v15, %v3383_v12  ;;  %1682 = vst.msk [vmem:[%s3296_s1 + $0x8] sm:$0xff] %vm264_vm0, %v1566_v25  ;;  %v3388_v38 = vld [vmem:[#allocation16_spill] sm:$0xff]  ;;  %v1602_v20 = vsel %vm1546_vm2, %v3390_v16, %v3389_v60  ;;  %v3408_v51 = vld [vmem:[#allocation14_spill] sm:$0xff]  ;;  %v3409_v25 = vld [vmem:[#allocation21_spill] sm:$0xff] }
 0x12c   :  { %v1584_v4 = vsel %vm1552_vm5, %v3385_v55, %v1583_v50  ;;  %v1589_v0 = vsel %vm1548_vm3, %v3386_v47, %v1588_v63  ;;  %v1595_v36 = vsel %vm1546_vm2, %v3388_v38, %v3387_v48  ;;  %1683 = vst.msk [vmem:[%s3296_s1 + $0x10] sm:$0xff] %vm264_vm0, %v1573_v39  ;;  %1684 = vst.msk [vmem:[%s3296_s1 + $0x18] sm:$0xff] %vm264_vm0, %v1580_v52  ;;  %v3407_v46 = vld [vmem:[#allocation32_spill] sm:$0xff]  ;;  %v3410_v26 = vld [vmem:[#allocation29_spill] sm:$0xff] }
 0x12d   :  { %v1585_v27 = vsel %vm1554_vm6, %v3391_v61, %v1584_v4  ;;  %v1590_v5 = vsel %vm1550_vm4, %v3392_v31, %v1589_v0  ;;  %v1596_v49 = vsel %vm1548_vm3, %v3393_v41, %v1595_v36  ;;  %v1603_v3 = vsel %vm1548_vm3, %v3394_v11, %v1602_v20  ;;  %v3411_v39 = vld [vmem:[#allocation33_spill] sm:$0xff]  ;;  %v3412_v10 = vld [vmem:[#allocation22_spill] sm:$0xff]  ;;  %v3415_v4 = vld [vmem:[#allocation39_spill] sm:$0xff] }
 0x12e   :  { %v1586_v37 = vsel %vm1556_vm7, %v3395_v54, %v1585_v27  ;;  %v1591_v43 = vsel %vm1552_vm5, %v3396_v42, %v1590_v5  ;;  %v1597_v44 = vsel %vm1550_vm4, %v3397_v1, %v1596_v49  ;;  %v1604_v32 = vsel %vm1550_vm4, %v3398_v18, %v1603_v3  ;;  %v3413_v12 = vld [vmem:[#allocation30_spill] sm:$0xff]  ;;  %v3416_v47 = vld [vmem:[#allocation40_spill] sm:$0xff]  ;;  %v3417_v48 = vld [vmem:[#allocation35_spill] sm:$0xff] }
 0x12f   :  { %v1587_v7 = vsel %vm1558_vm8, %v3399_v8, %v1586_v37  ;;  %v1592_v62 = vsel %vm1554_vm6, %v3400_v57, %v1591_v43  ;;  %v1598_v35 = vsel %vm1552_vm5, %v3401_v21, %v1597_v44  ;;  %v1605_v13 = vsel %vm1552_vm5, %v3402_v59, %v1604_v32  ;;  %v3414_v63 = vld [vmem:[#allocation34_spill] sm:$0xff]  ;;  %v3418_v36 = vld [vmem:[#allocation41_spill] sm:$0xff]  ;;  %v3419_v16 = vld [vmem:[#allocation47_spill] sm:$0xff] }
 0x130   :  { %v1593_v24 = vsel %vm1556_vm7, %v3403_v17, %v1592_v62  ;;  %v1599_v6 = vsel %vm1554_vm6, %v3404_v23, %v1598_v35  ;;  %v1606_v45 = vsel %vm1554_vm6, %v3405_v29, %v1605_v13  ;;  %v1609_v30 = vsel %vm1546_vm2, %v3407_v46, %v3406_v56  ;;  %1685 = vst.msk [vmem:[%s3296_s1 + $0x20] sm:$0xff] %vm264_vm0, %v1587_v7  ;;  %v3420_v20 = vld [vmem:[#allocation48_spill] sm:$0xff]  ;;  %v3421_v27 = vld [vmem:[#allocation55_spill] sm:$0xff]  ;;  %v3424_v11 = vld [vmem:[#allocation42_spill] sm:$0xff] }
 0x131   :  { %v1594_v34 = vsel %vm1558_vm8, %v3408_v51, %v1593_v24  ;;  %v1600_v40 = vsel %vm1556_vm7, %v3409_v25, %v1599_v6  ;;  %v1607_v9 = vsel %vm1556_vm7, %v3410_v26, %v1606_v45  ;;  %v1610_v52 = vsel %vm1548_vm3, %v3411_v39, %v1609_v30  ;;  %v3422_v31 = vld [vmem:[#allocation56_spill] sm:$0xff]  ;;  %v3425_v54 = vld [vmem:[#allocation49_spill] sm:$0xff]  ;;  %v3428_v18 = vld [vmem:[#allocation43_spill] sm:$0xff] }
 0x132   :  { %v1601_v50 = vsel %vm1558_vm8, %v3412_v10, %v1600_v40  ;;  %v1608_v15 = vsel %vm1558_vm8, %v3413_v12, %v1607_v9  ;;  %v1611_v55 = vsel %vm1550_vm4, %v3414_v63, %v1610_v52  ;;  %v1616_v0 = vsel %vm1546_vm2, %v3416_v47, %v3415_v4  ;;  %1686 = vst.msk [vmem:[%s3296_s1 + $0x28] sm:$0xff] %vm264_vm0, %v1594_v34  ;;  %v3423_v41 = vld [vmem:[#allocation36_spill] sm:$0xff]  ;;  %v3426_v42 = vld [vmem:[#allocation57_spill] sm:$0xff]  ;;  %v3429_v8 = vld [vmem:[#allocation50_spill] sm:$0xff] }
 0x133   :  { %v1612_v38 = vsel %vm1552_vm5, %v3417_v48, %v1611_v55  ;;  %v1617_v60 = vsel %vm1548_vm3, %v3418_v36, %v1616_v0  ;;  %v1623_v61 = vsel %vm1546_vm2, %v3420_v20, %v3419_v16  ;;  %v1630_v5 = vsel %vm1546_vm2, %v3422_v31, %v3421_v27  ;;  %1687 = vst.msk [vmem:[%s3296_s1 + $0x30] sm:$0xff] %vm264_vm0, %v1601_v50  ;;  %v3427_v1 = vld [vmem:[#allocation37_spill] sm:$0xff]  ;;  %v3430_v57 = vld [vmem:[#allocation58_spill] sm:$0xff]  ;;  %v3432_v59 = vld [vmem:[#allocation44_spill] sm:$0xff] }
 0x134   :  { %1688 = vst.msk [vmem:[%s3296_s1 + $0x38] sm:$0xff] %vm264_vm0, %v1608_v15  ;;  %v1613_v49 = vsel %vm1554_vm6, %v3423_v41, %v1612_v38  ;;  %v1618_v3 = vsel %vm1550_vm4, %v3424_v11, %v1617_v60  ;;  %v1624_v37 = vsel %vm1548_vm3, %v3425_v54, %v1623_v61  ;;  %v1631_v43 = vsel %vm1548_vm3, %v3426_v42, %v1630_v5  ;;  %v3431_v21 = vld [vmem:[#allocation38_spill] sm:$0xff]  ;;  %v3433_v17 = vld [vmem:[#allocation51_spill] sm:$0xff]  ;;  %v3435_v29 = vld [vmem:[#allocation45_spill] sm:$0xff] }
 0x135   :  { %v1614_v44 = vsel %vm1556_vm7, %v3427_v1, %v1613_v49  ;;  %v1619_v32 = vsel %vm1552_vm5, %v3428_v18, %v1618_v3  ;;  %v1625_v7 = vsel %vm1550_vm4, %v3429_v8, %v1624_v37  ;;  %v1632_v62 = vsel %vm1550_vm4, %v3430_v57, %v1631_v43  ;;  %v3434_v23 = vld [vmem:[#allocation59_spill] sm:$0xff]  ;;  %v3436_v56 = vld [vmem:[#allocation52_spill] sm:$0xff]  ;;  %v3440_v26 = vld [vmem:[#allocation46_spill] sm:$0xff] }
 0x136   :  { %v1615_v35 = vsel %vm1558_vm8, %v3431_v21, %v1614_v44  ;;  %v1620_v13 = vsel %vm1554_vm6, %v3432_v59, %v1619_v32  ;;  %v1626_v24 = vsel %vm1552_vm5, %v3433_v17, %v1625_v7  ;;  %v1633_v6 = vsel %vm1552_vm5, %v3434_v23, %v1632_v62  ;;  %v3437_v30 = vld [vmem:[#allocation60_spill] sm:$0xff]  ;;  %v3438_v34 = vld [vmem:[#allocation63_spill] sm:$0xff]  ;;  %v3441_v39 = vld [vmem:[#allocation53_spill] sm:$0xff] }
 0x137   :  { %v1621_v45 = vsel %vm1556_vm7, %v3435_v29, %v1620_v13  ;;  %v1627_v46 = vsel %vm1554_vm6, %v3436_v56, %v1626_v24  ;;  %v1634_v51 = vsel %vm1554_vm6, %v3437_v30, %v1633_v6  ;;  %v3439_v25 = vld [vmem:[#allocation64_spill] sm:$0xff]  ;;  %1689 = vst.msk [vmem:[%s3296_s1 + $0x40] sm:$0xff] %vm264_vm0, %v1615_v35  ;;  %v3442_v10 = vld [vmem:[#allocation61_spill] sm:$0xff]  ;;  %v3444_v63 = vld [vmem:[#allocation54_spill] sm:$0xff]  ;;  %v1658_v49 = vsel %vm1546_vm2, %v2976_v14, %v2973_v28 }
 0x138   :  { %v1637_v40 = vsel %vm1546_vm2, %v3439_v25, %v3438_v34  ;;  %v1622_v9 = vsel %vm1558_vm8, %v3440_v26, %v1621_v45  ;;  %v1628_v52 = vsel %vm1556_vm7, %v3441_v39, %v1627_v46  ;;  %v1635_v50 = vsel %vm1556_vm7, %v3442_v10, %v1634_v51  ;;  %v3443_v12 = vld [vmem:[#allocation65_spill] sm:$0xff]  ;;  %v3445_v4 = vld [vmem:[#allocation62_spill] sm:$0xff]  ;;  %v3447_v38 = vld [vmem:[#allocation71_spill] sm:$0xff] }
 0x139   :  { %v1638_v15 = vsel %vm1548_vm3, %v3443_v12, %v1637_v40  ;;  %v1629_v55 = vsel %vm1558_vm8, %v3444_v63, %v1628_v52  ;;  %v1636_v47 = vsel %vm1558_vm8, %v3445_v4, %v1635_v50  ;;  %v3446_v0 = vld [vmem:[#allocation66_spill] sm:$0xff]  ;;  %v3448_v36 = vld [vmem:[#allocation72_spill] sm:$0xff]  ;;  %1690 = vst.msk [vmem:[%s3296_s1 + $0x48] sm:$0xff] %vm264_vm0, %v1622_v9  ;;  %v3449_v16 = vld [vmem:[#allocation67_spill] sm:$0xff]  ;;  %v1659_v28 = vsel %vm1548_vm3, %v2979_v19, %v1658_v49 }
 0x13a   :  { %v1639_v48 = vsel %vm1550_vm4, %v3446_v0, %v1638_v15  ;;  %v1644_v60 = vsel %vm1546_vm2, %v3448_v36, %v3447_v38  ;;  %v3450_v61 = vld [vmem:[#allocation73_spill] sm:$0xff]  ;;  %v3451_v31 = vld [vmem:[#allocation79_spill] sm:$0xff]  ;;  %v3452_v5 = vld [vmem:[#allocation80_spill] sm:$0xff]  ;;  %1691 = vst.msk [vmem:[%s3296_s1 + $0x50] sm:$0xff] %vm264_vm0, %v1629_v55  ;;  %v1660_v7 = vsel %vm1550_vm4, %v2981_v53, %v1659_v28 }
 0x13b   :  { %v1640_v20 = vsel %vm1552_vm5, %v3449_v16, %v1639_v48  ;;  %v1645_v27 = vsel %vm1548_vm3, %v3450_v61, %v1644_v60  ;;  %v1651_v41 = vsel %vm1546_vm2, %v3452_v5, %v3451_v31  ;;  %1692 = vst.msk [vmem:[%s3296_s1 + $0x58] sm:$0xff] %vm264_vm0, %v1636_v47  ;;  %v3453_v11 = vld [vmem:[#allocation68_spill] sm:$0xff]  ;;  %v3454_v54 = vld [vmem:[#allocation74_spill] sm:$0xff]  ;;  %v3455_v42 = vld [vmem:[#allocation81_spill] sm:$0xff]  ;;  %v1661_v13 = vsel %vm1552_vm5, %v2988_v58, %v1660_v7 }
 0x13c   :  { %v1641_v3 = vsel %vm1554_vm6, %v3453_v11, %v1640_v20  ;;  %v1646_v37 = vsel %vm1550_vm4, %v3454_v54, %v1645_v27  ;;  %v1652_v43 = vsel %vm1548_vm3, %v3455_v42, %v1651_v41  ;;  %v3456_v14 = vld [vmem:[#allocation69_spill] sm:$0xff]  ;;  %v3457_v44 = vld [vmem:[#allocation75_spill] sm:$0xff]  ;;  %v3458_v32 = vld [vmem:[#allocation82_spill] sm:$0xff]  ;;  %v1662_v53 = vsel %vm1554_vm6, %v3001_v2, %v1661_v13 }
 0x13d   :  { %v1642_v1 = vsel %vm1556_vm7, %v3456_v14, %v1641_v3  ;;  %v1647_v18 = vsel %vm1552_vm5, %v3457_v44, %v1646_v37  ;;  %v1653_v8 = vsel %vm1550_vm4, %v3458_v32, %v1652_v43  ;;  %v3459_v57 = vld [vmem:[#allocation70_spill] sm:$0xff]  ;;  %v3460_v21 = vld [vmem:[#allocation76_spill] sm:$0xff]  ;;  %v3461_v59 = vld [vmem:[#allocation83_spill] sm:$0xff]  ;;  %v1663_v46 = vsel %vm1556_vm7, %v3013_v22, %v1662_v53 }
 0x13e   :  { %v1643_v62 = vsel %vm1558_vm8, %v3459_v57, %v1642_v1  ;;  %v1648_v35 = vsel %vm1554_vm6, %v3460_v21, %v1647_v18  ;;  %v1654_v19 = vsel %vm1552_vm5, %v3461_v59, %v1653_v8  ;;  %v3462_v17 = vld [vmem:[#allocation77_spill] sm:$0xff]  ;;  %v3463_v23 = vld [vmem:[#allocation84_spill] sm:$0xff]  ;;  %v3464_v29 = vld [vmem:[#allocation78_spill] sm:$0xff]  ;;  %v1664_v2 = vsel %vm1558_vm8, %v3027_v33, %v1663_v46 }
 0x13f   :  { %v1649_v24 = vsel %vm1556_vm7, %v3462_v17, %v1648_v35  ;;  %v1655_v6 = vsel %vm1554_vm6, %v3463_v23, %v1654_v19  ;;  %1693 = vst.msk [vmem:[%s3296_s1 + $0x60] sm:$0xff] %vm264_vm0, %v1643_v62  ;;  %v3465_v56 = vld [vmem:[#allocation85_spill] sm:$0xff]  ;;  %v3466_v30 = vld [vmem:[#allocation86_spill] sm:$0xff]  ;;  %1696 = vst.msk [vmem:[%s3296_s1 + $0x78] sm:$0xff] %vm264_vm0, %v1664_v2 }
 0x140   :  { %v1650_v45 = vsel %vm1558_vm8, %v3464_v29, %v1649_v24  ;;  %v1656_v58 = vsel %vm1556_vm7, %v3465_v56, %v1655_v6 }
 0x141   :  { %v1657_v51 = vsel %vm1558_vm8, %v3466_v30, %v1656_v58  ;;  %1694 = vst.msk [vmem:[%s3296_s1 + $0x68] sm:$0xff] %vm264_vm0, %v1650_v45 }
 0x142   :  { %1695 = vst.msk [vmem:[%s3296_s1 + $0x70] sm:$0xff] %vm264_vm0, %v1657_v51 }

// kernel: _lambda_.13
= control target key start
LH: loop header
LB: loop body
LE: loop exit
PB: predicated region body
PF: predicated region fallthrough
CT: control target
= control target key end

     0   :  { %vm136_vm0 = vcmask 130048   ;;  %vm384_vm1 = vcmask 60416   ;;  %vm738_vm2 = vcmask 64512   ;;  %vm616_vm3 = vcmask 523264   ;;  %s1443_s4 = inlined_call_operand.vmem [shape: bf16[16,8], index: 4, kind: input, shape index: {}]   ;;  %s1444_s0 = inlined_call_operand.vmem [shape: f32[128,16], index: 0, kind: input, shape index: {}, may-alias: {0,1}]   ;;  %s1445_s2 = inlined_call_operand.vmem [shape: f32[1,16], index: 2, kind: input, shape index: {}]   ;;  %s1446_s3 = inlined_call_operand.vmem [shape: f32[1,16], index: 3, kind: input, shape index: {}]   ;;  %s1447_s9 = inlined_call_operand.vmem [shape: bf16[16,64], index: 9, kind: input, shape index: {}]   ;;  %s1448_s10 = inlined_call_operand.vmem [shape: bf16[16,8], index: 10, kind: input, shape index: {}]   ;;  %s1449_s1 = inlined_call_operand.vmem [shape: f32[128,16], index: 1, kind: input, shape index: {}, may-alias: {0,1}]   ;;  %s1450_s7 = inlined_call_operand.vmem [shape: f32[1,16], index: 7, kind: input, shape index: {}]   ;;  %s1451_s8 = inlined_call_operand.vmem [shape: f32[1,16], index: 8, kind: input, shape index: {}]   ;;  %s1452_s5 = inlined_call_operand.vmem [shape: f32[1,8], index: 5, kind: input, shape index: {}]   ;;  %s1453_s6 = inlined_call_operand.vmem [shape: f32[1,8], index: 6, kind: input, shape index: {}]   ;;  %s1454_s11 = inlined_call_operand.vmem [shape: bf16[128,8], index: 11, kind: output, shape index: {0}]   ;;  %s1455_s13 = inlined_call_operand.vmem [shape: f32[128,8], index: 13, kind: output, shape index: {2}]   ;;  %s1456_s12 = inlined_call_operand.vmem [shape: f32[128,64], index: 12, kind: output, shape index: {1}]  }
   0x1   :  { %v915_v0 = vld [vmem:[%s1443_s4] sm:$0xff]   ;;  %v43_v2 = vld [vmem:[%s1444_s0 + $0x8] sm:$0xff]  ;;  %v44_v17 = vld [vmem:[%s1444_s0 + $0x10] sm:$0xff] }
   0x2   :  { %v42_v1 = vld [vmem:[%s1444_s0] sm:$0xff]  ;;  %859 = vmatprep.subr.bf16.mxu0 %v915_v0  ;;  %913 = vmatprep.subr.bf16.mxu1 %v915_v0  ;;  %v51_v8 = vld [vmem:[%s1444_s0 + $0x48] sm:$0xff]  ;;  %v45_v18 = vld [vmem:[%s1444_s0 + $0x18] sm:$0xff] }
   0x3   :  { %v1000_v3 = vld [vmem:[%s1445_s2] ss:$0 sm:$0xff]  ;;  %860 = vmatpush3.bf16.msra.mxu0 %v915_v0  ;;  %914 = vmatpush3.bf16.msra.mxu1 %v915_v0  ;;  %v52_v19 = vld [vmem:[%s1444_s0 + $0x50] sm:$0xff]  ;;  %v53_v24 = vld [vmem:[%s1444_s0 + $0x58] sm:$0xff] }
   0x4   :  { %v65_v4 = vmul.f32 %v1000_v3, %v42_v1  ;;  %v66_v5 = vmul.f32 %v1000_v3, %v43_v2  ;;  %v1007_v6 = vld [vmem:[%s1446_s3] ss:$0 sm:$0xff]  ;;  %v74_v10 = vmul.f32 %v1000_v3, %v51_v8  ;;  %v67_v22 = vmul.f32 %v1000_v3, %v44_v17  ;;  %v47_v26 = vld [vmem:[%s1444_s0 + $0x28] sm:$0xff]  ;;  %v48_v41 = vld [vmem:[%s1444_s0 + $0x30] sm:$0xff] }
   0x5   :  { %v50_v7 = vld [vmem:[%s1444_s0 + $0x40] sm:$0xff]  ;;  %v68_v23 = vmul.f32 %v1000_v3, %v45_v18  ;;  %v75_v29 = vmul.f32 %v1000_v3, %v52_v19  ;;  %v76_v30 = vmul.f32 %v1000_v3, %v53_v24  ;;  %v55_v36 = vld [vmem:[%s1444_s0 + $0x68] sm:$0xff]  ;;  %v70_v40 = vmul.f32 %v1000_v3, %v47_v26  ;;  %v49_v46 = vld [vmem:[%s1444_s0 + $0x38] sm:$0xff] }
   0x6   :  { %v73_v9 = vmul.f32 %v1000_v3, %v50_v7  ;;  %v1020_v11 = vld [vmem:[%s1447_s9] sm:$0xff]   ;;  %v88_v12 = vadd.f32 %v1007_v6, %v65_v4  ;;  %v89_v13 = vadd.f32 %v1007_v6, %v66_v5  ;;  %v97_v16 = vadd.f32 %v1007_v6, %v74_v10  ;;  %v56_v51 = vld [vmem:[%s1444_s0 + $0x70] sm:$0xff]  ;;  %v57_v52 = vld [vmem:[%s1444_s0 + $0x78] sm:$0xff] }
   0x7   :  { %v1027_v14 = vld [vmem:[%s1448_s10] sm:$0xff]   ;;  %877 = vmatprep.subr.bf16.mxu1 %v1020_v11  ;;  %v90_v33 = vadd.f32 %v1007_v6, %v67_v22  ;;  %v91_v34 = vadd.f32 %v1007_v6, %v68_v23  ;;  %v98_v38 = vadd.f32 %v1007_v6, %v75_v29  ;;  %v99_v39 = vadd.f32 %v1007_v6, %v76_v30  ;;  %v402_v63 = vld [vmem:[%s1449_s1 + $0x8] sm:$0xff]  ;;  %v403_v7 = vld [vmem:[%s1449_s1 + $0x10] sm:$0xff] }
   0x8   :  { %v96_v15 = vadd.f32 %v1007_v6, %v73_v9  ;;  %v104_v20 = vmax.f32 %v88_v12, 0.0  ;;  %v105_v21 = vmax.f32 %v89_v13, 0.0  ;;  %895 = vmatprep.subr.bf16.mxu0 %v1027_v14  ;;  %v46_v25 = vld [vmem:[%s1444_s0 + $0x20] sm:$0xff]  ;;  %v113_v28 = vmax.f32 %v97_v16, 0.0  ;;  %v408_v30 = vld [vmem:[%s1449_s1 + $0x38] sm:$0xff] }
   0x9   :  { %v54_v31 = vld [vmem:[%s1444_s0 + $0x60] sm:$0xff]  ;;  %v69_v35 = vmul.f32 %v1000_v3, %v46_v25  ;;  %v106_v42 = vmax.f32 %v90_v33, 0.0  ;;  %v107_v43 = vmax.f32 %v91_v34, 0.0  ;;  %v114_v47 = vmax.f32 %v98_v38, 0.0  ;;  %v407_v25 = vld [vmem:[%s1449_s1 + $0x30] sm:$0xff] }
   0xa   :  { %v112_v27 = vmax.f32 %v96_v15, 0.0  ;;  %v120_v32 = vpack.c.bf16 %v105_v21, %v104_v20  ;;  %v77_v45 = vmul.f32 %v1000_v3, %v54_v31  ;;  %v115_v48 = vmax.f32 %v99_v39, 0.0  ;;  %v401_v57 = vld [vmem:[%s1449_s1] sm:$0xff] }
   0xb   :  { %v92_v44 = vadd.f32 %v1007_v6, %v69_v35  ;;  %v93_v49 = vadd.f32 %v1007_v6, %v70_v40  ;;  %v78_v50 = vmul.f32 %v1000_v3, %v55_v36  ;;  %v121_v53 = vpack.c.bf16 %v107_v43, %v106_v42  ;;  %v1093_v58 = vld [vmem:[%s1450_s7] ss:$0 sm:$0xff]  ;;  %v410_v36 = vld [vmem:[%s1449_s1 + $0x48] sm:$0xff] }
   0xc   :  { %v124_v37 = vpack.c.bf16 %v113_v28, %v112_v27  ;;  %861 = vmatprep.mubr.msk.bf16.mxu0 %vm136_vm0, %v120_v32  ;;  %v100_v55 = vadd.f32 %v1007_v6, %v77_v45  ;;  %v71_v56 = vmul.f32 %v1000_v3, %v48_v41  ;;  %v125_v59 = vpack.c.bf16 %v115_v48, %v114_v47  ;;  %v1107_v5 = vld [vmem:[%s1451_s8] ss:$0 sm:$0xff] }
   0xd   :  { %v108_v54 = vmax.f32 %v92_v44, 0.0  ;;  %v109_v60 = vmax.f32 %v93_v49, 0.0  ;;  %v101_v61 = vadd.f32 %v1007_v6, %v78_v50  ;;  %v72_v62 = vmul.f32 %v1000_v3, %v49_v46  ;;  %862 = vmatmul.mubr.msk.bf16.vlgmr.msra.gmra.mrb[0].mxu0 %vm136_vm0, %v121_v53  ;;  %v409_v35 = vld [vmem:[%s1449_s1 + $0x40] sm:$0xff] }
   0xe   :  { %869 = vmatprep.mubr.msk.bf16.mxu1 %vm136_vm0, %v124_v37  ;;  %v116_v0 = vmax.f32 %v100_v55, 0.0  ;;  %v94_v1 = vadd.f32 %v1007_v6, %v71_v56  ;;  %v79_v2 = vmul.f32 %v1000_v3, %v56_v51  ;;  %v80_v4 = vmul.f32 %v1000_v3, %v57_v52  ;;  %896 = vmatpush3.bf16.msra.mxu0 %v1027_v14  ;;  %v404_v3 = vld [vmem:[%s1449_s1 + $0x18] sm:$0xff]  ;;  %v405_v14 = vld [vmem:[%s1449_s1 + $0x20] sm:$0xff] }
   0xf   :  { %870 = vmatmul.mubr.msk.bf16.vlgmr.msra.gmra.mrb[0].mxu1 %vm136_vm0, %v125_v59  ;;  %v122_v8 = vpack.c.bf16 %v109_v60, %v108_v54  ;;  %v117_v9 = vmax.f32 %v101_v61, 0.0  ;;  %v95_v10 = vadd.f32 %v1007_v6, %v72_v62  ;;  %v424_v12 = vmul.f32 %v1093_v58, %v401_v57  ;;  %v411_v54 = vld [vmem:[%s1449_s1 + $0x50] sm:$0xff]  ;;  %v412_v55 = vld [vmem:[%s1449_s1 + $0x58] sm:$0xff]  ;;  %v413_v56 = vld [vmem:[%s1449_s1 + $0x60] sm:$0xff] }
  0x10   :  { %878 = vmatpush3.bf16.msra.mxu1 %v1020_v11  ;;  %v110_v13 = vmax.f32 %v94_v1, 0.0  ;;  %v102_v15 = vadd.f32 %v1007_v6, %v79_v2  ;;  %v103_v16 = vadd.f32 %v1007_v6, %v80_v4  ;;  %v425_v17 = vmul.f32 %v1093_v58, %v402_v63  ;;  %v406_v11 = vld [vmem:[%s1449_s1 + $0x28] sm:$0xff] }
  0x11   :  { %865 = vmatprep.mubr.msk.bf16.mxu0 %vm136_vm0, %v122_v8  ;;  %v126_v18 = vpack.c.bf16 %v117_v9, %v116_v0  ;;  %v111_v19 = vmax.f32 %v95_v10, 0.0  ;;  %v447_v20 = vadd.f32 %v1107_v5, %v424_v12  ;;  %v426_v21 = vmul.f32 %v1093_v58, %v403_v7  ;;  %v414_v57 = vld [vmem:[%s1449_s1 + $0x68] sm:$0xff] }
  0x12   :  { %v118_v22 = vmax.f32 %v102_v15, 0.0  ;;  %v119_v6 = vmax.f32 %v103_v16, 0.0  ;;  %v448_v23 = vadd.f32 %v1107_v5, %v425_v17  ;;  %v427_v24 = vmul.f32 %v1093_v58, %v404_v3  ;;  %v415_v3 = vld [vmem:[%s1449_s1 + $0x70] sm:$0xff] }
  0x13   :  { %873 = vmatprep.mubr.msk.bf16.mxu1 %vm136_vm0, %v126_v18  ;;  %v123_v26 = vpack.c.bf16 %v111_v19, %v110_v13  ;;  %v463_v27 = vmax.f32 %v447_v20, 0.0  ;;  %v449_v28 = vadd.f32 %v1107_v5, %v426_v21  ;;  %v428_v29 = vmul.f32 %v1093_v58, %v405_v14  ;;  %v416_v13 = vld [vmem:[%s1449_s1 + $0x78] sm:$0xff] }
  0x14   :  { %v127_v31 = vpack.c.bf16 %v119_v6, %v118_v22  ;;  %v464_v32 = vmax.f32 %v448_v23, 0.0  ;;  %v450_v33 = vadd.f32 %v1107_v5, %v427_v24  ;;  %v429_v34 = vmul.f32 %v1093_v58, %v406_v11 }
  0x15   :  { %v465_v37 = vmax.f32 %v449_v28, 0.0  ;;  %v451_v38 = vadd.f32 %v1107_v5, %v428_v29  ;;  %v430_v39 = vmul.f32 %v1093_v58, %v407_v25  ;;  %866 = vmatmul.mubr.msk.bf16.gmra.mrb[4].mxu0 %vm136_vm0, %v123_v26  ;;  %v431_v43 = vmul.f32 %v1093_v58, %v408_v30  ;;  %v1217_v25 = vld [vmem:[%s1453_s6] ss:$0 sm:$0xff] }
  0x16   :  { %v479_v40 = vpack.c.bf16 %v464_v32, %v463_v27  ;;  %v466_v41 = vmax.f32 %v450_v33, 0.0  ;;  %v452_v42 = vadd.f32 %v1107_v5, %v429_v34  ;;  %v432_v45 = vmul.f32 %v1093_v58, %v409_v35 }
  0x17   :  { %874 = vmatmul.mubr.msk.bf16.gmra.mrb[4].mxu1 %vm136_vm0, %v127_v31  ;;  %v467_v44 = vmax.f32 %v451_v38, 0.0  ;;  %v433_v46 = vmul.f32 %v1093_v58, %v410_v36  ;;  %v453_v49 = vadd.f32 %v1107_v5, %v430_v39  ;;  %v454_v50 = vadd.f32 %v1107_v5, %v431_v43 }
  0x18   :  { %879 = vmatprep.mubr.msk.bf16.mxu1 %vm136_vm0, %v479_v40  ;;  %897 = vmatprep.mubr.msk.bf16.mxu0 %vm136_vm0, %v479_v40  ;;  %v468_v47 = vmax.f32 %v452_v42, 0.0  ;;  %v480_v48 = vpack.c.bf16 %v466_v41, %v465_v37  ;;  %v455_v52 = vadd.f32 %v1107_v5, %v432_v45  ;;  %v434_v61 = vmul.f32 %v1093_v58, %v411_v54 }
  0x19   :  { %v456_v53 = vadd.f32 %v1107_v5, %v433_v46  ;;  %v469_v59 = vmax.f32 %v453_v49, 0.0  ;;  %v470_v60 = vmax.f32 %v454_v50, 0.0  ;;  %v435_v62 = vmul.f32 %v1093_v58, %v412_v55 }
  0x1a   :  { %v481_v51 = vpack.c.bf16 %v468_v47, %v467_v44  ;;  %v471_v63 = vmax.f32 %v455_v52, 0.0  ;;  %v436_v1 = vmul.f32 %v1093_v58, %v413_v56  ;;  %v437_v2 = vmul.f32 %v1093_v58, %v414_v57 }
  0x1b   :  { %v472_v0 = vmax.f32 %v456_v53, 0.0  ;;  %v482_v4 = vpack.c.bf16 %v470_v60, %v469_v59  ;;  %v457_v7 = vadd.f32 %v1107_v5, %v434_v61  ;;  %v458_v8 = vadd.f32 %v1107_v5, %v435_v62 }
  0x1c   :  { %v459_v10 = vadd.f32 %v1107_v5, %v436_v1  ;;  %v460_v12 = vadd.f32 %v1107_v5, %v437_v2  ;;  %v438_v17 = vmul.f32 %v1093_v58, %v415_v3  ;;  %v439_v14 = vmul.f32 %v1093_v58, %v416_v13 }
  0x1d   :  { %898 = vmatmul.mubr.msk.bf16.vlgmr.msra.gmra.mrb[8].mxu0 %vm136_vm0, %v480_v48  ;;  %v483_v9 = vpack.c.bf16 %v472_v0, %v471_v63  ;;  %v473_v15 = vmax.f32 %v457_v7, 0.0  ;;  %v474_v16 = vmax.f32 %v458_v8, 0.0 }
  0x1e   :  { %901 = vmatprep.mubr.msk.bf16.mxu0 %vm136_vm0, %v481_v51  ;;  %v475_v18 = vmax.f32 %v459_v10, 0.0  ;;  %v476_v19 = vmax.f32 %v460_v12, 0.0  ;;  %v461_v21 = vadd.f32 %v1107_v5, %v438_v17  ;;  %v462_v11 = vadd.f32 %v1107_v5, %v439_v14  ;;  %v1212_v5 = vld [vmem:[%s1452_s5] ss:$0 sm:$0xff] }
  0x1f   :  { %880 = vmatmul.mubr.msk.bf16.vlgmr.msra.gmra.mrb[8].mxu1 %vm136_vm0, %v480_v48  ;;  %v484_v20 = vpack.c.bf16 %v474_v16, %v473_v15 }
  0x20   :  { %883 = vmatprep.mubr.msk.bf16.mxu1 %vm136_vm0, %v481_v51  ;;  %v485_v22 = vpack.c.bf16 %v476_v19, %v475_v18  ;;  %v477_v6 = vmax.f32 %v461_v21, 0.0  ;;  %v478_v23 = vmax.f32 %v462_v11, 0.0 }
  0x22   :  { %v486_v58 = vpack.c.bf16 %v478_v23, %v477_v6 }
  0x25   :  { %902 = vmatmul.mubr.msk.bf16.gmra.mrb[12].mxu0 %vm136_vm0, %v482_v4 }
  0x26   :  { %905 = vmatprep.mubr.msk.bf16.mxu0 %vm136_vm0, %v483_v9 }
  0x27   :  { %884 = vmatmul.mubr.msk.bf16.gmra.mrb[12].mxu1 %vm136_vm0, %v482_v4 }
  0x28   :  { %887 = vmatprep.mubr.msk.bf16.mxu1 %vm136_vm0, %v483_v9 }
  0x2d   :  { %906 = vmatmul.mubr.msk.bf16.gmra.mrb[16].mxu0 %vm136_vm0, %v484_v20 }
  0x2e   :  { %909 = vmatprep.mubr.msk.bf16.mxu0 %vm136_vm0, %v485_v22 }
  0x2f   :  { %888 = vmatmul.mubr.msk.bf16.gmra.mrb[16].mxu1 %vm136_vm0, %v484_v20 }
  0x30   :  { %891 = vmatprep.mubr.msk.bf16.mxu1 %vm136_vm0, %v485_v22 }
  0x35   :  { %910 = vmatmul.mubr.msk.bf16.gmra.mrb[20].mxu0 %vm136_vm0, %v486_v58 }
  0x37   :  { %892 = vmatmul.mubr.msk.bf16.gmra.mrb[20].mxu1 %vm136_vm0, %v486_v58 }
  0xe0   :  { %v863_v24 = vpop.f32.mrb[0].mxu0 }
  0xe1   :  { %v267_v26 = vmul.f32 %v863_v24, %v1212_v5  ;;  %v195_v28 = vpop.f32.mrb[1].mxu0 }
  0xe2   :  { %v871_v27 = vpop.f32.mrb[0].mxu1  ;;  %v265_v30 = vmul.f32 %v1212_v5, %v195_v28  ;;  %v864_v32 = vpop.f32.mrb[2].mxu0 }
  0xe3   :  { %v275_v29 = vmul.f32 %v871_v27, %v1212_v5  ;;  %v227_v31 = vpop.f32.mrb[1].mxu1  ;;  %v290_v33 = vadd.f32 %v1217_v25, %v267_v26  ;;  %v268_v35 = vmul.f32 %v864_v32, %v1212_v5  ;;  %v198_v37 = vpop.f32.mrb[3].mxu0 }
  0xe4   :  { %v273_v34 = vmul.f32 %v1212_v5, %v227_v31  ;;  %v872_v36 = vpop.f32.mrb[2].mxu1  ;;  %v288_v39 = vadd.f32 %v1217_v25, %v265_v30  ;;  %v266_v41 = vmul.f32 %v1212_v5, %v198_v37 }
  0xe5   :  { %v298_v38 = vadd.f32 %v1217_v25, %v275_v29  ;;  %v276_v40 = vmul.f32 %v872_v36, %v1212_v5  ;;  %v230_v42 = vpop.f32.mrb[3].mxu1  ;;  %v306_v43 = vmax.f32 %v290_v33, 0.0  ;;  %v291_v45 = vadd.f32 %v1217_v25, %v268_v35 }
  0xe6   :  { %v296_v44 = vadd.f32 %v1217_v25, %v273_v34  ;;  %v274_v46 = vmul.f32 %v1212_v5, %v230_v42  ;;  %v304_v48 = vmax.f32 %v288_v39, 0.0  ;;  %v289_v50 = vadd.f32 %v1217_v25, %v266_v41 }
  0xe7   :  { %v314_v47 = vmax.f32 %v298_v38, 0.0  ;;  %v299_v49 = vadd.f32 %v1217_v25, %v276_v40  ;;  %v818_v51 = vpack.c.bf16 %v306_v43, %v306_v43  ;;  %v307_v53 = vmax.f32 %v291_v45, 0.0 }
  0xe8   :  { %v312_v52 = vmax.f32 %v296_v44, 0.0  ;;  %v297_v54 = vadd.f32 %v1217_v25, %v274_v46  ;;  %v816_v56 = vpack.c.bf16 %v304_v48, %v304_v48  ;;  %v305_v59 = vmax.f32 %v289_v50, 0.0  ;;  %v867_v60 = vpop.f32.mrb[4].mxu0 }
  0xe9   :  { %v826_v55 = vpack.c.bf16 %v314_v47, %v314_v47  ;;  %v315_v57 = vmax.f32 %v299_v49, 0.0  ;;  %387 = vst.msk [vmem:[%s1454_s11 + $0x8] sm:$0xf] %vm384_vm1, %v818_v51  ;;  %v819_v62 = vpack.c.bf16 %v307_v53, %v307_v53  ;;  %v271_v0 = vmul.f32 %v867_v60, %v1212_v5  ;;  %v211_v2 = vpop.f32.mrb[5].mxu0 }
  0xea   :  { %v824_v61 = vpack.c.bf16 %v312_v52, %v312_v52  ;;  %v313_v63 = vmax.f32 %v297_v54, 0.0  ;;  %v875_v1 = vpop.f32.mrb[4].mxu1  ;;  %385 = vst.msk [vmem:[%s1454_s11] sm:$0xf] %vm384_vm1, %v816_v56  ;;  %v817_v7 = vpack.c.bf16 %v305_v59, %v305_v59  ;;  %v269_v9 = vmul.f32 %v1212_v5, %v211_v2  ;;  %v868_v12 = vpop.f32.mrb[6].mxu0 }
  0xeb   :  { %395 = vst.msk [vmem:[%s1454_s11 + $0x28] sm:$0xf] %vm384_vm1, %v826_v55  ;;  %v827_v4 = vpack.c.bf16 %v315_v57, %v315_v57  ;;  %v279_v8 = vmul.f32 %v875_v1, %v1212_v5  ;;  %v243_v10 = vpop.f32.mrb[5].mxu1  ;;  %388 = vst.msk [vmem:[%s1454_s11 + $0xc] sm:$0xf] %vm384_vm1, %v819_v62  ;;  %v294_v13 = vadd.f32 %v1217_v25, %v271_v0  ;;  %v214_v14 = vpop.f32.mrb[7].mxu0 }
  0xec   :  { %393 = vst.msk [vmem:[%s1454_s11 + $0x20] sm:$0xf] %vm384_vm1, %v824_v61  ;;  %v825_v3 = vpack.c.bf16 %v313_v63, %v313_v63  ;;  %v277_v15 = vmul.f32 %v1212_v5, %v243_v10  ;;  %v272_v16 = vmul.f32 %v868_v12, %v1212_v5  ;;  %v876_v17 = vpop.f32.mrb[6].mxu1  ;;  %386 = vst.msk [vmem:[%s1454_s11 + $0x4] sm:$0xf] %vm384_vm1, %v817_v7 }
  0xed   :  { %396 = vst.msk [vmem:[%s1454_s11 + $0x2c] sm:$0xf] %vm384_vm1, %v827_v4  ;;  %v302_v18 = vadd.f32 %v1217_v25, %v279_v8  ;;  %v292_v19 = vadd.f32 %v1217_v25, %v269_v9  ;;  %v280_v20 = vmul.f32 %v876_v17, %v1212_v5  ;;  %v270_v21 = vmul.f32 %v1212_v5, %v214_v14  ;;  %v246_v11 = vpop.f32.mrb[7].mxu1 }
  0xee   :  { %394 = vst.msk [vmem:[%s1454_s11 + $0x24] sm:$0xf] %vm384_vm1, %v825_v3  ;;  %v310_v22 = vmax.f32 %v294_v13, 0.0  ;;  %v300_v6 = vadd.f32 %v1217_v25, %v277_v15  ;;  %v295_v23 = vadd.f32 %v1217_v25, %v272_v16  ;;  %v278_v58 = vmul.f32 %v1212_v5, %v246_v11 }
  0xef   :  { %v318_v24 = vmax.f32 %v302_v18, 0.0  ;;  %v308_v26 = vmax.f32 %v292_v19, 0.0  ;;  %v303_v27 = vadd.f32 %v1217_v25, %v280_v20  ;;  %v293_v28 = vadd.f32 %v1217_v25, %v270_v21 }
  0xf0   :  { %v822_v29 = vpack.c.bf16 %v310_v22, %v310_v22  ;;  %v316_v30 = vmax.f32 %v300_v6, 0.0  ;;  %v311_v31 = vmax.f32 %v295_v23, 0.0  ;;  %v301_v32 = vadd.f32 %v1217_v25, %v278_v58  ;;  %v899_v37 = vpop.f32.mrb[8].mxu0 }
  0xf1   :  { %v830_v33 = vpack.c.bf16 %v318_v24, %v318_v24  ;;  %v820_v34 = vpack.c.bf16 %v308_v26, %v308_v26  ;;  %v319_v35 = vmax.f32 %v303_v27, 0.0  ;;  %v309_v36 = vmax.f32 %v293_v28, 0.0  ;;  %741 = vst.msk [vmem:[%s1455_s13 + $0x10] sm:$0xff] %vm738_vm2, %v899_v37  ;;  %v675_v25 = vpop.f32.mrb[9].mxu0 }
  0xf2   :  { %391 = vst.msk [vmem:[%s1454_s11 + $0x18] sm:$0xf] %vm384_vm1, %v822_v29  ;;  %v828_v5 = vpack.c.bf16 %v316_v30, %v316_v30  ;;  %v823_v38 = vpack.c.bf16 %v311_v31, %v311_v31  ;;  %v317_v39 = vmax.f32 %v301_v32, 0.0  ;;  %v881_v40 = vpop.f32.mrb[8].mxu1  ;;  %v900_v44 = vpop.f32.mrb[10].mxu0 }
  0xf3   :  { %399 = vst.msk [vmem:[%s1454_s11 + $0x38] sm:$0xf] %vm384_vm1, %v830_v33  ;;  %389 = vst.msk [vmem:[%s1454_s11 + $0x10] sm:$0xf] %vm384_vm1, %v820_v34  ;;  %v831_v41 = vpack.c.bf16 %v319_v35, %v319_v35  ;;  %v821_v42 = vpack.c.bf16 %v309_v36, %v309_v36  ;;  %v553_v43 = vpop.f32.mrb[9].mxu1  ;;  %v678_v47 = vpop.f32.mrb[11].mxu0 }
  0xf4   :  { %619 = vst.msk [vmem:[%s1456_s12 + $0x10] sm:$0xff] %vm616_vm3, %v881_v40  ;;  %v829_v45 = vpack.c.bf16 %v317_v39, %v317_v39  ;;  %617 = vst.msk [vmem:[%s1456_s12] sm:$0xff] %vm616_vm3, %v553_v43  ;;  %v882_v46 = vpop.f32.mrb[10].mxu1 }
  0xf5   :  { %739 = vst.msk [vmem:[%s1455_s13] sm:$0xff] %vm738_vm2, %v675_v25  ;;  %742 = vst.msk [vmem:[%s1455_s13 + $0x18] sm:$0xff] %vm738_vm2, %v900_v44  ;;  %v556_v48 = vpop.f32.mrb[11].mxu1 }
  0xf6   :  { %397 = vst.msk [vmem:[%s1454_s11 + $0x30] sm:$0xf] %vm384_vm1, %v828_v5  ;;  %392 = vst.msk [vmem:[%s1454_s11 + $0x1c] sm:$0xf] %vm384_vm1, %v823_v38 }
  0xf7   :  { %400 = vst.msk [vmem:[%s1454_s11 + $0x3c] sm:$0xf] %vm384_vm1, %v831_v41  ;;  %390 = vst.msk [vmem:[%s1454_s11 + $0x14] sm:$0xf] %vm384_vm1, %v821_v42 }
  0xf8   :  { %620 = vst.msk [vmem:[%s1456_s12 + $0x18] sm:$0xff] %vm616_vm3, %v882_v46  ;;  %618 = vst.msk [vmem:[%s1456_s12 + $0x8] sm:$0xff] %vm616_vm3, %v556_v48  ;;  %v903_v49 = vpop.f32.mrb[12].mxu0 }
  0xf9   :  { %740 = vst.msk [vmem:[%s1455_s13 + $0x8] sm:$0xff] %vm738_vm2, %v678_v47  ;;  %745 = vst.msk [vmem:[%s1455_s13 + $0x30] sm:$0xff] %vm738_vm2, %v903_v49  ;;  %v691_v51 = vpop.f32.mrb[13].mxu0 }
  0xfa   :  { %398 = vst.msk [vmem:[%s1454_s11 + $0x34] sm:$0xf] %vm384_vm1, %v829_v45  ;;  %v885_v50 = vpop.f32.mrb[12].mxu1  ;;  %v904_v53 = vpop.f32.mrb[14].mxu0 }
  0xfb   :  { %623 = vst.msk [vmem:[%s1456_s12 + $0x30] sm:$0xff] %vm616_vm3, %v885_v50  ;;  %v569_v52 = vpop.f32.mrb[13].mxu1  ;;  %v694_v55 = vpop.f32.mrb[15].mxu0 }
  0xfc   :  { %743 = vst.msk [vmem:[%s1455_s13 + $0x20] sm:$0xff] %vm738_vm2, %v691_v51  ;;  %v886_v54 = vpop.f32.mrb[14].mxu1  ;;  %746 = vst.msk [vmem:[%s1455_s13 + $0x38] sm:$0xff] %vm738_vm2, %v904_v53 }
  0xfd   :  { %621 = vst.msk [vmem:[%s1456_s12 + $0x20] sm:$0xff] %vm616_vm3, %v569_v52  ;;  %624 = vst.msk [vmem:[%s1456_s12 + $0x38] sm:$0xff] %vm616_vm3, %v886_v54  ;;  %v572_v56 = vpop.f32.mrb[15].mxu1 }
  0xfe   :  { %744 = vst.msk [vmem:[%s1455_s13 + $0x28] sm:$0xff] %vm738_vm2, %v694_v55 }
  0xff   :  { %622 = vst.msk [vmem:[%s1456_s12 + $0x28] sm:$0xff] %vm616_vm3, %v572_v56 }
 0x100   :  { %v907_v57 = vpop.f32.mrb[16].mxu0 }
 0x101   :  { %749 = vst.msk [vmem:[%s1455_s13 + $0x50] sm:$0xff] %vm738_vm2, %v907_v57  ;;  %v707_v60 = vpop.f32.mrb[17].mxu0 }
 0x102   :  { %v889_v59 = vpop.f32.mrb[16].mxu1  ;;  %747 = vst.msk [vmem:[%s1455_s13 + $0x40] sm:$0xff] %vm738_vm2, %v707_v60  ;;  %v908_v62 = vpop.f32.mrb[18].mxu0 }
 0x103   :  { %627 = vst.msk [vmem:[%s1456_s12 + $0x50] sm:$0xff] %vm616_vm3, %v889_v59  ;;  %v585_v61 = vpop.f32.mrb[17].mxu1  ;;  %v710_v0 = vpop.f32.mrb[19].mxu0 }
 0x104   :  { %625 = vst.msk [vmem:[%s1456_s12 + $0x40] sm:$0xff] %vm616_vm3, %v585_v61  ;;  %v890_v63 = vpop.f32.mrb[18].mxu1 }
 0x105   :  { %750 = vst.msk [vmem:[%s1455_s13 + $0x58] sm:$0xff] %vm738_vm2, %v908_v62  ;;  %v588_v1 = vpop.f32.mrb[19].mxu1  ;;  %748 = vst.msk [vmem:[%s1455_s13 + $0x48] sm:$0xff] %vm738_vm2, %v710_v0 }
 0x106   :  { %628 = vst.msk [vmem:[%s1456_s12 + $0x58] sm:$0xff] %vm616_vm3, %v890_v63  ;;  %626 = vst.msk [vmem:[%s1456_s12 + $0x48] sm:$0xff] %vm616_vm3, %v588_v1 }
 0x108   :  { %v911_v2 = vpop.f32.mrb[20].mxu0 }
 0x109   :  { %753 = vst.msk [vmem:[%s1455_s13 + $0x70] sm:$0xff] %vm738_vm2, %v911_v2  ;;  %v723_v7 = vpop.f32.mrb[21].mxu0 }
 0x10a   :  { %v893_v4 = vpop.f32.mrb[20].mxu1  ;;  %751 = vst.msk [vmem:[%s1455_s13 + $0x60] sm:$0xff] %vm738_vm2, %v723_v7  ;;  %v912_v9 = vpop.f32.mrb[22].mxu0 }
 0x10b   :  { %631 = vst.msk [vmem:[%s1456_s12 + $0x70] sm:$0xff] %vm616_vm3, %v893_v4  ;;  %v601_v8 = vpop.f32.mrb[21].mxu1  ;;  %v726_v12 = vpop.f32.mrb[23].mxu0 }
 0x10c   :  { %629 = vst.msk [vmem:[%s1456_s12 + $0x60] sm:$0xff] %vm616_vm3, %v601_v8  ;;  %v894_v10 = vpop.f32.mrb[22].mxu1 }
 0x10d   :  { %754 = vst.msk [vmem:[%s1455_s13 + $0x78] sm:$0xff] %vm738_vm2, %v912_v9  ;;  %v604_v3 = vpop.f32.mrb[23].mxu1  ;;  %752 = vst.msk [vmem:[%s1455_s13 + $0x68] sm:$0xff] %vm738_vm2, %v726_v12 }
 0x10e   :  { %632 = vst.msk [vmem:[%s1456_s12 + $0x78] sm:$0xff] %vm616_vm3, %v894_v10  ;;  %630 = vst.msk [vmem:[%s1456_s12 + $0x68] sm:$0xff] %vm616_vm3, %v604_v3 }

// kernel: _lambda_.14
= control target key start
LH: loop header
LB: loop body
LE: loop exit
PB: predicated region body
PF: predicated region fallthrough
CT: control target
= control target key end

     0   :  { %vm121_vm0 = vcmask 588800   ;;  %vm146_vm1 = vcmask 1043456   ;;  %vm334_vm2 = vcmask 64512   ;;  %vm475_vm3 = vcmask 523264   ;;  %s1112_s1 = inlined_call_operand.vmem [shape: bf16[72,8], index: 1, kind: input, shape index: {}]   ;;  %s1113_s0 = inlined_call_operand.vmem [shape: bf16[128,72], index: 0, kind: input, shape index: {}]   ;;  %s1114_s4 = inlined_call_operand.vmem [shape: bf16[8,64], index: 4, kind: input, shape index: {}]   ;;  %s1115_s5 = inlined_call_operand.vmem [shape: bf16[8,4], index: 5, kind: input, shape index: {}]   ;;  %s1116_s2 = inlined_call_operand.vmem [shape: f32[1,8], index: 2, kind: input, shape index: {}]   ;;  %s1117_s3 = inlined_call_operand.vmem [shape: f32[1,8], index: 3, kind: input, shape index: {}]   ;;  %s1118_s6 = inlined_call_operand.vmem [shape: f32[128,64], index: 6, kind: input, shape index: {}]   ;;  %s1119_s7 = inlined_call_operand.vmem [shape: f32[128,64], index: 7, kind: output, shape index: {0}]   ;;  %s1120_s8 = inlined_call_operand.vmem [shape: f32[128,4], index: 8, kind: output, shape index: {1}]  }
   0x1   :  { %v756_v0 = vld [vmem:[%s1112_s1] sm:$0xff]   ;;  %v757_v1 = vld [vmem:[%s1112_s1 + $0x8] sm:$0xff]   ;;  %v758_v2 = vld [vmem:[%s1112_s1 + $0x10] sm:$0xff]   ;;  %vm593_vm4 = vcmask 31744  }
   0x2   :  { %688 = vmatprep.subr.bf16.mxu0 %v756_v0  ;;  %v761_v3 = vld [vmem:[%s1113_s0] sm:$0xff]   ;;  %v759_v4 = vld [vmem:[%s1112_s1 + $0x18] sm:$0xff]   ;;  %v762_v7 = vld [vmem:[%s1113_s0 + $0x8] sm:$0xff]  }
   0x3   :  { %689 = vmatpush3.bf16.msra.mxu0 %v756_v0  ;;  %698 = vmatprep.mubr.msk.bf16.mxu0 %vm121_vm0, %v761_v3  ;;  %v760_v5 = vld [vmem:[%s1112_s1 + $0x20] ss:$0 sps:$4 sm:$0xff]   ;;  %v763_v8 = vld [vmem:[%s1113_s0 + $0x10] sm:$0xff]   ;;  %v764_v9 = vld [vmem:[%s1113_s0 + $0x18] sm:$0xff]  }
   0x4   :  { %690 = vmatprep.subr.bf16.mxu0 %v757_v1  ;;  %v148_v6 = vsel %vm146_vm1, %v760_v5, 0  ;;  %v765_v10 = vld [vmem:[%s1113_s0 + $0x20] sm:$0xff]   ;;  %v766_v11 = vld [vmem:[%s1113_s0 + $0x28] sm:$0xff]   ;;  %v767_v12 = vld [vmem:[%s1113_s0 + $0x30] sm:$0xff]  }
   0x5   :  { %v768_v13 = vld [vmem:[%s1113_s0 + $0x38] sm:$0xff]   ;;  %v333_v14 = vld [vmem:[%s1114_s4] sm:$0xf] }
   0x6   :  { %v360_v15 = vsel %vm146_vm1, %v333_v14, 0  ;;  %754 = vmatprep.subr.msk.bf16.mxu1 %vm146_vm1, %v333_v14  ;;  %v492_v16 = vld [vmem:[%s1115_s5] sm:$0xf] }
   0x7   :  { %691 = vmatpush3.bf16.msra.mxu0 %v757_v1  ;;  %751 = vmatpush3.bf16.msra.mxu1 %v360_v15  ;;  %v876_v17 = vld [vmem:[%s1116_s2] ss:$0 sm:$0xff]  ;;  %v494_v63 = vsel %vm146_vm1, %v492_v16, 0 }
   0x8   :  { %692 = vmatprep.subr.bf16.mxu0 %v758_v2  ;;  %755 = vmatprep.subr.msk.bf16.mxu1 %vm146_vm1, %v492_v16  ;;  %v881_v19 = vld [vmem:[%s1117_s3] ss:$0 sm:$0xff] }
   0xb   :  { %693 = vmatpush3.bf16.msra.mxu0 %v758_v2 }
   0xc   :  { %694 = vmatprep.subr.bf16.mxu0 %v759_v4 }
   0xf   :  { %695 = vmatpush3.bf16.msra.mxu0 %v759_v4 }
  0x10   :  { %752 = vmatprep.subr.msk.bf16.mxu0 %vm146_vm1, %v760_v5 }
  0x13   :  { %697 = vmatpush3.bf16.msra.mxu0 %v148_v6 }
  0x14   :  { %753 = vmatprep.subr.msk.bf16.mxu0 %vm146_vm1, %v333_v14 }
  0x16   :  { %699 = vmatmul.mubr.msk.bf16.vlgmr.msra.gmra.mrb[0].mxu0 %vm121_vm0, %v762_v7 }
  0x17   :  { %702 = vmatprep.mubr.msk.bf16.mxu0 %vm121_vm0, %v763_v8  ;;  %715 = vmatpush3.bf16.msra.mxu0 %v360_v15 }
  0x1e   :  { %703 = vmatmul.mubr.msk.bf16.gmra.mrb[4].mxu0 %vm121_vm0, %v764_v9 }
  0x1f   :  { %706 = vmatprep.mubr.msk.bf16.mxu0 %vm121_vm0, %v765_v10 }
  0x26   :  { %707 = vmatmul.mubr.msk.bf16.gmra.mrb[8].mxu0 %vm121_vm0, %v766_v11 }
  0x27   :  { %710 = vmatprep.mubr.msk.bf16.mxu0 %vm121_vm0, %v767_v12 }
  0x2e   :  { %711 = vmatmul.mubr.msk.bf16.gmra.mrb[12].mxu0 %vm121_vm0, %v768_v13 }
  0xe9   :  { %v700_v18 = vpop.f32.mrb[0].mxu0 }
  0xea   :  { %v256_v20 = vmul.f32 %v700_v18, %v876_v17  ;;  %v184_v21 = vpop.f32.mrb[1].mxu0 }
  0xeb   :  { %v254_v22 = vmul.f32 %v876_v17, %v184_v21  ;;  %v701_v23 = vpop.f32.mrb[2].mxu0 }
  0xec   :  { %v279_v24 = vadd.f32 %v881_v19, %v256_v20  ;;  %v257_v25 = vmul.f32 %v701_v23, %v876_v17  ;;  %v187_v26 = vpop.f32.mrb[3].mxu0 }
  0xed   :  { %v277_v27 = vadd.f32 %v881_v19, %v254_v22  ;;  %v255_v28 = vmul.f32 %v876_v17, %v187_v26 }
  0xee   :  { %v280_v29 = vadd.f32 %v881_v19, %v257_v25  ;;  %v295_v31 = vmax.f32 %v279_v24, 0.0 }
  0xef   :  { %v278_v30 = vadd.f32 %v881_v19, %v255_v28  ;;  %v293_v33 = vmax.f32 %v277_v27, 0.0 }
  0xf0   :  { %v296_v32 = vmax.f32 %v280_v29, 0.0 }
  0xf1   :  { %v294_v34 = vmax.f32 %v278_v30, 0.0  ;;  %v704_v35 = vpop.f32.mrb[4].mxu0 }
  0xf2   :  { %v891_v36 = vpack.c.bf16 %v296_v32, %v295_v31  ;;  %v260_v37 = vmul.f32 %v704_v35, %v876_v17  ;;  %v200_v38 = vpop.f32.mrb[5].mxu0  ;;  %v320_v31 = vld [vmem:[%s1118_s6 + $0x18] sm:$0xff] }
  0xf3   :  { %v309_v39 = vpack.c.bf16 %v294_v34, %v293_v33  ;;  %v258_v40 = vmul.f32 %v876_v17, %v200_v38  ;;  %v705_v41 = vpop.f32.mrb[6].mxu0  ;;  %v318_v34 = vld [vmem:[%s1118_s6 + $0x8] sm:$0xff] }
  0xf4   :  { %v283_v42 = vadd.f32 %v881_v19, %v260_v37  ;;  %v261_v43 = vmul.f32 %v705_v41, %v876_v17  ;;  %v203_v44 = vpop.f32.mrb[7].mxu0  ;;  %v321_v41 = vld [vmem:[%s1118_s6 + $0x20] sm:$0xff] }
  0xf5   :  { %v281_v45 = vadd.f32 %v881_v19, %v258_v40  ;;  %v259_v46 = vmul.f32 %v876_v17, %v203_v44  ;;  %716 = vmatprep.mubr.msk.bf16.mxu0 %vm334_vm2, %v309_v39  ;;  %v323_v40 = vld [vmem:[%s1118_s6 + $0x30] sm:$0xff] }
  0xf6   :  { %v284_v47 = vadd.f32 %v881_v19, %v261_v43  ;;  %717 = vmatmul.mubr.msk.bf16.vlgmr.msra.gmra.mrb[16].mxu0 %vm334_vm2, %v891_v36  ;;  %v299_v49 = vmax.f32 %v283_v42, 0.0  ;;  %v324_v43 = vld [vmem:[%s1118_s6 + $0x38] sm:$0xff] }
  0xf7   :  { %v282_v48 = vadd.f32 %v881_v19, %v259_v46  ;;  %v297_v51 = vmax.f32 %v281_v45, 0.0  ;;  %v322_v46 = vld [vmem:[%s1118_s6 + $0x28] sm:$0xff] }
  0xf8   :  { %v300_v50 = vmax.f32 %v284_v47, 0.0 }
  0xf9   :  { %v298_v52 = vmax.f32 %v282_v48, 0.0  ;;  %v708_v53 = vpop.f32.mrb[8].mxu0 }
  0xfa   :  { %v312_v54 = vpack.c.bf16 %v300_v50, %v299_v49  ;;  %v264_v55 = vmul.f32 %v708_v53, %v876_v17  ;;  %v216_v56 = vpop.f32.mrb[9].mxu0  ;;  %v325_v53 = vld [vmem:[%s1118_s6 + $0x40] sm:$0xff] }
  0xfb   :  { %v262_v57 = vmul.f32 %v876_v17, %v216_v56  ;;  %v709_v58 = vpop.f32.mrb[10].mxu0  ;;  %v311_v59 = vpack.c.bf16 %v298_v52, %v297_v51  ;;  %v327_v52 = vld [vmem:[%s1118_s6 + $0x50] sm:$0xff] }
  0xfc   :  { %v287_v60 = vadd.f32 %v881_v19, %v264_v55  ;;  %v265_v61 = vmul.f32 %v709_v58, %v876_v17  ;;  %v219_v62 = vpop.f32.mrb[11].mxu0  ;;  %v328_v55 = vld [vmem:[%s1118_s6 + $0x58] sm:$0xff]  ;;  %v326_v58 = vld [vmem:[%s1118_s6 + $0x48] sm:$0xff] }
  0xfd   :  { %v285_v0 = vadd.f32 %v881_v19, %v262_v57  ;;  %v263_v1 = vmul.f32 %v876_v17, %v219_v62  ;;  %720 = vmatprep.mubr.msk.bf16.mxu1 %vm334_vm2, %v311_v59 }
  0xfe   :  { %v288_v2 = vadd.f32 %v881_v19, %v265_v61  ;;  %721 = vmatmul.mubr.msk.bf16.vlgmr.msra.gmra.mrb[0].mxu1 %vm334_vm2, %v312_v54  ;;  %v303_v4 = vmax.f32 %v287_v60, 0.0 }
  0xff   :  { %v286_v3 = vadd.f32 %v881_v19, %v263_v1  ;;  %733 = vmatpush3.bf16.msra.mxu1 %v494_v63  ;;  %v301_v6 = vmax.f32 %v285_v0, 0.0  ;;  %v331_v0 = vld [vmem:[%s1118_s6 + $0x70] sm:$0xff]  ;;  %v329_v1 = vld [vmem:[%s1118_s6 + $0x60] sm:$0xff] }
 0x100   :  { %v304_v5 = vmax.f32 %v288_v2, 0.0 }
 0x101   :  { %v302_v7 = vmax.f32 %v286_v3, 0.0  ;;  %v712_v8 = vpop.f32.mrb[12].mxu0  ;;  %v332_v3 = vld [vmem:[%s1118_s6 + $0x78] sm:$0xff] }
 0x102   :  { %v314_v9 = vpack.c.bf16 %v304_v5, %v303_v4  ;;  %v268_v10 = vmul.f32 %v712_v8, %v876_v17  ;;  %v232_v11 = vpop.f32.mrb[13].mxu0 }
 0x103   :  { %v313_v12 = vpack.c.bf16 %v302_v7, %v301_v6  ;;  %v266_v13 = vmul.f32 %v876_v17, %v232_v11  ;;  %v713_v14 = vpop.f32.mrb[14].mxu0  ;;  %v330_v6 = vld [vmem:[%s1118_s6 + $0x68] sm:$0xff] }
 0x104   :  { %v291_v15 = vadd.f32 %v881_v19, %v268_v10  ;;  %v269_v16 = vmul.f32 %v713_v14, %v876_v17  ;;  %v235_v18 = vpop.f32.mrb[15].mxu0 }
 0x105   :  { %v289_v20 = vadd.f32 %v881_v19, %v266_v13  ;;  %v267_v21 = vmul.f32 %v876_v17, %v235_v18  ;;  %724 = vmatprep.mubr.msk.bf16.mxu1 %vm334_vm2, %v313_v12  ;;  %v319_v17 = vld [vmem:[%s1118_s6 + $0x10] sm:$0xff] }
 0x106   :  { %v292_v22 = vadd.f32 %v881_v19, %v269_v16  ;;  %725 = vmatmul.mubr.msk.bf16.gmra.mrb[4].mxu1 %vm334_vm2, %v314_v9  ;;  %v307_v24 = vmax.f32 %v291_v15, 0.0 }
 0x107   :  { %v290_v23 = vadd.f32 %v881_v19, %v267_v21  ;;  %v305_v26 = vmax.f32 %v289_v20, 0.0  ;;  %v317_v19 = vld [vmem:[%s1118_s6] sm:$0xff] }
 0x108   :  { %v308_v25 = vmax.f32 %v292_v22, 0.0 }
 0x109   :  { %v306_v27 = vmax.f32 %v290_v23, 0.0 }
 0x10a   :  { %v316_v28 = vpack.c.bf16 %v308_v25, %v307_v24 }
 0x10b   :  { %v315_v29 = vpack.c.bf16 %v306_v27, %v305_v26 }
 0x10d   :  { %728 = vmatprep.mubr.msk.bf16.mxu1 %vm334_vm2, %v315_v29 }
 0x10e   :  { %729 = vmatmul.mubr.msk.bf16.gmra.mrb[8].mxu1 %vm334_vm2, %v316_v28 }
 0x10f   :  { %734 = vmatprep.mubr.msk.bf16.mxu1 %vm334_vm2, %v309_v39 }
 0x116   :  { %735 = vmatmul.mubr.msk.bf16.vlgmr.msra.gmra.mrb[12].mxu1 %vm334_vm2, %v891_v36 }
 0x117   :  { %738 = vmatprep.mubr.msk.bf16.mxu1 %vm334_vm2, %v311_v59 }
 0x11e   :  { %739 = vmatmul.mubr.msk.bf16.gmra.mrb[16].mxu1 %vm334_vm2, %v312_v54 }
 0x11f   :  { %742 = vmatprep.mubr.msk.bf16.mxu1 %vm334_vm2, %v313_v12 }
 0x126   :  { %743 = vmatmul.mubr.msk.bf16.gmra.mrb[20].mxu1 %vm334_vm2, %v314_v9 }
 0x127   :  { %746 = vmatprep.mubr.msk.bf16.mxu1 %vm334_vm2, %v315_v29 }
 0x12e   :  { %747 = vmatmul.mubr.msk.bf16.gmra.mrb[24].mxu1 %vm334_vm2, %v316_v28 }
 0x1c9   :  { %v718_v30 = vpop.f32.mrb[16].mxu0 }
 0x1ca   :  { %v461_v32 = vadd.f32 %v718_v30, %v319_v17  ;;  %v396_v33 = vpop.f32.mrb[17].mxu0 }
 0x1cb   :  { %v459_v35 = vadd.f32 %v396_v33, %v317_v19  ;;  %v719_v36 = vpop.f32.mrb[18].mxu0 }
 0x1cc   :  { %478 = vst.msk [vmem:[%s1119_s7 + $0x10] sm:$0xff] %vm475_vm3, %v461_v32  ;;  %v462_v37 = vadd.f32 %v719_v36, %v320_v31  ;;  %v399_v38 = vpop.f32.mrb[19].mxu0 }
 0x1cd   :  { %476 = vst.msk [vmem:[%s1119_s7] sm:$0xff] %vm475_vm3, %v459_v35  ;;  %v460_v39 = vadd.f32 %v399_v38, %v318_v34 }
 0x1ce   :  { %479 = vst.msk [vmem:[%s1119_s7 + $0x18] sm:$0xff] %vm475_vm3, %v462_v37 }
 0x1cf   :  { %477 = vst.msk [vmem:[%s1119_s7 + $0x8] sm:$0xff] %vm475_vm3, %v460_v39 }
 0x1d1   :  { %v722_v42 = vpop.f32.mrb[0].mxu1 }
 0x1d2   :  { %v465_v44 = vadd.f32 %v722_v42, %v323_v40  ;;  %v412_v45 = vpop.f32.mrb[1].mxu1 }
 0x1d3   :  { %v463_v47 = vadd.f32 %v412_v45, %v321_v41  ;;  %v723_v48 = vpop.f32.mrb[2].mxu1 }
 0x1d4   :  { %482 = vst.msk [vmem:[%s1119_s7 + $0x30] sm:$0xff] %vm475_vm3, %v465_v44  ;;  %v466_v49 = vadd.f32 %v723_v48, %v324_v43  ;;  %v415_v50 = vpop.f32.mrb[3].mxu1 }
 0x1d5   :  { %480 = vst.msk [vmem:[%s1119_s7 + $0x20] sm:$0xff] %vm475_vm3, %v463_v47  ;;  %v464_v51 = vadd.f32 %v415_v50, %v322_v46 }
 0x1d6   :  { %483 = vst.msk [vmem:[%s1119_s7 + $0x38] sm:$0xff] %vm475_vm3, %v466_v49 }
 0x1d7   :  { %481 = vst.msk [vmem:[%s1119_s7 + $0x28] sm:$0xff] %vm475_vm3, %v464_v51 }
 0x1d9   :  { %v726_v54 = vpop.f32.mrb[4].mxu1 }
 0x1da   :  { %v469_v56 = vadd.f32 %v726_v54, %v327_v52  ;;  %v428_v57 = vpop.f32.mrb[5].mxu1 }
 0x1db   :  { %v467_v59 = vadd.f32 %v428_v57, %v325_v53  ;;  %v727_v60 = vpop.f32.mrb[6].mxu1 }
 0x1dc   :  { %486 = vst.msk [vmem:[%s1119_s7 + $0x50] sm:$0xff] %vm475_vm3, %v469_v56  ;;  %v470_v61 = vadd.f32 %v727_v60, %v328_v55  ;;  %v431_v62 = vpop.f32.mrb[7].mxu1 }
 0x1dd   :  { %484 = vst.msk [vmem:[%s1119_s7 + $0x40] sm:$0xff] %vm475_vm3, %v467_v59  ;;  %v468_v63 = vadd.f32 %v431_v62, %v326_v58 }
 0x1de   :  { %487 = vst.msk [vmem:[%s1119_s7 + $0x58] sm:$0xff] %vm475_vm3, %v470_v61 }
 0x1df   :  { %485 = vst.msk [vmem:[%s1119_s7 + $0x48] sm:$0xff] %vm475_vm3, %v468_v63 }
 0x1e1   :  { %v730_v2 = vpop.f32.mrb[8].mxu1 }
 0x1e2   :  { %v473_v4 = vadd.f32 %v730_v2, %v331_v0  ;;  %v444_v5 = vpop.f32.mrb[9].mxu1 }
 0x1e3   :  { %v471_v7 = vadd.f32 %v444_v5, %v329_v1  ;;  %v731_v8 = vpop.f32.mrb[10].mxu1 }
 0x1e4   :  { %490 = vst.msk [vmem:[%s1119_s7 + $0x70] sm:$0xff] %vm475_vm3, %v473_v4  ;;  %v474_v9 = vadd.f32 %v731_v8, %v332_v3  ;;  %v447_v10 = vpop.f32.mrb[11].mxu1 }
 0x1e5   :  { %488 = vst.msk [vmem:[%s1119_s7 + $0x60] sm:$0xff] %vm475_vm3, %v471_v7  ;;  %v472_v11 = vadd.f32 %v447_v10, %v330_v6 }
 0x1e6   :  { %491 = vst.msk [vmem:[%s1119_s7 + $0x78] sm:$0xff] %vm475_vm3, %v474_v9 }
 0x1e7   :  { %489 = vst.msk [vmem:[%s1119_s7 + $0x68] sm:$0xff] %vm475_vm3, %v472_v11 }
 0x1e9   :  { %v736_v12 = vpop.f32.mrb[12].mxu1 }
 0x1ea   :  { %596 = vst.msk [vmem:[%s1120_s8 + $0x10] sm:$0xff] %vm593_vm4, %v736_v12  ;;  %v530_v13 = vpop.f32.mrb[13].mxu1 }
 0x1eb   :  { %594 = vst.msk [vmem:[%s1120_s8] sm:$0xff] %vm593_vm4, %v530_v13  ;;  %v737_v14 = vpop.f32.mrb[14].mxu1 }
 0x1ec   :  { %597 = vst.msk [vmem:[%s1120_s8 + $0x18] sm:$0xff] %vm593_vm4, %v737_v14  ;;  %v533_v15 = vpop.f32.mrb[15].mxu1 }
 0x1ed   :  { %595 = vst.msk [vmem:[%s1120_s8 + $0x8] sm:$0xff] %vm593_vm4, %v533_v15 }
 0x1f1   :  { %v740_v16 = vpop.f32.mrb[16].mxu1 }
 0x1f2   :  { %600 = vst.msk [vmem:[%s1120_s8 + $0x30] sm:$0xff] %vm593_vm4, %v740_v16  ;;  %v546_v18 = vpop.f32.mrb[17].mxu1 }
 0x1f3   :  { %598 = vst.msk [vmem:[%s1120_s8 + $0x20] sm:$0xff] %vm593_vm4, %v546_v18  ;;  %v741_v20 = vpop.f32.mrb[18].mxu1 }
 0x1f4   :  { %601 = vst.msk [vmem:[%s1120_s8 + $0x38] sm:$0xff] %vm593_vm4, %v741_v20  ;;  %v549_v21 = vpop.f32.mrb[19].mxu1 }
 0x1f5   :  { %599 = vst.msk [vmem:[%s1120_s8 + $0x28] sm:$0xff] %vm593_vm4, %v549_v21 }
 0x1f9   :  { %v744_v22 = vpop.f32.mrb[20].mxu1 }
 0x1fa   :  { %604 = vst.msk [vmem:[%s1120_s8 + $0x50] sm:$0xff] %vm593_vm4, %v744_v22  ;;  %v562_v23 = vpop.f32.mrb[21].mxu1 }
 0x1fb   :  { %602 = vst.msk [vmem:[%s1120_s8 + $0x40] sm:$0xff] %vm593_vm4, %v562_v23  ;;  %v745_v24 = vpop.f32.mrb[22].mxu1 }
 0x1fc   :  { %605 = vst.msk [vmem:[%s1120_s8 + $0x58] sm:$0xff] %vm593_vm4, %v745_v24  ;;  %v565_v25 = vpop.f32.mrb[23].mxu1 }
 0x1fd   :  { %603 = vst.msk [vmem:[%s1120_s8 + $0x48] sm:$0xff] %vm593_vm4, %v565_v25 }
 0x201   :  { %v748_v26 = vpop.f32.mrb[24].mxu1 }
 0x202   :  { %608 = vst.msk [vmem:[%s1120_s8 + $0x70] sm:$0xff] %vm593_vm4, %v748_v26  ;;  %v578_v27 = vpop.f32.mrb[25].mxu1 }
 0x203   :  { %606 = vst.msk [vmem:[%s1120_s8 + $0x60] sm:$0xff] %vm593_vm4, %v578_v27  ;;  %v749_v28 = vpop.f32.mrb[26].mxu1 }
 0x204   :  { %609 = vst.msk [vmem:[%s1120_s8 + $0x78] sm:$0xff] %vm593_vm4, %v749_v28  ;;  %v581_v29 = vpop.f32.mrb[27].mxu1 }
 0x205   :  { %607 = vst.msk [vmem:[%s1120_s8 + $0x68] sm:$0xff] %vm593_vm4, %v581_v29 }

// kernel: _lambda_.15
= control target key start
LH: loop header
LB: loop body
LE: loop exit
PB: predicated region body
PF: predicated region fallthrough
CT: control target
= control target key end

     0   :  { %vm192_vm0 = vcmask 1045504   ;;  %vm167_vm1 = vcmask 621568   ;;  %vm419_vm2 = vcmask 125952   ;;  %vm660_vm3 = vcmask 64512   ;;  %s1216_s4 = inlined_call_operand.vmem [shape: bf16[76,16], index: 4, kind: input, shape index: {}]   ;;  %s1217_s9 = inlined_call_operand.vmem [shape: bf16[76,128], index: 9, kind: input, shape index: {}]   ;;  %s1218_s0 = inlined_call_operand.vmem [shape: f32[128,76], index: 0, kind: input, shape index: {}]   ;;  %s1219_s2 = inlined_call_operand.vmem [shape: f32[1,76], index: 2, kind: input, shape index: {}]   ;;  %s1220_s3 = inlined_call_operand.vmem [shape: f32[1,76], index: 3, kind: input, shape index: {}]   ;;  %s1221_s1 = inlined_call_operand.vmem [shape: f32[32,76], index: 1, kind: input, shape index: {}]   ;;  %s1222_s7 = inlined_call_operand.vmem [shape: f32[1,76], index: 7, kind: input, shape index: {}]   ;;  %s1223_s8 = inlined_call_operand.vmem [shape: f32[1,76], index: 8, kind: input, shape index: {}]   ;;  %s1224_s10 = inlined_call_operand.vmem [shape: bf16[76,8], index: 10, kind: input, shape index: {}]   ;;  %s1225_s5 = inlined_call_operand.vmem [shape: f32[1,16], index: 5, kind: input, shape index: {}]   ;;  %s1226_s6 = inlined_call_operand.vmem [shape: f32[1,16], index: 6, kind: input, shape index: {}]   ;;  %s1227_s12 = inlined_call_operand.vmem [shape: f32[32,128], index: 12, kind: output, shape index: {1}]   ;;  %s1228_s11 = inlined_call_operand.vmem [shape: bf16[128,16], index: 11, kind: output, shape index: {0}]   ;;  %s1229_s13 = inlined_call_operand.vmem [shape: f32[32,8], index: 13, kind: output, shape index: {2}]  }
   0x1   :  { %v826_v0 = vld [vmem:[%s1216_s4] sm:$0xff]   ;;  %v827_v1 = vld [vmem:[%s1216_s4 + $0x8] sm:$0xff]   ;;  %v828_v3 = vld [vmem:[%s1216_s4 + $0x10] sm:$0xff]  }
   0x2   :  { %769 = vmatprep.subr.bf16.mxu0 %v826_v0  ;;  %v829_v2 = vld [vmem:[%s1217_s9] sm:$0xff]   ;;  %v831_v4 = vld [vmem:[%s1217_s9 + $0x8] sm:$0xff]   ;;  %v830_v5 = vld [vmem:[%s1216_s4 + $0x18] sm:$0xff]  }
   0x3   :  { %770 = vmatpush3.bf16.msra.mxu0 %v826_v0  ;;  %795 = vmatprep.subr.bf16.mxu1 %v829_v2  ;;  %v832_v6 = vld [vmem:[%s1216_s4 + $0x20] sm:$0x3f]   ;;  %v833_v7 = vld [vmem:[%s1217_s9 + $0x10] sm:$0xff]   ;;  %v43_v9 = vld [vmem:[%s1218_s0 + $0x8] sm:$0xff] }
   0x4   :  { %771 = vmatprep.subr.bf16.mxu0 %v827_v1  ;;  %796 = vmatpush3.bf16.msra.mxu1 %v829_v2  ;;  %v42_v8 = vld [vmem:[%s1218_s0] sm:$0xff]  ;;  %v44_v14 = vld [vmem:[%s1218_s0 + $0x10] sm:$0xff]  ;;  %v45_v15 = vld [vmem:[%s1218_s0 + $0x18] sm:$0xff]  ;;  %v194_v27 = vsel %vm192_vm0, %v832_v6, 0 }
   0x5   :  { %797 = vmatprep.subr.bf16.mxu1 %v831_v4  ;;  %v944_v10 = vld [vmem:[%s1219_s2] ss:$0 sm:$0xff]  ;;  %v834_v18 = vld [vmem:[%s1217_s9 + $0x18] sm:$0xff]   ;;  %v47_v25 = vld [vmem:[%s1218_s0 + $0x28] sm:$0xff] }
   0x6   :  { %v65_v11 = vmul.f32 %v944_v10, %v42_v8  ;;  %v66_v12 = vmul.f32 %v944_v10, %v43_v9  ;;  %v951_v13 = vld [vmem:[%s1220_s3] ss:$0 sm:$0xff]  ;;  %v67_v16 = vmul.f32 %v944_v10, %v44_v14  ;;  %v68_v17 = vmul.f32 %v944_v10, %v45_v15  ;;  %v48_v26 = vld [vmem:[%s1218_s0 + $0x30] sm:$0xff]  ;;  %v49_v31 = vld [vmem:[%s1218_s0 + $0x38] sm:$0xff] }
   0x7   :  { %772 = vmatpush3.bf16.msra.mxu0 %v827_v1  ;;  %v835_v21 = vld [vmem:[%s1217_s9 + $0x20] sm:$0x3f]   ;;  %v70_v35 = vmul.f32 %v944_v10, %v47_v25  ;;  %v71_v36 = vmul.f32 %v944_v10, %v48_v26  ;;  %v437_v37 = vld [vmem:[%s1221_s1 + $0x8] sm:$0xff]  ;;  %v72_v41 = vmul.f32 %v944_v10, %v49_v31  ;;  %v438_v47 = vld [vmem:[%s1221_s1 + $0x10] sm:$0xff] }
   0x8   :  { %773 = vmatprep.subr.bf16.mxu0 %v828_v3  ;;  %798 = vmatpush3.bf16.msra.mxu1 %v831_v4  ;;  %v88_v19 = vadd.f32 %v951_v13, %v65_v11  ;;  %v89_v20 = vadd.f32 %v951_v13, %v66_v12  ;;  %v90_v22 = vadd.f32 %v951_v13, %v67_v16  ;;  %v46_v24 = vld [vmem:[%s1218_s0 + $0x20] sm:$0xff]  ;;  %v514_v43 = vsel %vm192_vm0, %v835_v21, 0  ;;  %v439_v48 = vld [vmem:[%s1221_s1 + $0x18] sm:$0xff]  ;;  %v51_v59 = vld [vmem:[%s1218_s0 + $0x48] sm:$0xff] }
   0x9   :  { %799 = vmatprep.subr.bf16.mxu1 %v833_v7  ;;  %v91_v23 = vadd.f32 %v951_v13, %v68_v17  ;;  %v69_v30 = vmul.f32 %v944_v10, %v46_v24  ;;  %v436_v32 = vld [vmem:[%s1221_s1] sm:$0xff]  ;;  %v93_v44 = vadd.f32 %v951_v13, %v70_v35  ;;  %v94_v45 = vadd.f32 %v951_v13, %v71_v36  ;;  %v52_v60 = vld [vmem:[%s1218_s0 + $0x50] sm:$0xff]  ;;  %v53_v1 = vld [vmem:[%s1218_s0 + $0x58] sm:$0xff] }
   0xa   :  { %v104_v28 = vmax.f32 %v88_v19, 0.0  ;;  %v105_v29 = vmax.f32 %v89_v20, 0.0  ;;  %v106_v33 = vmax.f32 %v90_v22, 0.0  ;;  %v710_v38 = vld [vmem:[%s1222_s7] ss:$0 sm:$0xff]  ;;  %v95_v50 = vadd.f32 %v951_v13, %v72_v41  ;;  %v55_v12 = vld [vmem:[%s1218_s0 + $0x68] sm:$0xff] }
   0xb   :  { %774 = vmatpush3.bf16.msra.mxu0 %v828_v3  ;;  %v107_v34 = vmax.f32 %v91_v23, 0.0  ;;  %v92_v40 = vadd.f32 %v951_v13, %v69_v30  ;;  %v711_v42 = vld [vmem:[%s1223_s8] ss:$0 sm:$0xff]  ;;  %v447_v46 = vmul.f32 %v710_v38, %v436_v32  ;;  %v448_v51 = vmul.f32 %v710_v38, %v437_v37  ;;  %v837_v23 = vld [vmem:[%s1224_s10 + $0x8] sm:$0xff]   ;;  %v56_v31 = vld [vmem:[%s1218_s0 + $0x70] sm:$0xff] }
   0xc   :  { %775 = vmatprep.subr.bf16.mxu0 %v830_v5  ;;  %800 = vmatpush3.bf16.msra.mxu1 %v833_v7  ;;  %v120_v39 = vpack.c.bf16 %v105_v29, %v104_v28  ;;  %v449_v52 = vmul.f32 %v710_v38, %v438_v47  ;;  %v50_v53 = vld [vmem:[%s1218_s0 + $0x40] sm:$0xff]  ;;  %v109_v55 = vmax.f32 %v93_v44, 0.0  ;;  %v450_v58 = vmul.f32 %v710_v38, %v439_v48  ;;  %v57_v32 = vld [vmem:[%s1218_s0 + $0x78] sm:$0xff] }
   0xd   :  { %801 = vmatprep.subr.bf16.mxu1 %v834_v18  ;;  %v108_v49 = vmax.f32 %v92_v40, 0.0  ;;  %v121_v54 = vpack.c.bf16 %v107_v34, %v106_v33  ;;  %v458_v56 = vadd.f32 %v711_v42, %v447_v46  ;;  %v836_v57 = vld [vmem:[%s1224_s10] sm:$0xff]   ;;  %v110_v61 = vmax.f32 %v94_v45, 0.0  ;;  %v838_v33 = vld [vmem:[%s1224_s10 + $0x10] sm:$0xff]   ;;  %v839_v40 = vld [vmem:[%s1224_s10 + $0x18] sm:$0xff]  }
   0xe   :  { %779 = vmatprep.mubr.msk.bf16.mxu0 %vm167_vm1, %v120_v39  ;;  %v459_v62 = vadd.f32 %v711_v42, %v448_v51  ;;  %v460_v63 = vadd.f32 %v711_v42, %v449_v52  ;;  %v73_v0 = vmul.f32 %v944_v10, %v50_v53  ;;  %v461_v4 = vadd.f32 %v711_v42, %v450_v58  ;;  %v54_v11 = vld [vmem:[%s1218_s0 + $0x60] sm:$0xff] }
   0xf   :  { %776 = vmatpush3.bf16.msra.mxu0 %v830_v5  ;;  %v122_v2 = vpack.c.bf16 %v109_v55, %v108_v49  ;;  %v462_v3 = vmax.f32 %v458_v56, 0.0  ;;  %v74_v5 = vmul.f32 %v944_v10, %v51_v59  ;;  %v75_v16 = vmul.f32 %v944_v10, %v52_v60 }
  0x10   :  { %823 = vmatprep.subr.msk.bf16.mxu0 %vm192_vm0, %v832_v6  ;;  %802 = vmatpush3.bf16.msra.mxu1 %v834_v18  ;;  %v111_v6 = vmax.f32 %v95_v50, 0.0  ;;  %v463_v7 = vmax.f32 %v459_v62, 0.0  ;;  %v464_v8 = vmax.f32 %v460_v63, 0.0  ;;  %v96_v9 = vadd.f32 %v951_v13, %v73_v0  ;;  %v1090_v50 = vld [vmem:[%s1226_s6] ss:$0 sm:$0xff] }
  0x11   :  { %824 = vmatprep.subr.msk.bf16.mxu1 %vm192_vm0, %v835_v21  ;;  %v465_v14 = vmax.f32 %v461_v4, 0.0  ;;  %v97_v15 = vadd.f32 %v951_v13, %v74_v5  ;;  %v76_v17 = vmul.f32 %v944_v10, %v53_v1  ;;  %v77_v20 = vmul.f32 %v944_v10, %v54_v11 }
  0x12   :  { %v466_v18 = vpack.c.bf16 %v463_v7, %v462_v3  ;;  %v112_v19 = vmax.f32 %v96_v9, 0.0  ;;  %v78_v21 = vmul.f32 %v944_v10, %v55_v12  ;;  %v123_v25 = vpack.c.bf16 %v111_v6, %v110_v61 }
  0x13   :  { %778 = vmatpush3.bf16.msra.mxu0 %v194_v27  ;;  %v467_v22 = vpack.c.bf16 %v465_v14, %v464_v8  ;;  %v113_v24 = vmax.f32 %v97_v15, 0.0  ;;  %v98_v26 = vadd.f32 %v951_v13, %v75_v16  ;;  %v99_v27 = vadd.f32 %v951_v13, %v76_v17 }
  0x14   :  { %804 = vmatpush3.bf16.msra.mxu1 %v514_v43  ;;  %805 = vmatprep.mubr.msk.bf16.mxu1 %vm167_vm1, %v466_v18  ;;  %v100_v29 = vadd.f32 %v951_v13, %v77_v20  ;;  %v101_v30 = vadd.f32 %v951_v13, %v78_v21  ;;  %v79_v36 = vmul.f32 %v944_v10, %v56_v31 }
  0x15   :  { %809 = vmatprep.subr.bf16.mxu1 %v836_v57  ;;  %v124_v28 = vpack.c.bf16 %v113_v24, %v112_v19  ;;  %v114_v34 = vmax.f32 %v98_v26, 0.0  ;;  %v115_v35 = vmax.f32 %v99_v27, 0.0  ;;  %v80_v37 = vmul.f32 %v944_v10, %v57_v32  ;;  %v840_v10 = vld [vmem:[%s1224_s10 + $0x20] sm:$0x3f]  }
  0x16   :  { %780 = vmatmul.mubr.msk.bf16.vlgmr.msra.gmra.mrb[0].mxu0 %vm167_vm1, %v121_v54  ;;  %v116_v38 = vmax.f32 %v100_v29, 0.0  ;;  %v117_v39 = vmax.f32 %v101_v30, 0.0  ;;  %v102_v42 = vadd.f32 %v951_v13, %v79_v36  ;;  %v609_v47 = vsel %vm192_vm0, %v840_v10, 0 }
  0x17   :  { %783 = vmatprep.mubr.msk.bf16.mxu0 %vm167_vm1, %v122_v2  ;;  %806 = vmatmul.mubr.msk.bf16.vlgmr.msra.gmra.mrb[0].mxu1 %vm167_vm1, %v467_v22  ;;  %v125_v41 = vpack.c.bf16 %v115_v35, %v114_v34  ;;  %v103_v43 = vadd.f32 %v951_v13, %v80_v37  ;;  %v1085_v13 = vld [vmem:[%s1225_s5] ss:$0 sm:$0xff] }
  0x18   :  { %810 = vmatpush3.bf16.msra.mxu1 %v836_v57  ;;  %819 = vmatprep.mubr.msk.bf16.mxu1 %vm167_vm1, %v466_v18  ;;  %v126_v44 = vpack.c.bf16 %v117_v39, %v116_v38  ;;  %v118_v45 = vmax.f32 %v102_v42, 0.0 }
  0x19   :  { %811 = vmatprep.subr.bf16.mxu1 %v837_v23  ;;  %v119_v46 = vmax.f32 %v103_v43, 0.0 }
  0x1b   :  { %v127_v48 = vpack.c.bf16 %v119_v46, %v118_v45 }
  0x1c   :  { %812 = vmatpush3.bf16.msra.mxu1 %v837_v23 }
  0x1d   :  { %813 = vmatprep.subr.bf16.mxu1 %v838_v33 }
  0x1e   :  { %784 = vmatmul.mubr.msk.bf16.gmra.mrb[4].mxu0 %vm167_vm1, %v123_v25 }
  0x1f   :  { %787 = vmatprep.mubr.msk.bf16.mxu0 %vm167_vm1, %v124_v28 }
  0x20   :  { %814 = vmatpush3.bf16.msra.mxu1 %v838_v33 }
  0x21   :  { %815 = vmatprep.subr.bf16.mxu1 %v839_v40 }
  0x24   :  { %816 = vmatpush3.bf16.msra.mxu1 %v839_v40 }
  0x25   :  { %825 = vmatprep.subr.msk.bf16.mxu1 %vm192_vm0, %v840_v10 }
  0x26   :  { %788 = vmatmul.mubr.msk.bf16.gmra.mrb[8].mxu0 %vm167_vm1, %v125_v41 }
  0x27   :  { %791 = vmatprep.mubr.msk.bf16.mxu0 %vm167_vm1, %v126_v44 }
  0x28   :  { %818 = vmatpush3.bf16.msra.mxu1 %v609_v47 }
  0x2b   :  { %820 = vmatmul.mubr.msk.bf16.vlgmr.msra.gmra.mrb[4].mxu1 %vm167_vm1, %v467_v22 }
  0x2e   :  { %792 = vmatmul.mubr.msk.bf16.gmra.mrb[12].mxu0 %vm167_vm1, %v127_v48 }
  0xe9   :  { %v781_v49 = vpop.f32.mrb[0].mxu0 }
  0xea   :  { %v302_v51 = vmul.f32 %v781_v49, %v1085_v13  ;;  %v230_v52 = vpop.f32.mrb[1].mxu0  ;;  %v807_v60 = vpop.f32.mrb[0].mxu1 }
  0xeb   :  { %v300_v53 = vmul.f32 %v1085_v13, %v230_v52  ;;  %v782_v54 = vpop.f32.mrb[2].mxu0  ;;  %567 = vst [vmem:[%s1227_s12 + $0x10] sm:$0xff] %v807_v60  ;;  %v550_v63 = vpop.f32.mrb[1].mxu1 }
  0xec   :  { %v325_v55 = vadd.f32 %v1090_v50, %v302_v51  ;;  %v303_v56 = vmul.f32 %v782_v54, %v1085_v13  ;;  %v233_v57 = vpop.f32.mrb[3].mxu0  ;;  %565 = vst [vmem:[%s1227_s12] sm:$0xff] %v550_v63  ;;  %v808_v2 = vpop.f32.mrb[2].mxu1 }
  0xed   :  { %v323_v58 = vadd.f32 %v1090_v50, %v300_v53  ;;  %v301_v59 = vmul.f32 %v1085_v13, %v233_v57  ;;  %568 = vst [vmem:[%s1227_s12 + $0x18] sm:$0xff] %v808_v2  ;;  %v553_v5 = vpop.f32.mrb[3].mxu1 }
  0xee   :  { %v341_v61 = vmax.f32 %v325_v55, 0.0  ;;  %v326_v62 = vadd.f32 %v1090_v50, %v303_v56  ;;  %566 = vst [vmem:[%s1227_s12 + $0x8] sm:$0xff] %v553_v5 }
  0xef   :  { %v339_v0 = vmax.f32 %v323_v58, 0.0  ;;  %v324_v1 = vadd.f32 %v1090_v50, %v301_v59 }
  0xf0   :  { %v728_v3 = vpack.c.bf16 %v341_v61, %v341_v61  ;;  %v342_v4 = vmax.f32 %v326_v62, 0.0 }
  0xf1   :  { %v726_v6 = vpack.c.bf16 %v339_v0, %v339_v0  ;;  %v340_v7 = vmax.f32 %v324_v1, 0.0  ;;  %v785_v8 = vpop.f32.mrb[4].mxu0 }
  0xf2   :  { %422 = vst.msk [vmem:[%s1228_s11 + $0x8] sm:$0xf] %vm419_vm2, %v728_v3  ;;  %v729_v9 = vpack.c.bf16 %v342_v4, %v342_v4  ;;  %v306_v11 = vmul.f32 %v785_v8, %v1085_v13  ;;  %v246_v12 = vpop.f32.mrb[5].mxu0 }
  0xf3   :  { %420 = vst.msk [vmem:[%s1228_s11] sm:$0xf] %vm419_vm2, %v726_v6  ;;  %v727_v14 = vpack.c.bf16 %v340_v7, %v340_v7  ;;  %v304_v15 = vmul.f32 %v1085_v13, %v246_v12  ;;  %v786_v16 = vpop.f32.mrb[6].mxu0 }
  0xf4   :  { %423 = vst.msk [vmem:[%s1228_s11 + $0xc] sm:$0xf] %vm419_vm2, %v729_v9  ;;  %v329_v17 = vadd.f32 %v1090_v50, %v306_v11  ;;  %v307_v18 = vmul.f32 %v786_v16, %v1085_v13  ;;  %v249_v19 = vpop.f32.mrb[7].mxu0 }
  0xf5   :  { %421 = vst.msk [vmem:[%s1228_s11 + $0x4] sm:$0xf] %vm419_vm2, %v727_v14  ;;  %v327_v20 = vadd.f32 %v1090_v50, %v304_v15  ;;  %v305_v21 = vmul.f32 %v1085_v13, %v249_v19 }
  0xf6   :  { %v345_v22 = vmax.f32 %v329_v17, 0.0  ;;  %v330_v23 = vadd.f32 %v1090_v50, %v307_v18 }
  0xf7   :  { %v343_v24 = vmax.f32 %v327_v20, 0.0  ;;  %v328_v25 = vadd.f32 %v1090_v50, %v305_v21 }
  0xf8   :  { %v732_v26 = vpack.c.bf16 %v345_v22, %v345_v22  ;;  %v346_v27 = vmax.f32 %v330_v23, 0.0 }
  0xf9   :  { %v730_v28 = vpack.c.bf16 %v343_v24, %v343_v24  ;;  %v344_v29 = vmax.f32 %v328_v25, 0.0  ;;  %v789_v30 = vpop.f32.mrb[8].mxu0 }
  0xfa   :  { %426 = vst.msk [vmem:[%s1228_s11 + $0x18] sm:$0xf] %vm419_vm2, %v732_v26  ;;  %v733_v31 = vpack.c.bf16 %v346_v27, %v346_v27  ;;  %v310_v32 = vmul.f32 %v789_v30, %v1085_v13  ;;  %v262_v33 = vpop.f32.mrb[9].mxu0 }
  0xfb   :  { %424 = vst.msk [vmem:[%s1228_s11 + $0x10] sm:$0xf] %vm419_vm2, %v730_v28  ;;  %v731_v34 = vpack.c.bf16 %v344_v29, %v344_v29  ;;  %v308_v35 = vmul.f32 %v1085_v13, %v262_v33  ;;  %v790_v36 = vpop.f32.mrb[10].mxu0 }
  0xfc   :  { %427 = vst.msk [vmem:[%s1228_s11 + $0x1c] sm:$0xf] %vm419_vm2, %v733_v31  ;;  %v333_v37 = vadd.f32 %v1090_v50, %v310_v32  ;;  %v311_v38 = vmul.f32 %v790_v36, %v1085_v13  ;;  %v265_v39 = vpop.f32.mrb[11].mxu0 }
  0xfd   :  { %425 = vst.msk [vmem:[%s1228_s11 + $0x14] sm:$0xf] %vm419_vm2, %v731_v34  ;;  %v331_v40 = vadd.f32 %v1090_v50, %v308_v35  ;;  %v309_v41 = vmul.f32 %v1085_v13, %v265_v39 }
  0xfe   :  { %v349_v42 = vmax.f32 %v333_v37, 0.0  ;;  %v334_v43 = vadd.f32 %v1090_v50, %v311_v38  ;;  %v821_v51 = vpop.f32.mrb[4].mxu1 }
  0xff   :  { %v347_v44 = vmax.f32 %v331_v40, 0.0  ;;  %v332_v10 = vadd.f32 %v1090_v50, %v309_v41  ;;  %663 = vst.msk [vmem:[%s1229_s13 + $0x10] sm:$0xff] %vm660_vm3, %v821_v51  ;;  %v645_v55 = vpop.f32.mrb[5].mxu1 }
 0x100   :  { %v736_v45 = vpack.c.bf16 %v349_v42, %v349_v42  ;;  %v350_v46 = vmax.f32 %v334_v43, 0.0  ;;  %661 = vst.msk [vmem:[%s1229_s13] sm:$0xff] %vm660_vm3, %v645_v55  ;;  %v822_v59 = vpop.f32.mrb[6].mxu1 }
 0x101   :  { %v734_v47 = vpack.c.bf16 %v347_v44, %v347_v44  ;;  %v348_v48 = vmax.f32 %v332_v10, 0.0  ;;  %v793_v49 = vpop.f32.mrb[12].mxu0  ;;  %664 = vst.msk [vmem:[%s1229_s13 + $0x18] sm:$0xff] %vm660_vm3, %v822_v59  ;;  %v648_v63 = vpop.f32.mrb[7].mxu1 }
 0x102   :  { %430 = vst.msk [vmem:[%s1228_s11 + $0x28] sm:$0xf] %vm419_vm2, %v736_v45  ;;  %v737_v52 = vpack.c.bf16 %v350_v46, %v350_v46  ;;  %v314_v53 = vmul.f32 %v793_v49, %v1085_v13  ;;  %v278_v54 = vpop.f32.mrb[13].mxu0 }
 0x103   :  { %428 = vst.msk [vmem:[%s1228_s11 + $0x20] sm:$0xf] %vm419_vm2, %v734_v47  ;;  %v735_v56 = vpack.c.bf16 %v348_v48, %v348_v48  ;;  %v312_v57 = vmul.f32 %v1085_v13, %v278_v54  ;;  %v794_v58 = vpop.f32.mrb[14].mxu0 }
 0x104   :  { %431 = vst.msk [vmem:[%s1228_s11 + $0x2c] sm:$0xf] %vm419_vm2, %v737_v52  ;;  %v337_v60 = vadd.f32 %v1090_v50, %v314_v53  ;;  %v315_v61 = vmul.f32 %v794_v58, %v1085_v13  ;;  %v281_v62 = vpop.f32.mrb[15].mxu0 }
 0x105   :  { %429 = vst.msk [vmem:[%s1228_s11 + $0x24] sm:$0xf] %vm419_vm2, %v735_v56  ;;  %v335_v0 = vadd.f32 %v1090_v50, %v312_v57  ;;  %v313_v1 = vmul.f32 %v1085_v13, %v281_v62 }
 0x106   :  { %662 = vst.msk [vmem:[%s1229_s13 + $0x8] sm:$0xff] %vm660_vm3, %v648_v63  ;;  %v353_v2 = vmax.f32 %v337_v60, 0.0  ;;  %v338_v3 = vadd.f32 %v1090_v50, %v315_v61 }
 0x107   :  { %v351_v4 = vmax.f32 %v335_v0, 0.0  ;;  %v336_v5 = vadd.f32 %v1090_v50, %v313_v1 }
 0x108   :  { %v740_v6 = vpack.c.bf16 %v353_v2, %v353_v2  ;;  %v354_v7 = vmax.f32 %v338_v3, 0.0 }
 0x109   :  { %v738_v8 = vpack.c.bf16 %v351_v4, %v351_v4  ;;  %v352_v9 = vmax.f32 %v336_v5, 0.0 }
 0x10a   :  { %434 = vst.msk [vmem:[%s1228_s11 + $0x38] sm:$0xf] %vm419_vm2, %v740_v6  ;;  %v741_v13 = vpack.c.bf16 %v354_v7, %v354_v7 }
 0x10b   :  { %432 = vst.msk [vmem:[%s1228_s11 + $0x30] sm:$0xf] %vm419_vm2, %v738_v8  ;;  %v739_v11 = vpack.c.bf16 %v352_v9, %v352_v9 }
 0x10c   :  { %435 = vst.msk [vmem:[%s1228_s11 + $0x3c] sm:$0xf] %vm419_vm2, %v741_v13 }
 0x10d   :  { %433 = vst.msk [vmem:[%s1228_s11 + $0x34] sm:$0xf] %vm419_vm2, %v739_v11 }

// kernel: _lambda_.16
= control target key start
LH: loop header
LB: loop body
LE: loop exit
PB: predicated region body
PF: predicated region fallthrough
CT: control target
= control target key end

     0   :  { %v411_v0 = vmov 0   ;;  %vm123_vm0 = vcmask 130048   ;;  %vm339_vm1 = vcmask 31744   ;;  %s550_s1 = inlined_call_operand.vmem [shape: bf16[144,16], index: 1, kind: input, shape index: {}]   ;;  %s551_s0 = inlined_call_operand.vmem [shape: bf16[32,144], index: 0, kind: input, shape index: {}]   ;;  %s552_s4 = inlined_call_operand.vmem [shape: bf16[16,128], index: 4, kind: input, shape index: {}]   ;;  %s553_s5 = inlined_call_operand.vmem [shape: bf16[16,4], index: 5, kind: input, shape index: {}]   ;;  %s554_s2 = inlined_call_operand.vmem [shape: f32[1,16], index: 2, kind: input, shape index: {}]   ;;  %s555_s3 = inlined_call_operand.vmem [shape: f32[1,16], index: 3, kind: input, shape index: {}]   ;;  %s556_s6 = inlined_call_operand.vmem [shape: f32[32,128], index: 6, kind: input, shape index: {}]   ;;  %s557_s7 = inlined_call_operand.vmem [shape: f32[32,128], index: 7, kind: output, shape index: {0}]   ;;  %s558_s8 = inlined_call_operand.vmem [shape: f32[32,4], index: 8, kind: output, shape index: {1}]  }
   0x1   :  { %130 = vmatprep.subr.bf16.mxu0 %v411_v0  ;;  %v394_v1 = vld [vmem:[%s550_s1] sm:$0xff]   ;;  %v395_v2 = vld [vmem:[%s550_s1 + $0x8] sm:$0xff]   ;;  %v396_v3 = vld [vmem:[%s550_s1 + $0x10] sm:$0xff]  }
   0x2   :  { %131 = vmatpush1.bf16.msra.mxu0 %v394_v1  ;;  %v397_v4 = vld [vmem:[%s550_s1 + $0x18] sm:$0xff]   ;;  %v405_v5 = vld [vmem:[%s551_s0 + $0x4] ss:$8 sps:$4 sm:$0xff]   ;;  %v400_v8 = vld [vmem:[%s550_s1 + $0x30] sm:$0xff]  }
   0x3   :  { %132 = vmatprep.subr.bf16.mxu0 %v411_v0  ;;  %365 = vmatprep.mubr.msk.bf16.mxu0 %vm123_vm0, %v405_v5  ;;  %v398_v6 = vld [vmem:[%s550_s1 + $0x20] sm:$0xff]   ;;  %v399_v7 = vld [vmem:[%s550_s1 + $0x28] sm:$0xff]   ;;  %v401_v9 = vld [vmem:[%s550_s1 + $0x38] sm:$0xff]  }
   0x4   :  { %v402_v10 = vld [vmem:[%s550_s1 + $0x40] sm:$0xff]   ;;  %v406_v12 = vld [vmem:[%s551_s0 + $0x14] ss:$8 sps:$4 sm:$0xff]   ;;  %v408_v13 = vld [vmem:[%s551_s0 + $0x10] ss:$8 sps:$4 sm:$0xff]  }
   0x5   :  { %v403_v11 = vld [vmem:[%s551_s0] ss:$8 sps:$4 sm:$0xff]   ;;  %v209_v40 = vld [vmem:[%s556_s6 + $0x10] sm:$0xff]  ;;  %v210_v43 = vld [vmem:[%s556_s6 + $0x18] sm:$0xff] }
   0x6   :  { %133 = vmatpush1.bf16.msra.mxu0 %v395_v2  ;;  %v409_v14 = vld [vmem:[%s552_s4] sm:$0xff]   ;;  %v208_v46 = vld [vmem:[%s556_s6 + $0x8] sm:$0xff] }
   0x7   :  { %134 = vmatprep.subr.bf16.mxu0 %v411_v0  ;;  %381 = vmatprep.subr.bf16.mxu1 %v409_v14  ;;  %v410_v15 = vld [vmem:[%s553_s5] sm:$0xff]  }
   0x8   :  { %382 = vmatpush3.bf16.msra.mxu1 %v409_v14  ;;  %v367_v16 = vld [vmem:[%s554_s2] ss:$0 sm:$0xff] }
   0x9   :  { %387 = vmatprep.subr.bf16.mxu1 %v410_v15  ;;  %v368_v18 = vld [vmem:[%s555_s3] ss:$0 sm:$0xff] }
   0xa   :  { %135 = vmatpush1.bf16.msra.mxu0 %v396_v3  ;;  %v207_v41 = vld [vmem:[%s556_s6] sm:$0xff] }
   0xb   :  { %136 = vmatprep.subr.bf16.mxu0 %v411_v0 }
   0xe   :  { %137 = vmatpush1.bf16.msra.mxu0 %v397_v4 }
   0xf   :  { %138 = vmatprep.subr.bf16.mxu0 %v411_v0 }
  0x12   :  { %139 = vmatpush1.bf16.msra.mxu0 %v398_v6 }
  0x13   :  { %140 = vmatprep.subr.bf16.mxu0 %v411_v0 }
  0x16   :  { %141 = vmatpush1.bf16.msra.mxu0 %v399_v7 }
  0x17   :  { %142 = vmatprep.subr.bf16.mxu0 %v411_v0 }
  0x1a   :  { %143 = vmatpush1.bf16.msra.mxu0 %v400_v8 }
  0x1b   :  { %144 = vmatprep.subr.bf16.mxu0 %v411_v0 }
  0x1e   :  { %145 = vmatpush1.bf16.msra.mxu0 %v401_v9 }
  0x1f   :  { %146 = vmatprep.subr.bf16.mxu0 %v411_v0 }
  0x22   :  { %147 = vmatpush1.bf16.msra.mxu0 %v402_v10 }
  0x25   :  { %163 = vmatmul.mubr.bf16.vlgmr.msra.gmra.mrb[0].mxu0 %v403_v11 }
  0x26   :  { %366 = vmatprep.mubr.msk.bf16.mxu0 %vm123_vm0, %v406_v12 }
  0x2d   :  { %171 = vmatmul.mubr.bf16.gmra.mrb[4].mxu0 %v408_v13 }
  0xf8   :  { %v164_v17 = vpop.f32.mrb[0].mxu0 }
  0xf9   :  { %v186_v19 = vmul.f32 %v367_v16, %v164_v17  ;;  %v166_v20 = vpop.f32.mrb[1].mxu0 }
  0xfa   :  { %v167_v21 = vpop.f32.mrb[2].mxu0 }
  0xfb   :  { %v197_v22 = vadd.f32 %v368_v18, %v186_v19  ;;  %v187_v23 = vmul.f32 %v367_v16, %v167_v21  ;;  %v169_v24 = vpop.f32.mrb[3].mxu0 }
  0xfd   :  { %v198_v25 = vadd.f32 %v368_v18, %v187_v23  ;;  %v201_v26 = vmax.f32 %v197_v22, 0.0 }
  0xff   :  { %v202_v27 = vmax.f32 %v198_v25, 0.0 }
 0x100   :  { %v172_v28 = vpop.f32.mrb[4].mxu0 }
 0x101   :  { %v188_v29 = vmul.f32 %v367_v16, %v172_v28  ;;  %v174_v30 = vpop.f32.mrb[5].mxu0  ;;  %v205_v31 = vpack.c.bf16 %v202_v27, %v201_v26 }
 0x102   :  { %v175_v32 = vpop.f32.mrb[6].mxu0 }
 0x103   :  { %v199_v33 = vadd.f32 %v368_v18, %v188_v29  ;;  %v189_v34 = vmul.f32 %v367_v16, %v175_v32  ;;  %v177_v35 = vpop.f32.mrb[7].mxu0  ;;  %383 = vmatprep.mubr.msk.bf16.mxu1 %vm123_vm0, %v205_v31 }
 0x105   :  { %v200_v36 = vadd.f32 %v368_v18, %v189_v34  ;;  %v203_v37 = vmax.f32 %v199_v33, 0.0 }
 0x107   :  { %v204_v38 = vmax.f32 %v200_v36, 0.0 }
 0x109   :  { %v206_v39 = vpack.c.bf16 %v204_v38, %v203_v37 }
 0x10b   :  { %384 = vmatmul.mubr.msk.bf16.vlgmr.msra.gmra.mrb[0].mxu1 %vm123_vm0, %v206_v39 }
 0x10c   :  { %388 = vmatpush3.bf16.msra.mxu1 %v410_v15  ;;  %389 = vmatprep.mubr.msk.bf16.mxu1 %vm123_vm0, %v205_v31 }
 0x113   :  { %390 = vmatmul.mubr.msk.bf16.vlgmr.msra.gmra.mrb[4].mxu1 %vm123_vm0, %v206_v39 }
 0x1de   :  { %v385_v42 = vpop.f32.mrb[0].mxu1 }
 0x1df   :  { %v276_v44 = vadd.f32 %v385_v42, %v209_v40  ;;  %v259_v45 = vpop.f32.mrb[1].mxu1 }
 0x1e0   :  { %v274_v47 = vadd.f32 %v259_v45, %v207_v41  ;;  %v386_v48 = vpop.f32.mrb[2].mxu1 }
 0x1e1   :  { %280 = vst [vmem:[%s557_s7 + $0x10] sm:$0xff] %v276_v44  ;;  %v277_v49 = vadd.f32 %v386_v48, %v210_v43  ;;  %v262_v50 = vpop.f32.mrb[3].mxu1 }
 0x1e2   :  { %278 = vst [vmem:[%s557_s7] sm:$0xff] %v274_v47  ;;  %v275_v51 = vadd.f32 %v262_v50, %v208_v46 }
 0x1e3   :  { %281 = vst [vmem:[%s557_s7 + $0x18] sm:$0xff] %v277_v49 }
 0x1e4   :  { %279 = vst [vmem:[%s557_s7 + $0x8] sm:$0xff] %v275_v51 }
 0x1e6   :  { %v391_v52 = vpop.f32.mrb[4].mxu1 }
 0x1e7   :  { %342 = vst.msk [vmem:[%s558_s8 + $0x10] sm:$0xff] %vm339_vm1, %v391_v52  ;;  %v324_v53 = vpop.f32.mrb[5].mxu1 }
 0x1e8   :  { %340 = vst.msk [vmem:[%s558_s8] sm:$0xff] %vm339_vm1, %v324_v53  ;;  %v392_v54 = vpop.f32.mrb[6].mxu1 }
 0x1e9   :  { %343 = vst.msk [vmem:[%s558_s8 + $0x18] sm:$0xff] %vm339_vm1, %v392_v54  ;;  %v327_v55 = vpop.f32.mrb[7].mxu1 }
 0x1ea   :  { %341 = vst.msk [vmem:[%s558_s8 + $0x8] sm:$0xff] %vm339_vm1, %v327_v55 }

// kernel: _lambda_.17
= control target key start
LH: loop header
LB: loop body
LE: loop exit
PB: predicated region body
PF: predicated region fallthrough
CT: control target
= control target key end

     0   :  { %v697_v0 = vmov 0   ;;  %v52_v2 = vlaneseq  ;;  %vm173_vm0 = vcmask 97280   ;;  %vm180_vm1 = vcmask 1045504   ;;  %s993_s4 = inlined_call_operand.vmem [shape: bf16[140,32], index: 4, kind: input, shape index: {}]   ;;  %s994_s9 = inlined_call_operand.vmem [shape: bf16[140,256], index: 9, kind: input, shape index: {}]   ;;  %s995_s0 = inlined_call_operand.vmem [shape: f32[32,140], index: 0, kind: input, shape index: {}]   ;;  %s996_s2 = inlined_call_operand.vmem [shape: f32[1,140], index: 2, kind: input, shape index: {}]   ;;  %s997_s3 = inlined_call_operand.vmem [shape: f32[1,140], index: 3, kind: input, shape index: {}]   ;;  %s998_s10 = inlined_call_operand.vmem [shape: bf16[140,8], index: 10, kind: input, shape index: {}]   ;;  %s999_s1 = inlined_call_operand.vmem [shape: f32[8,140], index: 1, kind: input, shape index: {}]   ;;  %s1000_s7 = inlined_call_operand.vmem [shape: f32[1,140], index: 7, kind: input, shape index: {}]   ;;  %s1001_s8 = inlined_call_operand.vmem [shape: f32[1,140], index: 8, kind: input, shape index: {}]   ;;  %s1002_s5 = inlined_call_operand.vmem [shape: f32[1,32], index: 5, kind: input, shape index: {}]   ;;  %s1003_s6 = inlined_call_operand.vmem [shape: f32[1,32], index: 6, kind: input, shape index: {}]   ;;  %s1004_s11 = inlined_call_operand.vmem [shape: bf16[32,32], index: 11, kind: output, shape index: {0}]   ;;  %s1005_s12 = inlined_call_operand.vmem [shape: f32[8,256], index: 12, kind: output, shape index: {1}]   ;;  %s1006_s13 = inlined_call_operand.vmem [shape: f32[8,8], index: 13, kind: output, shape index: {2}]  }
   0x1   :  { %184 = vmatprep.subr.bf16.mxu0 %v697_v0  ;;  %v652_v1 = vld [vmem:[%s993_s4] sm:$0xff]   ;;  %v653_v3 = vld [vmem:[%s993_s4 + $0x8] sm:$0xff]   ;;  %v654_v5 = vld [vmem:[%s993_s4 + $0x10] sm:$0xff]   ;;  %vm275_vm2 = vcmask 257024   ;;  %vm586_vm3 = vcmask 64512  }
   0x2   :  { %185 = vmatpush1.bf16.msra.mxu0 %v652_v1  ;;  %v53_v4 = vshrl.u32 %v52_v2, 7  ;;  %v661_v7 = vld [vmem:[%s994_s9 + $0x4] ss:$8 sps:$4 sm:$0xff]   ;;  %v655_v8 = vld [vmem:[%s993_s4 + $0x18] sm:$0xff]   ;;  %v663_v9 = vld [vmem:[%s994_s9] ss:$8 sps:$4 sm:$0xff]  }
   0x3   :  { %186 = vmatprep.subr.bf16.mxu0 %v697_v0  ;;  %v43_v10 = vld [vmem:[%s995_s0 + $0x8] sm:$0xff]  ;;  %429 = vmatprep.subr.bf16.mxu1 %v661_v7  ;;  %v45_v11 = vld [vmem:[%s995_s0 + $0x18] sm:$0xff]  ;;  %v50_v12 = vld [vmem:[%s996_s2] sm:$0x3] }
   0x4   :  { %v780_v6 = vsub.s32 1, %v53_v4  ;;  %v70_v13 = vld [vmem:[%s997_s3] sm:$0x3]  ;;  %430 = vmatpush1.bf16.msra.mxu1 %v663_v9  ;;  %v804_v14 = vsub.s32 0, %v53_v4  ;;  %v664_v17 = vld [vmem:[%s994_s9 + $0x14] ss:$8 sps:$4 sm:$0xff]  }
   0x5   :  { %v656_v18 = vld [vmem:[%s993_s4 + $0x20] sm:$0xff]   ;;  %v667_v21 = vld [vmem:[%s994_s9 + $0x10] ss:$8 sps:$4 sm:$0xff]   ;;  %431 = vmatprep.subr.bf16.mxu1 %v664_v17  ;;  %v672_v29 = vld [vmem:[%s994_s9 + $0x34] ss:$8 sps:$4 sm:$0xff]  }
   0x6   :  { %187 = vmatpush1.bf16.msra.mxu0 %v653_v3  ;;  %v59_v15 = vrot.slane %v50_v12, %v780_v6  ;;  %v808_v16 = vrot.slane %v70_v13, %v780_v6  ;;  %v42_v22 = vld [vmem:[%s995_s0] sm:$0xff]  ;;  %v55_v24 = vrot.slane %v50_v12, %v804_v14  ;;  %v44_v27 = vld [vmem:[%s995_s0 + $0x10] sm:$0xff]  ;;  %v657_v30 = vld [vmem:[%s993_s4 + $0x28] sm:$0xff]   ;;  %v75_v33 = vrot.slane %v70_v13, %v804_v14 }
   0x7   :  { %188 = vmatprep.subr.bf16.mxu0 %v697_v0  ;;  %v668_v23 = vld [vmem:[%s994_s9 + $0x24] ss:$8 sps:$4 sm:$0xff]   ;;  %v671_v28 = vld [vmem:[%s994_s9 + $0x20] ss:$8 sps:$4 sm:$0xff]   ;;  %v675_v37 = vld [vmem:[%s994_s9 + $0x30] ss:$8 sps:$4 sm:$0xff]  }
   0x8   :  { %v63_v19 = vmul.f32 %v59_v15, %v43_v10  ;;  %v65_v20 = vmul.f32 %v59_v15, %v45_v11  ;;  %432 = vmatpush1.bf16.msra.mxu1 %v667_v21  ;;  %v62_v35 = vmul.f32 %v55_v24, %v42_v22  ;;  %v64_v36 = vmul.f32 %v55_v24, %v44_v27  ;;  %v676_v38 = vld [vmem:[%s994_s9 + $0x44] ss:$8 sps:$4 sm:$0xff]   ;;  %v658_v39 = vld [vmem:[%s993_s4 + $0x30] sm:$0xff]   ;;  %v659_v40 = vld [vmem:[%s993_s4 + $0x38] sm:$0xff]  }
   0x9   :  { %433 = vmatprep.subr.bf16.mxu1 %v668_v23  ;;  %v679_v43 = vld [vmem:[%s994_s9 + $0x40] ss:$8 sps:$4 sm:$0xff]   ;;  %v680_v44 = vld [vmem:[%s994_s9 + $0x54] ss:$8 sps:$4 sm:$0xff]   ;;  %v683_v46 = vld [vmem:[%s994_s9 + $0x50] ss:$8 sps:$4 sm:$0xff]  }
   0xa   :  { %189 = vmatpush1.bf16.msra.mxu0 %v654_v5  ;;  %v83_v25 = vadd.f32 %v808_v16, %v63_v19  ;;  %v85_v26 = vadd.f32 %v808_v16, %v65_v20  ;;  %v82_v41 = vadd.f32 %v75_v33, %v62_v35  ;;  %v84_v42 = vadd.f32 %v75_v33, %v64_v36  ;;  %v660_v45 = vld [vmem:[%s993_s4 + $0x40] sm:$0x3f]   ;;  %v47_v47 = vld [vmem:[%s995_s0 + $0x28] sm:$0xff]  ;;  %v49_v48 = vld [vmem:[%s995_s0 + $0x38] sm:$0xff] }
   0xb   :  { %190 = vmatprep.subr.bf16.mxu0 %v697_v0  ;;  %v46_v49 = vld [vmem:[%s995_s0 + $0x20] sm:$0xff]  ;;  %v67_v52 = vmul.f32 %v59_v15, %v47_v47  ;;  %v69_v53 = vmul.f32 %v59_v15, %v49_v48  ;;  %v48_v54 = vld [vmem:[%s995_s0 + $0x30] sm:$0xff]  ;;  %v182_v60 = vsel %vm180_vm1, %v660_v45, 0  ;;  %v281_v9 = vld [vmem:[%s999_s1 + $0x8] sm:$0xff] }
   0xc   :  { %v91_v31 = vmax.f32 %v83_v25, 0.0  ;;  %v93_v32 = vmax.f32 %v85_v26, 0.0  ;;  %434 = vmatpush1.bf16.msra.mxu1 %v671_v28  ;;  %v90_v50 = vmax.f32 %v82_v41, 0.0  ;;  %v92_v51 = vmax.f32 %v84_v42, 0.0  ;;  %v684_v55 = vld [vmem:[%s994_s9 + $0x64] ss:$8 sps:$4 sm:$0xff]  }
   0xd   :  { %435 = vmatprep.subr.bf16.mxu1 %v672_v29  ;;  %v66_v56 = vmul.f32 %v55_v24, %v46_v49  ;;  %v68_v57 = vmul.f32 %v55_v24, %v48_v54  ;;  %v87_v58 = vadd.f32 %v808_v16, %v67_v52  ;;  %v89_v59 = vadd.f32 %v808_v16, %v69_v53  ;;  %v666_v61 = vld [vmem:[%s998_s10] sm:$0xff]   ;;  %v688_v5 = vld [vmem:[%s994_s9 + $0x74] ss:$8 sps:$4 sm:$0xff]   ;;  %v691_v15 = vld [vmem:[%s994_s9 + $0x70] ss:$8 sps:$4 sm:$0xff]  }
   0xe   :  { %191 = vmatpush1.bf16.msra.mxu0 %v655_v8  ;;  %v99_v34 = vpack.c.bf16 %v93_v32, %v91_v31  ;;  %v687_v62 = vld [vmem:[%s994_s9 + $0x60] ss:$8 sps:$4 sm:$0xff]   ;;  %v98_v2 = vpack.c.bf16 %v92_v51, %v90_v50  ;;  %v692_v16 = vld [vmem:[%s994_s9 + $0x84] ss:$8 sps:$4 sm:$0x3f]   ;;  %v674_v29 = vld [vmem:[%s998_s10 + $0x10] sm:$0xff]  }
   0xf   :  { %192 = vmatprep.subr.bf16.mxu0 %v697_v0  ;;  %v95_v63 = vmax.f32 %v87_v58, 0.0  ;;  %v97_v1 = vmax.f32 %v89_v59, 0.0  ;;  %v86_v3 = vadd.f32 %v75_v33, %v66_v56  ;;  %v88_v4 = vadd.f32 %v75_v33, %v68_v57  ;;  %v280_v7 = vld [vmem:[%s999_s1] sm:$0xff]  ;;  %v670_v24 = vld [vmem:[%s998_s10 + $0x8] sm:$0xff]   ;;  %v678_v32 = vld [vmem:[%s998_s10 + $0x18] sm:$0xff]  }
  0x10   :  { %609 = vmatprep.mubr.msk.bf16.mxu0 %vm173_vm0, %v99_v34  ;;  %436 = vmatpush1.bf16.msra.mxu1 %v675_v37  ;;  %v282_v10 = vld [vmem:[%s1000_s7] sm:$0x3]  ;;  %v686_v34 = vld [vmem:[%s998_s10 + $0x28] sm:$0xff]   ;;  %v690_v35 = vld [vmem:[%s998_s10 + $0x30] sm:$0xff]  }
  0x11   :  { %437 = vmatprep.subr.bf16.mxu1 %v676_v38  ;;  %v101_v8 = vpack.c.bf16 %v97_v1, %v95_v63  ;;  %v296_v11 = vld [vmem:[%s1001_s8] sm:$0x3]  ;;  %v287_v12 = vrot.slane %v282_v10, %v804_v14  ;;  %v291_v13 = vrot.slane %v282_v10, %v780_v6  ;;  %v94_v19 = vmax.f32 %v86_v3, 0.0  ;;  %v694_v36 = vld [vmem:[%s998_s10 + $0x38] sm:$0xff]  }
  0x12   :  { %193 = vmatpush1.bf16.msra.mxu0 %v656_v18  ;;  %v301_v17 = vrot.slane %v296_v11, %v804_v14  ;;  %v305_v18 = vrot.slane %v296_v11, %v780_v6  ;;  %v96_v20 = vmax.f32 %v88_v4, 0.0  ;;  %v695_v21 = vld [vmem:[%s994_s9 + $0x80] ss:$8 sps:$4 sm:$0x3f]  }
  0x13   :  { %194 = vmatprep.subr.bf16.mxu0 %v697_v0  ;;  %v295_v22 = vmul.f32 %v291_v13, %v281_v9  ;;  %v294_v23 = vmul.f32 %v287_v12, %v280_v7  ;;  %v424_v26 = vsel %vm180_vm1, %v695_v21, 0  ;;  %v682_v33 = vld [vmem:[%s998_s10 + $0x20] sm:$0xff]  }
  0x14   :  { %438 = vmatpush1.bf16.msra.mxu1 %v679_v43  ;;  %v100_v25 = vpack.c.bf16 %v96_v20, %v94_v19  ;;  %v696_v37 = vld [vmem:[%s998_s10 + $0x40] sm:$0x3f]  }
  0x15   :  { %439 = vmatprep.subr.bf16.mxu1 %v680_v44  ;;  %v309_v6 = vadd.f32 %v305_v18, %v295_v22  ;;  %v308_v14 = vadd.f32 %v301_v17, %v294_v23  ;;  %v544_v38 = vsel %vm180_vm1, %v696_v37, 0  ;;  %v612_v41 = vld [vmem:[%s1003_s6] ss:$0 sm:$0xff] }
  0x16   :  { %195 = vmatpush1.bf16.msra.mxu0 %v657_v30 }
  0x17   :  { %196 = vmatprep.subr.bf16.mxu0 %v697_v0  ;;  %v311_v27 = vmax.f32 %v309_v6, 0.0  ;;  %v310_v28 = vmax.f32 %v308_v14, 0.0 }
  0x18   :  { %440 = vmatpush1.bf16.msra.mxu1 %v683_v46 }
  0x19   :  { %441 = vmatprep.subr.bf16.mxu1 %v684_v55  ;;  %v313_v30 = vpack.c.bf16 %v311_v27, %v311_v27  ;;  %v312_v31 = vpack.c.bf16 %v310_v28, %v310_v28 }
  0x1a   :  { %197 = vmatpush1.bf16.msra.mxu0 %v658_v39  ;;  %v611_v39 = vld [vmem:[%s1002_s5] ss:$0 sm:$0xff] }
  0x1b   :  { %198 = vmatprep.subr.bf16.mxu0 %v697_v0  ;;  %636 = vmatprep.mubr.msk.bf16.mxu1 %vm173_vm0, %v313_v30 }
  0x1c   :  { %442 = vmatpush1.bf16.msra.mxu1 %v687_v62 }
  0x1d   :  { %443 = vmatprep.subr.bf16.mxu1 %v688_v5 }
  0x1e   :  { %199 = vmatpush1.bf16.msra.mxu0 %v659_v40 }
  0x1f   :  { %200 = vmatprep.subr.bf16.mxu0 %v697_v0 }
  0x20   :  { %444 = vmatpush1.bf16.msra.mxu1 %v691_v15 }
  0x21   :  { %635 = vmatprep.subr.msk.bf16.mxu1 %vm180_vm1, %v692_v16 }
  0x22   :  { %201 = vmatpush1.bf16.msra.mxu0 %v182_v60 }
  0x23   :  { %546 = vmatprep.subr.bf16.mxu0 %v697_v0 }
  0x24   :  { %446 = vmatpush1.bf16.msra.mxu1 %v424_v26 }
  0x25   :  { %217 = vmatmul.mubr.bf16.vlgmr.msra.gmra.mrb[0].mxu0 %v98_v2 }
  0x26   :  { %547 = vmatpush1.bf16.msra.mxu0 %v666_v61  ;;  %610 = vmatprep.mubr.msk.bf16.mxu0 %vm173_vm0, %v101_v8 }
  0x27   :  { %548 = vmatprep.subr.bf16.mxu0 %v697_v0  ;;  %462 = vmatmul.mubr.bf16.vlgmr.msra.gmra.mrb[0].mxu1 %v312_v31 }
  0x2a   :  { %549 = vmatpush1.bf16.msra.mxu0 %v670_v24 }
  0x2b   :  { %550 = vmatprep.subr.bf16.mxu0 %v697_v0 }
  0x2d   :  { %225 = vmatmul.mubr.bf16.gmra.mrb[4].mxu0 %v100_v25 }
  0x2e   :  { %551 = vmatpush1.bf16.msra.mxu0 %v674_v29  ;;  %646 = vmatprep.mubr.msk.bf16.mxu0 %vm173_vm0, %v313_v30 }
  0x2f   :  { %552 = vmatprep.subr.bf16.mxu0 %v697_v0 }
  0x32   :  { %553 = vmatpush1.bf16.msra.mxu0 %v678_v32 }
  0x33   :  { %554 = vmatprep.subr.bf16.mxu0 %v697_v0 }
  0x36   :  { %555 = vmatpush1.bf16.msra.mxu0 %v682_v33 }
  0x37   :  { %556 = vmatprep.subr.bf16.mxu0 %v697_v0 }
  0x3a   :  { %557 = vmatpush1.bf16.msra.mxu0 %v686_v34 }
  0x3b   :  { %558 = vmatprep.subr.bf16.mxu0 %v697_v0 }
  0x3e   :  { %559 = vmatpush1.bf16.msra.mxu0 %v690_v35 }
  0x3f   :  { %560 = vmatprep.subr.bf16.mxu0 %v697_v0 }
  0x42   :  { %561 = vmatpush1.bf16.msra.mxu0 %v694_v36 }
  0x43   :  { %562 = vmatprep.subr.bf16.mxu0 %v697_v0 }
  0x46   :  { %563 = vmatpush1.bf16.msra.mxu0 %v544_v38 }
  0x49   :  { %579 = vmatmul.mubr.bf16.vlgmr.msra.gmra.mrb[8].mxu0 %v312_v31 }
  0xf8   :  { %v218_v40 = vpop.f32.mrb[0].mxu0 }
  0xf9   :  { %v240_v42 = vmul.f32 %v611_v39, %v218_v40  ;;  %v220_v43 = vpop.f32.mrb[1].mxu0 }
  0xfa   :  { %v221_v44 = vpop.f32.mrb[2].mxu0  ;;  %v463_v56 = vpop.f32.mrb[0].mxu1 }
  0xfb   :  { %v251_v45 = vadd.f32 %v612_v41, %v240_v42  ;;  %v241_v46 = vmul.f32 %v611_v39, %v221_v44  ;;  %v223_v47 = vpop.f32.mrb[3].mxu0  ;;  %470 = vst [vmem:[%s1005_s12] sm:$0xff] %v463_v56  ;;  %v465_v60 = vpop.f32.mrb[1].mxu1 }
  0xfc   :  { %471 = vst [vmem:[%s1005_s12 + $0x8] sm:$0xff] %v465_v60  ;;  %v467_v61 = vpop.f32.mrb[2].mxu1 }
  0xfd   :  { %v255_v0 = vmax.f32 %v251_v45, 0.0  ;;  %v252_v48 = vadd.f32 %v612_v41, %v241_v46  ;;  %v468_v1 = vpop.f32.mrb[3].mxu1 }
  0xff   :  { %v647_v49 = vpack.c.bf16 %v255_v0, %v255_v0  ;;  %v256_v50 = vmax.f32 %v252_v48, 0.0 }
 0x100   :  { %v226_v51 = vpop.f32.mrb[4].mxu0 }
 0x101   :  { %276 = vst.msk [vmem:[%s1004_s11] sm:$0xf] %vm275_vm2, %v647_v49  ;;  %v648_v52 = vpack.c.bf16 %v256_v50, %v256_v50  ;;  %v242_v53 = vmul.f32 %v611_v39, %v226_v51  ;;  %v228_v54 = vpop.f32.mrb[5].mxu0 }
 0x102   :  { %v229_v55 = vpop.f32.mrb[6].mxu0 }
 0x103   :  { %277 = vst.msk [vmem:[%s1004_s11 + $0x4] sm:$0xf] %vm275_vm2, %v648_v52  ;;  %v253_v57 = vadd.f32 %v612_v41, %v242_v53  ;;  %v243_v58 = vmul.f32 %v611_v39, %v229_v55  ;;  %v231_v59 = vpop.f32.mrb[7].mxu0 }
 0x105   :  { %v257_v62 = vmax.f32 %v253_v57, 0.0  ;;  %v254_v63 = vadd.f32 %v612_v41, %v243_v58 }
 0x107   :  { %v649_v2 = vpack.c.bf16 %v257_v62, %v257_v62  ;;  %v258_v3 = vmax.f32 %v254_v63, 0.0 }
 0x109   :  { %278 = vst.msk [vmem:[%s1004_s11 + $0x8] sm:$0xf] %vm275_vm2, %v649_v2  ;;  %v650_v4 = vpack.c.bf16 %v258_v3, %v258_v3 }
 0x10b   :  { %279 = vst.msk [vmem:[%s1004_s11 + $0xc] sm:$0xf] %vm275_vm2, %v650_v4 }
 0x11c   :  { %v580_v5 = vpop.f32.mrb[8].mxu0 }
 0x11d   :  { %587 = vst.msk [vmem:[%s1006_s13] sm:$0xff] %vm586_vm3, %v580_v5  ;;  %v582_v7 = vpop.f32.mrb[9].mxu0 }
 0x11e   :  { %v583_v8 = vpop.f32.mrb[10].mxu0 }
 0x11f   :  { %v584_v9 = vpop.f32.mrb[11].mxu0 }

// kernel: _lambda_.18
= control target key start
LH: loop header
LB: loop body
LE: loop exit
PB: predicated region body
PF: predicated region fallthrough
CT: control target
= control target key end

     0   :  { %v535_v1 = vmov 0.0   ;;  %vm536_vm0 = vmmov 0   ;;  %vm185_vm1 = vcmask 261120   ;;  %v537_v27 = vmov 0   ;;  %s693_s1 = inlined_call_operand.vmem [shape: bf16[288,32], index: 1, kind: input, shape index: {}]   ;;  %s694_s0 = inlined_call_operand.vmem [shape: bf16[8,288], index: 0, kind: input, shape index: {}]   ;;  %s695_s4 = inlined_call_operand.vmem [shape: bf16[32,256], index: 4, kind: input, shape index: {}]   ;;  %s696_s5 = inlined_call_operand.vmem [shape: bf16[32,4], index: 5, kind: input, shape index: {}]   ;;  %s697_s2 = inlined_call_operand.vmem [shape: f32[1,32], index: 2, kind: input, shape index: {}]   ;;  %s698_s3 = inlined_call_operand.vmem [shape: f32[1,32], index: 3, kind: input, shape index: {}]   ;;  %s699_s6 = inlined_call_operand.vmem [shape: f32[8,256], index: 6, kind: input, shape index: {}]   ;;  %s700_s7 = inlined_call_operand.vmem [shape: f32[8,256], index: 7, kind: output, shape index: {0}]   ;;  %s701_s8 = inlined_call_operand.vmem [shape: f32[8,4], index: 8, kind: output, shape index: {1}]  }
   0x1   :  { %v506_v0 = vld [vmem:[%s693_s1 + $0x40] sm:$0xff]   ;;  %487 = vmatprep.subr.bf16.mxu1 %v535_v1  ;;  %491 = vmatprep.mubr.msk.bf16.mxu1 %vm536_vm0, %v535_v1  ;;  %v508_v3 = vld [vmem:[%s693_s1 + $0x48] sm:$0xff]   ;;  %v510_v5 = vld [vmem:[%s693_s1 + $0x50] sm:$0xff]   ;;  %vm417_vm2 = vcmask 31744  }
   0x2   :  { %v507_v2 = vld [vmem:[%s693_s1] sm:$0xff]   ;;  %459 = vmatprep.subr.bf16.mxu0 %v506_v0  ;;  %v509_v4 = vld [vmem:[%s693_s1 + $0x8] sm:$0xff]   ;;  %v511_v6 = vld [vmem:[%s693_s1 + $0x10] sm:$0xff]  }
   0x3   :  { %460 = vmatpush3.bf16.msra.mxu0 %v507_v2  ;;  %v512_v7 = vld [vmem:[%s693_s1 + $0x58] sm:$0xff]   ;;  %v514_v9 = vld [vmem:[%s693_s1 + $0x60] sm:$0xff]   ;;  %v516_v12 = vld [vmem:[%s693_s1 + $0x68] sm:$0xff]  }
   0x4   :  { %461 = vmatprep.subr.bf16.mxu0 %v508_v3  ;;  %v513_v8 = vld [vmem:[%s693_s1 + $0x18] sm:$0xff]   ;;  %v520_v10 = vld [vmem:[%s693_s1 + $0x80] sm:$0xff]   ;;  %v523_v13 = vld [vmem:[%s693_s1 + $0x88] sm:$0xff]  }
   0x5   :  { %v515_v11 = vld [vmem:[%s693_s1 + $0x20] sm:$0xff]   ;;  %488 = vmatpush3.bf16.msra.mxu1 %v520_v10  ;;  %v517_v15 = vld [vmem:[%s693_s1 + $0x28] sm:$0xff]   ;;  %v518_v18 = vld [vmem:[%s693_s1 + $0x70] sm:$0xff]  }
   0x6   :  { %489 = vmatprep.subr.bf16.mxu1 %v535_v1  ;;  %v29_v14 = vld [vmem:[%s694_s0] sm:$0xff]  ;;  %v526_v17 = vld [vmem:[%s694_s0 + $0x8] ss:$0 sps:$4 sm:$0xff]   ;;  %v519_v19 = vld [vmem:[%s693_s1 + $0x30] sm:$0xff]  }
   0x7   :  { %462 = vmatpush3.bf16.msra.mxu0 %v509_v4  ;;  %v428_v16 = vcombine.high %v29_v14, %v29_v14  ;;  %v521_v20 = vld [vmem:[%s693_s1 + $0x78] sm:$0xff]   ;;  %v427_v22 = vcombine.low %v29_v14, %v29_v14  ;;  %v527_v23 = vld [vmem:[%s695_s4] ss:$8 sps:$4 sm:$0xff]   ;;  %v529_v24 = vld [vmem:[%s695_s4 + $0x4] ss:$8 sps:$4 sm:$0xff]  }
   0x8   :  { %463 = vmatprep.subr.bf16.mxu0 %v510_v5  ;;  %v522_v21 = vld [vmem:[%s693_s1 + $0x38] sm:$0xff]   ;;  %v449_v36 = vld [vmem:[%s697_s2] ss:$0 sm:$0xff]  ;;  %v534_v45 = vld [vmem:[%s696_s5 + $0x8] sm:$0xff]  }
   0x9   :  { %490 = vmatpush3.bf16.msra.mxu1 %v523_v13  ;;  %221 = vmatprep.mubr.bf16.mxu0 %v428_v16  ;;  %v532_v25 = vld [vmem:[%s695_s4 + $0x14] ss:$8 sps:$4 sm:$0xff]   ;;  %v530_v26 = vld [vmem:[%s695_s4 + $0x10] ss:$8 sps:$4 sm:$0xff]   ;;  %v450_v39 = vld [vmem:[%s698_s3] ss:$0 sm:$0xff] }
   0xa   :  { %316 = vmatprep.subr.bf16.mxu1 %v529_v24  ;;  %v533_v43 = vld [vmem:[%s696_s5] sm:$0xff]   ;;  %v288_v47 = vld [vmem:[%s699_s6 + $0x8] sm:$0xff] }
   0xb   :  { %464 = vmatpush3.bf16.msra.mxu0 %v511_v6  ;;  %v287_v46 = vld [vmem:[%s699_s6] sm:$0xff] }
   0xc   :  { %465 = vmatprep.subr.bf16.mxu0 %v512_v7  ;;  %492 = vmatmul.mubr.msk.bf16.vlgmr.msra.gmra.mrb[0].mxu1 %vm185_vm1, %v526_v17 }
   0xd   :  { %317 = vmatpush1.bf16.msra.mxu1 %v527_v23  ;;  %348 = vmatprep.mubr.bf16.mxu1 %v537_v27 }
   0xe   :  { %318 = vmatprep.subr.bf16.mxu1 %v532_v25 }
   0xf   :  { %466 = vmatpush3.bf16.msra.mxu0 %v513_v8 }
  0x10   :  { %467 = vmatprep.subr.bf16.mxu0 %v514_v9 }
  0x11   :  { %319 = vmatpush1.bf16.msra.mxu1 %v530_v26 }
  0x12   :  { %495 = vmatprep.subr.bf16.mxu1 %v535_v1 }
  0x13   :  { %468 = vmatpush3.bf16.msra.mxu0 %v515_v11 }
  0x14   :  { %469 = vmatprep.subr.bf16.mxu0 %v516_v12 }
  0x17   :  { %470 = vmatpush3.bf16.msra.mxu0 %v517_v15 }
  0x18   :  { %471 = vmatprep.subr.bf16.mxu0 %v518_v18 }
  0x1b   :  { %472 = vmatpush3.bf16.msra.mxu0 %v519_v19 }
  0x1c   :  { %473 = vmatprep.subr.bf16.mxu0 %v521_v20 }
  0x1f   :  { %474 = vmatpush3.bf16.msra.mxu0 %v522_v21 }
  0x22   :  { %222 = vmatmul.mubr.bf16.vlgmr.msra.gmra.mrb[0].mxu0 %v427_v22 }
  0xdf   :  { %v263_v28 = vpop.f32.mrb[0].mxu1 }
  0xe0   :  { %v493_v29 = vpop.f32.mrb[1].mxu1 }
  0xe1   :  { %v266_v30 = vpop.f32.mrb[2].mxu1 }
  0xe2   :  { %v494_v31 = vpop.f32.mrb[3].mxu1 }
  0xf5   :  { %v475_v32 = vpop.f32.mrb[0].mxu0 }
  0xf6   :  { %v476_v33 = vpop.f32.mrb[1].mxu0 }
  0xf7   :  { %v477_v34 = vadd.f32 %v476_v33, %v475_v32  ;;  %v478_v35 = vpop.f32.mrb[2].mxu0 }
  0xf8   :  { %v479_v37 = vpop.f32.mrb[3].mxu0 }
  0xf9   :  { %v264_v38 = vadd.f32 %v477_v34, %v263_v28 }
  0xfb   :  { %v276_v40 = vmul.f32 %v449_v36, %v264_v38 }
  0xfd   :  { %v284_v41 = vadd.f32 %v450_v39, %v276_v40 }
  0xff   :  { %v285_v42 = vmax.f32 %v284_v41, 0.0 }
 0x101   :  { %v286_v44 = vpack.c.bf16 %v285_v42, %v285_v42 }
 0x103   :  { %455 = vmatmul.mubr.msk.bf16.vlgmr.msra.gmra.mrb[4].mxu1 %vm185_vm1, %v286_v44 }
 0x104   :  { %496 = vmatpush3.bf16.msra.mxu1 %v533_v43  ;;  %499 = vmatprep.mubr.msk.bf16.mxu1 %vm536_vm0, %v535_v1 }
 0x105   :  { %497 = vmatprep.subr.bf16.mxu1 %v535_v1 }
 0x108   :  { %498 = vmatpush3.bf16.msra.mxu1 %v534_v45 }
 0x10b   :  { %500 = vmatmul.mubr.msk.bf16.vlgmr.msra.gmra.mrb[8].mxu1 %vm185_vm1, %v286_v44 }
 0x1d6   :  { %v350_v48 = vpop.f32.mrb[4].mxu1 }
 0x1d7   :  { %v357_v49 = vadd.f32 %v350_v48, %v287_v46  ;;  %v352_v50 = vpop.f32.mrb[5].mxu1 }
 0x1d8   :  { %v358_v51 = vadd.f32 %v352_v50, %v288_v47  ;;  %v354_v52 = vpop.f32.mrb[6].mxu1 }
 0x1d9   :  { %359 = vst [vmem:[%s700_s7] sm:$0xff] %v357_v49  ;;  %v355_v53 = vpop.f32.mrb[7].mxu1 }
 0x1da   :  { %360 = vst [vmem:[%s700_s7 + $0x8] sm:$0xff] %v358_v51 }
 0x1de   :  { %v411_v54 = vpop.f32.mrb[8].mxu1 }
 0x1df   :  { %418 = vst.msk [vmem:[%s701_s8] sm:$0xff] %vm417_vm2, %v411_v54  ;;  %v501_v55 = vpop.f32.mrb[9].mxu1 }
 0x1e0   :  { %v414_v56 = vpop.f32.mrb[10].mxu1 }
 0x1e1   :  { %v502_v57 = vpop.f32.mrb[11].mxu1 }

// kernel: _lambda_.19
= control target key start
LH: loop header
LB: loop body
LE: loop exit
PB: predicated region body
PF: predicated region fallthrough
CT: control target
= control target key end

     0   :  { %v47_v0 = vlaneseq  ;;  %v1579_v2 = vmov 0.0   ;;  %vm1580_vm0 = vmmov 0   ;;  %vm230_vm1 = vcmask 1045504   ;;  %s2053_s4 = inlined_call_operand.vmem [shape: bf16[268,64], index: 4, kind: input, shape index: {}]   ;;  %s2054_s9 = inlined_call_operand.vmem [shape: bf16[268,512], index: 9, kind: input, shape index: {}]   ;;  %s2055_s0 = inlined_call_operand.vmem [shape: f32[8,268], index: 0, kind: input, shape index: {}]   ;;  %s2056_s2 = inlined_call_operand.vmem [shape: f32[1,268], index: 2, kind: input, shape index: {}]   ;;  %s2057_s3 = inlined_call_operand.vmem [shape: f32[1,268], index: 3, kind: input, shape index: {}]   ;;  %s2058_s7 = inlined_call_operand.vmem [shape: f32[1,268], index: 7, kind: input, shape index: {}]   ;;  %s2059_s8 = inlined_call_operand.vmem [shape: f32[1,268], index: 8, kind: input, shape index: {}]   ;;  %s2060_s1 = inlined_call_operand.vmem [shape: f32[2,268], index: 1, kind: input, shape index: {}]   ;;  %s2061_s10 = inlined_call_operand.vmem [shape: bf16[268,8], index: 10, kind: input, shape index: {}]   ;;  %s2062_s5 = inlined_call_operand.vmem [shape: f32[1,64], index: 5, kind: input, shape index: {}]   ;;  %s2063_s6 = inlined_call_operand.vmem [shape: f32[1,64], index: 6, kind: input, shape index: {}]   ;;  %s2064_s11 = inlined_call_operand.vmem [shape: bf16[8,64], index: 11, kind: output, shape index: {0}]   ;;  %s2065_s12 = inlined_call_operand.vmem [shape: f32[2,512], index: 12, kind: output, shape index: {1}]   ;;  %s2066_s13 = inlined_call_operand.vmem [shape: f32[2,8], index: 13, kind: output, shape index: {2}]  }
   0x1   :  { %v1443_v1 = vld [vmem:[%s2053_s4 + $0x40] sm:$0xff]   ;;  %1419 = vmatprep.subr.bf16.mxu1 %v1579_v2  ;;  %1421 = vmatprep.mubr.msk.bf16.mxu1 %vm1580_vm0, %v1579_v2  ;;  %v1445_v4 = vld [vmem:[%s2053_s4 + $0x48] sm:$0xff]   ;;  %v1447_v7 = vld [vmem:[%s2053_s4 + $0x50] sm:$0xff]   ;;  %vm226_vm2 = vcmask 97280   ;;  %vm332_vm3 = vcmask 519168   ;;  %vm1247_vm4 = vcmask 58368  }
   0x2   :  { %v1444_v3 = vld [vmem:[%s2053_s4] sm:$0xff]   ;;  %1371 = vmatprep.subr.bf16.mxu0 %v1443_v1  ;;  %v1665_v5 = vshrl.u32 %v47_v0, 7  ;;  %v1446_v6 = vld [vmem:[%s2053_s4 + $0x8] sm:$0xff]   ;;  %v1449_v11 = vld [vmem:[%s2053_s4 + $0x10] sm:$0xff]  }
   0x3   :  { %1372 = vmatpush3.bf16.msra.mxu0 %v1444_v3  ;;  %v1448_v8 = vld [vmem:[%s2053_s4 + $0x80] sm:$0x3f]   ;;  %v1453_v13 = vld [vmem:[%s2053_s4 + $0x58] sm:$0xff]   ;;  %v44_v14 = vld [vmem:[%s2055_s0 + $0x10] sm:$0xff] }
   0x4   :  { %1373 = vmatprep.subr.bf16.mxu0 %v1445_v4  ;;  %v1677_v9 = vsub.s32 2, %v1665_v5  ;;  %v232_v10 = vsel %vm230_vm1, %v1448_v8, 0  ;;  %v1452_v12 = vld [vmem:[%s2054_s9 + $0x4] ss:$16 sps:$4 sm:$0xff]   ;;  %v45_v15 = vld [vmem:[%s2056_s2] sm:$0x7] }
   0x5   :  { %1420 = vmatpush3.bf16.msra.mxu1 %v232_v10  ;;  %v65_v17 = vld [vmem:[%s2057_s3] sm:$0x7]  ;;  %v1454_v19 = vld [vmem:[%s2053_s4 + $0x18] sm:$0xff]   ;;  %v1710_v24 = vsub.s32 1, %v1665_v5  ;;  %v1463_v26 = vld [vmem:[%s2053_s4 + $0x68] sm:$0xff]   ;;  %v1725_v31 = vsub.s32 0, %v1665_v5 }
   0x6   :  { %842 = vmatprep.subr.bf16.mxu1 %v1452_v12  ;;  %v58_v16 = vrot.slane %v45_v15, %v1677_v9  ;;  %v78_v18 = vrot.slane %v65_v17, %v1677_v9  ;;  %v1458_v21 = vld [vmem:[%s2053_s4 + $0x60] sm:$0xff]   ;;  %v1464_v30 = vld [vmem:[%s2053_s4 + $0x28] sm:$0xff]   ;;  %v1468_v32 = vld [vmem:[%s2053_s4 + $0x70] sm:$0xff]  }
   0x7   :  { %1374 = vmatpush3.bf16.msra.mxu0 %v1446_v6  ;;  %v1459_v23 = vld [vmem:[%s2053_s4 + $0x20] sm:$0xff]   ;;  %v54_v34 = vrot.slane %v45_v15, %v1710_v24  ;;  %v1469_v36 = vld [vmem:[%s2053_s4 + $0x30] sm:$0xff]   ;;  %v74_v37 = vrot.slane %v65_v17, %v1710_v24  ;;  %v50_v38 = vrot.slane %v45_v15, %v1725_v31  ;;  %v1473_v39 = vld [vmem:[%s2053_s4 + $0x78] sm:$0xff]   ;;  %v70_v43 = vrot.slane %v65_v17, %v1725_v31 }
   0x8   :  { %1375 = vmatprep.subr.bf16.mxu0 %v1447_v7  ;;  %v64_v20 = vmul.f32 %v58_v16, %v44_v14  ;;  %v1450_v27 = vld [vmem:[%s2054_s9] ss:$16 sps:$4 sm:$0xff]   ;;  %v1457_v29 = vld [vmem:[%s2054_s9 + $0x24] ss:$16 sps:$4 sm:$0xff]   ;;  %v43_v40 = vld [vmem:[%s2055_s0 + $0x8] sm:$0xff] }
   0x9   :  { %v1455_v33 = vld [vmem:[%s2054_s9 + $0x20] ss:$16 sps:$4 sm:$0xff]   ;;  %v1462_v35 = vld [vmem:[%s2054_s9 + $0x44] ss:$16 sps:$4 sm:$0xff]   ;;  %v63_v42 = vmul.f32 %v54_v34, %v43_v40  ;;  %v1474_v46 = vld [vmem:[%s2053_s4 + $0x38] sm:$0xff]  }
   0xa   :  { %v84_v22 = vadd.f32 %v78_v18, %v64_v20  ;;  %v1460_v41 = vld [vmem:[%s2054_s9 + $0x40] ss:$16 sps:$4 sm:$0xff]   ;;  %v1467_v44 = vld [vmem:[%s2054_s9 + $0x64] ss:$16 sps:$4 sm:$0xff]   ;;  %v1480_v49 = vld [vmem:[%s2054_s9 + $0xc] ss:$16 sps:$4 sm:$0xff]  }
   0xb   :  { %1376 = vmatpush3.bf16.msra.mxu0 %v1449_v11  ;;  %v42_v45 = vld [vmem:[%s2055_s0] sm:$0xff]  ;;  %v83_v47 = vadd.f32 %v74_v37, %v63_v42  ;;  %v1478_v57 = vld [vmem:[%s2054_s9 + $0x8] ss:$16 sps:$4 sm:$0xff]   ;;  %v1486_v59 = vld [vmem:[%s2054_s9 + $0x2c] ss:$16 sps:$4 sm:$0xff]  }
   0xc   :  { %1377 = vmatprep.subr.bf16.mxu0 %v1453_v13  ;;  %v87_v25 = vmax.f32 %v84_v22, 0.0  ;;  %v62_v48 = vmul.f32 %v50_v38, %v42_v45  ;;  %v1465_v50 = vld [vmem:[%s2054_s9 + $0x60] ss:$16 sps:$4 sm:$0xff]   ;;  %v1472_v53 = vld [vmem:[%s2054_s9 + $0x84] ss:$16 sps:$4 sm:$0xff]  }
   0xd   :  { %v86_v51 = vmax.f32 %v83_v47, 0.0  ;;  %v1470_v54 = vld [vmem:[%s2054_s9 + $0x80] ss:$16 sps:$4 sm:$0xff]   ;;  %v1477_v60 = vld [vmem:[%s2054_s9 + $0xa4] ss:$16 sps:$4 sm:$0xff]  }
   0xe   :  { %v90_v28 = vpack.c.bf16 %v87_v25, %v87_v25  ;;  %v82_v52 = vadd.f32 %v70_v43, %v62_v48  ;;  %v1475_v61 = vld [vmem:[%s2054_s9 + $0xa0] ss:$16 sps:$4 sm:$0xff]   ;;  %v1484_v62 = vld [vmem:[%s2054_s9 + $0x28] ss:$16 sps:$4 sm:$0xff]   ;;  %v1492_v63 = vld [vmem:[%s2054_s9 + $0x4c] ss:$16 sps:$4 sm:$0xff]  }
   0xf   :  { %1378 = vmatpush3.bf16.msra.mxu0 %v1454_v19  ;;  %v89_v55 = vpack.c.bf16 %v86_v51, %v86_v51  ;;  %v1483_v0 = vld [vmem:[%s2054_s9 + $0xc4] ss:$16 sps:$4 sm:$0xff]   ;;  %v1481_v1 = vld [vmem:[%s2054_s9 + $0xc0] ss:$16 sps:$4 sm:$0xff]   ;;  %v1490_v3 = vld [vmem:[%s2054_s9 + $0x48] ss:$16 sps:$4 sm:$0xff]  }
  0x10   :  { %1379 = vmatprep.subr.bf16.mxu0 %v1458_v21  ;;  %1422 = vmatmul.mubr.msk.bf16.vlgmr.msra.gmra.mrb[0].mxu1 %vm226_vm2, %v90_v28  ;;  %v85_v56 = vmax.f32 %v82_v52, 0.0  ;;  %v1498_v4 = vld [vmem:[%s2054_s9 + $0x6c] ss:$16 sps:$4 sm:$0xff]   ;;  %v1489_v6 = vld [vmem:[%s2054_s9 + $0xe4] ss:$16 sps:$4 sm:$0xff]  }
  0x11   :  { %843 = vmatpush1.bf16.msra.mxu1 %v1450_v27  ;;  %266 = vmatprep.mubr.bf16.mxu0 %v89_v55  ;;  %v1487_v7 = vld [vmem:[%s2054_s9 + $0xe0] ss:$16 sps:$4 sm:$0xff]   ;;  %v1496_v8 = vld [vmem:[%s2054_s9 + $0x68] ss:$16 sps:$4 sm:$0xff]   ;;  %v1504_v10 = vld [vmem:[%s2054_s9 + $0x8c] ss:$16 sps:$4 sm:$0xff]  }
  0x12   :  { %844 = vmatprep.subr.bf16.mxu1 %v1457_v29  ;;  %v88_v58 = vpack.c.bf16 %v85_v56, %v85_v56  ;;  %v1581_v11 = vmov 1983009808   ;;  %v1495_v13 = vld [vmem:[%s2054_s9 + $0x104] ss:$16 sps:$4 sm:$0xff]   ;;  %v1493_v14 = vld [vmem:[%s2054_s9 + $0x100] ss:$16 sps:$4 sm:$0xff]  }
  0x13   :  { %1380 = vmatpush3.bf16.msra.mxu0 %v1459_v23  ;;  %v351_v12 = vunpack.c.l.s4 %v1581_v11  ;;  %v1502_v15 = vld [vmem:[%s2054_s9 + $0x88] ss:$16 sps:$4 sm:$0xff]   ;;  %v1510_v16 = vld [vmem:[%s2054_s9 + $0xac] ss:$16 sps:$4 sm:$0xff]   ;;  %v1501_v18 = vld [vmem:[%s2054_s9 + $0x124] ss:$16 sps:$4 sm:$0xff]  }
  0x14   :  { %1381 = vmatprep.subr.bf16.mxu0 %v1463_v26  ;;  %v1499_v19 = vld [vmem:[%s2054_s9 + $0x120] ss:$16 sps:$4 sm:$0xff]   ;;  %v1508_v20 = vld [vmem:[%s2054_s9 + $0xa8] ss:$16 sps:$4 sm:$0xff]   ;;  %v1516_v21 = vld [vmem:[%s2054_s9 + $0xcc] ss:$16 sps:$4 sm:$0xff]  }
  0x15   :  { %845 = vmatpush1.bf16.msra.mxu1 %v1455_v33  ;;  %v352_v17 = vunpack.c.0.s8 %v351_v12  ;;  %v1507_v23 = vld [vmem:[%s2054_s9 + $0x144] ss:$16 sps:$4 sm:$0xff]   ;;  %v335_v25 = vld [vmem:[%s2058_s7] sm:$0x7]  ;;  %v1514_v27 = vld [vmem:[%s2054_s9 + $0xc8] ss:$16 sps:$4 sm:$0xff]  }
  0x16   :  { %846 = vmatprep.subr.bf16.mxu1 %v1462_v35  ;;  %v367_v26 = vld [vmem:[%s2059_s8] sm:$0x7]  ;;  %v344_v28 = vrot.slane %v335_v25, %v1710_v24  ;;  %v348_v29 = vrot.slane %v335_v25, %v1677_v9  ;;  %v1522_v33 = vld [vmem:[%s2054_s9 + $0xec] ss:$16 sps:$4 sm:$0xff]   ;;  %v1526_v48 = vld [vmem:[%s2054_s9 + $0x108] ss:$16 sps:$4 sm:$0xff]  }
  0x17   :  { %1382 = vmatpush3.bf16.msra.mxu0 %v1464_v30  ;;  %v1841_v22 = vsub.s32 %v352_v17, %v1665_v5  ;;  %v340_v5 = vrot.slane %v335_v25, %v1725_v31  ;;  %v372_v30 = vrot.slane %v367_v26, %v1725_v31  ;;  %v376_v34 = vrot.slane %v367_v26, %v1710_v24  ;;  %v1511_v38 = vld [vmem:[%s2054_s9 + $0x160] ss:$16 sps:$4 sm:$0xff]   ;;  %v1528_v24 = vld [vmem:[%s2054_s9 + $0x10c] ss:$16 sps:$4 sm:$0xff]   ;;  %v1525_v51 = vld [vmem:[%s2054_s9 + $0x1a4] ss:$16 sps:$4 sm:$0xff]  }
  0x18   :  { %1383 = vmatprep.subr.bf16.mxu0 %v1468_v32  ;;  %v1505_v32 = vld [vmem:[%s2054_s9 + $0x140] ss:$16 sps:$4 sm:$0xff]   ;;  %v380_v35 = vrot.slane %v367_v26, %v1677_v9  ;;  %v1520_v9 = vld [vmem:[%s2054_s9 + $0xe8] ss:$16 sps:$4 sm:$0xff]   ;;  %v1540_v56 = vld [vmem:[%s2054_s9 + $0x14c] ss:$16 sps:$4 sm:$0xff]  }
  0x19   :  { %847 = vmatpush1.bf16.msra.mxu1 %v1460_v41  ;;  %v349_v31 = vcombine.low %v340_v5, %v344_v28  ;;  %v363_v37 = vrot.slane %v348_v29, %v1841_v22  ;;  %v334_v42 = vld [vmem:[%s2060_s1] sm:$0x3f]  ;;  %v1552_v11 = vld [vmem:[%s2054_s9 + $0x1ac] ss:$16 sps:$4 sm:$0xff]   ;;  %v1582_v17 = vmov 0  }
  0x1a   :  { %848 = vmatprep.subr.bf16.mxu1 %v1467_v44  ;;  %v395_v40 = vrot.slane %v380_v35, %v1841_v22  ;;  %v1519_v44 = vld [vmem:[%s2054_s9 + $0x184] ss:$16 sps:$4 sm:$0xff]   ;;  %v1560_v25 = vld [vmem:[%s2054_s9 + $0x1e8] ss:$16 sps:$4 sm:$0xff]  }
  0x1b   :  { %1384 = vmatpush3.bf16.msra.mxu0 %v1469_v36  ;;  %v1513_v36 = vld [vmem:[%s2054_s9 + $0x164] ss:$16 sps:$4 sm:$0xff]   ;;  %v356_v41 = vrot.slane %v349_v31, %v1841_v22  ;;  %v1567_v26 = vld [vmem:[%s2054_s9 + $0x20c] ss:$16 sps:$4 sm:$0x3f]  }
  0x1c   :  { %1385 = vmatprep.subr.bf16.mxu0 %v1473_v39  ;;  %v381_v39 = vcombine.low %v372_v30, %v376_v34  ;;  %v1558_v5 = vld [vmem:[%s2061_s10 + $0x48] sm:$0xff]   ;;  %v1563_v30 = vld [vmem:[%s2061_s10 + $0x50] sm:$0xff]   ;;  %v1566_v34 = vld [vmem:[%s2061_s10 + $0x18] sm:$0xff]  }
  0x1d   :  { %849 = vmatpush1.bf16.msra.mxu1 %v1465_v50  ;;  %v364_v45 = vcombine.low %v356_v41, %v363_v37  ;;  %v1534_v50 = vld [vmem:[%s2054_s9 + $0x12c] ss:$16 sps:$4 sm:$0xff]   ;;  %v1577_v35 = vld [vmem:[%s2061_s10 + $0x80] sm:$0x3f]  }
  0x1e   :  { %850 = vmatprep.subr.bf16.mxu1 %v1472_v53  ;;  %v388_v43 = vrot.slane %v381_v39, %v1841_v22  ;;  %v1523_v53 = vld [vmem:[%s2054_s9 + $0x1a0] ss:$16 sps:$4 sm:$0xff]   ;;  %v1559_v28 = vld [vmem:[%s2061_s10 + $0x8] sm:$0xff]   ;;  %v1165_v37 = vsel %vm230_vm1, %v1577_v35, 0 }
  0x1f   :  { %1386 = vmatpush3.bf16.msra.mxu0 %v1474_v46  ;;  %v1517_v46 = vld [vmem:[%s2054_s9 + $0x180] ss:$16 sps:$4 sm:$0xff]   ;;  %v1573_v39 = vld [vmem:[%s2061_s10 + $0x28] sm:$0xff]  }
  0x20   :  { %924 = vmatprep.subr.bf16.mxu0 %v1480_v49  ;;  %v396_v47 = vcombine.low %v388_v43, %v395_v40  ;;  %v366_v49 = vmul.f32 %v364_v45, %v334_v42  ;;  %v1571_v31 = vld [vmem:[%s2061_s10 + $0x20] sm:$0xff]   ;;  %v1574_v40 = vld [vmem:[%s2061_s10 + $0x70] sm:$0xff]  }
  0x21   :  { %851 = vmatpush1.bf16.msra.mxu1 %v1470_v54  ;;  %v1532_v54 = vld [vmem:[%s2054_s9 + $0x128] ss:$16 sps:$4 sm:$0xff]  }
  0x22   :  { %267 = vmatmul.mubr.bf16.vlgmr.msra.gmra.mrb[0].mxu0 %v88_v58  ;;  %852 = vmatprep.subr.bf16.mxu1 %v1477_v60  ;;  %v398_v52 = vadd.f32 %v396_v47, %v366_v49  ;;  %v1538_v60 = vld [vmem:[%s2054_s9 + $0x148] ss:$16 sps:$4 sm:$0xff]   ;;  %v1279_v49 = vld [vmem:[%s2062_s5] ss:$0 sm:$0xff] }
  0x23   :  { %925 = vmatpush1.bf16.msra.mxu0 %v1478_v57  ;;  %v1531_v57 = vld [vmem:[%s2054_s9 + $0x1c4] ss:$16 sps:$4 sm:$0xff]  }
  0x24   :  { %926 = vmatprep.subr.bf16.mxu0 %v1486_v59  ;;  %v399_v55 = vmax.f32 %v398_v52, 0.0  ;;  %v1529_v59 = vld [vmem:[%s2054_s9 + $0x1c0] ss:$16 sps:$4 sm:$0xff]  }
  0x25   :  { %853 = vmatpush1.bf16.msra.mxu1 %v1475_v61  ;;  %v1280_v52 = vld [vmem:[%s2063_s6] ss:$0 sm:$0xff] }
  0x26   :  { %854 = vmatprep.subr.bf16.mxu1 %v1483_v0  ;;  %v408_v58 = vrot.slane %v399_v55, %v1841_v22 }
  0x27   :  { %927 = vmatpush1.bf16.msra.mxu0 %v1484_v62  ;;  %v1537_v62 = vld [vmem:[%s2054_s9 + $0x1e4] ss:$16 sps:$4 sm:$0xff]  }
  0x28   :  { %928 = vmatprep.subr.bf16.mxu0 %v1492_v63  ;;  %v416_v61 = vcombine.high %v408_v58, %v408_v58  ;;  %v1546_v63 = vld [vmem:[%s2054_s9 + $0x16c] ss:$16 sps:$4 sm:$0xff]  }
  0x29   :  { %855 = vmatpush1.bf16.msra.mxu1 %v1481_v1  ;;  %v1535_v1 = vld [vmem:[%s2054_s9 + $0x1e0] ss:$16 sps:$4 sm:$0xff]  }
  0x2a   :  { %856 = vmatprep.subr.bf16.mxu1 %v1489_v6  ;;  %v421_v0 = vpack.c.bf16 %v416_v61, %v416_v61  ;;  %v1544_v6 = vld [vmem:[%s2054_s9 + $0x168] ss:$16 sps:$4 sm:$0xff]  }
  0x2b   :  { %929 = vmatpush1.bf16.msra.mxu0 %v1490_v3  ;;  %v1541_v3 = vld [vmem:[%s2054_s9 + $0x204] ss:$16 sps:$4 sm:$0x3f]  }
  0x2c   :  { %930 = vmatprep.subr.bf16.mxu0 %v1498_v4  ;;  %874 = vmatprep.mubr.bf16.mxu1 %v421_v0  ;;  %v1543_v4 = vld [vmem:[%s2054_s9 + $0x200] ss:$16 sps:$4 sm:$0x3f]  }
  0x2d   :  { %857 = vmatpush1.bf16.msra.mxu1 %v1487_v7  ;;  %v1549_v7 = vld [vmem:[%s2054_s9 + $0x18c] ss:$16 sps:$4 sm:$0xff]   ;;  %956 = vmatprep.mubr.bf16.mxu0 %v421_v0  ;;  %v831_v12 = vsel %vm230_vm1, %v1543_v4, 0 }
  0x2e   :  { %858 = vmatprep.subr.bf16.mxu1 %v1495_v13  ;;  %v1553_v13 = vld [vmem:[%s2061_s10 + $0x40] sm:$0xff]  }
  0x2f   :  { %931 = vmatpush1.bf16.msra.mxu0 %v1496_v8  ;;  %v1941_v8 = vpack.c.bf16 %v408_v58, %v408_v58 }
  0x30   :  { %932 = vmatprep.subr.bf16.mxu0 %v1504_v10  ;;  %v1547_v10 = vld [vmem:[%s2054_s9 + $0x188] ss:$16 sps:$4 sm:$0xff]  }
  0x31   :  { %859 = vmatpush1.bf16.msra.mxu1 %v1493_v14  ;;  %v401_v14 = vcombine.high %v399_v55, %v399_v55 }
  0x32   :  { %860 = vmatprep.subr.bf16.mxu1 %v1501_v18 }
  0x33   :  { %933 = vmatpush1.bf16.msra.mxu0 %v1502_v15  ;;  %v1550_v15 = vld [vmem:[%s2054_s9 + $0x1a8] ss:$16 sps:$4 sm:$0xff]   ;;  %v415_v18 = vrot.slane %v401_v14, %v1841_v22 }
  0x34   :  { %934 = vmatprep.subr.bf16.mxu0 %v1510_v16  ;;  %v1557_v16 = vld [vmem:[%s2054_s9 + $0x1cc] ss:$16 sps:$4 sm:$0xff]  }
  0x35   :  { %861 = vmatpush1.bf16.msra.mxu1 %v1499_v19  ;;  %v1555_v19 = vld [vmem:[%s2054_s9 + $0x1c8] ss:$16 sps:$4 sm:$0xff]  }
  0x36   :  { %862 = vmatprep.subr.bf16.mxu1 %v1507_v23  ;;  %v1554_v23 = vld [vmem:[%s2061_s10] sm:$0xff]  }
  0x37   :  { %935 = vmatpush1.bf16.msra.mxu0 %v1508_v20  ;;  %v1562_v20 = vld [vmem:[%s2054_s9 + $0x1ec] ss:$16 sps:$4 sm:$0xff]  }
  0x38   :  { %936 = vmatprep.subr.bf16.mxu0 %v1516_v21  ;;  %v422_v21 = vpack.c.bf16 %v415_v18, %v415_v18 }
  0x39   :  { %863 = vmatpush1.bf16.msra.mxu1 %v1505_v32  ;;  %v1564_v32 = vld [vmem:[%s2061_s10 + $0x10] sm:$0xff]  }
  0x3a   :  { %864 = vmatprep.subr.bf16.mxu1 %v1513_v36  ;;  %v1570_v36 = vld [vmem:[%s2061_s10 + $0x60] sm:$0xff]  }
  0x3b   :  { %937 = vmatpush1.bf16.msra.mxu0 %v1514_v27  ;;  %v1569_v27 = vld [vmem:[%s2054_s9 + $0x208] ss:$16 sps:$4 sm:$0x3f]  }
  0x3c   :  { %938 = vmatprep.subr.bf16.mxu0 %v1522_v33  ;;  %v837_v29 = vsel %vm230_vm1, %v1569_v27, 0  ;;  %v1565_v33 = vld [vmem:[%s2061_s10 + $0x58] sm:$0xff]  }
  0x3d   :  { %865 = vmatpush1.bf16.msra.mxu1 %v1511_v38  ;;  %v1572_v38 = vld [vmem:[%s2061_s10 + $0x68] sm:$0xff]  }
  0x3e   :  { %866 = vmatprep.subr.bf16.mxu1 %v1519_v44 }
  0x3f   :  { %939 = vmatpush1.bf16.msra.mxu0 %v1520_v9  ;;  %v1575_v9 = vld [vmem:[%s2061_s10 + $0x30] sm:$0xff]  }
  0x40   :  { %940 = vmatprep.subr.bf16.mxu0 %v1528_v24  ;;  %v1578_v24 = vld [vmem:[%s2061_s10 + $0x38] sm:$0xff]  }
  0x41   :  { %867 = vmatpush1.bf16.msra.mxu1 %v1517_v46 }
  0x42   :  { %868 = vmatprep.subr.bf16.mxu1 %v1525_v51 }
  0x43   :  { %941 = vmatpush1.bf16.msra.mxu0 %v1526_v48 }
  0x44   :  { %942 = vmatprep.subr.bf16.mxu0 %v1534_v50 }
  0x45   :  { %869 = vmatpush1.bf16.msra.mxu1 %v1523_v53 }
  0x46   :  { %870 = vmatprep.subr.bf16.mxu1 %v1531_v57 }
  0x47   :  { %943 = vmatpush1.bf16.msra.mxu0 %v1532_v54 }
  0x48   :  { %944 = vmatprep.subr.bf16.mxu0 %v1540_v56 }
  0x49   :  { %871 = vmatpush1.bf16.msra.mxu1 %v1529_v59 }
  0x4a   :  { %872 = vmatprep.subr.bf16.mxu1 %v1537_v62 }
  0x4b   :  { %945 = vmatpush1.bf16.msra.mxu0 %v1538_v60 }
  0x4c   :  { %946 = vmatprep.subr.bf16.mxu0 %v1546_v63 }
  0x4d   :  { %873 = vmatpush1.bf16.msra.mxu1 %v1535_v1 }
  0x4e   :  { %1349 = vmatprep.subr.msk.bf16.mxu1 %vm230_vm1, %v1541_v3 }
  0x4f   :  { %947 = vmatpush1.bf16.msra.mxu0 %v1544_v6 }
  0x50   :  { %948 = vmatprep.subr.bf16.mxu0 %v1549_v7  ;;  %875 = vmatmul.mubr.bf16.vlgmr.msra.gmra.mrb[4].mxu1 %v1941_v8 }
  0x51   :  { %884 = vmatpush1.bf16.msra.mxu1 %v831_v12  ;;  %915 = vmatprep.mubr.bf16.mxu1 %v1582_v17 }
  0x52   :  { %1395 = vmatprep.subr.bf16.mxu1 %v1553_v13 }
  0x53   :  { %949 = vmatpush1.bf16.msra.mxu0 %v1547_v10 }
  0x54   :  { %950 = vmatprep.subr.bf16.mxu0 %v1552_v11 }
  0x57   :  { %951 = vmatpush1.bf16.msra.mxu0 %v1550_v15 }
  0x58   :  { %952 = vmatprep.subr.bf16.mxu0 %v1557_v16 }
  0x5b   :  { %953 = vmatpush1.bf16.msra.mxu0 %v1555_v19 }
  0x5c   :  { %954 = vmatprep.subr.bf16.mxu0 %v1562_v20  ;;  %1350 = vmatmul.mubr.msk.bf16.vlgmr.msra.gmra.mrb[4].mxu1 %vm226_vm2, %v422_v21 }
  0x5d   :  { %1396 = vmatpush3.bf16.msra.mxu1 %v1554_v23  ;;  %1199 = vmatprep.mubr.bf16.mxu1 %v421_v0 }
  0x5e   :  { %1397 = vmatprep.subr.bf16.mxu1 %v1558_v5 }
  0x5f   :  { %955 = vmatpush1.bf16.msra.mxu0 %v1560_v25 }
  0x60   :  { %1351 = vmatprep.subr.msk.bf16.mxu0 %vm230_vm1, %v1567_v26 }
  0x61   :  { %1398 = vmatpush3.bf16.msra.mxu1 %v1559_v28 }
  0x62   :  { %957 = vmatmul.mubr.bf16.vlgmr.msra.gmra.mrb[4].mxu0 %v1941_v8  ;;  %1399 = vmatprep.subr.bf16.mxu1 %v1563_v30 }
  0x63   :  { %966 = vmatpush1.bf16.msra.mxu0 %v837_v29  ;;  %997 = vmatprep.mubr.bf16.mxu0 %v1582_v17 }
  0x64   :  { %1425 = vmatprep.subr.bf16.mxu0 %v1579_v2 }
  0x65   :  { %1400 = vmatpush3.bf16.msra.mxu1 %v1564_v32 }
  0x66   :  { %1401 = vmatprep.subr.bf16.mxu1 %v1565_v33 }
  0x69   :  { %1402 = vmatpush3.bf16.msra.mxu1 %v1566_v34 }
  0x6a   :  { %1403 = vmatprep.subr.bf16.mxu1 %v1570_v36 }
  0x6d   :  { %1404 = vmatpush3.bf16.msra.mxu1 %v1571_v31 }
  0x6e   :  { %1352 = vmatmul.mubr.msk.bf16.vlgmr.msra.gmra.mrb[4].mxu0 %vm226_vm2, %v422_v21  ;;  %1405 = vmatprep.subr.bf16.mxu1 %v1572_v38 }
  0x6f   :  { %1426 = vmatpush3.bf16.msra.mxu0 %v1165_v37  ;;  %1427 = vmatprep.mubr.msk.bf16.mxu0 %vm1580_vm0, %v1579_v2  ;;  %v1576_v2 = vld [vmem:[%s2061_s10 + $0x78] sm:$0xff]  }
  0x71   :  { %1406 = vmatpush3.bf16.msra.mxu1 %v1573_v39 }
  0x72   :  { %1407 = vmatprep.subr.bf16.mxu1 %v1574_v40 }
  0x75   :  { %1408 = vmatpush3.bf16.msra.mxu1 %v1575_v9 }
  0x76   :  { %1428 = vmatmul.mubr.msk.bf16.vlgmr.msra.gmra.mrb[8].mxu0 %vm226_vm2, %v422_v21  ;;  %1409 = vmatprep.subr.bf16.mxu1 %v1576_v2 }
  0x79   :  { %1410 = vmatpush3.bf16.msra.mxu1 %v1578_v24 }
  0x7c   :  { %1200 = vmatmul.mubr.bf16.vlgmr.msra.gmra.mrb[8].mxu1 %v1941_v8 }
  0xe3   :  { %v308_v41 = vpop.f32.mrb[0].mxu1 }
  0xe4   :  { %v1423_v42 = vpop.f32.mrb[1].mxu1 }
  0xe5   :  { %v311_v43 = vpop.f32.mrb[2].mxu1 }
  0xe6   :  { %v1424_v44 = vpop.f32.mrb[3].mxu1 }
  0xf5   :  { %v1387_v45 = vpop.f32.mrb[0].mxu0 }
  0xf6   :  { %v1388_v46 = vpop.f32.mrb[1].mxu0 }
  0xf7   :  { %v1389_v47 = vadd.f32 %v1388_v46, %v1387_v45  ;;  %v1390_v48 = vpop.f32.mrb[2].mxu0 }
  0xf8   :  { %v1391_v50 = vpop.f32.mrb[3].mxu0 }
  0xf9   :  { %v309_v51 = vadd.f32 %v1389_v47, %v308_v41 }
  0xfb   :  { %v321_v53 = vmul.f32 %v1279_v49, %v309_v51 }
  0xfd   :  { %v329_v54 = vadd.f32 %v1280_v52, %v321_v53 }
  0xff   :  { %v330_v55 = vmax.f32 %v329_v54, 0.0 }
 0x101   :  { %v331_v56 = vpack.c.bf16 %v330_v55, %v330_v55 }
 0x103   :  { %333 = vst.msk [vmem:[%s2064_s11] sm:$0xf] %vm332_vm3, %v331_v56 }
 0x12f   :  { %v917_v57 = vpop.f32.mrb[4].mxu1 }
 0x130   :  { %v919_v58 = vpop.f32.mrb[5].mxu1 }
 0x131   :  { %v1010_v59 = vcombine.low %v917_v57, %v919_v58  ;;  %v921_v60 = vpop.f32.mrb[6].mxu1 }
 0x132   :  { %v922_v61 = vpop.f32.mrb[7].mxu1 }
 0x133   :  { %v1018_v4 = vrot.slane %v1010_v59, %v1841_v22 }
 0x141   :  { %v999_v62 = vpop.f32.mrb[4].mxu0 }
 0x142   :  { %v1001_v63 = vpop.f32.mrb[5].mxu0 }
 0x143   :  { %v1011_v0 = vcombine.low %v999_v62, %v1001_v63  ;;  %v1003_v1 = vpop.f32.mrb[6].mxu0 }
 0x144   :  { %v1004_v3 = vpop.f32.mrb[7].mxu0 }
 0x145   :  { %v1025_v6 = vrot.slane %v1011_v0, %v1841_v22 }
 0x147   :  { %v1026_v7 = vcombine.low %v1018_v4, %v1025_v6 }
 0x149   :  { %1028 = vst [vmem:[%s2065_s12] sm:$0xff] %v1026_v7  ;;  %v1241_v8 = vpop.f32.mrb[8].mxu0 }
 0x14a   :  { %v1429_v10 = vpop.f32.mrb[9].mxu0 }
 0x14b   :  { %v1244_v11 = vpop.f32.mrb[10].mxu0 }
 0x14c   :  { %v1430_v12 = vpop.f32.mrb[11].mxu0 }
 0x14f   :  { %v1411_v13 = vpop.f32.mrb[8].mxu1 }
 0x150   :  { %v1412_v14 = vpop.f32.mrb[9].mxu1 }
 0x151   :  { %v1413_v15 = vadd.f32 %v1412_v14, %v1411_v13  ;;  %v1414_v16 = vpop.f32.mrb[10].mxu1 }
 0x152   :  { %v1415_v17 = vpop.f32.mrb[11].mxu1 }
 0x153   :  { %v1242_v18 = vadd.f32 %v1413_v15, %v1241_v8 }
 0x155   :  { %1248 = vst.msk [vmem:[%s2066_s13] sm:$0x3] %vm1247_vm4, %v1242_v18 }

// kernel: _lambda_.21
= control target key start
LH: loop header
LB: loop body
LE: loop exit
PB: predicated region body
PF: predicated region fallthrough
CT: control target
= control target key end

     0   :  { %v36_v28 = vlaneseq  ;;  %v697_v37 = vmov 0.0   ;;  %s864_s0 = inlined_call_operand.vmem [shape: f32[2,1,524], index: 0, kind: input, shape index: {}]   ;;  %s865_s1 = inlined_call_operand.vmem [shape: f32[1,1,524], index: 1, kind: input, shape index: {}]   ;;  %s866_s2 = inlined_call_operand.vmem [shape: f32[1,1,524], index: 2, kind: input, shape index: {}]   ;;  %s867_s3 = inlined_call_operand.vmem [shape: bf16[524,10], index: 3, kind: input, shape index: {}]   ;;  %s868_s4 = inlined_call_operand.vmem [shape: f32[1,10], index: 4, kind: input, shape index: {}]   ;;  %s869_s5 = inlined_call_operand.hbm [shape: f32[2,10], index: 5, kind: output, shape index: {}]  }
   0x1   :  { %v640_v0 = vld [vmem:[%s867_s3 + $0x40] sm:$0xff]   ;;  %v644_v4 = vld [vmem:[%s867_s3 + $0x48] sm:$0xff]   ;;  %v648_v8 = vld [vmem:[%s867_s3 + $0x50] sm:$0xff]  }
   0x2   :  { %v641_v1 = vld [vmem:[%s867_s3] sm:$0xff]   ;;  %585 = vmatprep.subr.bf16.mxu0 %v640_v0  ;;  %v645_v5 = vld [vmem:[%s867_s3 + $0x8] sm:$0xff]   ;;  %v649_v9 = vld [vmem:[%s867_s3 + $0x10] sm:$0xff]   ;;  %v37_v33 = vshrl.u32 %v36_v28, 7 }
   0x3   :  { %v642_v2 = vld [vmem:[%s867_s3 + $0xc0] sm:$0xff]   ;;  %586 = vmatpush3.bf16.msra.mxu0 %v641_v1  ;;  %v646_v6 = vld [vmem:[%s867_s3 + $0xc8] sm:$0xff]   ;;  %v650_v10 = vld [vmem:[%s867_s3 + $0xd0] sm:$0xff]  }
   0x4   :  { %v643_v3 = vld [vmem:[%s867_s3 + $0x80] sm:$0xff]   ;;  %607 = vmatprep.subr.bf16.mxu1 %v642_v2  ;;  %587 = vmatprep.subr.bf16.mxu0 %v644_v4  ;;  %v647_v7 = vld [vmem:[%s867_s3 + $0x88] sm:$0xff]   ;;  %v651_v11 = vld [vmem:[%s867_s3 + $0x90] sm:$0xff]  }
   0x5   :  { %608 = vmatpush3.bf16.msra.mxu1 %v643_v3  ;;  %v652_v12 = vld [vmem:[%s867_s3 + $0x58] sm:$0xff]   ;;  %v656_v16 = vld [vmem:[%s867_s3 + $0x60] sm:$0xff]   ;;  %v660_v20 = vld [vmem:[%s867_s3 + $0x68] sm:$0xff]  }
   0x6   :  { %609 = vmatprep.subr.bf16.mxu1 %v646_v6  ;;  %v653_v13 = vld [vmem:[%s867_s3 + $0x18] sm:$0xff]   ;;  %v657_v17 = vld [vmem:[%s867_s3 + $0x20] sm:$0xff]   ;;  %v661_v21 = vld [vmem:[%s867_s3 + $0x28] sm:$0xff]  }
   0x7   :  { %588 = vmatpush3.bf16.msra.mxu0 %v645_v5  ;;  %v654_v14 = vld [vmem:[%s867_s3 + $0xd8] sm:$0xff]   ;;  %v658_v18 = vld [vmem:[%s867_s3 + $0xe0] sm:$0xff]   ;;  %v662_v22 = vld [vmem:[%s867_s3 + $0xe8] sm:$0xff]  }
   0x8   :  { %589 = vmatprep.subr.bf16.mxu0 %v648_v8  ;;  %v655_v15 = vld [vmem:[%s867_s3 + $0x98] sm:$0xff]   ;;  %v659_v19 = vld [vmem:[%s867_s3 + $0xa0] sm:$0xff]   ;;  %v663_v23 = vld [vmem:[%s867_s3 + $0xa8] sm:$0xff]  }
   0x9   :  { %610 = vmatpush3.bf16.msra.mxu1 %v647_v7  ;;  %v664_v24 = vld [vmem:[%s867_s3 + $0x70] sm:$0xff]   ;;  %v668_v29 = vld [vmem:[%s867_s3 + $0x78] sm:$0xff]   ;;  %v22_v34 = vld [vmem:[%s864_s0] sm:$0x1f] }
   0xa   :  { %611 = vmatprep.subr.bf16.mxu1 %v650_v10  ;;  %v665_v25 = vld [vmem:[%s867_s3 + $0x30] sm:$0xff]   ;;  %v669_v30 = vld [vmem:[%s867_s3 + $0x38] sm:$0xff]   ;;  %v23_v35 = vld [vmem:[%s864_s0 + $0x5] sm:$0x1f] }
   0xb   :  { %590 = vmatpush3.bf16.msra.mxu0 %v649_v9  ;;  %v666_v26 = vld [vmem:[%s867_s3 + $0xf0] sm:$0xff]   ;;  %v670_v31 = vld [vmem:[%s867_s3 + $0xf8] sm:$0xff]   ;;  %v24_v36 = vld [vmem:[%s865_s1] sm:$0x1f] }
   0xc   :  { %591 = vmatprep.subr.bf16.mxu0 %v652_v12  ;;  %v667_v27 = vld [vmem:[%s867_s3 + $0xb0] sm:$0xff]   ;;  %v671_v32 = vld [vmem:[%s867_s3 + $0xb8] sm:$0xff]   ;;  %v25_v38 = vmul.f32 %v24_v36, %v22_v34  ;;  %v26_v39 = vmul.f32 %v24_v36, %v23_v35  ;;  %v27_v40 = vld [vmem:[%s866_s2] sm:$0x1f] }
   0xd   :  { %612 = vmatpush3.bf16.msra.mxu1 %v651_v11 }
   0xe   :  { %613 = vmatprep.subr.bf16.mxu1 %v654_v14 }
   0xf   :  { %592 = vmatpush3.bf16.msra.mxu0 %v653_v13 }
  0x10   :  { %593 = vmatprep.subr.bf16.mxu0 %v656_v16 }
  0x11   :  { %614 = vmatpush3.bf16.msra.mxu1 %v655_v15 }
  0x12   :  { %615 = vmatprep.subr.bf16.mxu1 %v658_v18 }
  0x13   :  { %594 = vmatpush3.bf16.msra.mxu0 %v657_v17 }
  0x14   :  { %595 = vmatprep.subr.bf16.mxu0 %v660_v20 }
  0x15   :  { %616 = vmatpush3.bf16.msra.mxu1 %v659_v19 }
  0x16   :  { %617 = vmatprep.subr.bf16.mxu1 %v662_v22 }
  0x17   :  { %596 = vmatpush3.bf16.msra.mxu0 %v661_v21 }
  0x18   :  { %597 = vmatprep.subr.bf16.mxu0 %v664_v24 }
  0x19   :  { %618 = vmatpush3.bf16.msra.mxu1 %v663_v23 }
  0x1a   :  { %619 = vmatprep.subr.bf16.mxu1 %v666_v26 }
  0x1b   :  { %598 = vmatpush3.bf16.msra.mxu0 %v665_v25 }
  0x1c   :  { %599 = vmatprep.subr.bf16.mxu0 %v668_v29 }
  0x1d   :  { %620 = vmatpush3.bf16.msra.mxu1 %v667_v27 }
  0x1e   :  { %621 = vmatprep.subr.bf16.mxu1 %v670_v31 }
  0x1f   :  { %600 = vmatpush3.bf16.msra.mxu0 %v669_v30 }
  0x20   :  { %631 = vmatprep.subr.bf16.mxu0 %v697_v37 }
  0x21   :  { %622 = vmatpush3.bf16.msra.mxu1 %v671_v32 }
  0x22   :  { %10 = vsyncpa [#allocation3], 0  ;;  %v28_v41 = vadd.f32 %v27_v40, %v25_v38  ;;  %v29_v42 = vadd.f32 %v27_v40, %v26_v39  ;;  %v42_v43 = vsub.s32 1, %v37_v33  ;;  %v38_v44 = vsub.s32 0, %v37_v33  ;;  %v672_v2 = vld [vmem:[%s867_s3 + $0x100] sm:$0x3f]  }
  0x23   :  { %v50_v45 = vsub.s32 3, %v37_v33  ;;  %v46_v46 = vsub.s32 2, %v37_v33  ;;  %vm190_vm0 = vcmask 1041409   ;;  %vm410_vm1 = vcmask 1045504   ;;  %v550_v34 = vld [vmem:[%s868_s4] ss:$0 sm:$0xff] }
  0x24   :  { %v30_v47 = vmax.f32 %v28_v41, 0.0  ;;  %v31_v48 = vmax.f32 %v29_v42, 0.0  ;;  %v54_v49 = vsub.s32 4, %v37_v33  ;;  %v412_v17 = vsel %vm410_vm1, %v672_v2, 0  ;;  %s699_s15 = smov [#allocation2]  }
  0x25   :  { %vm698_vm2 = vmmov 0   ;;  %vm406_vm3 = vcmask 97280   ;;  %s542_s16 = sshll.u32 %s699_s15, 4  ;;  %vm534_vm4 = vcmask 74752   ;;  %s543_s16 = int_to_ptr.vmem [resolvable:$true] %s542_s16 }
  0x26   :  { %v43_v50 = vrot.slane %v30_v47, %v42_v43  ;;  %v63_v51 = vrot.slane %v31_v48, %v42_v43  ;;  %v39_v52 = vrot.slane %v30_v47, %v38_v44  ;;  %v59_v53 = vrot.slane %v31_v48, %v38_v44  ;;  %s673_s4 = scalar_lea.vmem %s543_s16, 32  ;;  %p678_p1 = scmp.lt.s32.totalorder %s543_s16, %s543_s16 }
  0x27   :  { %v51_v54 = vrot.slane %v30_v47, %v50_v45  ;;  %v71_v55 = vrot.slane %v31_v48, %v50_v45  ;;  %v47_v56 = vrot.slane %v30_v47, %v46_v46  ;;  %v67_v57 = vrot.slane %v31_v48, %v46_v46  ;;  %p674_p0 = scmp.ne.s32.totalorder %s543_s16, %s673_s4  ;;  %p679_p2 = scmp.lt.s32.totalorder %s673_s4, %s673_s4 }
  0x28   :  { %v87_v58 = vpack.c.bf16 %v43_v50, %v43_v50  ;;  %v92_v59 = vpack.c.bf16 %v63_v51, %v63_v51  ;;  %v86_v60 = vpack.c.bf16 %v39_v52, %v39_v52  ;;  %v91_v61 = vpack.c.bf16 %v59_v53, %v59_v53 }
  0x29   :  { %v89_v62 = vpack.c.bf16 %v51_v54, %v51_v54  ;;  %v94_v63 = vpack.c.bf16 %v71_v55, %v71_v55  ;;  %v88_v0 = vpack.c.bf16 %v47_v56, %v47_v56  ;;  %v93_v1 = vpack.c.bf16 %v67_v57, %v67_v57  ;;  %p680_p3 = por %p679_p2, %p678_p1 }
  0x2a   :  { %v180_v3 = vunpack.c.l.b16 %v87_v58  ;;  %v185_v4 = vunpack.c.l.b16 %v92_v59  ;;  %v179_v5 = vunpack.c.l.b16 %v86_v60  ;;  %v184_v6 = vunpack.c.l.b16 %v91_v61 }
  0x2b   :  { %v182_v7 = vunpack.c.l.b16 %v89_v62  ;;  %v187_v8 = vunpack.c.l.b16 %v94_v63  ;;  %v181_v9 = vunpack.c.l.b16 %v88_v0  ;;  %v186_v10 = vunpack.c.l.b16 %v93_v1  ;;  %p681_p4 = pnand %p680_p3, %p674_p0 }
  0x2c   :  { %v192_v11 = vrot.slane %v185_v4, 7  ;;  %v189_v12 = vrot.slane %v184_v6, 7  ;;  %v55_v13 = vrot.slane %v30_v47, %v54_v49  ;;  %v75_v14 = vrot.slane %v31_v48, %v54_v49 }
  0x2d   :  { %v196_v15 = vrot.slane %v187_v8, 7  ;;  %v194_v16 = vrot.slane %v186_v10, 7 }
  0x2e   :  { %v193_v18 = vsel %vm190_vm0, %v192_v11, %v180_v3  ;;  %v191_v19 = vsel %vm190_vm0, %v189_v12, %v179_v5  ;;  %v90_v20 = vpack.c.bf16 %v55_v13, %v55_v13  ;;  %v95_v21 = vpack.c.bf16 %v75_v14, %v75_v14 }
  0x2f   :  { %v201_v22 = vpack.c.b16 %v193_v18, %v193_v18  ;;  %v200_v23 = vpack.c.b16 %v191_v19, %v191_v19  ;;  %v197_v24 = vsel %vm190_vm0, %v196_v15, %v182_v7  ;;  %v195_v25 = vsel %vm190_vm0, %v194_v16, %v181_v9 }
  0x30   :  { %v203_v26 = vpack.c.b16 %v197_v24, %v197_v24  ;;  %v202_v27 = vpack.c.b16 %v195_v25, %v195_v25  ;;  %v183_v28 = vunpack.c.l.b16 %v90_v20  ;;  %v188_v29 = vunpack.c.l.b16 %v95_v21 }
  0x31   :  { %446 = vmatprep.mubr.bf16.mxu0 %v201_v22 }
  0x32   :  { %447 = vmatmul.mubr.bf16.vlgmr.msra.gmra.mrb[0].mxu0 %v200_v23  ;;  %486 = vmatprep.mubr.bf16.mxu1 %v203_v26  ;;  %v198_v30 = vrot.slane %v188_v29, 7 }
  0x33   :  { %487 = vmatmul.mubr.bf16.vlgmr.msra.gmra.mrb[0].mxu1 %v202_v27  ;;  %632 = vmatpush3.bf16.msra.mxu0 %v412_v17 }
  0x34   :  { %633 = vmatprep.mubr.msk.bf16.mxu0 %vm698_vm2, %v697_v37  ;;  %v199_v31 = vsel %vm190_vm0, %v198_v30, %v183_v28 }
  0x35   :  { %v204_v32 = vpack.c.b16 %v199_v31, %v199_v31 }
  0x3a   :  { %634 = vmatmul.mubr.msk.bf16.vlgmr.msra.gmra.mrb[4].mxu0 %vm406_vm3, %v204_v32 }
 0x105   :  { %v601_v33 = vpop.f32.mrb[0].mxu0 }
 0x106   :  { %v602_v35 = vpop.f32.mrb[1].mxu0  ;;  %v623_v36 = vpop.f32.mrb[0].mxu1 }
 0x107   :  { %v603_v38 = vadd.f32 %v602_v35, %v601_v33  ;;  %v604_v39 = vpop.f32.mrb[2].mxu0  ;;  %v624_v40 = vpop.f32.mrb[1].mxu1 }
 0x108   :  { %v625_v41 = vadd.f32 %v624_v40, %v623_v36  ;;  %v605_v42 = vpop.f32.mrb[3].mxu0  ;;  %v626_v43 = vpop.f32.mrb[2].mxu1 }
 0x109   :  { %v449_v44 = vadd.f32 %v603_v38, %v550_v34  ;;  %v627_v37 = vpop.f32.mrb[3].mxu1 }
 0x10b   :  { %v489_v45 = vadd.f32 %v625_v41, %v449_v44 }
 0x10d   :  { %v528_v46 = vpop.f32.mrb[4].mxu0 }
 0x10e   :  { %v529_v47 = vadd.f32 %v528_v46, %v489_v45  ;;  %v635_v48 = vpop.f32.mrb[5].mxu0 }
 0x10f   :  { %v531_v49 = vpop.f32.mrb[6].mxu0 }
 0x110   :  { %v636_v50 = vpop.f32.mrb[7].mxu0  ;;  %535 = vst.msk [vmem:[#allocation2] sm:$0x3] %vm534_vm4, %v529_v47 }
 0x111   :  { %684 = shalt.err (!%p681_p4)
}
 0x112   :  { %s685_s19 = scalar_lea.hbm %s869_s5, 32 }
 0x113   :  { %p686_p5 = scmp.ne.s32.totalorder %s869_s5, %s685_s19  ;;  %p689_p6 = scmp.lt.u32.totalorder %s685_s19, %s869_s5 }
 0x115   :  { %p691_p7 = pnand %p689_p6, %p686_p5 }
 0x117   :  { %694 = shalt.err (!%p691_p7)
}
 0x118   :  { %545 = dma.vmem_to_hbm [thread:$0]  %s543_s16, 32, %s869_s5, [#allocation3]  }
 0x119   :  { %695 = dma.done.wait [#allocation3], 32  }
 0x11a   :  { %696 = vsyncadd [#allocation3], 4294967264 }
 0x11b   :  { %549 = vsyncpa [#allocation3], 1 }

// kernel: _lambda_.20
= control target key start
LH: loop header
LB: loop body
LE: loop exit
PB: predicated region body
PF: predicated region fallthrough
CT: control target
= control target key end

     0   :  { %v1002_v22 = vmov 1966171168   ;;  %v107_v24 = vlaneseq  ;;  %v1003_v40 = vmov 0.0   ;;  %vm1004_vm0 = vmmov 0   ;;  %s1258_s1 = inlined_call_operand.vmem [shape: bf16[576,64], index: 1, kind: input, shape index: {}]   ;;  %s1259_s0 = inlined_call_operand.vmem [shape: bf16[2,576], index: 0, kind: input, shape index: {}]   ;;  %s1260_s4 = inlined_call_operand.vmem [shape: bf16[64,512], index: 4, kind: input, shape index: {}]   ;;  %s1261_s5 = inlined_call_operand.vmem [shape: bf16[64,4], index: 5, kind: input, shape index: {}]   ;;  %s1262_s2 = inlined_call_operand.vmem [shape: f32[1,64], index: 2, kind: input, shape index: {}]   ;;  %s1263_s3 = inlined_call_operand.vmem [shape: f32[1,64], index: 3, kind: input, shape index: {}]   ;;  %s1264_s6 = inlined_call_operand.vmem [shape: f32[2,512], index: 6, kind: input, shape index: {}]   ;;  %s1265_s7 = inlined_call_operand.vmem [shape: f32[2,512], index: 7, kind: output, shape index: {0}]   ;;  %s1266_s8 = inlined_call_operand.vmem [shape: f32[2,4], index: 8, kind: output, shape index: {1}]  }
   0x1   :  { %v937_v0 = vld [vmem:[%s1258_s1 + $0x40] sm:$0xff]   ;;  %v941_v4 = vld [vmem:[%s1258_s1 + $0x48] sm:$0xff]   ;;  %v945_v8 = vld [vmem:[%s1258_s1 + $0x50] sm:$0xff]   ;;  %v105_v23 = vunpack.c.l.s4 %v1002_v22  ;;  %vm362_vm1 = vcmask 523264   ;;  %vm782_vm2 = vcmask 25600  }
   0x2   :  { %v938_v1 = vld [vmem:[%s1258_s1 + $0xc0] sm:$0xff]   ;;  %854 = vmatprep.subr.bf16.mxu0 %v937_v0  ;;  %v942_v5 = vld [vmem:[%s1258_s1 + $0xc8] sm:$0xff]   ;;  %v946_v9 = vld [vmem:[%s1258_s1 + $0xd0] sm:$0xff]   ;;  %v1130_v30 = vshrl.u32 %v107_v24, 7 }
   0x3   :  { %v939_v2 = vld [vmem:[%s1258_s1] sm:$0xff]   ;;  %876 = vmatprep.subr.bf16.mxu1 %v938_v1  ;;  %v943_v6 = vld [vmem:[%s1258_s1 + $0x8] sm:$0xff]   ;;  %v947_v10 = vld [vmem:[%s1258_s1 + $0x10] sm:$0xff]   ;;  %v106_v29 = vunpack.c.0.s8 %v105_v23 }
   0x4   :  { %v940_v3 = vld [vmem:[%s1258_s1 + $0x80] sm:$0xff]   ;;  %855 = vmatpush3.bf16.msra.mxu0 %v939_v2  ;;  %v944_v7 = vld [vmem:[%s1258_s1 + $0x88] sm:$0xff]   ;;  %v948_v11 = vld [vmem:[%s1258_s1 + $0x90] sm:$0xff]  }
   0x5   :  { %877 = vmatpush3.bf16.msra.mxu1 %v940_v3  ;;  %856 = vmatprep.subr.bf16.mxu0 %v941_v4  ;;  %v949_v12 = vld [vmem:[%s1258_s1 + $0x58] sm:$0xff]   ;;  %v953_v16 = vld [vmem:[%s1258_s1 + $0x60] sm:$0xff]   ;;  %v957_v20 = vld [vmem:[%s1258_s1 + $0x68] sm:$0xff]   ;;  %v109_v35 = vsub.s32 %v106_v29, %v1130_v30 }
   0x6   :  { %878 = vmatprep.subr.bf16.mxu1 %v942_v5  ;;  %v950_v13 = vld [vmem:[%s1258_s1 + $0xd8] sm:$0xff]   ;;  %v954_v17 = vld [vmem:[%s1258_s1 + $0xe0] sm:$0xff]   ;;  %v958_v21 = vld [vmem:[%s1258_s1 + $0xe8] sm:$0xff]   ;;  %v1005_v5 = vmov 0  }
   0x7   :  { %v951_v14 = vld [vmem:[%s1258_s1 + $0x18] sm:$0xff]   ;;  %v955_v18 = vld [vmem:[%s1258_s1 + $0x20] sm:$0xff]   ;;  %v959_v25 = vld [vmem:[%s1258_s1 + $0x28] sm:$0xff]  }
   0x8   :  { %857 = vmatpush3.bf16.msra.mxu0 %v943_v6  ;;  %v952_v15 = vld [vmem:[%s1258_s1 + $0x98] sm:$0xff]   ;;  %v956_v19 = vld [vmem:[%s1258_s1 + $0xa0] sm:$0xff]   ;;  %v960_v26 = vld [vmem:[%s1258_s1 + $0xa8] sm:$0xff]  }
   0x9   :  { %879 = vmatpush3.bf16.msra.mxu1 %v944_v7  ;;  %858 = vmatprep.subr.bf16.mxu0 %v945_v8  ;;  %v961_v27 = vld [vmem:[%s1258_s1 + $0x70] sm:$0xff]   ;;  %v965_v33 = vld [vmem:[%s1258_s1 + $0x78] sm:$0xff]   ;;  %v29_v38 = vld [vmem:[%s1259_s0] sm:$0x1f] }
   0xa   :  { %880 = vmatprep.subr.bf16.mxu1 %v946_v9  ;;  %v962_v28 = vld [vmem:[%s1258_s1 + $0xf0] sm:$0xff]   ;;  %v966_v34 = vld [vmem:[%s1258_s1 + $0xf8] sm:$0xff]   ;;  %v110_v39 = vrot.slane %v29_v38, %v109_v35  ;;  %v970_v44 = vld [vmem:[%s1258_s1 + $0x100] sm:$0xff]   ;;  %v103_v48 = vcombine.high %v29_v38, %v29_v38 }
   0xb   :  { %v963_v31 = vld [vmem:[%s1258_s1 + $0x30] sm:$0xff]   ;;  %v967_v36 = vld [vmem:[%s1258_s1 + $0x38] sm:$0xff]   ;;  %v971_v47 = vld [vmem:[%s1258_s1 + $0x108] sm:$0xff]  }
   0xc   :  { %859 = vmatpush3.bf16.msra.mxu0 %v947_v10  ;;  %v964_v32 = vld [vmem:[%s1258_s1 + $0xb0] sm:$0xff]   ;;  %v968_v37 = vld [vmem:[%s1258_s1 + $0xb8] sm:$0xff]   ;;  %v118_v41 = vcombine.high %v110_v39, %v110_v39  ;;  %v125_v42 = vrot.slane %v110_v39, %v109_v35  ;;  %v117_v50 = vrot.slane %v103_v48, %v109_v35  ;;  %v999_v29 = vld [vmem:[%s1261_s5 + $0x8] sm:$0xff]  }
   0xd   :  { %881 = vmatpush3.bf16.msra.mxu1 %v948_v11  ;;  %860 = vmatprep.subr.bf16.mxu0 %v949_v12  ;;  %v972_v49 = vld [vmem:[%s1258_s1 + $0x110] sm:$0xff]   ;;  %v973_v51 = vld [vmem:[%s1258_s1 + $0x118] sm:$0xff]  }
   0xe   :  { %882 = vmatprep.subr.bf16.mxu1 %v950_v13  ;;  %v139_v43 = vrot.slane %v118_v41, %v109_v35  ;;  %v140_v45 = vcombine.high %v125_v42, %v125_v42  ;;  %v132_v52 = vrot.slane %v117_v50, %v109_v35  ;;  %v974_v53 = vld [vmem:[%s1260_s4] ss:$16 sps:$4 sm:$0xff]   ;;  %v976_v54 = vld [vmem:[%s1260_s4 + $0x4] ss:$16 sps:$4 sm:$0xff]   ;;  %v977_v55 = vld [vmem:[%s1260_s4 + $0x8] ss:$16 sps:$4 sm:$0xff]  }
   0xf   :  { %v979_v56 = vld [vmem:[%s1260_s4 + $0xc] ss:$16 sps:$4 sm:$0xff]   ;;  %v980_v57 = vld [vmem:[%s1260_s4 + $0x20] ss:$16 sps:$4 sm:$0xff]   ;;  %v982_v58 = vld [vmem:[%s1260_s4 + $0x24] ss:$16 sps:$4 sm:$0xff]  }
  0x10   :  { %861 = vmatpush3.bf16.msra.mxu0 %v951_v14  ;;  %398 = vmatprep.mubr.bf16.mxu0 %v139_v43  ;;  %v141_v46 = vcombine.high %v139_v43, %v139_v43  ;;  %v983_v59 = vld [vmem:[%s1260_s4 + $0x28] ss:$16 sps:$4 sm:$0xff]   ;;  %v985_v60 = vld [vmem:[%s1260_s4 + $0x2c] ss:$16 sps:$4 sm:$0xff]   ;;  %v988_v61 = vld [vmem:[%s1260_s4 + $0x44] ss:$16 sps:$4 sm:$0xff]  }
  0x11   :  { %883 = vmatpush3.bf16.msra.mxu1 %v952_v15  ;;  %862 = vmatprep.subr.bf16.mxu0 %v953_v16  ;;  %v986_v62 = vld [vmem:[%s1260_s4 + $0x40] ss:$16 sps:$4 sm:$0xff]   ;;  %v991_v63 = vld [vmem:[%s1260_s4 + $0x4c] ss:$16 sps:$4 sm:$0xff]   ;;  %v989_v0 = vld [vmem:[%s1260_s4 + $0x48] ss:$16 sps:$4 sm:$0xff]  }
  0x12   :  { %884 = vmatprep.subr.bf16.mxu1 %v954_v17  ;;  %438 = vmatprep.mubr.bf16.mxu1 %v141_v46  ;;  %v994_v1 = vld [vmem:[%s1260_s4 + $0x64] ss:$16 sps:$4 sm:$0xff]   ;;  %v992_v2 = vld [vmem:[%s1260_s4 + $0x60] ss:$16 sps:$4 sm:$0xff]   ;;  %v997_v3 = vld [vmem:[%s1260_s4 + $0x6c] ss:$16 sps:$4 sm:$0xff]  }
  0x13   :  { %v995_v4 = vld [vmem:[%s1260_s4 + $0x68] ss:$16 sps:$4 sm:$0xff]  }
  0x14   :  { %863 = vmatpush3.bf16.msra.mxu0 %v955_v18  ;;  %v829_v18 = vld [vmem:[%s1262_s2] ss:$0 sm:$0xff] }
  0x15   :  { %885 = vmatpush3.bf16.msra.mxu1 %v956_v19  ;;  %864 = vmatprep.subr.bf16.mxu0 %v957_v20 }
  0x16   :  { %886 = vmatprep.subr.bf16.mxu1 %v958_v21  ;;  %v830_v21 = vld [vmem:[%s1263_s3] ss:$0 sm:$0xff] }
  0x18   :  { %865 = vmatpush3.bf16.msra.mxu0 %v959_v25 }
  0x19   :  { %887 = vmatpush3.bf16.msra.mxu1 %v960_v26  ;;  %866 = vmatprep.subr.bf16.mxu0 %v961_v27  ;;  %v998_v27 = vld [vmem:[%s1261_s5] sm:$0xff]  }
  0x1a   :  { %888 = vmatprep.subr.bf16.mxu1 %v962_v28 }
  0x1c   :  { %867 = vmatpush3.bf16.msra.mxu0 %v963_v31  ;;  %v1000_v31 = vld [vmem:[%s1261_s5 + $0x10] sm:$0xff]  }
  0x1d   :  { %889 = vmatpush3.bf16.msra.mxu1 %v964_v32  ;;  %868 = vmatprep.subr.bf16.mxu0 %v965_v33  ;;  %v1001_v32 = vld [vmem:[%s1261_s5 + $0x18] sm:$0xff]   ;;  %v1006_v33 = vmov 1983009808  }
  0x1e   :  { %890 = vmatprep.subr.bf16.mxu1 %v966_v34  ;;  %v693_v34 = vunpack.c.l.s4 %v1006_v33 }
  0x20   :  { %869 = vmatpush3.bf16.msra.mxu0 %v967_v36  ;;  %v694_v35 = vunpack.c.0.s8 %v693_v34 }
  0x21   :  { %891 = vmatpush3.bf16.msra.mxu1 %v968_v37  ;;  %908 = vmatprep.subr.bf16.mxu0 %v1003_v40 }
  0x22   :  { %604 = vmatprep.subr.bf16.mxu1 %v976_v54  ;;  %v697_v38 = vsub.s32 %v694_v35, %v1130_v30 }
  0x23   :  { %399 = vmatmul.mubr.bf16.vlgmr.msra.gmra.mrb[0].mxu0 %v125_v42 }
  0x24   :  { %909 = vmatpush3.bf16.msra.mxu0 %v970_v44  ;;  %439 = vmatmul.mubr.bf16.vlgmr.msra.gmra.mrb[0].mxu1 %v140_v45 }
  0x25   :  { %910 = vmatprep.subr.bf16.mxu0 %v1003_v40  ;;  %916 = vmatprep.mubr.msk.bf16.mxu0 %vm1004_vm0, %v1003_v40 }
  0x26   :  { %605 = vmatpush1.bf16.msra.mxu1 %v974_v53  ;;  %636 = vmatprep.mubr.bf16.mxu1 %v1005_v5 }
  0x27   :  { %606 = vmatprep.subr.bf16.mxu1 %v982_v58 }
  0x28   :  { %911 = vmatpush3.bf16.msra.mxu0 %v971_v47 }
  0x29   :  { %912 = vmatprep.subr.bf16.mxu0 %v1003_v40 }
  0x2a   :  { %607 = vmatpush1.bf16.msra.mxu1 %v980_v57 }
  0x2b   :  { %608 = vmatprep.subr.bf16.mxu1 %v988_v61 }
  0x2c   :  { %913 = vmatpush3.bf16.msra.mxu0 %v972_v49  ;;  %v504_v49 = vld [vmem:[%s1264_s6] sm:$0xff] }
  0x2d   :  { %914 = vmatprep.subr.bf16.mxu0 %v1003_v40 }
  0x2e   :  { %609 = vmatpush1.bf16.msra.mxu1 %v986_v62 }
  0x2f   :  { %610 = vmatprep.subr.bf16.mxu1 %v994_v1 }
  0x30   :  { %915 = vmatpush3.bf16.msra.mxu0 %v973_v51 }
  0x31   :  { %645 = vmatprep.subr.bf16.mxu0 %v979_v56 }
  0x32   :  { %611 = vmatpush1.bf16.msra.mxu1 %v992_v2 }
  0x33   :  { %917 = vmatmul.mubr.msk.bf16.vlgmr.msra.gmra.mrb[4].mxu0 %vm362_vm1, %v132_v52  ;;  %920 = vmatprep.subr.bf16.mxu1 %v1003_v40 }
  0x34   :  { %646 = vmatpush1.bf16.msra.mxu0 %v977_v55  ;;  %677 = vmatprep.mubr.bf16.mxu0 %v1005_v5 }
  0x35   :  { %647 = vmatprep.subr.bf16.mxu0 %v985_v60 }
  0x38   :  { %648 = vmatpush1.bf16.msra.mxu0 %v983_v59 }
  0x39   :  { %649 = vmatprep.subr.bf16.mxu0 %v991_v63 }
  0x3c   :  { %650 = vmatpush1.bf16.msra.mxu0 %v989_v0 }
  0x3d   :  { %651 = vmatprep.subr.bf16.mxu0 %v997_v3 }
  0x40   :  { %652 = vmatpush1.bf16.msra.mxu0 %v995_v4 }
  0xf6   :  { %v870_v6 = vpop.f32.mrb[0].mxu0 }
  0xf7   :  { %v871_v7 = vpop.f32.mrb[1].mxu0  ;;  %v892_v8 = vpop.f32.mrb[0].mxu1 }
  0xf8   :  { %v872_v9 = vadd.f32 %v871_v7, %v870_v6  ;;  %v873_v10 = vpop.f32.mrb[2].mxu0  ;;  %v893_v11 = vpop.f32.mrb[1].mxu1 }
  0xf9   :  { %v874_v12 = vpop.f32.mrb[3].mxu0  ;;  %v894_v13 = vadd.f32 %v893_v11, %v892_v8  ;;  %v895_v14 = vpop.f32.mrb[2].mxu1 }
  0xfa   :  { %v896_v15 = vpop.f32.mrb[3].mxu1 }
  0xfb   :  { %v441_v16 = vadd.f32 %v894_v13, %v872_v9 }
 0x106   :  { %v480_v17 = vpop.f32.mrb[4].mxu0 }
 0x107   :  { %v481_v19 = vadd.f32 %v480_v17, %v441_v16  ;;  %v918_v20 = vpop.f32.mrb[5].mxu0 }
 0x108   :  { %v483_v22 = vpop.f32.mrb[6].mxu0 }
 0x109   :  { %v493_v23 = vmul.f32 %v829_v18, %v481_v19  ;;  %v919_v24 = vpop.f32.mrb[7].mxu0 }
 0x10b   :  { %v501_v25 = vadd.f32 %v830_v21, %v493_v23 }
 0x10d   :  { %v502_v26 = vmax.f32 %v501_v25, 0.0 }
 0x10f   :  { %v503_v28 = vpack.c.bf16 %v502_v26, %v502_v26 }
 0x111   :  { %847 = vmatmul.mubr.msk.bf16.vlgmr.msra.gmra.mrb[4].mxu1 %vm362_vm1, %v503_v28  ;;  %848 = vmatmul.mubr.msk.bf16.vlgmr.msra.gmra.mrb[8].mxu0 %vm362_vm1, %v503_v28 }
 0x112   :  { %921 = vmatpush3.bf16.msra.mxu1 %v998_v27  ;;  %928 = vmatprep.mubr.msk.bf16.mxu1 %vm1004_vm0, %v1003_v40 }
 0x113   :  { %922 = vmatprep.subr.bf16.mxu1 %v1003_v40 }
 0x116   :  { %923 = vmatpush3.bf16.msra.mxu1 %v999_v29 }
 0x117   :  { %924 = vmatprep.subr.bf16.mxu1 %v1003_v40 }
 0x11a   :  { %925 = vmatpush3.bf16.msra.mxu1 %v1000_v31 }
 0x11b   :  { %926 = vmatprep.subr.bf16.mxu1 %v1003_v40 }
 0x11e   :  { %927 = vmatpush3.bf16.msra.mxu1 %v1001_v32 }
 0x121   :  { %929 = vmatmul.mubr.msk.bf16.vlgmr.msra.gmra.mrb[8].mxu1 %vm362_vm1, %v503_v28 }
 0x1e4   :  { %v638_v36 = vpop.f32.mrb[4].mxu1  ;;  %v679_v37 = vpop.f32.mrb[8].mxu0 }
 0x1e5   :  { %v640_v39 = vpop.f32.mrb[5].mxu1  ;;  %v681_v41 = vpop.f32.mrb[9].mxu0 }
 0x1e6   :  { %v690_v42 = vcombine.low %v638_v36, %v640_v39  ;;  %v691_v43 = vcombine.low %v679_v37, %v681_v41  ;;  %v642_v44 = vpop.f32.mrb[6].mxu1  ;;  %v683_v45 = vpop.f32.mrb[10].mxu0 }
 0x1e7   :  { %v643_v46 = vpop.f32.mrb[7].mxu1  ;;  %v684_v47 = vpop.f32.mrb[11].mxu0 }
 0x1e8   :  { %v698_v48 = vrot.slane %v690_v42, %v697_v38  ;;  %v705_v40 = vrot.slane %v691_v43, %v697_v38 }
 0x1ea   :  { %v706_v50 = vcombine.low %v698_v48, %v705_v40 }
 0x1ec   :  { %v708_v51 = vadd.f32 %v706_v50, %v504_v49 }
 0x1ee   :  { %709 = vst [vmem:[%s1265_s7] sm:$0xff] %v708_v51 }
 0x1f4   :  { %v776_v30 = vpop.f32.mrb[8].mxu1 }
 0x1f5   :  { %783 = vst.msk [vmem:[%s1266_s8] sm:$0x3] %vm782_vm2, %v776_v30  ;;  %v930_v52 = vpop.f32.mrb[9].mxu1 }
 0x1f6   :  { %v779_v53 = vpop.f32.mrb[10].mxu1 }
 0x1f7   :  { %v931_v54 = vpop.f32.mrb[11].mxu1 }

</bundles_post_ra>
